<compile_context>
chip_gen: v6e
topology: v6e:2x2x1
jax: 0.10.0
libtpu: 0.0.40
codegen_flags: <defaults>
</compile_context>

<pallas_src>
import functools

import jax
import jax.numpy as jnp
from jax import lax
from jax.experimental import pallas as pl
from jax.experimental.pallas import tpu as pltpu

# ----------------------------- config (small, consistent with the module) -----
BATCH = 2
EMB_SIZE = 8          # configs.embedding_size  (doctor sequence length)
SUM_SEQ = 8           # summary (patient) sequence length
PIECES = 2            # configs.pieces_size
HIDDEN = 32           # configs.bert_output_dim
LSTM_H = 16           # configs.lstm_hidden_dim  (2*LSTM_H == HIDDEN here)
NUM_CLASSES = 4       # configs.num_classes
VOCAB = 50
MAX_SEQ = 64
LANE = 128


# ----------------------------- BlockSpec helper -------------------------------
def _full_spec(shape):
    nd = len(shape)
    return pl.BlockSpec(shape, lambda i, _nd=nd: (0,) * _nd)


# ----------------------------- the single fused kernel ------------------------
def cste_kernel(xdbl_ref, w_in_ref, b_in_ref, w_hh_ref,
                xrows_ref, wfc_ref, bfc_ref, wdd1_ref, wdd2_ref, wdd3_ref,
                w1_ref, w2_ref, o_ref, gx_ref,
                *, lens, hl, bp, seq, nb, sc):
    """Fused 3-branch biLSTM recurrence + fc_bert/dd gating + final head.

    State lane layout (width GB=128): branch b occupies lanes [b*2H, (b+1)*2H), fwd hidden
    first then bwd hidden; lanes [3*2H, 128) are zero padding. Gate layout (width 512):
    four 128-lane blocks [i | f | g | o], each using the same state lane layout.
    """
    S = seq
    GB = w_hh_ref.shape[0]               # 128 = gate-block / state width
    G4 = 4 * GB

    # ---- hoisted input projection: one matmul for all steps & both directions ----
    # xdbl lanes [0, 3H) hold x(t) (forward gates), lanes [3H, 6H) hold x(S-1-t) (backward
    # gates), so the result is already time-aligned per direction.
    xdbl = xdbl_ref[...]                  # [S, BP, 6H]
    din = xdbl.shape[-1]
    gx = (jnp.dot(xdbl.reshape(S * bp, din), w_in_ref[...],
                  preferred_element_type=jnp.float32) + b_in_ref[...])
    gx_ref[...] = gx.reshape(S, bp, G4)

    # ---- static lane masks (lengths are compile-time constants) ----
    lane = lax.broadcasted_iota(jnp.int32, (1, GB), 1)

    def blocks_mask(blocks):
        m = jnp.zeros((1, GB), jnp.float32)
        for (b, d) in blocks:
            lo = b * 2 * hl + d * hl
            m = m + jnp.where((lane >= lo) & (lane < lo + hl), 1.0, 0.0)
        return m

    mask_cache = {}

    def step_mask(t):
        blocks = tuple(sorted(
            [(b, 0) for b in range(nb) if t >= S - lens[b]] +
            [(b, 1) for b in range(nb) if t < lens[b]]))
        if blocks not in mask_cache:
            mask_cache[blocks] = blocks_mask(blocks)
        return mask_cache[blocks]

    step_masks = [step_mask(t) for t in range(S)]       # only 2 distinct masks here

    # front-padded shorter branches: zero their fwd-direction state at the first real step
    reset_steps = {}
    for b in range(nb):
        t0 = S - lens[b]
        if 0 < t0 < S:
            reset_steps.setdefault(t0, []).append(b)
    keep_masks = {t: 1.0 - blocks_mask([(b, 0) for b in bs])
                  for t, bs in reset_steps.items()}

    inv_len = jnp.zeros((1, GB), jnp.float32)
    for b in range(nb):
        inv_len = inv_len + blocks_mask([(b, 0), (b, 1)]) * (1.0 / lens[b])

    is_fwd_state = blocks_mask([(b, 0) for b in range(nb)]) > 0.5   # [1, GB] bool

    # ---- fused 3-branch bidirectional recurrence (statically unrolled, S steps) ----
    w_hh = w_hh_ref[...]
    h = jnp.zeros((bp, GB), jnp.float32)
    c = jnp.zeros((bp, GB), jnp.float32)
    acc = jnp.zeros((bp, GB), jnp.float32)
    h_first = h
    for t in range(S):
        if t in keep_masks:               # static: one multiply at t == S - L for short branches
            h = h * keep_masks[t]
            c = c * keep_masks[t]
        gates = gx_ref[t] + jnp.dot(h, w_hh, preferred_element_type=jnp.float32)   # [BP, 512]
        i_g = jax.nn.sigmoid(gates[:, 0 * GB:1 * GB])     # vreg-aligned 128-lane slices
        f_g = jax.nn.sigmoid(gates[:, 1 * GB:2 * GB])
        g_g = jnp.tanh(gates[:, 2 * GB:3 * GB])
        o_g = jax.nn.sigmoid(gates[:, 3 * GB:4 * GB])
        c = f_g * c + i_g * g_g
        h = o_g * jnp.tanh(c)
        acc = acc + h * step_masks[t]                     # masked mean accumulation
        if t == 0:
            h_first = h    # backward direction's first step = output at the real last time index

    # lstm_last = [h_fwd(T-1) | h_bwd(T-1)] per branch; lstm_mean = time-mean per branch
    lstm_last = jnp.where(is_fwd_state, h, h_first)       # [BP, GB]
    lstm_mean = acc * inv_len                             # [BP, GB]

    # ---- head: shared fc_bert, dd1/dd2/dd3 gating, concat, fc_final1/2 + leaky_relu ----
    d_all = (jnp.dot(xrows_ref[...], wfc_ref[...], preferred_element_type=jnp.float32)
             + bfc_ref[...])                              # [2*BP + BP*SC, 2H]

    def gate2(d, wdd):
        g1 = jnp.dot(d, wdd, preferred_element_type=jnp.float32)
        d = g1 * d + g1
        g2 = jnp.dot(d, wdd, preferred_element_type=jnp.float32)
        return g2 * d + g2

    pat_g = gate2(d_all[0:bp], wdd1_ref[...])                        # [BP, 2H]
    doc_g = gate2(d_all[bp:2 * bp], wdd2_ref[...])                   # [BP, 2H]
    ctx_g = gate2(d_all[2 * bp:2 * bp + bp * sc], wdd3_ref[...])     # [BP*SC, 2H]
    ctx_g_mean = jnp.mean(ctx_g.reshape(bp, sc, 2 * hl), axis=1)     # [BP, 2H]

    two_h = 2 * hl
    # order: [ctx_gate_mean, ctx_lstm_mean, doctor_gate, doctor_lstm_last,
    #         patient_gate, patient_lstm_last]  -> 12 * lstm_hidden features
    fvec = jnp.concatenate([
        ctx_g_mean,
        lstm_mean[:, 2 * two_h:3 * two_h],
        doc_g,
        lstm_last[:, 1 * two_h:2 * two_h],
        pat_g,
        lstm_last[:, 0:two_h],
    ], axis=-1)                                                      # [BP, 12H]

    z = jnp.dot(jnp.dot(fvec, w1_ref[...], preferred_element_type=jnp.float32),
                w2_ref[...], preferred_element_type=jnp.float32)     # [BP, 128] lane-dense
    o_ref[...] = jnp.where(z >= 0.0, z, 0.01 * z)                    # leaky_relu, slope 0.01


def cste_fused(xdbl, w_in, b_in, w_hh, xrows, wfc, bfc, wdd1, wdd2, wdd3, w1, w2p,
               *, lens, hl, bp, seq, nb, sc):
    kern = functools.partial(cste_kernel, lens=lens, hl=hl, bp=bp, seq=seq, nb=nb, sc=sc)
    args = (xdbl, w_in, b_in, w_hh, xrows, wfc, bfc, wdd1, wdd2, wdd3, w1, w2p)
    gb = w_hh.shape[0]
    return pl.pallas_call(
        kern,
        grid=(1,),
        in_specs=[_full_spec(a.shape) for a in args],
        out_specs=_full_spec((bp, w2p.shape[1])),
        out_shape=jax.ShapeDtypeStruct((bp, w2p.shape[1]), jnp.float32),
        scratch_shapes=[pltpu.VMEM((seq, bp, 4 * gb), jnp.float32)],
        compiler_params=pltpu.CompilerParams(dimension_semantics=("arbitrary",)),
    )(*args)


# ----------------------------- LSTM weight packing (host-side, done once) -----
def pack_fused_lstm(lstm_ps, hl):
    """Pack 3 biLSTM param sets into one block-diagonal fused recurrence.

    Returns:
      w_in [2*NB*D, 4*GB]: rows [0, NB*D) read x(t) (forward gates), rows [NB*D, 2*NB*D)
                           read x(S-1-t) (backward gates).
      b_in [1, 4*GB]
      w_hh [GB, 4*GB]: block-diagonal per branch per direction.
    where GB = 128 (NB*2*hl real state lanes padded to a full lane block).
    """
    nb = len(lstm_ps)
    d = lstm_ps[0]["wih_f"].shape[0]
    sw = nb * 2 * hl
    gb = ((sw + LANE - 1) // LANE) * LANE
    w_in = jnp.zeros((2 * nb * d, 4 * gb), jnp.float32)
    b_in = jnp.zeros((1, 4 * gb), jnp.float32)
    w_hh = jnp.zeros((gb, 4 * gb), jnp.float32)
    for b, p in enumerate(lstm_ps):
        for k in range(4):                      # gate order i, f, g, o
            cf = k * gb + b * 2 * hl            # fwd gate columns of branch b
            cb = cf + hl                        # bwd gate columns of branch b
            w_in = w_in.at[b * d:(b + 1) * d, cf:cf + hl].set(
                p["wih_f"][:, k * hl:(k + 1) * hl])
            w_in = w_in.at[nb * d + b * d:nb * d + (b + 1) * d, cb:cb + hl].set(
                p["wih_b"][:, k * hl:(k + 1) * hl])
            b_in = b_in.at[0, cf:cf + hl].set(p["b_f"][0, k * hl:(k + 1) * hl])
            b_in = b_in.at[0, cb:cb + hl].set(p["b_b"][0, k * hl:(k + 1) * hl])
            rf = b * 2 * hl
            rb = rf + hl
            w_hh = w_hh.at[rf:rf + hl, cf:cf + hl].set(p["whh_f"][:, k * hl:(k + 1) * hl])
            w_hh = w_hh.at[rb:rb + hl, cb:cb + hl].set(p["whh_b"][:, k * hl:(k + 1) * hl])
    return w_in, b_in, w_hh


# ----------------------------- BERT stub (plain JAX glue) ---------------------
def bert_stub(p, token, mask, token_type):
    # TODO(synk): pretrained BERT encoder stack (bert_0 / bert_1) has no clean in-script
    # Pallas equivalent; this deterministic embedding + LayerNorm stub produces the
    # [B, S, HIDDEN] last_hidden_state shape that the rest of the forward consumes.
    tok = token.astype(jnp.int32)
    ttp = token_type.astype(jnp.int32)
    S = tok.shape[1]
    emb = p["word"][tok] + p["pos"][:S][None, :, :] + p["type"][ttp]
    emb = emb * mask.astype(jnp.float32)[..., None]
    mu = jnp.mean(emb, axis=-1, keepdims=True)
    var = jnp.var(emb, axis=-1, keepdims=True)
    return (emb - mu) * lax.rsqrt(var + 1e-12) * p["gamma"] + p["beta"]


# ----------------------------- parameters -------------------------------------
def init_params(key):
    keys = iter(jax.random.split(key, 64))

    def lin(shape, scale):
        return jax.random.normal(next(keys), shape, jnp.float32) * scale

    H, HL = HIDDEN, LSTM_H

    def bert_params():
        return dict(word=lin((VOCAB, H), 0.1),
                    pos=lin((MAX_SEQ, H), 0.02),
                    type=lin((2, H), 0.02),
                    gamma=jnp.ones((H,), jnp.float32),
                    beta=jnp.zeros((H,), jnp.float32))

    def lstm_params():
        s = 1.0 / (HL ** 0.5)
        return dict(wih_f=lin((H, 4 * HL), s), whh_f=lin((HL, 4 * HL), s), b_f=lin((1, 4 * HL), s),
                    wih_b=lin((H, 4 * HL), s), whh_b=lin((HL, 4 * HL), s), b_b=lin((1, 4 * HL), s))

    # branch order: 0 = patient (lstm_layer), 1 = doctor (lstm_layer1), 2 = context
    w_in, b_in, w_hh = pack_fused_lstm([lstm_params(), lstm_params(), lstm_params()], HL)

    fc_final2 = lin((512, NUM_CLASSES), 0.05)
    fc_final2_pad = jnp.pad(fc_final2, ((0, 0), (0, LANE - NUM_CLASSES)))   # lane-dense output

    return dict(
        bert0=bert_params(), bert1=bert_params(),
        lstm_w_in=w_in, lstm_b_in=b_in, lstm_w_hh=w_hh,
        fc_bert_w=lin((H, 2 * HL), 0.1), fc_bert_b=lin((1, 2 * HL), 0.1),
        dd1=lin((2 * HL, 2 * HL), 0.1), dd2=lin((2 * HL, 2 * HL), 0.1), dd3=lin((2 * HL, 2 * HL), 0.1),
        fc_final1=lin((12 * HL, 512), 0.05), fc_final2_pad=fc_final2_pad,
    )


# ----------------------------- forward (mirrors the PyTorch module) -----------
def forward(params, bert_token, bert_mask, token_type, length,
            bert_token_summary, bert_mask_summary, token_type_summary):
    # patient branch (summary inputs -> bert_0)
    patient_pooler = bert_stub(params["bert0"], bert_token_summary,
                               bert_mask_summary, token_type_summary)      # [B, Sp, H]
    # doctor branch (piece 0 of the dialogue tensors -> bert_1)
    tok = (bert_token[:, :, 0] * length[:, :, 0]).reshape(-1, EMB_SIZE)
    msk = (bert_mask[:, :, 0] * length[:, :, 0]).reshape(-1, EMB_SIZE)
    ttp = (token_type[:, :, 0] * length[:, :, 0]).reshape(-1, EMB_SIZE)
    doctor_pooler = bert_stub(params["bert1"], tok, msk, ttp)              # [B, Sd, H]

    contextual_cat = jnp.concatenate([patient_pooler, doctor_pooler], axis=1)  # [B, Sc, H]

    B, Sp, H = patient_pooler.shape
    Sd = doctor_pooler.shape[1]
    Sc = contextual_cat.shape[1]
    S = max(Sp, Sd, Sc)
    BP = ((B + 7) // 8) * 8                       # pad batch to a full sublane block
    lens = (Sp, Sd, Sc)

    # Fused LSTM input: concat branch features along lanes, front-pad shorter branches in
    # time, pad batch to 8; then concat x(t) with time-reversed x(S-1-t) along features so
    # the kernel's single input-projection matmul is already fwd/bwd time-aligned.
    def prep(x):
        return jnp.pad(x, ((0, BP - B), (S - x.shape[1], 0), (0, 0)))

    x_all = jnp.concatenate([prep(patient_pooler), prep(doctor_pooler),
                             prep(contextual_cat)], axis=-1)               # [BP, S, 3H]
    x_t = jnp.transpose(x_all, (1, 0, 2))                                  # [S, BP, 3H]
    x_dbl = jnp.concatenate([x_t, x_t[::-1]], axis=-1)                     # [S, BP, 6H]

    # Head rows for the shared fc_bert: sublane-aligned slabs
    # (patient rows 0:8, doctor 8:16, context 16:16+BP*Sc).
    pat0 = jnp.pad(patient_pooler[:, 0, :], ((0, BP - B), (0, 0)))         # [BP, H]
    doc0 = jnp.pad(doctor_pooler[:, 0, :], ((0, BP - B), (0, 0)))          # [BP, H]
    ctx_rows = jnp.pad(contextual_cat, ((0, BP - B), (0, 0), (0, 0))).reshape(BP * Sc, H)
    x_rows = jnp.concatenate([pat0, doc0, ctx_rows], axis=0)               # [2*BP + BP*Sc, H]

    out_full = cste_fused(
        x_dbl, params["lstm_w_in"], params["lstm_b_in"], params["lstm_w_hh"],
        x_rows, params["fc_bert_w"], params["fc_bert_b"],
        params["dd1"], params["dd2"], params["dd3"],
        params["fc_final1"], params["fc_final2_pad"],
        lens=lens, hl=LSTM_H, bp=BP, seq=S, nb=3, sc=Sc)                   # [BP, 128]

    return out_full[:B, :NUM_CLASSES]                                      # [B, C]


# ----------------------------- main --------------------------------------------
if __name__ == "__main__":
    key = jax.random.PRNGKey(0)
    pkey, dkey = jax.random.split(key)
    params = init_params(pkey)

    k1, k2 = jax.random.split(dkey, 2)
    bert_token = jax.random.randint(k1, (BATCH, EMB_SIZE, PIECES), 1, VOCAB, jnp.int32)
    bert_mask = jnp.ones((BATCH, EMB_SIZE, PIECES), jnp.int32)
    token_type = jnp.zeros((BATCH, EMB_SIZE, PIECES), jnp.int32)
    length = jnp.ones((BATCH, EMB_SIZE, PIECES), jnp.int32)
    bert_token_summary = jax.random.randint(k2, (BATCH, SUM_SEQ), 1, VOCAB, jnp.int32)
    bert_mask_summary = jnp.ones((BATCH, SUM_SEQ), jnp.int32)
    token_type_summary = jnp.zeros((BATCH, SUM_SEQ), jnp.int32)

    fwd = jax.jit(forward)
    out = fwd(params, bert_token, bert_mask, token_type, length,
              bert_token_summary, bert_mask_summary, token_type_summary)
    out = jax.block_until_ready(out)
    assert out.shape == (BATCH, NUM_CLASSES), out.shape
    print("KERNEL_OK")
</pallas_src>

<mosaic_0001>
module attributes {stable_mosaic.version = 11 : i64} {
  func.func @cste_kernel(%arg0: i32, %arg1: memref<16x8x192xf32, #tpu.memory_space<vmem>>, %arg2: memref<192x512xf32, #tpu.memory_space<vmem>>, %arg3: memref<1x512xf32, #tpu.memory_space<vmem>>, %arg4: memref<128x512xf32, #tpu.memory_space<vmem>>, %arg5: memref<144x32xf32, #tpu.memory_space<vmem>>, %arg6: memref<32x32xf32, #tpu.memory_space<vmem>>, %arg7: memref<1x32xf32, #tpu.memory_space<vmem>>, %arg8: memref<32x32xf32, #tpu.memory_space<vmem>>, %arg9: memref<32x32xf32, #tpu.memory_space<vmem>>, %arg10: memref<32x32xf32, #tpu.memory_space<vmem>>, %arg11: memref<192x512xf32, #tpu.memory_space<vmem>>, %arg12: memref<512x128xf32, #tpu.memory_space<vmem>>, %arg13: memref<8x128xf32, #tpu.memory_space<vmem>>, %arg14: memref<16x8x512xf32, #tpu.memory_space<vmem>>) attributes {dimension_semantics = [#tpu.dimension_semantics<arbitrary>], iteration_bounds = array<i64: 1>, scalar_prefetch = 0 : i64, scratch_operands = 1 : i64, tpu.core_type = #tpu.core_type<tc>, window_params = [{pipeline_mode = #tpu.pipeline_mode<synchronous>, transform_indices = @transform_0, window_bounds = array<i64: 16, 8, 192>}, {pipeline_mode = #tpu.pipeline_mode<synchronous>, transform_indices = @transform_1, window_bounds = array<i64: 192, 512>}, {pipeline_mode = #tpu.pipeline_mode<synchronous>, transform_indices = @transform_2, window_bounds = array<i64: 1, 512>}, {pipeline_mode = #tpu.pipeline_mode<synchronous>, transform_indices = @transform_3, window_bounds = array<i64: 128, 512>}, {pipeline_mode = #tpu.pipeline_mode<synchronous>, transform_indices = @transform_4, window_bounds = array<i64: 144, 32>}, {pipeline_mode = #tpu.pipeline_mode<synchronous>, transform_indices = @transform_5, window_bounds = array<i64: 32, 32>}, {pipeline_mode = #tpu.pipeline_mode<synchronous>, transform_indices = @transform_6, window_bounds = array<i64: 1, 32>}, {pipeline_mode = #tpu.pipeline_mode<synchronous>, transform_indices = @transform_7, window_bounds = array<i64: 32, 32>}, {pipeline_mode = #tpu.pipeline_mode<synchronous>, transform_indices = @transform_8, window_bounds = array<i64: 32, 32>}, {pipeline_mode = #tpu.pipeline_mode<synchronous>, transform_indices = @transform_9, window_bounds = array<i64: 32, 32>}, {pipeline_mode = #tpu.pipeline_mode<synchronous>, transform_indices = @transform_10, window_bounds = array<i64: 192, 512>}, {pipeline_mode = #tpu.pipeline_mode<synchronous>, transform_indices = @transform_11, window_bounds = array<i64: 512, 128>}, {pipeline_mode = #tpu.pipeline_mode<synchronous>, transform_indices = @transform_12, window_bounds = array<i64: 8, 128>}]} {
    %c0 = arith.constant 0 : index
    %c0_0 = arith.constant 0 : index
    %c0_1 = arith.constant 0 : index
    %0 = vector.load %arg1[%c0, %c0_0, %c0_1] : memref<16x8x192xf32, #tpu.memory_space<vmem>>, vector<16x8x192xf32>
    %1 = vector.shape_cast %0 : vector<16x8x192xf32> to vector<128x192xf32>
    %c0_2 = arith.constant 0 : index
    %c0_3 = arith.constant 0 : index
    %2 = vector.load %arg2[%c0_2, %c0_3] : memref<192x512xf32, #tpu.memory_space<vmem>>, vector<192x512xf32>
    %cst = arith.constant dense<0.000000e+00> : vector<128x512xf32>
    %3 = tpu.matmul %1, %2, %cst {dimension_numbers = #tpu.dot_dimension_numbers<[1], [0], [0], [1], [0, 0, 1, 1], [], []>} : vector<128x192xf32>, vector<192x512xf32>, vector<128x512xf32> -> vector<128x512xf32>
    %c0_4 = arith.constant 0 : index
    %c0_5 = arith.constant 0 : index
    %4 = vector.load %arg3[%c0_4, %c0_5] : memref<1x512xf32, #tpu.memory_space<vmem>>, vector<1x512xf32>
    %5 = vector.broadcast %4 : vector<1x512xf32> to vector<128x512xf32>
    %6 = arith.addf %3, %5 : vector<128x512xf32>
    %7 = vector.shape_cast %6 : vector<128x512xf32> to vector<16x8x512xf32>
    %c0_6 = arith.constant 0 : index
    %c0_7 = arith.constant 0 : index
    %c0_8 = arith.constant 0 : index
    %8 = vector.load %arg14[%c0_6, %c0_7, %c0_8] : memref<16x8x512xf32, #tpu.memory_space<vmem>>, vector<16x8x512xf32>
    tpu.vector_store %arg14[%c0_6, %c0_7, %c0_8], %7 {strides = array<i32>} : memref<16x8x512xf32, #tpu.memory_space<vmem>>, vector<16x8x512xf32>,
    %9 = tpu.iota {dimensions = array<i32: 1>} : vector<1x128xi32>
    %cst_9 = arith.constant 0.000000e+00 : f32
    %10 = vector.broadcast %cst_9 : f32 to vector<1x128xf32>
    %c16_i32 = arith.constant 16 : i32
    %11 = vector.broadcast %c16_i32 : i32 to vector<1x128xi32>
    %12 = arith.cmpi sge, %9, %11 : vector<1x128xi32>
    %c32_i32 = arith.constant 32 : i32
    %13 = vector.broadcast %c32_i32 : i32 to vector<1x128xi32>
    %14 = arith.cmpi slt, %9, %13 : vector<1x128xi32>
    %15 = arith.andi %12, %14 : vector<1x128xi1>
    %cst_10 = arith.constant 1.000000e+00 : f32
    %cst_11 = arith.constant 0.000000e+00 : f32
    %16 = vector.broadcast %cst_10 : f32 to vector<1x128xf32>
    %17 = vector.broadcast %cst_11 : f32 to vector<1x128xf32>
    %18 = arith.select %15, %16, %17 : vector<1x128xi1>, vector<1x128xf32>
    %19 = arith.addf %10, %18 : vector<1x128xf32>
    %c48_i32 = arith.constant 48 : i32
    %20 = vector.broadcast %c48_i32 : i32 to vector<1x128xi32>
    %21 = arith.cmpi sge, %9, %20 : vector<1x128xi32>
    %c64_i32 = arith.constant 64 : i32
    %22 = vector.broadcast %c64_i32 : i32 to vector<1x128xi32>
    %23 = arith.cmpi slt, %9, %22 : vector<1x128xi32>
    %24 = arith.andi %21, %23 : vector<1x128xi1>
    %cst_12 = arith.constant 1.000000e+00 : f32
    %cst_13 = arith.constant 0.000000e+00 : f32
    %25 = vector.broadcast %cst_12 : f32 to vector<1x128xf32>
    %26 = vector.broadcast %cst_13 : f32 to vector<1x128xf32>
    %27 = arith.select %24, %25, %26 : vector<1x128xi1>, vector<1x128xf32>
    %28 = arith.addf %19, %27 : vector<1x128xf32>
    %c64_i32_14 = arith.constant 64 : i32
    %29 = vector.broadcast %c64_i32_14 : i32 to vector<1x128xi32>
    %30 = arith.cmpi sge, %9, %29 : vector<1x128xi32>
    %c80_i32 = arith.constant 80 : i32
    %31 = vector.broadcast %c80_i32 : i32 to vector<1x128xi32>
    %32 = arith.cmpi slt, %9, %31 : vector<1x128xi32>
    %33 = arith.andi %30, %32 : vector<1x128xi1>
    %cst_15 = arith.constant 1.000000e+00 : f32
    %cst_16 = arith.constant 0.000000e+00 : f32
    %34 = vector.broadcast %cst_15 : f32 to vector<1x128xf32>
    %35 = vector.broadcast %cst_16 : f32 to vector<1x128xf32>
    %36 = arith.select %33, %34, %35 : vector<1x128xi1>, vector<1x128xf32>
    %37 = arith.addf %28, %36 : vector<1x128xf32>
    %c80_i32_17 = arith.constant 80 : i32
    %38 = vector.broadcast %c80_i32_17 : i32 to vector<1x128xi32>
    %39 = arith.cmpi sge, %9, %38 : vector<1x128xi32>
    %c96_i32 = arith.constant 96 : i32
    %40 = vector.broadcast %c96_i32 : i32 to vector<1x128xi32>
    %41 = arith.cmpi slt, %9, %40 : vector<1x128xi32>
    %42 = arith.andi %39, %41 : vector<1x128xi1>
    %cst_18 = arith.constant 1.000000e+00 : f32
    %cst_19 = arith.constant 0.000000e+00 : f32
    %43 = vector.broadcast %cst_18 : f32 to vector<1x128xf32>
    %44 = vector.broadcast %cst_19 : f32 to vector<1x128xf32>
    %45 = arith.select %42, %43, %44 : vector<1x128xi1>, vector<1x128xf32>
    %46 = arith.addf %37, %45 : vector<1x128xf32>
    %cst_20 = arith.constant 0.000000e+00 : f32
    %47 = vector.broadcast %cst_20 : f32 to vector<1x128xf32>
    %c0_i32 = arith.constant 0 : i32
    %48 = vector.broadcast %c0_i32 : i32 to vector<1x128xi32>
    %49 = arith.cmpi sge, %9, %48 : vector<1x128xi32>
    %c16_i32_21 = arith.constant 16 : i32
    %50 = vector.broadcast %c16_i32_21 : i32 to vector<1x128xi32>
    %51 = arith.cmpi slt, %9, %50 : vector<1x128xi32>
    %52 = arith.andi %49, %51 : vector<1x128xi1>
    %cst_22 = arith.constant 1.000000e+00 : f32
    %cst_23 = arith.constant 0.000000e+00 : f32
    %53 = vector.broadcast %cst_22 : f32 to vector<1x128xf32>
    %54 = vector.broadcast %cst_23 : f32 to vector<1x128xf32>
    %55 = arith.select %52, %53, %54 : vector<1x128xi1>, vector<1x128xf32>
    %56 = arith.addf %47, %55 : vector<1x128xf32>
    %c32_i32_24 = arith.constant 32 : i32
    %57 = vector.broadcast %c32_i32_24 : i32 to vector<1x128xi32>
    %58 = arith.cmpi sge, %9, %57 : vector<1x128xi32>
    %c48_i32_25 = arith.constant 48 : i32
    %59 = vector.broadcast %c48_i32_25 : i32 to vector<1x128xi32>
    %60 = arith.cmpi slt, %9, %59 : vector<1x128xi32>
    %61 = arith.andi %58, %60 : vector<1x128xi1>
    %cst_26 = arith.constant 1.000000e+00 : f32
    %cst_27 = arith.constant 0.000000e+00 : f32
    %62 = vector.broadcast %cst_26 : f32 to vector<1x128xf32>
    %63 = vector.broadcast %cst_27 : f32 to vector<1x128xf32>
    %64 = arith.select %61, %62, %63 : vector<1x128xi1>, vector<1x128xf32>
    %65 = arith.addf %56, %64 : vector<1x128xf32>
    %c64_i32_28 = arith.constant 64 : i32
    %66 = vector.broadcast %c64_i32_28 : i32 to vector<1x128xi32>
    %67 = arith.cmpi sge, %9, %66 : vector<1x128xi32>
    %c80_i32_29 = arith.constant 80 : i32
    %68 = vector.broadcast %c80_i32_29 : i32 to vector<1x128xi32>
    %69 = arith.cmpi slt, %9, %68 : vector<1x128xi32>
    %70 = arith.andi %67, %69 : vector<1x128xi1>
    %cst_30 = arith.constant 1.000000e+00 : f32
    %cst_31 = arith.constant 0.000000e+00 : f32
    %71 = vector.broadcast %cst_30 : f32 to vector<1x128xf32>
    %72 = vector.broadcast %cst_31 : f32 to vector<1x128xf32>
    %73 = arith.select %70, %71, %72 : vector<1x128xi1>, vector<1x128xf32>
    %74 = arith.addf %65, %73 : vector<1x128xf32>
    %c80_i32_32 = arith.constant 80 : i32
    %75 = vector.broadcast %c80_i32_32 : i32 to vector<1x128xi32>
    %76 = arith.cmpi sge, %9, %75 : vector<1x128xi32>
    %c96_i32_33 = arith.constant 96 : i32
    %77 = vector.broadcast %c96_i32_33 : i32 to vector<1x128xi32>
    %78 = arith.cmpi slt, %9, %77 : vector<1x128xi32>
    %79 = arith.andi %76, %78 : vector<1x128xi1>
    %cst_34 = arith.constant 1.000000e+00 : f32
    %cst_35 = arith.constant 0.000000e+00 : f32
    %80 = vector.broadcast %cst_34 : f32 to vector<1x128xf32>
    %81 = vector.broadcast %cst_35 : f32 to vector<1x128xf32>
    %82 = arith.select %79, %80, %81 : vector<1x128xi1>, vector<1x128xf32>
    %83 = arith.addf %74, %82 : vector<1x128xf32>
    %cst_36 = arith.constant 0.000000e+00 : f32
    %84 = vector.broadcast %cst_36 : f32 to vector<1x128xf32>
    %c0_i32_37 = arith.constant 0 : i32
    %85 = vector.broadcast %c0_i32_37 : i32 to vector<1x128xi32>
    %86 = arith.cmpi sge, %9, %85 : vector<1x128xi32>
    %c16_i32_38 = arith.constant 16 : i32
    %87 = vector.broadcast %c16_i32_38 : i32 to vector<1x128xi32>
    %88 = arith.cmpi slt, %9, %87 : vector<1x128xi32>
    %89 = arith.andi %86, %88 : vector<1x128xi1>
    %cst_39 = arith.constant 1.000000e+00 : f32
    %cst_40 = arith.constant 0.000000e+00 : f32
    %90 = vector.broadcast %cst_39 : f32 to vector<1x128xf32>
    %91 = vector.broadcast %cst_40 : f32 to vector<1x128xf32>
    %92 = arith.select %89, %90, %91 : vector<1x128xi1>, vector<1x128xf32>
    %93 = arith.addf %84, %92 : vector<1x128xf32>
    %c32_i32_41 = arith.constant 32 : i32
    %94 = vector.broadcast %c32_i32_41 : i32 to vector<1x128xi32>
    %95 = arith.cmpi sge, %9, %94 : vector<1x128xi32>
    %c48_i32_42 = arith.constant 48 : i32
    %96 = vector.broadcast %c48_i32_42 : i32 to vector<1x128xi32>
    %97 = arith.cmpi slt, %9, %96 : vector<1x128xi32>
    %98 = arith.andi %95, %97 : vector<1x128xi1>
    %cst_43 = arith.constant 1.000000e+00 : f32
    %cst_44 = arith.constant 0.000000e+00 : f32
    %99 = vector.broadcast %cst_43 : f32 to vector<1x128xf32>
    %100 = vector.broadcast %cst_44 : f32 to vector<1x128xf32>
    %101 = arith.select %98, %99, %100 : vector<1x128xi1>, vector<1x128xf32>
    %102 = arith.addf %93, %101 : vector<1x128xf32>
    %cst_45 = arith.constant 1.000000e+00 : f32
    %103 = vector.broadcast %cst_45 : f32 to vector<1x128xf32>
    %104 = arith.subf %103, %102 : vector<1x128xf32>
    %cst_46 = arith.constant 0.000000e+00 : f32
    %105 = vector.broadcast %cst_46 : f32 to vector<1x128xf32>
    %cst_47 = arith.constant 0.000000e+00 : f32
    %106 = vector.broadcast %cst_47 : f32 to vector<1x128xf32>
    %c0_i32_48 = arith.constant 0 : i32
    %107 = vector.broadcast %c0_i32_48 : i32 to vector<1x128xi32>
    %108 = arith.cmpi sge, %9, %107 : vector<1x128xi32>
    %c16_i32_49 = arith.constant 16 : i32
    %109 = vector.broadcast %c16_i32_49 : i32 to vector<1x128xi32>
    %110 = arith.cmpi slt, %9, %109 : vector<1x128xi32>
    %111 = arith.andi %108, %110 : vector<1x128xi1>
    %cst_50 = arith.constant 1.000000e+00 : f32
    %cst_51 = arith.constant 0.000000e+00 : f32
    %112 = vector.broadcast %cst_50 : f32 to vector<1x128xf32>
    %113 = vector.broadcast %cst_51 : f32 to vector<1x128xf32>
    %114 = arith.select %111, %112, %113 : vector<1x128xi1>, vector<1x128xf32>
    %115 = arith.addf %106, %114 : vector<1x128xf32>
    %c16_i32_52 = arith.constant 16 : i32
    %116 = vector.broadcast %c16_i32_52 : i32 to vector<1x128xi32>
    %117 = arith.cmpi sge, %9, %116 : vector<1x128xi32>
    %c32_i32_53 = arith.constant 32 : i32
    %118 = vector.broadcast %c32_i32_53 : i32 to vector<1x128xi32>
    %119 = arith.cmpi slt, %9, %118 : vector<1x128xi32>
    %120 = arith.andi %117, %119 : vector<1x128xi1>
    %cst_54 = arith.constant 1.000000e+00 : f32
    %cst_55 = arith.constant 0.000000e+00 : f32
    %121 = vector.broadcast %cst_54 : f32 to vector<1x128xf32>
    %122 = vector.broadcast %cst_55 : f32 to vector<1x128xf32>
    %123 = arith.select %120, %121, %122 : vector<1x128xi1>, vector<1x128xf32>
    %124 = arith.addf %115, %123 : vector<1x128xf32>
    %cst_56 = arith.constant 1.250000e-01 : f32
    %125 = vector.broadcast %cst_56 : f32 to vector<1x128xf32>
    %126 = arith.mulf %124, %125 : vector<1x128xf32>
    %127 = arith.addf %105, %126 : vector<1x128xf32>
    %cst_57 = arith.constant 0.000000e+00 : f32
    %128 = vector.broadcast %cst_57 : f32 to vector<1x128xf32>
    %c32_i32_58 = arith.constant 32 : i32
    %129 = vector.broadcast %c32_i32_58 : i32 to vector<1x128xi32>
    %130 = arith.cmpi sge, %9, %129 : vector<1x128xi32>
    %c48_i32_59 = arith.constant 48 : i32
    %131 = vector.broadcast %c48_i32_59 : i32 to vector<1x128xi32>
    %132 = arith.cmpi slt, %9, %131 : vector<1x128xi32>
    %133 = arith.andi %130, %132 : vector<1x128xi1>
    %cst_60 = arith.constant 1.000000e+00 : f32
    %cst_61 = arith.constant 0.000000e+00 : f32
    %134 = vector.broadcast %cst_60 : f32 to vector<1x128xf32>
    %135 = vector.broadcast %cst_61 : f32 to vector<1x128xf32>
    %136 = arith.select %133, %134, %135 : vector<1x128xi1>, vector<1x128xf32>
    %137 = arith.addf %128, %136 : vector<1x128xf32>
    %c48_i32_62 = arith.constant 48 : i32
    %138 = vector.broadcast %c48_i32_62 : i32 to vector<1x128xi32>
    %139 = arith.cmpi sge, %9, %138 : vector<1x128xi32>
    %c64_i32_63 = arith.constant 64 : i32
    %140 = vector.broadcast %c64_i32_63 : i32 to vector<1x128xi32>
    %141 = arith.cmpi slt, %9, %140 : vector<1x128xi32>
    %142 = arith.andi %139, %141 : vector<1x128xi1>
    %cst_64 = arith.constant 1.000000e+00 : f32
    %cst_65 = arith.constant 0.000000e+00 : f32
    %143 = vector.broadcast %cst_64 : f32 to vector<1x128xf32>
    %144 = vector.broadcast %cst_65 : f32 to vector<1x128xf32>
    %145 = arith.select %142, %143, %144 : vector<1x128xi1>, vector<1x128xf32>
    %146 = arith.addf %137, %145 : vector<1x128xf32>
    %cst_66 = arith.constant 1.250000e-01 : f32
    %147 = vector.broadcast %cst_66 : f32 to vector<1x128xf32>
    %148 = arith.mulf %146, %147 : vector<1x128xf32>
    %149 = arith.addf %127, %148 : vector<1x128xf32>
    %cst_67 = arith.constant 0.000000e+00 : f32
    %150 = vector.broadcast %cst_67 : f32 to vector<1x128xf32>
    %c64_i32_68 = arith.constant 64 : i32
    %151 = vector.broadcast %c64_i32_68 : i32 to vector<1x128xi32>
    %152 = arith.cmpi sge, %9, %151 : vector<1x128xi32>
    %c80_i32_69 = arith.constant 80 : i32
    %153 = vector.broadcast %c80_i32_69 : i32 to vector<1x128xi32>
    %154 = arith.cmpi slt, %9, %153 : vector<1x128xi32>
    %155 = arith.andi %152, %154 : vector<1x128xi1>
    %cst_70 = arith.constant 1.000000e+00 : f32
    %cst_71 = arith.constant 0.000000e+00 : f32
    %156 = vector.broadcast %cst_70 : f32 to vector<1x128xf32>
    %157 = vector.broadcast %cst_71 : f32 to vector<1x128xf32>
    %158 = arith.select %155, %156, %157 : vector<1x128xi1>, vector<1x128xf32>
    %159 = arith.addf %150, %158 : vector<1x128xf32>
    %c80_i32_72 = arith.constant 80 : i32
    %160 = vector.broadcast %c80_i32_72 : i32 to vector<1x128xi32>
    %161 = arith.cmpi sge, %9, %160 : vector<1x128xi32>
    %c96_i32_73 = arith.constant 96 : i32
    %162 = vector.broadcast %c96_i32_73 : i32 to vector<1x128xi32>
    %163 = arith.cmpi slt, %9, %162 : vector<1x128xi32>
    %164 = arith.andi %161, %163 : vector<1x128xi1>
    %cst_74 = arith.constant 1.000000e+00 : f32
    %cst_75 = arith.constant 0.000000e+00 : f32
    %165 = vector.broadcast %cst_74 : f32 to vector<1x128xf32>
    %166 = vector.broadcast %cst_75 : f32 to vector<1x128xf32>
    %167 = arith.select %164, %165, %166 : vector<1x128xi1>, vector<1x128xf32>
    %168 = arith.addf %159, %167 : vector<1x128xf32>
    %cst_76 = arith.constant 6.250000e-02 : f32
    %169 = vector.broadcast %cst_76 : f32 to vector<1x128xf32>
    %170 = arith.mulf %168, %169 : vector<1x128xf32>
    %171 = arith.addf %149, %170 : vector<1x128xf32>
    %cst_77 = arith.constant 0.000000e+00 : f32
    %172 = vector.broadcast %cst_77 : f32 to vector<1x128xf32>
    %c0_i32_78 = arith.constant 0 : i32
    %173 = vector.broadcast %c0_i32_78 : i32 to vector<1x128xi32>
    %174 = arith.cmpi sge, %9, %173 : vector<1x128xi32>
    %c16_i32_79 = arith.constant 16 : i32
    %175 = vector.broadcast %c16_i32_79 : i32 to vector<1x128xi32>
    %176 = arith.cmpi slt, %9, %175 : vector<1x128xi32>
    %177 = arith.andi %174, %176 : vector<1x128xi1>
    %cst_80 = arith.constant 1.000000e+00 : f32
    %cst_81 = arith.constant 0.000000e+00 : f32
    %178 = vector.broadcast %cst_80 : f32 to vector<1x128xf32>
    %179 = vector.broadcast %cst_81 : f32 to vector<1x128xf32>
    %180 = arith.select %177, %178, %179 : vector<1x128xi1>, vector<1x128xf32>
    %181 = arith.addf %172, %180 : vector<1x128xf32>
    %c32_i32_82 = arith.constant 32 : i32
    %182 = vector.broadcast %c32_i32_82 : i32 to vector<1x128xi32>
    %183 = arith.cmpi sge, %9, %182 : vector<1x128xi32>
    %c48_i32_83 = arith.constant 48 : i32
    %184 = vector.broadcast %c48_i32_83 : i32 to vector<1x128xi32>
    %185 = arith.cmpi slt, %9, %184 : vector<1x128xi32>
    %186 = arith.andi %183, %185 : vector<1x128xi1>
    %cst_84 = arith.constant 1.000000e+00 : f32
    %cst_85 = arith.constant 0.000000e+00 : f32
    %187 = vector.broadcast %cst_84 : f32 to vector<1x128xf32>
    %188 = vector.broadcast %cst_85 : f32 to vector<1x128xf32>
    %189 = arith.select %186, %187, %188 : vector<1x128xi1>, vector<1x128xf32>
    %190 = arith.addf %181, %189 : vector<1x128xf32>
    %c64_i32_86 = arith.constant 64 : i32
    %191 = vector.broadcast %c64_i32_86 : i32 to vector<1x128xi32>
    %192 = arith.cmpi sge, %9, %191 : vector<1x128xi32>
    %c80_i32_87 = arith.constant 80 : i32
    %193 = vector.broadcast %c80_i32_87 : i32 to vector<1x128xi32>
    %194 = arith.cmpi slt, %9, %193 : vector<1x128xi32>
    %195 = arith.andi %192, %194 : vector<1x128xi1>
    %cst_88 = arith.constant 1.000000e+00 : f32
    %cst_89 = arith.constant 0.000000e+00 : f32
    %196 = vector.broadcast %cst_88 : f32 to vector<1x128xf32>
    %197 = vector.broadcast %cst_89 : f32 to vector<1x128xf32>
    %198 = arith.select %195, %196, %197 : vector<1x128xi1>, vector<1x128xf32>
    %199 = arith.addf %190, %198 : vector<1x128xf32>
    %cst_90 = arith.constant 5.000000e-01 : f32
    %200 = vector.broadcast %cst_90 : f32 to vector<1x128xf32>
    %201 = arith.cmpf ogt, %199, %200 : vector<1x128xf32>
    %c0_91 = arith.constant 0 : index
    %c0_92 = arith.constant 0 : index
    %202 = vector.load %arg4[%c0_91, %c0_92] : memref<128x512xf32, #tpu.memory_space<vmem>>, vector<128x512xf32>
    %cst_93 = arith.constant 0.000000e+00 : f32
    %203 = vector.broadcast %cst_93 : f32 to vector<8x128xf32>
    %cst_94 = arith.constant 0.000000e+00 : f32
    %204 = vector.broadcast %cst_94 : f32 to vector<8x128xf32>
    %cst_95 = arith.constant 0.000000e+00 : f32
    %205 = vector.broadcast %cst_95 : f32 to vector<8x128xf32>
    %c0_96 = arith.constant 0 : index
    %c0_97 = arith.constant 0 : index
    %c0_98 = arith.constant 0 : index
    %206 = vector.load %arg14[%c0_96, %c0_97, %c0_98] : memref<16x8x512xf32, #tpu.memory_space<vmem>>, vector<1x8x512xf32>
    %207 = vector.shape_cast %206 : vector<1x8x512xf32> to vector<8x512xf32>
    %cst_99 = arith.constant dense<0.000000e+00> : vector<8x512xf32>
    %208 = tpu.matmul %203, %202, %cst_99 {dimension_numbers = #tpu.dot_dimension_numbers<[1], [0], [0], [1], [0, 0, 1, 1], [], []>} : vector<8x128xf32>, vector<128x512xf32>, vector<8x512xf32> -> vector<8x512xf32>
    %209 = arith.addf %207, %208 : vector<8x512xf32>
    %210 = vector.extract_strided_slice %209 {offsets = [0, 0], sizes = [8, 128], strides = [1, 1]} : vector<8x512xf32> to vector<8x128xf32>
    %211 = arith.negf %210 : vector<8x128xf32>
    %212 = math.exp %211 : vector<8x128xf32>
    %cst_100 = arith.constant 1.000000e+00 : f32
    %213 = vector.broadcast %cst_100 : f32 to vector<8x128xf32>
    %214 = arith.addf %213, %212 : vector<8x128xf32>
    %215 = arith.divf %213, %214 : vector<8x128xf32>
    %216 = vector.extract_strided_slice %209 {offsets = [0, 128], sizes = [8, 128], strides = [1, 1]} : vector<8x512xf32> to vector<8x128xf32>
    %217 = arith.negf %216 : vector<8x128xf32>
    %218 = math.exp %217 : vector<8x128xf32>
    %cst_101 = arith.constant 1.000000e+00 : f32
    %219 = vector.broadcast %cst_101 : f32 to vector<8x128xf32>
    %220 = arith.addf %219, %218 : vector<8x128xf32>
    %221 = arith.divf %219, %220 : vector<8x128xf32>
    %222 = vector.extract_strided_slice %209 {offsets = [0, 256], sizes = [8, 128], strides = [1, 1]} : vector<8x512xf32> to vector<8x128xf32>
    %223 = math.tanh %222 : vector<8x128xf32>
    %224 = vector.extract_strided_slice %209 {offsets = [0, 384], sizes = [8, 128], strides = [1, 1]} : vector<8x512xf32> to vector<8x128xf32>
    %225 = arith.negf %224 : vector<8x128xf32>
    %226 = math.exp %225 : vector<8x128xf32>
    %cst_102 = arith.constant 1.000000e+00 : f32
    %227 = vector.broadcast %cst_102 : f32 to vector<8x128xf32>
    %228 = arith.addf %227, %226 : vector<8x128xf32>
    %229 = arith.divf %227, %228 : vector<8x128xf32>
    %230 = arith.mulf %221, %204 : vector<8x128xf32>
    %231 = arith.mulf %215, %223 : vector<8x128xf32>
    %232 = arith.addf %230, %231 : vector<8x128xf32>
    %233 = math.tanh %232 : vector<8x128xf32>
    %234 = arith.mulf %229, %233 : vector<8x128xf32>
    %235 = vector.broadcast %46 : vector<1x128xf32> to vector<8x128xf32>
    %236 = arith.mulf %234, %235 : vector<8x128xf32>
    %237 = arith.addf %205, %236 : vector<8x128xf32>
    %c1 = arith.constant 1 : index
    %c0_103 = arith.constant 0 : index
    %c0_104 = arith.constant 0 : index
    %238 = vector.load %arg14[%c1, %c0_103, %c0_104] : memref<16x8x512xf32, #tpu.memory_space<vmem>>, vector<1x8x512xf32>
    %239 = vector.shape_cast %238 : vector<1x8x512xf32> to vector<8x512xf32>
    %cst_105 = arith.constant dense<0.000000e+00> : vector<8x512xf32>
    %240 = tpu.matmul %234, %202, %cst_105 {dimension_numbers = #tpu.dot_dimension_numbers<[1], [0], [0], [1], [0, 0, 1, 1], [], []>} : vector<8x128xf32>, vector<128x512xf32>, vector<8x512xf32> -> vector<8x512xf32>
    %241 = arith.addf %239, %240 : vector<8x512xf32>
    %242 = vector.extract_strided_slice %241 {offsets = [0, 0], sizes = [8, 128], strides = [1, 1]} : vector<8x512xf32> to vector<8x128xf32>
    %243 = arith.negf %242 : vector<8x128xf32>
    %244 = math.exp %243 : vector<8x128xf32>
    %cst_106 = arith.constant 1.000000e+00 : f32
    %245 = vector.broadcast %cst_106 : f32 to vector<8x128xf32>
    %246 = arith.addf %245, %244 : vector<8x128xf32>
    %247 = arith.divf %245, %246 : vector<8x128xf32>
    %248 = vector.extract_strided_slice %241 {offsets = [0, 128], sizes = [8, 128], strides = [1, 1]} : vector<8x512xf32> to vector<8x128xf32>
    %249 = arith.negf %248 : vector<8x128xf32>
    %250 = math.exp %249 : vector<8x128xf32>
    %cst_107 = arith.constant 1.000000e+00 : f32
    %251 = vector.broadcast %cst_107 : f32 to vector<8x128xf32>
    %252 = arith.addf %251, %250 : vector<8x128xf32>
    %253 = arith.divf %251, %252 : vector<8x128xf32>
    %254 = vector.extract_strided_slice %241 {offsets = [0, 256], sizes = [8, 128], strides = [1, 1]} : vector<8x512xf32> to vector<8x128xf32>
    %255 = math.tanh %254 : vector<8x128xf32>
    %256 = vector.extract_strided_slice %241 {offsets = [0, 384], sizes = [8, 128], strides = [1, 1]} : vector<8x512xf32> to vector<8x128xf32>
    %257 = arith.negf %256 : vector<8x128xf32>
    %258 = math.exp %257 : vector<8x128xf32>
    %cst_108 = arith.constant 1.000000e+00 : f32
    %259 = vector.broadcast %cst_108 : f32 to vector<8x128xf32>
    %260 = arith.addf %259, %258 : vector<8x128xf32>
    %261 = arith.divf %259, %260 : vector<8x128xf32>
    %262 = arith.mulf %253, %232 : vector<8x128xf32>
    %263 = arith.mulf %247, %255 : vector<8x128xf32>
    %264 = arith.addf %262, %263 : vector<8x128xf32>
    %265 = math.tanh %264 : vector<8x128xf32>
    %266 = arith.mulf %261, %265 : vector<8x128xf32>
    %267 = vector.broadcast %46 : vector<1x128xf32> to vector<8x128xf32>
    %268 = arith.mulf %266, %267 : vector<8x128xf32>
    %269 = arith.addf %237, %268 : vector<8x128xf32>
    %c2 = arith.constant 2 : index
    %c0_109 = arith.constant 0 : index
    %c0_110 = arith.constant 0 : index
    %270 = vector.load %arg14[%c2, %c0_109, %c0_110] : memref<16x8x512xf32, #tpu.memory_space<vmem>>, vector<1x8x512xf32>
    %271 = vector.shape_cast %270 : vector<1x8x512xf32> to vector<8x512xf32>
    %cst_111 = arith.constant dense<0.000000e+00> : vector<8x512xf32>
    %272 = tpu.matmul %266, %202, %cst_111 {dimension_numbers = #tpu.dot_dimension_numbers<[1], [0], [0], [1], [0, 0, 1, 1], [], []>} : vector<8x128xf32>, vector<128x512xf32>, vector<8x512xf32> -> vector<8x512xf32>
    %273 = arith.addf %271, %272 : vector<8x512xf32>
    %274 = vector.extract_strided_slice %273 {offsets = [0, 0], sizes = [8, 128], strides = [1, 1]} : vector<8x512xf32> to vector<8x128xf32>
    %275 = arith.negf %274 : vector<8x128xf32>
    %276 = math.exp %275 : vector<8x128xf32>
    %cst_112 = arith.constant 1.000000e+00 : f32
    %277 = vector.broadcast %cst_112 : f32 to vector<8x128xf32>
    %278 = arith.addf %277, %276 : vector<8x128xf32>
    %279 = arith.divf %277, %278 : vector<8x128xf32>
    %280 = vector.extract_strided_slice %273 {offsets = [0, 128], sizes = [8, 128], strides = [1, 1]} : vector<8x512xf32> to vector<8x128xf32>
    %281 = arith.negf %280 : vector<8x128xf32>
    %282 = math.exp %281 : vector<8x128xf32>
    %cst_113 = arith.constant 1.000000e+00 : f32
    %283 = vector.broadcast %cst_113 : f32 to vector<8x128xf32>
    %284 = arith.addf %283, %282 : vector<8x128xf32>
    %285 = arith.divf %283, %284 : vector<8x128xf32>
    %286 = vector.extract_strided_slice %273 {offsets = [0, 256], sizes = [8, 128], strides = [1, 1]} : vector<8x512xf32> to vector<8x128xf32>
    %287 = math.tanh %286 : vector<8x128xf32>
    %288 = vector.extract_strided_slice %273 {offsets = [0, 384], sizes = [8, 128], strides = [1, 1]} : vector<8x512xf32> to vector<8x128xf32>
    %289 = arith.negf %288 : vector<8x128xf32>
    %290 = math.exp %289 : vector<8x128xf32>
    %cst_114 = arith.constant 1.000000e+00 : f32
    %291 = vector.broadcast %cst_114 : f32 to vector<8x128xf32>
    %292 = arith.addf %291, %290 : vector<8x128xf32>
    %293 = arith.divf %291, %292 : vector<8x128xf32>
    %294 = arith.mulf %285, %264 : vector<8x128xf32>
    %295 = arith.mulf %279, %287 : vector<8x128xf32>
    %296 = arith.addf %294, %295 : vector<8x128xf32>
    %297 = math.tanh %296 : vector<8x128xf32>
    %298 = arith.mulf %293, %297 : vector<8x128xf32>
    %299 = vector.broadcast %46 : vector<1x128xf32> to vector<8x128xf32>
    %300 = arith.mulf %298, %299 : vector<8x128xf32>
    %301 = arith.addf %269, %300 : vector<8x128xf32>
    %c3 = arith.constant 3 : index
    %c0_115 = arith.constant 0 : index
    %c0_116 = arith.constant 0 : index
    %302 = vector.load %arg14[%c3, %c0_115, %c0_116] : memref<16x8x512xf32, #tpu.memory_space<vmem>>, vector<1x8x512xf32>
    %303 = vector.shape_cast %302 : vector<1x8x512xf32> to vector<8x512xf32>
    %cst_117 = arith.constant dense<0.000000e+00> : vector<8x512xf32>
    %304 = tpu.matmul %298, %202, %cst_117 {dimension_numbers = #tpu.dot_dimension_numbers<[1], [0], [0], [1], [0, 0, 1, 1], [], []>} : vector<8x128xf32>, vector<128x512xf32>, vector<8x512xf32> -> vector<8x512xf32>
    %305 = arith.addf %303, %304 : vector<8x512xf32>
    %306 = vector.extract_strided_slice %305 {offsets = [0, 0], sizes = [8, 128], strides = [1, 1]} : vector<8x512xf32> to vector<8x128xf32>
    %307 = arith.negf %306 : vector<8x128xf32>
    %308 = math.exp %307 : vector<8x128xf32>
    %cst_118 = arith.constant 1.000000e+00 : f32
    %309 = vector.broadcast %cst_118 : f32 to vector<8x128xf32>
    %310 = arith.addf %309, %308 : vector<8x128xf32>
    %311 = arith.divf %309, %310 : vector<8x128xf32>
    %312 = vector.extract_strided_slice %305 {offsets = [0, 128], sizes = [8, 128], strides = [1, 1]} : vector<8x512xf32> to vector<8x128xf32>
    %313 = arith.negf %312 : vector<8x128xf32>
    %314 = math.exp %313 : vector<8x128xf32>
    %cst_119 = arith.constant 1.000000e+00 : f32
    %315 = vector.broadcast %cst_119 : f32 to vector<8x128xf32>
    %316 = arith.addf %315, %314 : vector<8x128xf32>
    %317 = arith.divf %315, %316 : vector<8x128xf32>
    %318 = vector.extract_strided_slice %305 {offsets = [0, 256], sizes = [8, 128], strides = [1, 1]} : vector<8x512xf32> to vector<8x128xf32>
    %319 = math.tanh %318 : vector<8x128xf32>
    %320 = vector.extract_strided_slice %305 {offsets = [0, 384], sizes = [8, 128], strides = [1, 1]} : vector<8x512xf32> to vector<8x128xf32>
    %321 = arith.negf %320 : vector<8x128xf32>
    %322 = math.exp %321 : vector<8x128xf32>
    %cst_120 = arith.constant 1.000000e+00 : f32
    %323 = vector.broadcast %cst_120 : f32 to vector<8x128xf32>
    %324 = arith.addf %323, %322 : vector<8x128xf32>
    %325 = arith.divf %323, %324 : vector<8x128xf32>
    %326 = arith.mulf %317, %296 : vector<8x128xf32>
    %327 = arith.mulf %311, %319 : vector<8x128xf32>
    %328 = arith.addf %326, %327 : vector<8x128xf32>
    %329 = math.tanh %328 : vector<8x128xf32>
    %330 = arith.mulf %325, %329 : vector<8x128xf32>
    %331 = vector.broadcast %46 : vector<1x128xf32> to vector<8x128xf32>
    %332 = arith.mulf %330, %331 : vector<8x128xf32>
    %333 = arith.addf %301, %332 : vector<8x128xf32>
    %c4 = arith.constant 4 : index
    %c0_121 = arith.constant 0 : index
    %c0_122 = arith.constant 0 : index
    %334 = vector.load %arg14[%c4, %c0_121, %c0_122] : memref<16x8x512xf32, #tpu.memory_space<vmem>>, vector<1x8x512xf32>
    %335 = vector.shape_cast %334 : vector<1x8x512xf32> to vector<8x512xf32>
    %cst_123 = arith.constant dense<0.000000e+00> : vector<8x512xf32>
    %336 = tpu.matmul %330, %202, %cst_123 {dimension_numbers = #tpu.dot_dimension_numbers<[1], [0], [0], [1], [0, 0, 1, 1], [], []>} : vector<8x128xf32>, vector<128x512xf32>, vector<8x512xf32> -> vector<8x512xf32>
    %337 = arith.addf %335, %336 : vector<8x512xf32>
    %338 = vector.extract_strided_slice %337 {offsets = [0, 0], sizes = [8, 128], strides = [1, 1]} : vector<8x512xf32> to vector<8x128xf32>
    %339 = arith.negf %338 : vector<8x128xf32>
    %340 = math.exp %339 : vector<8x128xf32>
    %cst_124 = arith.constant 1.000000e+00 : f32
    %341 = vector.broadcast %cst_124 : f32 to vector<8x128xf32>
    %342 = arith.addf %341, %340 : vector<8x128xf32>
    %343 = arith.divf %341, %342 : vector<8x128xf32>
    %344 = vector.extract_strided_slice %337 {offsets = [0, 128], sizes = [8, 128], strides = [1, 1]} : vector<8x512xf32> to vector<8x128xf32>
    %345 = arith.negf %344 : vector<8x128xf32>
    %346 = math.exp %345 : vector<8x128xf32>
    %cst_125 = arith.constant 1.000000e+00 : f32
    %347 = vector.broadcast %cst_125 : f32 to vector<8x128xf32>
    %348 = arith.addf %347, %346 : vector<8x128xf32>
    %349 = arith.divf %347, %348 : vector<8x128xf32>
    %350 = vector.extract_strided_slice %337 {offsets = [0, 256], sizes = [8, 128], strides = [1, 1]} : vector<8x512xf32> to vector<8x128xf32>
    %351 = math.tanh %350 : vector<8x128xf32>
    %352 = vector.extract_strided_slice %337 {offsets = [0, 384], sizes = [8, 128], strides = [1, 1]} : vector<8x512xf32> to vector<8x128xf32>
    %353 = arith.negf %352 : vector<8x128xf32>
    %354 = math.exp %353 : vector<8x128xf32>
    %cst_126 = arith.constant 1.000000e+00 : f32
    %355 = vector.broadcast %cst_126 : f32 to vector<8x128xf32>
    %356 = arith.addf %355, %354 : vector<8x128xf32>
    %357 = arith.divf %355, %356 : vector<8x128xf32>
    %358 = arith.mulf %349, %328 : vector<8x128xf32>
    %359 = arith.mulf %343, %351 : vector<8x128xf32>
    %360 = arith.addf %358, %359 : vector<8x128xf32>
    %361 = math.tanh %360 : vector<8x128xf32>
    %362 = arith.mulf %357, %361 : vector<8x128xf32>
    %363 = vector.broadcast %46 : vector<1x128xf32> to vector<8x128xf32>
    %364 = arith.mulf %362, %363 : vector<8x128xf32>
    %365 = arith.addf %333, %364 : vector<8x128xf32>
    %c5 = arith.constant 5 : index
    %c0_127 = arith.constant 0 : index
    %c0_128 = arith.constant 0 : index
    %366 = vector.load %arg14[%c5, %c0_127, %c0_128] : memref<16x8x512xf32, #tpu.memory_space<vmem>>, vector<1x8x512xf32>
    %367 = vector.shape_cast %366 : vector<1x8x512xf32> to vector<8x512xf32>
    %cst_129 = arith.constant dense<0.000000e+00> : vector<8x512xf32>
    %368 = tpu.matmul %362, %202, %cst_129 {dimension_numbers = #tpu.dot_dimension_numbers<[1], [0], [0], [1], [0, 0, 1, 1], [], []>} : vector<8x128xf32>, vector<128x512xf32>, vector<8x512xf32> -> vector<8x512xf32>
    %369 = arith.addf %367, %368 : vector<8x512xf32>
    %370 = vector.extract_strided_slice %369 {offsets = [0, 0], sizes = [8, 128], strides = [1, 1]} : vector<8x512xf32> to vector<8x128xf32>
    %371 = arith.negf %370 : vector<8x128xf32>
    %372 = math.exp %371 : vector<8x128xf32>
    %cst_130 = arith.constant 1.000000e+00 : f32
    %373 = vector.broadcast %cst_130 : f32 to vector<8x128xf32>
    %374 = arith.addf %373, %372 : vector<8x128xf32>
    %375 = arith.divf %373, %374 : vector<8x128xf32>
    %376 = vector.extract_strided_slice %369 {offsets = [0, 128], sizes = [8, 128], strides = [1, 1]} : vector<8x512xf32> to vector<8x128xf32>
    %377 = arith.negf %376 : vector<8x128xf32>
    %378 = math.exp %377 : vector<8x128xf32>
    %cst_131 = arith.constant 1.000000e+00 : f32
    %379 = vector.broadcast %cst_131 : f32 to vector<8x128xf32>
    %380 = arith.addf %379, %378 : vector<8x128xf32>
    %381 = arith.divf %379, %380 : vector<8x128xf32>
    %382 = vector.extract_strided_slice %369 {offsets = [0, 256], sizes = [8, 128], strides = [1, 1]} : vector<8x512xf32> to vector<8x128xf32>
    %383 = math.tanh %382 : vector<8x128xf32>
    %384 = vector.extract_strided_slice %369 {offsets = [0, 384], sizes = [8, 128], strides = [1, 1]} : vector<8x512xf32> to vector<8x128xf32>
    %385 = arith.negf %384 : vector<8x128xf32>
    %386 = math.exp %385 : vector<8x128xf32>
    %cst_132 = arith.constant 1.000000e+00 : f32
    %387 = vector.broadcast %cst_132 : f32 to vector<8x128xf32>
    %388 = arith.addf %387, %386 : vector<8x128xf32>
    %389 = arith.divf %387, %388 : vector<8x128xf32>
    %390 = arith.mulf %381, %360 : vector<8x128xf32>
    %391 = arith.mulf %375, %383 : vector<8x128xf32>
    %392 = arith.addf %390, %391 : vector<8x128xf32>
    %393 = math.tanh %392 : vector<8x128xf32>
    %394 = arith.mulf %389, %393 : vector<8x128xf32>
    %395 = vector.broadcast %46 : vector<1x128xf32> to vector<8x128xf32>
    %396 = arith.mulf %394, %395 : vector<8x128xf32>
    %397 = arith.addf %365, %396 : vector<8x128xf32>
    %c6 = arith.constant 6 : index
    %c0_133 = arith.constant 0 : index
    %c0_134 = arith.constant 0 : index
    %398 = vector.load %arg14[%c6, %c0_133, %c0_134] : memref<16x8x512xf32, #tpu.memory_space<vmem>>, vector<1x8x512xf32>
    %399 = vector.shape_cast %398 : vector<1x8x512xf32> to vector<8x512xf32>
    %cst_135 = arith.constant dense<0.000000e+00> : vector<8x512xf32>
    %400 = tpu.matmul %394, %202, %cst_135 {dimension_numbers = #tpu.dot_dimension_numbers<[1], [0], [0], [1], [0, 0, 1, 1], [], []>} : vector<8x128xf32>, vector<128x512xf32>, vector<8x512xf32> -> vector<8x512xf32>
    %401 = arith.addf %399, %400 : vector<8x512xf32>
    %402 = vector.extract_strided_slice %401 {offsets = [0, 0], sizes = [8, 128], strides = [1, 1]} : vector<8x512xf32> to vector<8x128xf32>
    %403 = arith.negf %402 : vector<8x128xf32>
    %404 = math.exp %403 : vector<8x128xf32>
    %cst_136 = arith.constant 1.000000e+00 : f32
    %405 = vector.broadcast %cst_136 : f32 to vector<8x128xf32>
    %406 = arith.addf %405, %404 : vector<8x128xf32>
    %407 = arith.divf %405, %406 : vector<8x128xf32>
    %408 = vector.extract_strided_slice %401 {offsets = [0, 128], sizes = [8, 128], strides = [1, 1]} : vector<8x512xf32> to vector<8x128xf32>
    %409 = arith.negf %408 : vector<8x128xf32>
    %410 = math.exp %409 : vector<8x128xf32>
    %cst_137 = arith.constant 1.000000e+00 : f32
    %411 = vector.broadcast %cst_137 : f32 to vector<8x128xf32>
    %412 = arith.addf %411, %410 : vector<8x128xf32>
    %413 = arith.divf %411, %412 : vector<8x128xf32>
    %414 = vector.extract_strided_slice %401 {offsets = [0, 256], sizes = [8, 128], strides = [1, 1]} : vector<8x512xf32> to vector<8x128xf32>
    %415 = math.tanh %414 : vector<8x128xf32>
    %416 = vector.extract_strided_slice %401 {offsets = [0, 384], sizes = [8, 128], strides = [1, 1]} : vector<8x512xf32> to vector<8x128xf32>
    %417 = arith.negf %416 : vector<8x128xf32>
    %418 = math.exp %417 : vector<8x128xf32>
    %cst_138 = arith.constant 1.000000e+00 : f32
    %419 = vector.broadcast %cst_138 : f32 to vector<8x128xf32>
    %420 = arith.addf %419, %418 : vector<8x128xf32>
    %421 = arith.divf %419, %420 : vector<8x128xf32>
    %422 = arith.mulf %413, %392 : vector<8x128xf32>
    %423 = arith.mulf %407, %415 : vector<8x128xf32>
    %424 = arith.addf %422, %423 : vector<8x128xf32>
    %425 = math.tanh %424 : vector<8x128xf32>
    %426 = arith.mulf %421, %425 : vector<8x128xf32>
    %427 = vector.broadcast %46 : vector<1x128xf32> to vector<8x128xf32>
    %428 = arith.mulf %426, %427 : vector<8x128xf32>
    %429 = arith.addf %397, %428 : vector<8x128xf32>
    %c7 = arith.constant 7 : index
    %c0_139 = arith.constant 0 : index
    %c0_140 = arith.constant 0 : index
    %430 = vector.load %arg14[%c7, %c0_139, %c0_140] : memref<16x8x512xf32, #tpu.memory_space<vmem>>, vector<1x8x512xf32>
    %431 = vector.shape_cast %430 : vector<1x8x512xf32> to vector<8x512xf32>
    %cst_141 = arith.constant dense<0.000000e+00> : vector<8x512xf32>
    %432 = tpu.matmul %426, %202, %cst_141 {dimension_numbers = #tpu.dot_dimension_numbers<[1], [0], [0], [1], [0, 0, 1, 1], [], []>} : vector<8x128xf32>, vector<128x512xf32>, vector<8x512xf32> -> vector<8x512xf32>
    %433 = arith.addf %431, %432 : vector<8x512xf32>
    %434 = vector.extract_strided_slice %433 {offsets = [0, 0], sizes = [8, 128], strides = [1, 1]} : vector<8x512xf32> to vector<8x128xf32>
    %435 = arith.negf %434 : vector<8x128xf32>
    %436 = math.exp %435 : vector<8x128xf32>
    %cst_142 = arith.constant 1.000000e+00 : f32
    %437 = vector.broadcast %cst_142 : f32 to vector<8x128xf32>
    %438 = arith.addf %437, %436 : vector<8x128xf32>
    %439 = arith.divf %437, %438 : vector<8x128xf32>
    %440 = vector.extract_strided_slice %433 {offsets = [0, 128], sizes = [8, 128], strides = [1, 1]} : vector<8x512xf32> to vector<8x128xf32>
    %441 = arith.negf %440 : vector<8x128xf32>
    %442 = math.exp %441 : vector<8x128xf32>
    %cst_143 = arith.constant 1.000000e+00 : f32
    %443 = vector.broadcast %cst_143 : f32 to vector<8x128xf32>
    %444 = arith.addf %443, %442 : vector<8x128xf32>
    %445 = arith.divf %443, %444 : vector<8x128xf32>
    %446 = vector.extract_strided_slice %433 {offsets = [0, 256], sizes = [8, 128], strides = [1, 1]} : vector<8x512xf32> to vector<8x128xf32>
    %447 = math.tanh %446 : vector<8x128xf32>
    %448 = vector.extract_strided_slice %433 {offsets = [0, 384], sizes = [8, 128], strides = [1, 1]} : vector<8x512xf32> to vector<8x128xf32>
    %449 = arith.negf %448 : vector<8x128xf32>
    %450 = math.exp %449 : vector<8x128xf32>
    %cst_144 = arith.constant 1.000000e+00 : f32
    %451 = vector.broadcast %cst_144 : f32 to vector<8x128xf32>
    %452 = arith.addf %451, %450 : vector<8x128xf32>
    %453 = arith.divf %451, %452 : vector<8x128xf32>
    %454 = arith.mulf %445, %424 : vector<8x128xf32>
    %455 = arith.mulf %439, %447 : vector<8x128xf32>
    %456 = arith.addf %454, %455 : vector<8x128xf32>
    %457 = math.tanh %456 : vector<8x128xf32>
    %458 = arith.mulf %453, %457 : vector<8x128xf32>
    %459 = vector.broadcast %46 : vector<1x128xf32> to vector<8x128xf32>
    %460 = arith.mulf %458, %459 : vector<8x128xf32>
    %461 = arith.addf %429, %460 : vector<8x128xf32>
    %462 = vector.broadcast %104 : vector<1x128xf32> to vector<8x128xf32>
    %463 = arith.mulf %458, %462 : vector<8x128xf32>
    %464 = vector.broadcast %104 : vector<1x128xf32> to vector<8x128xf32>
    %465 = arith.mulf %456, %464 : vector<8x128xf32>
    %c8 = arith.constant 8 : index
    %c0_145 = arith.constant 0 : index
    %c0_146 = arith.constant 0 : index
    %466 = vector.load %arg14[%c8, %c0_145, %c0_146] : memref<16x8x512xf32, #tpu.memory_space<vmem>>, vector<1x8x512xf32>
    %467 = vector.shape_cast %466 : vector<1x8x512xf32> to vector<8x512xf32>
    %cst_147 = arith.constant dense<0.000000e+00> : vector<8x512xf32>
    %468 = tpu.matmul %463, %202, %cst_147 {dimension_numbers = #tpu.dot_dimension_numbers<[1], [0], [0], [1], [0, 0, 1, 1], [], []>} : vector<8x128xf32>, vector<128x512xf32>, vector<8x512xf32> -> vector<8x512xf32>
    %469 = arith.addf %467, %468 : vector<8x512xf32>
    %470 = vector.extract_strided_slice %469 {offsets = [0, 0], sizes = [8, 128], strides = [1, 1]} : vector<8x512xf32> to vector<8x128xf32>
    %471 = arith.negf %470 : vector<8x128xf32>
    %472 = math.exp %471 : vector<8x128xf32>
    %cst_148 = arith.constant 1.000000e+00 : f32
    %473 = vector.broadcast %cst_148 : f32 to vector<8x128xf32>
    %474 = arith.addf %473, %472 : vector<8x128xf32>
    %475 = arith.divf %473, %474 : vector<8x128xf32>
    %476 = vector.extract_strided_slice %469 {offsets = [0, 128], sizes = [8, 128], strides = [1, 1]} : vector<8x512xf32> to vector<8x128xf32>
    %477 = arith.negf %476 : vector<8x128xf32>
    %478 = math.exp %477 : vector<8x128xf32>
    %cst_149 = arith.constant 1.000000e+00 : f32
    %479 = vector.broadcast %cst_149 : f32 to vector<8x128xf32>
    %480 = arith.addf %479, %478 : vector<8x128xf32>
    %481 = arith.divf %479, %480 : vector<8x128xf32>
    %482 = vector.extract_strided_slice %469 {offsets = [0, 256], sizes = [8, 128], strides = [1, 1]} : vector<8x512xf32> to vector<8x128xf32>
    %483 = math.tanh %482 : vector<8x128xf32>
    %484 = vector.extract_strided_slice %469 {offsets = [0, 384], sizes = [8, 128], strides = [1, 1]} : vector<8x512xf32> to vector<8x128xf32>
    %485 = arith.negf %484 : vector<8x128xf32>
    %486 = math.exp %485 : vector<8x128xf32>
    %cst_150 = arith.constant 1.000000e+00 : f32
    %487 = vector.broadcast %cst_150 : f32 to vector<8x128xf32>
    %488 = arith.addf %487, %486 : vector<8x128xf32>
    %489 = arith.divf %487, %488 : vector<8x128xf32>
    %490 = arith.mulf %481, %465 : vector<8x128xf32>
    %491 = arith.mulf %475, %483 : vector<8x128xf32>
    %492 = arith.addf %490, %491 : vector<8x128xf32>
    %493 = math.tanh %492 : vector<8x128xf32>
    %494 = arith.mulf %489, %493 : vector<8x128xf32>
    %495 = vector.broadcast %83 : vector<1x128xf32> to vector<8x128xf32>
    %496 = arith.mulf %494, %495 : vector<8x128xf32>
    %497 = arith.addf %461, %496 : vector<8x128xf32>
    %c9 = arith.constant 9 : index
    %c0_151 = arith.constant 0 : index
    %c0_152 = arith.constant 0 : index
    %498 = vector.load %arg14[%c9, %c0_151, %c0_152] : memref<16x8x512xf32, #tpu.memory_space<vmem>>, vector<1x8x512xf32>
    %499 = vector.shape_cast %498 : vector<1x8x512xf32> to vector<8x512xf32>
    %cst_153 = arith.constant dense<0.000000e+00> : vector<8x512xf32>
    %500 = tpu.matmul %494, %202, %cst_153 {dimension_numbers = #tpu.dot_dimension_numbers<[1], [0], [0], [1], [0, 0, 1, 1], [], []>} : vector<8x128xf32>, vector<128x512xf32>, vector<8x512xf32> -> vector<8x512xf32>
    %501 = arith.addf %499, %500 : vector<8x512xf32>
    %502 = vector.extract_strided_slice %501 {offsets = [0, 0], sizes = [8, 128], strides = [1, 1]} : vector<8x512xf32> to vector<8x128xf32>
    %503 = arith.negf %502 : vector<8x128xf32>
    %504 = math.exp %503 : vector<8x128xf32>
    %cst_154 = arith.constant 1.000000e+00 : f32
    %505 = vector.broadcast %cst_154 : f32 to vector<8x128xf32>
    %506 = arith.addf %505, %504 : vector<8x128xf32>
    %507 = arith.divf %505, %506 : vector<8x128xf32>
    %508 = vector.extract_strided_slice %501 {offsets = [0, 128], sizes = [8, 128], strides = [1, 1]} : vector<8x512xf32> to vector<8x128xf32>
    %509 = arith.negf %508 : vector<8x128xf32>
    %510 = math.exp %509 : vector<8x128xf32>
    %cst_155 = arith.constant 1.000000e+00 : f32
    %511 = vector.broadcast %cst_155 : f32 to vector<8x128xf32>
    %512 = arith.addf %511, %510 : vector<8x128xf32>
    %513 = arith.divf %511, %512 : vector<8x128xf32>
    %514 = vector.extract_strided_slice %501 {offsets = [0, 256], sizes = [8, 128], strides = [1, 1]} : vector<8x512xf32> to vector<8x128xf32>
    %515 = math.tanh %514 : vector<8x128xf32>
    %516 = vector.extract_strided_slice %501 {offsets = [0, 384], sizes = [8, 128], strides = [1, 1]} : vector<8x512xf32> to vector<8x128xf32>
    %517 = arith.negf %516 : vector<8x128xf32>
    %518 = math.exp %517 : vector<8x128xf32>
    %cst_156 = arith.constant 1.000000e+00 : f32
    %519 = vector.broadcast %cst_156 : f32 to vector<8x128xf32>
    %520 = arith.addf %519, %518 : vector<8x128xf32>
    %521 = arith.divf %519, %520 : vector<8x128xf32>
    %522 = arith.mulf %513, %492 : vector<8x128xf32>
    %523 = arith.mulf %507, %515 : vector<8x128xf32>
    %524 = arith.addf %522, %523 : vector<8x128xf32>
    %525 = math.tanh %524 : vector<8x128xf32>
    %526 = arith.mulf %521, %525 : vector<8x128xf32>
    %527 = vector.broadcast %83 : vector<1x128xf32> to vector<8x128xf32>
    %528 = arith.mulf %526, %527 : vector<8x128xf32>
    %529 = arith.addf %497, %528 : vector<8x128xf32>
    %c10 = arith.constant 10 : index
    %c0_157 = arith.constant 0 : index
    %c0_158 = arith.constant 0 : index
    %530 = vector.load %arg14[%c10, %c0_157, %c0_158] : memref<16x8x512xf32, #tpu.memory_space<vmem>>, vector<1x8x512xf32>
    %531 = vector.shape_cast %530 : vector<1x8x512xf32> to vector<8x512xf32>
    %cst_159 = arith.constant dense<0.000000e+00> : vector<8x512xf32>
    %532 = tpu.matmul %526, %202, %cst_159 {dimension_numbers = #tpu.dot_dimension_numbers<[1], [0], [0], [1], [0, 0, 1, 1], [], []>} : vector<8x128xf32>, vector<128x512xf32>, vector<8x512xf32> -> vector<8x512xf32>
    %533 = arith.addf %531, %532 : vector<8x512xf32>
    %534 = vector.extract_strided_slice %533 {offsets = [0, 0], sizes = [8, 128], strides = [1, 1]} : vector<8x512xf32> to vector<8x128xf32>
    %535 = arith.negf %534 : vector<8x128xf32>
    %536 = math.exp %535 : vector<8x128xf32>
    %cst_160 = arith.constant 1.000000e+00 : f32
    %537 = vector.broadcast %cst_160 : f32 to vector<8x128xf32>
    %538 = arith.addf %537, %536 : vector<8x128xf32>
    %539 = arith.divf %537, %538 : vector<8x128xf32>
    %540 = vector.extract_strided_slice %533 {offsets = [0, 128], sizes = [8, 128], strides = [1, 1]} : vector<8x512xf32> to vector<8x128xf32>
    %541 = arith.negf %540 : vector<8x128xf32>
    %542 = math.exp %541 : vector<8x128xf32>
    %cst_161 = arith.constant 1.000000e+00 : f32
    %543 = vector.broadcast %cst_161 : f32 to vector<8x128xf32>
    %544 = arith.addf %543, %542 : vector<8x128xf32>
    %545 = arith.divf %543, %544 : vector<8x128xf32>
    %546 = vector.extract_strided_slice %533 {offsets = [0, 256], sizes = [8, 128], strides = [1, 1]} : vector<8x512xf32> to vector<8x128xf32>
    %547 = math.tanh %546 : vector<8x128xf32>
    %548 = vector.extract_strided_slice %533 {offsets = [0, 384], sizes = [8, 128], strides = [1, 1]} : vector<8x512xf32> to vector<8x128xf32>
    %549 = arith.negf %548 : vector<8x128xf32>
    %550 = math.exp %549 : vector<8x128xf32>
    %cst_162 = arith.constant 1.000000e+00 : f32
    %551 = vector.broadcast %cst_162 : f32 to vector<8x128xf32>
    %552 = arith.addf %551, %550 : vector<8x128xf32>
    %553 = arith.divf %551, %552 : vector<8x128xf32>
    %554 = arith.mulf %545, %524 : vector<8x128xf32>
    %555 = arith.mulf %539, %547 : vector<8x128xf32>
    %556 = arith.addf %554, %555 : vector<8x128xf32>
    %557 = math.tanh %556 : vector<8x128xf32>
    %558 = arith.mulf %553, %557 : vector<8x128xf32>
    %559 = vector.broadcast %83 : vector<1x128xf32> to vector<8x128xf32>
    %560 = arith.mulf %558, %559 : vector<8x128xf32>
    %561 = arith.addf %529, %560 : vector<8x128xf32>
    %c11 = arith.constant 11 : index
    %c0_163 = arith.constant 0 : index
    %c0_164 = arith.constant 0 : index
    %562 = vector.load %arg14[%c11, %c0_163, %c0_164] : memref<16x8x512xf32, #tpu.memory_space<vmem>>, vector<1x8x512xf32>
    %563 = vector.shape_cast %562 : vector<1x8x512xf32> to vector<8x512xf32>
    %cst_165 = arith.constant dense<0.000000e+00> : vector<8x512xf32>
    %564 = tpu.matmul %558, %202, %cst_165 {dimension_numbers = #tpu.dot_dimension_numbers<[1], [0], [0], [1], [0, 0, 1, 1], [], []>} : vector<8x128xf32>, vector<128x512xf32>, vector<8x512xf32> -> vector<8x512xf32>
    %565 = arith.addf %563, %564 : vector<8x512xf32>
    %566 = vector.extract_strided_slice %565 {offsets = [0, 0], sizes = [8, 128], strides = [1, 1]} : vector<8x512xf32> to vector<8x128xf32>
    %567 = arith.negf %566 : vector<8x128xf32>
    %568 = math.exp %567 : vector<8x128xf32>
    %cst_166 = arith.constant 1.000000e+00 : f32
    %569 = vector.broadcast %cst_166 : f32 to vector<8x128xf32>
    %570 = arith.addf %569, %568 : vector<8x128xf32>
    %571 = arith.divf %569, %570 : vector<8x128xf32>
    %572 = vector.extract_strided_slice %565 {offsets = [0, 128], sizes = [8, 128], strides = [1, 1]} : vector<8x512xf32> to vector<8x128xf32>
    %573 = arith.negf %572 : vector<8x128xf32>
    %574 = math.exp %573 : vector<8x128xf32>
    %cst_167 = arith.constant 1.000000e+00 : f32
    %575 = vector.broadcast %cst_167 : f32 to vector<8x128xf32>
    %576 = arith.addf %575, %574 : vector<8x128xf32>
    %577 = arith.divf %575, %576 : vector<8x128xf32>
    %578 = vector.extract_strided_slice %565 {offsets = [0, 256], sizes = [8, 128], strides = [1, 1]} : vector<8x512xf32> to vector<8x128xf32>
    %579 = math.tanh %578 : vector<8x128xf32>
    %580 = vector.extract_strided_slice %565 {offsets = [0, 384], sizes = [8, 128], strides = [1, 1]} : vector<8x512xf32> to vector<8x128xf32>
    %581 = arith.negf %580 : vector<8x128xf32>
    %582 = math.exp %581 : vector<8x128xf32>
    %cst_168 = arith.constant 1.000000e+00 : f32
    %583 = vector.broadcast %cst_168 : f32 to vector<8x128xf32>
    %584 = arith.addf %583, %582 : vector<8x128xf32>
    %585 = arith.divf %583, %584 : vector<8x128xf32>
    %586 = arith.mulf %577, %556 : vector<8x128xf32>
    %587 = arith.mulf %571, %579 : vector<8x128xf32>
    %588 = arith.addf %586, %587 : vector<8x128xf32>
    %589 = math.tanh %588 : vector<8x128xf32>
    %590 = arith.mulf %585, %589 : vector<8x128xf32>
    %591 = vector.broadcast %83 : vector<1x128xf32> to vector<8x128xf32>
    %592 = arith.mulf %590, %591 : vector<8x128xf32>
    %593 = arith.addf %561, %592 : vector<8x128xf32>
    %c12 = arith.constant 12 : index
    %c0_169 = arith.constant 0 : index
    %c0_170 = arith.constant 0 : index
    %594 = vector.load %arg14[%c12, %c0_169, %c0_170] : memref<16x8x512xf32, #tpu.memory_space<vmem>>, vector<1x8x512xf32>
    %595 = vector.shape_cast %594 : vector<1x8x512xf32> to vector<8x512xf32>
    %cst_171 = arith.constant dense<0.000000e+00> : vector<8x512xf32>
    %596 = tpu.matmul %590, %202, %cst_171 {dimension_numbers = #tpu.dot_dimension_numbers<[1], [0], [0], [1], [0, 0, 1, 1], [], []>} : vector<8x128xf32>, vector<128x512xf32>, vector<8x512xf32> -> vector<8x512xf32>
    %597 = arith.addf %595, %596 : vector<8x512xf32>
    %598 = vector.extract_strided_slice %597 {offsets = [0, 0], sizes = [8, 128], strides = [1, 1]} : vector<8x512xf32> to vector<8x128xf32>
    %599 = arith.negf %598 : vector<8x128xf32>
    %600 = math.exp %599 : vector<8x128xf32>
    %cst_172 = arith.constant 1.000000e+00 : f32
    %601 = vector.broadcast %cst_172 : f32 to vector<8x128xf32>
    %602 = arith.addf %601, %600 : vector<8x128xf32>
    %603 = arith.divf %601, %602 : vector<8x128xf32>
    %604 = vector.extract_strided_slice %597 {offsets = [0, 128], sizes = [8, 128], strides = [1, 1]} : vector<8x512xf32> to vector<8x128xf32>
    %605 = arith.negf %604 : vector<8x128xf32>
    %606 = math.exp %605 : vector<8x128xf32>
    %cst_173 = arith.constant 1.000000e+00 : f32
    %607 = vector.broadcast %cst_173 : f32 to vector<8x128xf32>
    %608 = arith.addf %607, %606 : vector<8x128xf32>
    %609 = arith.divf %607, %608 : vector<8x128xf32>
    %610 = vector.extract_strided_slice %597 {offsets = [0, 256], sizes = [8, 128], strides = [1, 1]} : vector<8x512xf32> to vector<8x128xf32>
    %611 = math.tanh %610 : vector<8x128xf32>
    %612 = vector.extract_strided_slice %597 {offsets = [0, 384], sizes = [8, 128], strides = [1, 1]} : vector<8x512xf32> to vector<8x128xf32>
    %613 = arith.negf %612 : vector<8x128xf32>
    %614 = math.exp %613 : vector<8x128xf32>
    %cst_174 = arith.constant 1.000000e+00 : f32
    %615 = vector.broadcast %cst_174 : f32 to vector<8x128xf32>
    %616 = arith.addf %615, %614 : vector<8x128xf32>
    %617 = arith.divf %615, %616 : vector<8x128xf32>
    %618 = arith.mulf %609, %588 : vector<8x128xf32>
    %619 = arith.mulf %603, %611 : vector<8x128xf32>
    %620 = arith.addf %618, %619 : vector<8x128xf32>
    %621 = math.tanh %620 : vector<8x128xf32>
    %622 = arith.mulf %617, %621 : vector<8x128xf32>
    %623 = vector.broadcast %83 : vector<1x128xf32> to vector<8x128xf32>
    %624 = arith.mulf %622, %623 : vector<8x128xf32>
    %625 = arith.addf %593, %624 : vector<8x128xf32>
    %c13 = arith.constant 13 : index
    %c0_175 = arith.constant 0 : index
    %c0_176 = arith.constant 0 : index
    %626 = vector.load %arg14[%c13, %c0_175, %c0_176] : memref<16x8x512xf32, #tpu.memory_space<vmem>>, vector<1x8x512xf32>
    %627 = vector.shape_cast %626 : vector<1x8x512xf32> to vector<8x512xf32>
    %cst_177 = arith.constant dense<0.000000e+00> : vector<8x512xf32>
    %628 = tpu.matmul %622, %202, %cst_177 {dimension_numbers = #tpu.dot_dimension_numbers<[1], [0], [0], [1], [0, 0, 1, 1], [], []>} : vector<8x128xf32>, vector<128x512xf32>, vector<8x512xf32> -> vector<8x512xf32>
    %629 = arith.addf %627, %628 : vector<8x512xf32>
    %630 = vector.extract_strided_slice %629 {offsets = [0, 0], sizes = [8, 128], strides = [1, 1]} : vector<8x512xf32> to vector<8x128xf32>
    %631 = arith.negf %630 : vector<8x128xf32>
    %632 = math.exp %631 : vector<8x128xf32>
    %cst_178 = arith.constant 1.000000e+00 : f32
    %633 = vector.broadcast %cst_178 : f32 to vector<8x128xf32>
    %634 = arith.addf %633, %632 : vector<8x128xf32>
    %635 = arith.divf %633, %634 : vector<8x128xf32>
    %636 = vector.extract_strided_slice %629 {offsets = [0, 128], sizes = [8, 128], strides = [1, 1]} : vector<8x512xf32> to vector<8x128xf32>
    %637 = arith.negf %636 : vector<8x128xf32>
    %638 = math.exp %637 : vector<8x128xf32>
    %cst_179 = arith.constant 1.000000e+00 : f32
    %639 = vector.broadcast %cst_179 : f32 to vector<8x128xf32>
    %640 = arith.addf %639, %638 : vector<8x128xf32>
    %641 = arith.divf %639, %640 : vector<8x128xf32>
    %642 = vector.extract_strided_slice %629 {offsets = [0, 256], sizes = [8, 128], strides = [1, 1]} : vector<8x512xf32> to vector<8x128xf32>
    %643 = math.tanh %642 : vector<8x128xf32>
    %644 = vector.extract_strided_slice %629 {offsets = [0, 384], sizes = [8, 128], strides = [1, 1]} : vector<8x512xf32> to vector<8x128xf32>
    %645 = arith.negf %644 : vector<8x128xf32>
    %646 = math.exp %645 : vector<8x128xf32>
    %cst_180 = arith.constant 1.000000e+00 : f32
    %647 = vector.broadcast %cst_180 : f32 to vector<8x128xf32>
    %648 = arith.addf %647, %646 : vector<8x128xf32>
    %649 = arith.divf %647, %648 : vector<8x128xf32>
    %650 = arith.mulf %641, %620 : vector<8x128xf32>
    %651 = arith.mulf %635, %643 : vector<8x128xf32>
    %652 = arith.addf %650, %651 : vector<8x128xf32>
    %653 = math.tanh %652 : vector<8x128xf32>
    %654 = arith.mulf %649, %653 : vector<8x128xf32>
    %655 = vector.broadcast %83 : vector<1x128xf32> to vector<8x128xf32>
    %656 = arith.mulf %654, %655 : vector<8x128xf32>
    %657 = arith.addf %625, %656 : vector<8x128xf32>
    %c14 = arith.constant 14 : index
    %c0_181 = arith.constant 0 : index
    %c0_182 = arith.constant 0 : index
    %658 = vector.load %arg14[%c14, %c0_181, %c0_182] : memref<16x8x512xf32, #tpu.memory_space<vmem>>, vector<1x8x512xf32>
    %659 = vector.shape_cast %658 : vector<1x8x512xf32> to vector<8x512xf32>
    %cst_183 = arith.constant dense<0.000000e+00> : vector<8x512xf32>
    %660 = tpu.matmul %654, %202, %cst_183 {dimension_numbers = #tpu.dot_dimension_numbers<[1], [0], [0], [1], [0, 0, 1, 1], [], []>} : vector<8x128xf32>, vector<128x512xf32>, vector<8x512xf32> -> vector<8x512xf32>
    %661 = arith.addf %659, %660 : vector<8x512xf32>
    %662 = vector.extract_strided_slice %661 {offsets = [0, 0], sizes = [8, 128], strides = [1, 1]} : vector<8x512xf32> to vector<8x128xf32>
    %663 = arith.negf %662 : vector<8x128xf32>
    %664 = math.exp %663 : vector<8x128xf32>
    %cst_184 = arith.constant 1.000000e+00 : f32
    %665 = vector.broadcast %cst_184 : f32 to vector<8x128xf32>
    %666 = arith.addf %665, %664 : vector<8x128xf32>
    %667 = arith.divf %665, %666 : vector<8x128xf32>
    %668 = vector.extract_strided_slice %661 {offsets = [0, 128], sizes = [8, 128], strides = [1, 1]} : vector<8x512xf32> to vector<8x128xf32>
    %669 = arith.negf %668 : vector<8x128xf32>
    %670 = math.exp %669 : vector<8x128xf32>
    %cst_185 = arith.constant 1.000000e+00 : f32
    %671 = vector.broadcast %cst_185 : f32 to vector<8x128xf32>
    %672 = arith.addf %671, %670 : vector<8x128xf32>
    %673 = arith.divf %671, %672 : vector<8x128xf32>
    %674 = vector.extract_strided_slice %661 {offsets = [0, 256], sizes = [8, 128], strides = [1, 1]} : vector<8x512xf32> to vector<8x128xf32>
    %675 = math.tanh %674 : vector<8x128xf32>
    %676 = vector.extract_strided_slice %661 {offsets = [0, 384], sizes = [8, 128], strides = [1, 1]} : vector<8x512xf32> to vector<8x128xf32>
    %677 = arith.negf %676 : vector<8x128xf32>
    %678 = math.exp %677 : vector<8x128xf32>
    %cst_186 = arith.constant 1.000000e+00 : f32
    %679 = vector.broadcast %cst_186 : f32 to vector<8x128xf32>
    %680 = arith.addf %679, %678 : vector<8x128xf32>
    %681 = arith.divf %679, %680 : vector<8x128xf32>
    %682 = arith.mulf %673, %652 : vector<8x128xf32>
    %683 = arith.mulf %667, %675 : vector<8x128xf32>
    %684 = arith.addf %682, %683 : vector<8x128xf32>
    %685 = math.tanh %684 : vector<8x128xf32>
    %686 = arith.mulf %681, %685 : vector<8x128xf32>
    %687 = vector.broadcast %83 : vector<1x128xf32> to vector<8x128xf32>
    %688 = arith.mulf %686, %687 : vector<8x128xf32>
    %689 = arith.addf %657, %688 : vector<8x128xf32>
    %c15 = arith.constant 15 : index
    %c0_187 = arith.constant 0 : index
    %c0_188 = arith.constant 0 : index
    %690 = vector.load %arg14[%c15, %c0_187, %c0_188] : memref<16x8x512xf32, #tpu.memory_space<vmem>>, vector<1x8x512xf32>
    %691 = vector.shape_cast %690 : vector<1x8x512xf32> to vector<8x512xf32>
    %cst_189 = arith.constant dense<0.000000e+00> : vector<8x512xf32>
    %692 = tpu.matmul %686, %202, %cst_189 {dimension_numbers = #tpu.dot_dimension_numbers<[1], [0], [0], [1], [0, 0, 1, 1], [], []>} : vector<8x128xf32>, vector<128x512xf32>, vector<8x512xf32> -> vector<8x512xf32>
    %693 = arith.addf %691, %692 : vector<8x512xf32>
    %694 = vector.extract_strided_slice %693 {offsets = [0, 0], sizes = [8, 128], strides = [1, 1]} : vector<8x512xf32> to vector<8x128xf32>
    %695 = arith.negf %694 : vector<8x128xf32>
    %696 = math.exp %695 : vector<8x128xf32>
    %cst_190 = arith.constant 1.000000e+00 : f32
    %697 = vector.broadcast %cst_190 : f32 to vector<8x128xf32>
    %698 = arith.addf %697, %696 : vector<8x128xf32>
    %699 = arith.divf %697, %698 : vector<8x128xf32>
    %700 = vector.extract_strided_slice %693 {offsets = [0, 128], sizes = [8, 128], strides = [1, 1]} : vector<8x512xf32> to vector<8x128xf32>
    %701 = arith.negf %700 : vector<8x128xf32>
    %702 = math.exp %701 : vector<8x128xf32>
    %cst_191 = arith.constant 1.000000e+00 : f32
    %703 = vector.broadcast %cst_191 : f32 to vector<8x128xf32>
    %704 = arith.addf %703, %702 : vector<8x128xf32>
    %705 = arith.divf %703, %704 : vector<8x128xf32>
    %706 = vector.extract_strided_slice %693 {offsets = [0, 256], sizes = [8, 128], strides = [1, 1]} : vector<8x512xf32> to vector<8x128xf32>
    %707 = math.tanh %706 : vector<8x128xf32>
    %708 = vector.extract_strided_slice %693 {offsets = [0, 384], sizes = [8, 128], strides = [1, 1]} : vector<8x512xf32> to vector<8x128xf32>
    %709 = arith.negf %708 : vector<8x128xf32>
    %710 = math.exp %709 : vector<8x128xf32>
    %cst_192 = arith.constant 1.000000e+00 : f32
    %711 = vector.broadcast %cst_192 : f32 to vector<8x128xf32>
    %712 = arith.addf %711, %710 : vector<8x128xf32>
    %713 = arith.divf %711, %712 : vector<8x128xf32>
    %714 = arith.mulf %705, %684 : vector<8x128xf32>
    %715 = arith.mulf %699, %707 : vector<8x128xf32>
    %716 = arith.addf %714, %715 : vector<8x128xf32>
    %717 = math.tanh %716 : vector<8x128xf32>
    %718 = arith.mulf %713, %717 : vector<8x128xf32>
    %719 = vector.broadcast %83 : vector<1x128xf32> to vector<8x128xf32>
    %720 = arith.mulf %718, %719 : vector<8x128xf32>
    %721 = arith.addf %689, %720 : vector<8x128xf32>
    %722 = vector.shape_cast %201 : vector<1x128xi1> to vector<1x128xi1>
    %723 = vector.broadcast %722 : vector<1x128xi1> to vector<8x128xi1>
    %724 = arith.select %723, %718, %234 : vector<8x128xi1>, vector<8x128xf32>
    %725 = vector.broadcast %171 : vector<1x128xf32> to vector<8x128xf32>
    %726 = arith.mulf %721, %725 : vector<8x128xf32>
    %c0_193 = arith.constant 0 : index
    %c0_194 = arith.constant 0 : index
    %727 = vector.load %arg5[%c0_193, %c0_194] : memref<144x32xf32, #tpu.memory_space<vmem>>, vector<144x32xf32>
    %c0_195 = arith.constant 0 : index
    %c0_196 = arith.constant 0 : index
    %728 = vector.load %arg6[%c0_195, %c0_196] : memref<32x32xf32, #tpu.memory_space<vmem>>, vector<32x32xf32>
    %cst_197 = arith.constant dense<0.000000e+00> : vector<144x32xf32>
    %729 = tpu.matmul %727, %728, %cst_197 {dimension_numbers = #tpu.dot_dimension_numbers<[1], [0], [0], [1], [0, 0, 1, 1], [], []>} : vector<144x32xf32>, vector<32x32xf32>, vector<144x32xf32> -> vector<144x32xf32>
    %c0_198 = arith.constant 0 : index
    %c0_199 = arith.constant 0 : index
    %730 = vector.load %arg7[%c0_198, %c0_199] : memref<1x32xf32, #tpu.memory_space<vmem>>, vector<1x32xf32>
    %731 = vector.broadcast %730 : vector<1x32xf32> to vector<144x32xf32>
    %732 = arith.addf %729, %731 : vector<144x32xf32>
    %733 = vector.extract_strided_slice %732 {offsets = [0, 0], sizes = [8, 32], strides = [1, 1]} : vector<144x32xf32> to vector<8x32xf32>
    %c0_200 = arith.constant 0 : index
    %c0_201 = arith.constant 0 : index
    %734 = vector.load %arg8[%c0_200, %c0_201] : memref<32x32xf32, #tpu.memory_space<vmem>>, vector<32x32xf32>
    %cst_202 = arith.constant dense<0.000000e+00> : vector<8x32xf32>
    %735 = tpu.matmul %733, %734, %cst_202 {dimension_numbers = #tpu.dot_dimension_numbers<[1], [0], [0], [1], [0, 0, 1, 1], [], []>} : vector<8x32xf32>, vector<32x32xf32>, vector<8x32xf32> -> vector<8x32xf32>
    %736 = arith.mulf %735, %733 : vector<8x32xf32>
    %737 = arith.addf %736, %735 : vector<8x32xf32>
    %cst_203 = arith.constant dense<0.000000e+00> : vector<8x32xf32>
    %738 = tpu.matmul %737, %734, %cst_203 {dimension_numbers = #tpu.dot_dimension_numbers<[1], [0], [0], [1], [0, 0, 1, 1], [], []>} : vector<8x32xf32>, vector<32x32xf32>, vector<8x32xf32> -> vector<8x32xf32>
    %739 = arith.mulf %738, %737 : vector<8x32xf32>
    %740 = arith.addf %739, %738 : vector<8x32xf32>
    %741 = vector.extract_strided_slice %732 {offsets = [8, 0], sizes = [8, 32], strides = [1, 1]} : vector<144x32xf32> to vector<8x32xf32>
    %c0_204 = arith.constant 0 : index
    %c0_205 = arith.constant 0 : index
    %742 = vector.load %arg9[%c0_204, %c0_205] : memref<32x32xf32, #tpu.memory_space<vmem>>, vector<32x32xf32>
    %cst_206 = arith.constant dense<0.000000e+00> : vector<8x32xf32>
    %743 = tpu.matmul %741, %742, %cst_206 {dimension_numbers = #tpu.dot_dimension_numbers<[1], [0], [0], [1], [0, 0, 1, 1], [], []>} : vector<8x32xf32>, vector<32x32xf32>, vector<8x32xf32> -> vector<8x32xf32>
    %744 = arith.mulf %743, %741 : vector<8x32xf32>
    %745 = arith.addf %744, %743 : vector<8x32xf32>
    %cst_207 = arith.constant dense<0.000000e+00> : vector<8x32xf32>
    %746 = tpu.matmul %745, %742, %cst_207 {dimension_numbers = #tpu.dot_dimension_numbers<[1], [0], [0], [1], [0, 0, 1, 1], [], []>} : vector<8x32xf32>, vector<32x32xf32>, vector<8x32xf32> -> vector<8x32xf32>
    %747 = arith.mulf %746, %745 : vector<8x32xf32>
    %748 = arith.addf %747, %746 : vector<8x32xf32>
    %749 = vector.extract_strided_slice %732 {offsets = [16, 0], sizes = [128, 32], strides = [1, 1]} : vector<144x32xf32> to vector<128x32xf32>
    %c0_208 = arith.constant 0 : index
    %c0_209 = arith.constant 0 : index
    %750 = vector.load %arg10[%c0_208, %c0_209] : memref<32x32xf32, #tpu.memory_space<vmem>>, vector<32x32xf32>
    %cst_210 = arith.constant dense<0.000000e+00> : vector<128x32xf32>
    %751 = tpu.matmul %749, %750, %cst_210 {dimension_numbers = #tpu.dot_dimension_numbers<[1], [0], [0], [1], [0, 0, 1, 1], [], []>} : vector<128x32xf32>, vector<32x32xf32>, vector<128x32xf32> -> vector<128x32xf32>
    %752 = arith.mulf %751, %749 : vector<128x32xf32>
    %753 = arith.addf %752, %751 : vector<128x32xf32>
    %cst_211 = arith.constant dense<0.000000e+00> : vector<128x32xf32>
    %754 = tpu.matmul %753, %750, %cst_211 {dimension_numbers = #tpu.dot_dimension_numbers<[1], [0], [0], [1], [0, 0, 1, 1], [], []>} : vector<128x32xf32>, vector<32x32xf32>, vector<128x32xf32> -> vector<128x32xf32>
    %755 = arith.mulf %754, %753 : vector<128x32xf32>
    %756 = arith.addf %755, %754 : vector<128x32xf32>
    %757 = vector.shape_cast %756 : vector<128x32xf32> to vector<8x16x32xf32>
    %cst_212 = arith.constant dense<0.000000e+00> : vector<8x32xf32>
    %758 = vector.multi_reduction <add>, %757, %cst_212 [1] : vector<8x16x32xf32> to vector<8x32xf32>
    %cst_213 = arith.constant 1.600000e+01 : f32
    %759 = vector.broadcast %cst_213 : f32 to vector<8x32xf32>
    %760 = arith.divf %758, %759 : vector<8x32xf32>
    %761 = vector.extract_strided_slice %726 {offsets = [0, 64], sizes = [8, 32], strides = [1, 1]} : vector<8x128xf32> to vector<8x32xf32>
    %762 = vector.extract_strided_slice %724 {offsets = [0, 32], sizes = [8, 32], strides = [1, 1]} : vector<8x128xf32> to vector<8x32xf32>
    %763 = vector.extract_strided_slice %724 {offsets = [0, 0], sizes = [8, 32], strides = [1, 1]} : vector<8x128xf32> to vector<8x32xf32>
    %764 = tpu.concatenate %760, %761, %748, %762, %740, %763 in 1 : vector<8x32xf32>, vector<8x32xf32>, vector<8x32xf32>, vector<8x32xf32>, vector<8x32xf32>, vector<8x32xf32> -> vector<8x192xf32>
    %c0_214 = arith.constant 0 : index
    %c0_215 = arith.constant 0 : index
    %765 = vector.load %arg11[%c0_214, %c0_215] : memref<192x512xf32, #tpu.memory_space<vmem>>, vector<192x512xf32>
    %cst_216 = arith.constant dense<0.000000e+00> : vector<8x512xf32>
    %766 = tpu.matmul %764, %765, %cst_216 {dimension_numbers = #tpu.dot_dimension_numbers<[1], [0], [0], [1], [0, 0, 1, 1], [], []>} : vector<8x192xf32>, vector<192x512xf32>, vector<8x512xf32> -> vector<8x512xf32>
    %c0_217 = arith.constant 0 : index
    %c0_218 = arith.constant 0 : index
    %767 = vector.load %arg12[%c0_217, %c0_218] : memref<512x128xf32, #tpu.memory_space<vmem>>, vector<512x128xf32>
    %cst_219 = arith.constant dense<0.000000e+00> : vector<8x128xf32>
    %768 = tpu.matmul %766, %767, %cst_219 {dimension_numbers = #tpu.dot_dimension_numbers<[1], [0], [0], [1], [0, 0, 1, 1], [], []>} : vector<8x512xf32>, vector<512x128xf32>, vector<8x128xf32> -> vector<8x128xf32>
    %cst_220 = arith.constant 0.000000e+00 : f32
    %769 = vector.broadcast %cst_220 : f32 to vector<8x128xf32>
    %770 = arith.cmpf oge, %768, %769 : vector<8x128xf32>
    %cst_221 = arith.constant 0.00999999977 : f32
    %771 = vector.broadcast %cst_221 : f32 to vector<8x128xf32>
    %772 = arith.mulf %771, %768 : vector<8x128xf32>
    %773 = arith.select %770, %768, %772 : vector<8x128xi1>, vector<8x128xf32>
    %c0_222 = arith.constant 0 : index
    %c0_223 = arith.constant 0 : index
    %774 = vector.load %arg13[%c0_222, %c0_223] : memref<8x128xf32, #tpu.memory_space<vmem>>, vector<8x128xf32>
    tpu.vector_store %arg13[%c0_222, %c0_223], %773 {strides = array<i32>} : memref<8x128xf32, #tpu.memory_space<vmem>>, vector<8x128xf32>,
    return
  }
  func.func @transform_0(%arg0: i32) -> (i32, i32, i32) {
    %c0_i32 = arith.constant 0 : i32
    %c0_i32_0 = arith.constant 0 : i32
    %c0_i32_1 = arith.constant 0 : i32
    %c0_i32_2 = arith.constant 0 : i32
    return %c0_i32, %c0_i32_0, %c0_i32_1 : i32, i32, i32
  }
  func.func @transform_1(%arg0: i32) -> (i32, i32) {
    %c0_i32 = arith.constant 0 : i32
    %c0_i32_0 = arith.constant 0 : i32
    %c0_i32_1 = arith.constant 0 : i32
    return %c0_i32, %c0_i32_0 : i32, i32
  }
  func.func @transform_2(%arg0: i32) -> (i32, i32) {
    %c0_i32 = arith.constant 0 : i32
    %c0_i32_0 = arith.constant 0 : i32
    %c0_i32_1 = arith.constant 0 : i32
    return %c0_i32, %c0_i32_0 : i32, i32
  }
  func.func @transform_3(%arg0: i32) -> (i32, i32) {
    %c0_i32 = arith.constant 0 : i32
    %c0_i32_0 = arith.constant 0 : i32
    %c0_i32_1 = arith.constant 0 : i32
    return %c0_i32, %c0_i32_0 : i32, i32
  }
  func.func @transform_4(%arg0: i32) -> (i32, i32) {
    %c0_i32 = arith.constant 0 : i32
    %c0_i32_0 = arith.constant 0 : i32
    %c0_i32_1 = arith.constant 0 : i32
    return %c0_i32, %c0_i32_0 : i32, i32
  }
  func.func @transform_5(%arg0: i32) -> (i32, i32) {
    %c0_i32 = arith.constant 0 : i32
    %c0_i32_0 = arith.constant 0 : i32
    %c0_i32_1 = arith.constant 0 : i32
    return %c0_i32, %c0_i32_0 : i32, i32
  }
  func.func @transform_6(%arg0: i32) -> (i32, i32) {
    %c0_i32 = arith.constant 0 : i32
    %c0_i32_0 = arith.constant 0 : i32
    %c0_i32_1 = arith.constant 0 : i32
    return %c0_i32, %c0_i32_0 : i32, i32
  }
  func.func @transform_7(%arg0: i32) -> (i32, i32) {
    %c0_i32 = arith.constant 0 : i32
    %c0_i32_0 = arith.constant 0 : i32
    %c0_i32_1 = arith.constant 0 : i32
    return %c0_i32, %c0_i32_0 : i32, i32
  }
  func.func @transform_8(%arg0: i32) -> (i32, i32) {
    %c0_i32 = arith.constant 0 : i32
    %c0_i32_0 = arith.constant 0 : i32
    %c0_i32_1 = arith.constant 0 : i32
    return %c0_i32, %c0_i32_0 : i32, i32
  }
  func.func @transform_9(%arg0: i32) -> (i32, i32) {
    %c0_i32 = arith.constant 0 : i32
    %c0_i32_0 = arith.constant 0 : i32
    %c0_i32_1 = arith.constant 0 : i32
    return %c0_i32, %c0_i32_0 : i32, i32
  }
  func.func @transform_10(%arg0: i32) -> (i32, i32) {
    %c0_i32 = arith.constant 0 : i32
    %c0_i32_0 = arith.constant 0 : i32
    %c0_i32_1 = arith.constant 0 : i32
    return %c0_i32, %c0_i32_0 : i32, i32
  }
  func.func @transform_11(%arg0: i32) -> (i32, i32) {
    %c0_i32 = arith.constant 0 : i32
    %c0_i32_0 = arith.constant 0 : i32
    %c0_i32_1 = arith.constant 0 : i32
    return %c0_i32, %c0_i32_0 : i32, i32
  }
  func.func @transform_12(%arg0: i32) -> (i32, i32) {
    %c0_i32 = arith.constant 0 : i32
    %c0_i32_0 = arith.constant 0 : i32
    %c0_i32_1 = arith.constant 0 : i32
    return %c0_i32, %c0_i32_0 : i32, i32
  }
}

</mosaic_0001>

<bundles_post_ra>
// kernel: forward.1
= control target key start
LH: loop header
LB: loop body
LE: loop exit
PB: predicated region body
PF: predicated region fallthrough
CT: control target
= control target key end

     0   :  { %vm191_vm0 = vcmask 523264   ;;  %s6045_s21 = smov 96   ;;  %s10139_s1 = inlined_call_operand.vmem [shape: f32[192,512], index: 1, kind: input, shape index: {}]   ;;  %s10140_s0 = inlined_call_operand.vmem [shape: f32[16,8,192], index: 0, kind: input, shape index: {}]   ;;  %s10141_s3 = inlined_call_operand.vmem [shape: f32[128,512], index: 3, kind: input, shape index: {}]   ;;  %s10142_s2 = inlined_call_operand.vmem [shape: f32[1,512], index: 2, kind: input, shape index: {}]   ;;  %s10143_s5 = inlined_call_operand.vmem [shape: f32[32,32], index: 5, kind: input, shape index: {}]   ;;  %s10144_s4 = inlined_call_operand.vmem [shape: f32[144,32], index: 4, kind: input, shape index: {}]   ;;  %s10145_s7 = inlined_call_operand.vmem [shape: f32[32,32], index: 7, kind: input, shape index: {}]   ;;  %s10146_s6 = inlined_call_operand.vmem [shape: f32[1,32], index: 6, kind: input, shape index: {}]   ;;  %s10147_s8 = inlined_call_operand.vmem [shape: f32[32,32], index: 8, kind: input, shape index: {}]   ;;  %s10148_s9 = inlined_call_operand.vmem [shape: f32[32,32], index: 9, kind: input, shape index: {}]   ;;  %s10149_s10 = inlined_call_operand.vmem [shape: f32[192,512], index: 10, kind: input, shape index: {}]   ;;  %s10150_s11 = inlined_call_operand.vmem [shape: f32[512,128], index: 11, kind: input, shape index: {}]   ;;  %s10151_s12 = inlined_call_operand.vmem [shape: f32[8,128], index: 12, kind: output, shape index: {}]  }
   0x1   :  { %v134_v0 = vld [vmem:[%s10139_s1 + $0x1e8] sm:$0xff]  ;;  %v136_v1 = vld [vmem:[%s10139_s1 + $0x1f8] sm:$0xff]  ;;  %v133_v2 = vld [vmem:[%s10139_s1 + $0x1e0] sm:$0xff] }
   0x2   :  { %240 = vmatprep.subr.mxu0 %v134_v0  ;;  %401 = vmatprep.subr.mxu1 %v136_v1  ;;  %v135_v3 = vld [vmem:[%s10139_s1 + $0x1f0] sm:$0xff]  ;;  %v130_v4 = vld [vmem:[%s10139_s1 + $0x1c8] sm:$0xff]  ;;  %v132_v5 = vld [vmem:[%s10139_s1 + $0x1d8] sm:$0xff] }
   0x3   :  { %241 = vmatpush1.msra.mxu0 %v133_v2  ;;  %402 = vmatpush1.msra.mxu1 %v135_v3  ;;  %v129_v6 = vld [vmem:[%s10139_s1 + $0x1c0] sm:$0xff]  ;;  %v131_v7 = vld [vmem:[%s10139_s1 + $0x1d0] sm:$0xff]  ;;  %v126_v8 = vld [vmem:[%s10139_s1 + $0x1a8] sm:$0xff] }
   0x4   :  { %242 = vmatprep.subr.mxu0 %v130_v4  ;;  %403 = vmatprep.subr.mxu1 %v132_v5  ;;  %v128_v9 = vld [vmem:[%s10139_s1 + $0x1b8] sm:$0xff]  ;;  %v125_v10 = vld [vmem:[%s10139_s1 + $0x1a0] sm:$0xff]  ;;  %v127_v11 = vld [vmem:[%s10139_s1 + $0x1b0] sm:$0xff] }
   0x5   :  { %243 = vmatpush1.msra.mxu0 %v129_v6  ;;  %404 = vmatpush1.msra.mxu1 %v131_v7  ;;  %v122_v12 = vld [vmem:[%s10139_s1 + $0x188] sm:$0xff]  ;;  %v124_v13 = vld [vmem:[%s10139_s1 + $0x198] sm:$0xff]  ;;  %v121_v14 = vld [vmem:[%s10139_s1 + $0x180] sm:$0xff] }
   0x6   :  { %244 = vmatprep.subr.mxu0 %v126_v8  ;;  %405 = vmatprep.subr.mxu1 %v128_v9  ;;  %v123_v15 = vld [vmem:[%s10139_s1 + $0x190] sm:$0xff]  ;;  %v118_v16 = vld [vmem:[%s10139_s1 + $0x168] sm:$0xff]  ;;  %v120_v17 = vld [vmem:[%s10139_s1 + $0x178] sm:$0xff] }
   0x7   :  { %245 = vmatpush1.msra.mxu0 %v125_v10  ;;  %406 = vmatpush1.msra.mxu1 %v127_v11  ;;  %v117_v18 = vld [vmem:[%s10139_s1 + $0x160] sm:$0xff]  ;;  %v119_v19 = vld [vmem:[%s10139_s1 + $0x170] sm:$0xff]  ;;  %v114_v20 = vld [vmem:[%s10139_s1 + $0x148] sm:$0xff] }
   0x8   :  { %246 = vmatprep.subr.mxu0 %v122_v12  ;;  %407 = vmatprep.subr.mxu1 %v124_v13  ;;  %v116_v21 = vld [vmem:[%s10139_s1 + $0x158] sm:$0xff]  ;;  %v113_v22 = vld [vmem:[%s10139_s1 + $0x140] sm:$0xff]  ;;  %v115_v23 = vld [vmem:[%s10139_s1 + $0x150] sm:$0xff] }
   0x9   :  { %247 = vmatpush1.msra.mxu0 %v121_v14  ;;  %408 = vmatpush1.msra.mxu1 %v123_v15  ;;  %v110_v24 = vld [vmem:[%s10139_s1 + $0x128] sm:$0xff]  ;;  %v112_v25 = vld [vmem:[%s10139_s1 + $0x138] sm:$0xff]  ;;  %v109_v26 = vld [vmem:[%s10139_s1 + $0x120] sm:$0xff] }
   0xa   :  { %248 = vmatprep.subr.mxu0 %v118_v16  ;;  %409 = vmatprep.subr.mxu1 %v120_v17  ;;  %v111_v27 = vld [vmem:[%s10139_s1 + $0x130] sm:$0xff]  ;;  %v106_v28 = vld [vmem:[%s10139_s1 + $0x108] sm:$0xff]  ;;  %v108_v29 = vld [vmem:[%s10139_s1 + $0x118] sm:$0xff] }
   0xb   :  { %249 = vmatpush1.msra.mxu0 %v117_v18  ;;  %410 = vmatpush1.msra.mxu1 %v119_v19  ;;  %v105_v30 = vld [vmem:[%s10139_s1 + $0x100] sm:$0xff]  ;;  %v107_v31 = vld [vmem:[%s10139_s1 + $0x110] sm:$0xff]  ;;  %v102_v32 = vld [vmem:[%s10139_s1 + $0xe8] sm:$0xff] }
   0xc   :  { %250 = vmatprep.subr.mxu0 %v114_v20  ;;  %411 = vmatprep.subr.mxu1 %v116_v21  ;;  %v104_v33 = vld [vmem:[%s10139_s1 + $0xf8] sm:$0xff]  ;;  %v101_v34 = vld [vmem:[%s10139_s1 + $0xe0] sm:$0xff]  ;;  %v103_v35 = vld [vmem:[%s10139_s1 + $0xf0] sm:$0xff] }
   0xd   :  { %251 = vmatpush1.msra.mxu0 %v113_v22  ;;  %412 = vmatpush1.msra.mxu1 %v115_v23  ;;  %v98_v36 = vld [vmem:[%s10139_s1 + $0xc8] sm:$0xff]  ;;  %v100_v37 = vld [vmem:[%s10139_s1 + $0xd8] sm:$0xff]  ;;  %v97_v38 = vld [vmem:[%s10139_s1 + $0xc0] sm:$0xff] }
   0xe   :  { %252 = vmatprep.subr.mxu0 %v110_v24  ;;  %413 = vmatprep.subr.mxu1 %v112_v25  ;;  %v99_v39 = vld [vmem:[%s10139_s1 + $0xd0] sm:$0xff]  ;;  %v94_v40 = vld [vmem:[%s10139_s1 + $0xa8] sm:$0xff]  ;;  %v96_v41 = vld [vmem:[%s10139_s1 + $0xb8] sm:$0xff] }
   0xf   :  { %253 = vmatpush1.msra.mxu0 %v109_v26  ;;  %414 = vmatpush1.msra.mxu1 %v111_v27  ;;  %v93_v42 = vld [vmem:[%s10139_s1 + $0xa0] sm:$0xff]  ;;  %v95_v43 = vld [vmem:[%s10139_s1 + $0xb0] sm:$0xff]  ;;  %v90_v44 = vld [vmem:[%s10139_s1 + $0x88] sm:$0xff] }
  0x10   :  { %254 = vmatprep.subr.mxu0 %v106_v28  ;;  %415 = vmatprep.subr.mxu1 %v108_v29  ;;  %v92_v45 = vld [vmem:[%s10139_s1 + $0x98] sm:$0xff]  ;;  %v89_v46 = vld [vmem:[%s10139_s1 + $0x80] sm:$0xff]  ;;  %v91_v47 = vld [vmem:[%s10139_s1 + $0x90] sm:$0xff] }
  0x11   :  { %255 = vmatpush1.msra.mxu0 %v105_v30  ;;  %416 = vmatpush1.msra.mxu1 %v107_v31  ;;  %v86_v48 = vld [vmem:[%s10139_s1 + $0x68] sm:$0xff]  ;;  %v88_v49 = vld [vmem:[%s10139_s1 + $0x78] sm:$0xff]  ;;  %v85_v50 = vld [vmem:[%s10139_s1 + $0x60] sm:$0xff] }
  0x12   :  { %256 = vmatprep.subr.mxu0 %v102_v32  ;;  %417 = vmatprep.subr.mxu1 %v104_v33  ;;  %v87_v51 = vld [vmem:[%s10139_s1 + $0x70] sm:$0xff]  ;;  %v82_v52 = vld [vmem:[%s10139_s1 + $0x48] sm:$0xff]  ;;  %v84_v53 = vld [vmem:[%s10139_s1 + $0x58] sm:$0xff] }
  0x13   :  { %257 = vmatpush1.msra.mxu0 %v101_v34  ;;  %418 = vmatpush1.msra.mxu1 %v103_v35  ;;  %v81_v54 = vld [vmem:[%s10139_s1 + $0x40] sm:$0xff]  ;;  %v83_v55 = vld [vmem:[%s10139_s1 + $0x50] sm:$0xff]  ;;  %v78_v56 = vld [vmem:[%s10139_s1 + $0x28] sm:$0xff] }
  0x14   :  { %258 = vmatprep.subr.mxu0 %v98_v36  ;;  %419 = vmatprep.subr.mxu1 %v100_v37  ;;  %v80_v57 = vld [vmem:[%s10139_s1 + $0x38] sm:$0xff]  ;;  %v77_v58 = vld [vmem:[%s10139_s1 + $0x20] sm:$0xff]  ;;  %v79_v59 = vld [vmem:[%s10139_s1 + $0x30] sm:$0xff] }
  0x15   :  { %259 = vmatpush1.msra.mxu0 %v97_v38  ;;  %420 = vmatpush1.msra.mxu1 %v99_v39  ;;  %v74_v60 = vld [vmem:[%s10139_s1 + $0x8] sm:$0xff]  ;;  %v76_v61 = vld [vmem:[%s10139_s1 + $0x18] sm:$0xff]  ;;  %v73_v62 = vld [vmem:[%s10139_s1] sm:$0xff] }
  0x16   :  { %260 = vmatprep.subr.mxu0 %v94_v40  ;;  %421 = vmatprep.subr.mxu1 %v96_v41  ;;  %v75_v63 = vld [vmem:[%s10139_s1 + $0x10] sm:$0xff]  ;;  %v166_v0 = vld [vmem:[%s10139_s1 + $0x2e8] sm:$0xff]  ;;  %v168_v1 = vld [vmem:[%s10139_s1 + $0x2f8] sm:$0xff] }
  0x17   :  { %261 = vmatpush1.msra.mxu0 %v93_v42  ;;  %422 = vmatpush1.msra.mxu1 %v95_v43  ;;  %v165_v2 = vld [vmem:[%s10139_s1 + $0x2e0] sm:$0xff]  ;;  %v167_v3 = vld [vmem:[%s10139_s1 + $0x2f0] sm:$0xff]  ;;  %v162_v4 = vld [vmem:[%s10139_s1 + $0x2c8] sm:$0xff] }
  0x18   :  { %262 = vmatprep.subr.mxu0 %v90_v44  ;;  %423 = vmatprep.subr.mxu1 %v92_v45  ;;  %v164_v5 = vld [vmem:[%s10139_s1 + $0x2d8] sm:$0xff]  ;;  %v161_v6 = vld [vmem:[%s10139_s1 + $0x2c0] sm:$0xff]  ;;  %v163_v7 = vld [vmem:[%s10139_s1 + $0x2d0] sm:$0xff] }
  0x19   :  { %263 = vmatpush1.msra.mxu0 %v89_v46  ;;  %424 = vmatpush1.msra.mxu1 %v91_v47  ;;  %v158_v8 = vld [vmem:[%s10139_s1 + $0x2a8] sm:$0xff]  ;;  %v160_v9 = vld [vmem:[%s10139_s1 + $0x2b8] sm:$0xff]  ;;  %v157_v10 = vld [vmem:[%s10139_s1 + $0x2a0] sm:$0xff] }
  0x1a   :  { %264 = vmatprep.subr.mxu0 %v86_v48  ;;  %425 = vmatprep.subr.mxu1 %v88_v49  ;;  %v159_v11 = vld [vmem:[%s10139_s1 + $0x2b0] sm:$0xff]  ;;  %v154_v12 = vld [vmem:[%s10139_s1 + $0x288] sm:$0xff]  ;;  %v156_v13 = vld [vmem:[%s10139_s1 + $0x298] sm:$0xff] }
  0x1b   :  { %265 = vmatpush1.msra.mxu0 %v85_v50  ;;  %426 = vmatpush1.msra.mxu1 %v87_v51  ;;  %v153_v14 = vld [vmem:[%s10139_s1 + $0x280] sm:$0xff]  ;;  %v155_v15 = vld [vmem:[%s10139_s1 + $0x290] sm:$0xff]  ;;  %v150_v16 = vld [vmem:[%s10139_s1 + $0x268] sm:$0xff] }
  0x1c   :  { %266 = vmatprep.subr.mxu0 %v82_v52  ;;  %427 = vmatprep.subr.mxu1 %v84_v53  ;;  %v152_v17 = vld [vmem:[%s10139_s1 + $0x278] sm:$0xff]  ;;  %v149_v18 = vld [vmem:[%s10139_s1 + $0x260] sm:$0xff]  ;;  %v151_v19 = vld [vmem:[%s10139_s1 + $0x270] sm:$0xff] }
  0x1d   :  { %267 = vmatpush1.msra.mxu0 %v81_v54  ;;  %428 = vmatpush1.msra.mxu1 %v83_v55  ;;  %v146_v20 = vld [vmem:[%s10139_s1 + $0x248] sm:$0xff]  ;;  %v148_v21 = vld [vmem:[%s10139_s1 + $0x258] sm:$0xff]  ;;  %v145_v22 = vld [vmem:[%s10139_s1 + $0x240] sm:$0xff] }
  0x1e   :  { %268 = vmatprep.subr.mxu0 %v78_v56  ;;  %429 = vmatprep.subr.mxu1 %v80_v57  ;;  %v147_v23 = vld [vmem:[%s10139_s1 + $0x250] sm:$0xff]  ;;  %v142_v24 = vld [vmem:[%s10139_s1 + $0x228] sm:$0xff]  ;;  %v144_v25 = vld [vmem:[%s10139_s1 + $0x238] sm:$0xff] }
  0x1f   :  { %269 = vmatpush1.msra.mxu0 %v77_v58  ;;  %430 = vmatpush1.msra.mxu1 %v79_v59  ;;  %v141_v26 = vld [vmem:[%s10139_s1 + $0x220] sm:$0xff]  ;;  %v143_v27 = vld [vmem:[%s10139_s1 + $0x230] sm:$0xff]  ;;  %v138_v28 = vld [vmem:[%s10139_s1 + $0x208] sm:$0xff] }
  0x20   :  { %270 = vmatprep.subr.mxu0 %v74_v60  ;;  %431 = vmatprep.subr.mxu1 %v76_v61  ;;  %v140_v29 = vld [vmem:[%s10139_s1 + $0x218] sm:$0xff]  ;;  %v137_v30 = vld [vmem:[%s10139_s1 + $0x200] sm:$0xff]  ;;  %v42_v31 = vld [vmem:[%s10140_s0 + $0x8] sm:$0xff] }
  0x21   :  { %271 = vmatpush1.msra.mxu0 %v73_v62  ;;  %432 = vmatpush1.msra.mxu1 %v75_v63  ;;  %v139_v32 = vld [vmem:[%s10139_s1 + $0x210] sm:$0xff]  ;;  %v41_v33 = vld [vmem:[%s10140_s0] sm:$0xff]  ;;  %v6410_v34 = vld [vmem:[%s10141_s3 + $0x1e8] sm:$0xff] }
  0x22   :  { %288 = vmatprep.subr.mxu0 %v166_v0  ;;  %449 = vmatprep.subr.mxu1 %v168_v1  ;;  %v44_v35 = vld [vmem:[%s10140_s0 + $0x18] sm:$0xff]  ;;  %v6419_v36 = vld [vmem:[%s10141_s3 + $0x1e0] sm:$0xff]  ;;  %v6424_v37 = vld [vmem:[%s10141_s3 + $0x1c8] sm:$0xff] }
  0x23   :  { %289 = vmatpush2.msra.mxu0 %v165_v2  ;;  %450 = vmatpush2.msra.mxu1 %v167_v3  ;;  %v6429_v38 = vld [vmem:[%s10141_s3 + $0x1f8] sm:$0xff]  ;;  %v43_v39 = vld [vmem:[%s10140_s0 + $0x10] sm:$0xff]  ;;  %v6441_v40 = vld [vmem:[%s10141_s3 + $0x1c0] sm:$0xff] }
  0x24   :  { %290 = vmatprep.subr.mxu0 %v162_v4  ;;  %451 = vmatprep.subr.mxu1 %v164_v5  ;;  %v46_v41 = vld [vmem:[%s10140_s0 + $0x28] sm:$0xff]  ;;  %v6456_v43 = vld [vmem:[%s10141_s3 + $0x1a0] sm:$0xff]  ;;  %v6461_v44 = vld [vmem:[%s10141_s3 + $0x1f0] sm:$0xff] }
  0x25   :  { %291 = vmatpush2.msra.mxu0 %v161_v6  ;;  %452 = vmatpush2.msra.mxu1 %v163_v7  ;;  %v6450_v42 = vld [vmem:[%s10141_s3 + $0x1a8] sm:$0xff]  ;;  %v45_v45 = vld [vmem:[%s10140_s0 + $0x20] sm:$0xff]  ;;  %v48_v46 = vld [vmem:[%s10140_s0 + $0x38] sm:$0xff] }
  0x26   :  { %292 = vmatprep.subr.mxu0 %v158_v8  ;;  %453 = vmatprep.subr.mxu1 %v160_v9  ;;  %v6477_v47 = vld [vmem:[%s10141_s3 + $0x188] sm:$0xff]  ;;  %v6483_v48 = vld [vmem:[%s10141_s3 + $0x1d8] sm:$0xff]  ;;  %v6488_v49 = vld [vmem:[%s10141_s3 + $0x180] sm:$0xff] }
  0x27   :  { %293 = vmatpush2.msra.mxu0 %v157_v10  ;;  %454 = vmatpush2.msra.mxu1 %v159_v11  ;;  %v6493_v50 = vld [vmem:[%s10141_s3 + $0x1d0] sm:$0xff]  ;;  %v50_v52 = vld [vmem:[%s10140_s0 + $0x48] sm:$0xff]  ;;  %v6515_v54 = vld [vmem:[%s10141_s3 + $0x1b8] sm:$0xff] }
  0x28   :  { %294 = vmatprep.subr.mxu0 %v154_v12  ;;  %455 = vmatprep.subr.mxu1 %v156_v13  ;;  %v47_v51 = vld [vmem:[%s10140_s0 + $0x30] sm:$0xff]  ;;  %v6509_v53 = vld [vmem:[%s10141_s3 + $0x168] sm:$0xff]  ;;  %v6520_v55 = vld [vmem:[%s10141_s3 + $0x160] sm:$0xff] }
  0x29   :  { %295 = vmatpush2.msra.mxu0 %v153_v14  ;;  %456 = vmatpush2.msra.mxu1 %v155_v15  ;;  %v6525_v56 = vld [vmem:[%s10141_s3 + $0x1b0] sm:$0xff]  ;;  %v49_v57 = vld [vmem:[%s10140_s0 + $0x40] sm:$0xff]  ;;  %v52_v58 = vld [vmem:[%s10140_s0 + $0x58] sm:$0xff] }
  0x2a   :  { %296 = vmatprep.subr.mxu0 %v150_v16  ;;  %457 = vmatprep.subr.mxu1 %v152_v17  ;;  %v6541_v59 = vld [vmem:[%s10141_s3 + $0x148] sm:$0xff]  ;;  %v6547_v60 = vld [vmem:[%s10141_s3 + $0x198] sm:$0xff]  ;;  %v6552_v61 = vld [vmem:[%s10141_s3 + $0x140] sm:$0xff] }
  0x2b   :  { %297 = vmatpush2.msra.mxu0 %v149_v18  ;;  %458 = vmatpush2.msra.mxu1 %v151_v19  ;;  %v6557_v62 = vld [vmem:[%s10141_s3 + $0x190] sm:$0xff]  ;;  %v54_v0 = vld [vmem:[%s10140_s0 + $0x68] sm:$0xff]  ;;  %v6579_v2 = vld [vmem:[%s10141_s3 + $0x178] sm:$0xff] }
  0x2c   :  { %298 = vmatprep.subr.mxu0 %v146_v20  ;;  %459 = vmatprep.subr.mxu1 %v148_v21  ;;  %v51_v63 = vld [vmem:[%s10140_s0 + $0x50] sm:$0xff]  ;;  %v6573_v1 = vld [vmem:[%s10141_s3 + $0x128] sm:$0xff]  ;;  %v6584_v3 = vld [vmem:[%s10141_s3 + $0x120] sm:$0xff] }
  0x2d   :  { %299 = vmatpush2.msra.mxu0 %v145_v22  ;;  %460 = vmatpush2.msra.mxu1 %v147_v23  ;;  %v6589_v4 = vld [vmem:[%s10141_s3 + $0x170] sm:$0xff]  ;;  %v53_v5 = vld [vmem:[%s10140_s0 + $0x60] sm:$0xff]  ;;  %v56_v6 = vld [vmem:[%s10140_s0 + $0x78] sm:$0xff] }
  0x2e   :  { %300 = vmatprep.subr.mxu0 %v142_v24  ;;  %461 = vmatprep.subr.mxu1 %v144_v25  ;;  %v6605_v7 = vld [vmem:[%s10141_s3 + $0x108] sm:$0xff]  ;;  %v6611_v8 = vld [vmem:[%s10141_s3 + $0x158] sm:$0xff]  ;;  %v6616_v9 = vld [vmem:[%s10141_s3 + $0x100] sm:$0xff] }
  0x2f   :  { %301 = vmatpush2.msra.mxu0 %v141_v26  ;;  %462 = vmatpush2.msra.mxu1 %v143_v27  ;;  %v6621_v10 = vld [vmem:[%s10141_s3 + $0x150] sm:$0xff]  ;;  %v58_v12 = vld [vmem:[%s10140_s0 + $0x88] sm:$0xff]  ;;  %v6643_v14 = vld [vmem:[%s10141_s3 + $0x138] sm:$0xff] }
  0x30   :  { %302 = vmatprep.subr.mxu0 %v138_v28  ;;  %463 = vmatprep.subr.mxu1 %v140_v29  ;;  %v55_v11 = vld [vmem:[%s10140_s0 + $0x70] sm:$0xff]  ;;  %v6637_v13 = vld [vmem:[%s10141_s3 + $0xe8] sm:$0xff]  ;;  %v6648_v15 = vld [vmem:[%s10141_s3 + $0xe0] sm:$0xff] }
  0x31   :  { %303 = vmatpush2.msra.mxu0 %v137_v30  ;;  %5152 = vmatprep.mubr.msk.f32.mxu0 %vm191_vm0, %v42_v31  ;;  %v6653_v16 = vld [vmem:[%s10141_s3 + $0x130] sm:$0xff]  ;;  %v57_v17 = vld [vmem:[%s10140_s0 + $0x80] sm:$0xff]  ;;  %v60_v18 = vld [vmem:[%s10140_s0 + $0x98] sm:$0xff] }
  0x32   :  { %464 = vmatpush2.msra.mxu1 %v139_v32  ;;  %5168 = vmatprep.mubr.msk.f32.mxu1 %vm191_vm0, %v42_v31  ;;  %v6669_v19 = vld [vmem:[%s10141_s3 + $0xc8] sm:$0xff]  ;;  %v6675_v20 = vld [vmem:[%s10141_s3 + $0x118] sm:$0xff]  ;;  %v6680_v21 = vld [vmem:[%s10141_s3 + $0xc0] sm:$0xff] }
  0x33   :  { %305 = vmatmul.mubr.f32.vlgmr.msra.gmra.mxu0 %v41_v33  ;;  %466 = vmatmul.mubr.f32.vlgmr.msra.gmra.mxu1 %v41_v33  ;;  %v6685_v22 = vld [vmem:[%s10141_s3 + $0x110] sm:$0xff]  ;;  %v62_v24 = vld [vmem:[%s10140_s0 + $0xa8] sm:$0xff]  ;;  %v6707_v26 = vld [vmem:[%s10141_s3 + $0xf8] sm:$0xff] }
  0x34   :  { %741 = vmatprep.subr.mxu0 %v6410_v34  ;;  %5153 = vmatprep.mubr.msk.f32.mxu0 %vm191_vm0, %v44_v35  ;;  %v59_v23 = vld [vmem:[%s10140_s0 + $0x90] sm:$0xff]  ;;  %v6701_v25 = vld [vmem:[%s10141_s3 + $0xa8] sm:$0xff]  ;;  %v6712_v27 = vld [vmem:[%s10141_s3 + $0xa0] sm:$0xff] }
  0x35   :  { %742 = vmatpush1.msra.mxu0 %v6419_v36  ;;  %5169 = vmatprep.mubr.msk.f32.mxu1 %vm191_vm0, %v44_v35  ;;  %v6717_v28 = vld [vmem:[%s10141_s3 + $0xf0] sm:$0xff]  ;;  %v61_v29 = vld [vmem:[%s10140_s0 + $0xa0] sm:$0xff]  ;;  %v64_v30 = vld [vmem:[%s10140_s0 + $0xb8] sm:$0xff] }
  0x36   :  { %743 = vmatprep.subr.mxu0 %v6424_v37  ;;  %812 = vmatprep.subr.mxu1 %v6429_v38  ;;  %v6733_v31 = vld [vmem:[%s10141_s3 + $0x88] sm:$0xff]  ;;  %v6739_v32 = vld [vmem:[%s10141_s3 + $0xd8] sm:$0xff]  ;;  %v6744_v33 = vld [vmem:[%s10141_s3 + $0x80] sm:$0xff] }
  0x37   :  { %311 = vmatmul.mubr.f32.gmra.mxu0 %v43_v39  ;;  %472 = vmatmul.mubr.f32.gmra.mxu1 %v43_v39  ;;  %10330 = vst [vmem:[#allocation3_spill] sm:$0xff] %v6733_v31  ;;  %10331 = vst [vmem:[#allocation4_spill] sm:$0xff] %v6744_v33  ;;  %v6749_v35 = vld [vmem:[%s10141_s3 + $0xd0] sm:$0xff] }
  0x38   :  { %744 = vmatpush1.msra.mxu0 %v6441_v40  ;;  %5154 = vmatprep.mubr.msk.f32.mxu0 %vm191_vm0, %v46_v41  ;;  %v63_v39 = vld [vmem:[%s10140_s0 + $0xb0] sm:$0xff] }
  0x39   :  { %5170 = vmatprep.mubr.msk.f32.mxu1 %vm191_vm0, %v46_v41  ;;  %745 = vmatprep.subr.mxu0 %v6450_v42  ;;  %v66_v41 = vld [vmem:[%s10140_s0 + $0xc8] sm:$0xff] }
  0x3a   :  { %746 = vmatpush1.msra.mxu0 %v6456_v43  ;;  %813 = vmatpush1.msra.mxu1 %v6461_v44 }
  0x3b   :  { %317 = vmatmul.mubr.f32.gmra.mxu0 %v45_v45  ;;  %478 = vmatmul.mubr.f32.gmra.mxu1 %v45_v45  ;;  %v6765_v45 = vld [vmem:[%s10141_s3 + $0x68] sm:$0xff] }
  0x3c   :  { %5155 = vmatprep.mubr.msk.f32.mxu0 %vm191_vm0, %v48_v46  ;;  %5171 = vmatprep.mubr.msk.f32.mxu1 %vm191_vm0, %v48_v46  ;;  %10332 = vst [vmem:[#allocation5_spill] sm:$0xff] %v6765_v45  ;;  %v6771_v46 = vld [vmem:[%s10141_s3 + $0xb8] sm:$0xff] }
  0x3d   :  { %747 = vmatprep.subr.mxu0 %v6477_v47  ;;  %814 = vmatprep.subr.mxu1 %v6483_v48 }
  0x3e   :  { %748 = vmatpush1.msra.mxu0 %v6488_v49  ;;  %815 = vmatpush1.msra.mxu1 %v6493_v50 }
  0x3f   :  { %323 = vmatmul.mubr.f32.gmra.mxu0 %v47_v51  ;;  %484 = vmatmul.mubr.f32.gmra.mxu1 %v47_v51  ;;  %v6776_v51 = vld [vmem:[%s10141_s3 + $0x60] sm:$0xff] }
  0x40   :  { %5156 = vmatprep.mubr.msk.f32.mxu0 %vm191_vm0, %v50_v52  ;;  %5172 = vmatprep.mubr.msk.f32.mxu1 %vm191_vm0, %v50_v52  ;;  %10333 = vst [vmem:[#allocation6_spill] sm:$0xff] %v6776_v51  ;;  %v6781_v52 = vld [vmem:[%s10141_s3 + $0xb0] sm:$0xff] }
  0x41   :  { %749 = vmatprep.subr.mxu0 %v6509_v53  ;;  %816 = vmatprep.subr.mxu1 %v6515_v54 }
  0x42   :  { %750 = vmatpush1.msra.mxu0 %v6520_v55  ;;  %817 = vmatpush1.msra.mxu1 %v6525_v56 }
  0x43   :  { %329 = vmatmul.mubr.f32.gmra.mxu0 %v49_v57  ;;  %490 = vmatmul.mubr.f32.gmra.mxu1 %v49_v57  ;;  %v65_v57 = vld [vmem:[%s10140_s0 + $0xc0] sm:$0xff] }
  0x44   :  { %5157 = vmatprep.mubr.msk.f32.mxu0 %vm191_vm0, %v52_v58  ;;  %5173 = vmatprep.mubr.msk.f32.mxu1 %vm191_vm0, %v52_v58  ;;  %v68_v58 = vld [vmem:[%s10140_s0 + $0xd8] sm:$0xff] }
  0x45   :  { %751 = vmatprep.subr.mxu0 %v6541_v59  ;;  %818 = vmatprep.subr.mxu1 %v6547_v60 }
  0x46   :  { %752 = vmatpush1.msra.mxu0 %v6552_v61  ;;  %819 = vmatpush1.msra.mxu1 %v6557_v62 }
  0x47   :  { %335 = vmatmul.mubr.f32.gmra.mxu0 %v51_v63  ;;  %496 = vmatmul.mubr.f32.gmra.mxu1 %v51_v63  ;;  %v6797_v63 = vld [vmem:[%s10141_s3 + $0x48] sm:$0xff] }
  0x48   :  { %5158 = vmatprep.mubr.msk.f32.mxu0 %vm191_vm0, %v54_v0  ;;  %5174 = vmatprep.mubr.msk.f32.mxu1 %vm191_vm0, %v54_v0  ;;  %10334 = vst [vmem:[#allocation7_spill] sm:$0xff] %v6797_v63  ;;  %v6803_v0 = vld [vmem:[%s10141_s3 + $0x98] sm:$0xff] }
  0x49   :  { %753 = vmatprep.subr.mxu0 %v6573_v1  ;;  %820 = vmatprep.subr.mxu1 %v6579_v2  ;;  %10335 = vst [vmem:[#allocation8_spill] sm:$0xff] %v6803_v0 }
  0x4a   :  { %754 = vmatpush1.msra.mxu0 %v6584_v3  ;;  %821 = vmatpush1.msra.mxu1 %v6589_v4 }
  0x4b   :  { %341 = vmatmul.mubr.f32.gmra.mxu0 %v53_v5  ;;  %502 = vmatmul.mubr.f32.gmra.mxu1 %v53_v5  ;;  %v6808_v5 = vld [vmem:[%s10141_s3 + $0x40] sm:$0xff] }
  0x4c   :  { %5159 = vmatprep.mubr.msk.f32.mxu0 %vm191_vm0, %v56_v6  ;;  %5175 = vmatprep.mubr.msk.f32.mxu1 %vm191_vm0, %v56_v6  ;;  %10336 = vst [vmem:[#allocation9_spill] sm:$0xff] %v6808_v5  ;;  %v6813_v6 = vld [vmem:[%s10141_s3 + $0x90] sm:$0xff] }
  0x4d   :  { %755 = vmatprep.subr.mxu0 %v6605_v7  ;;  %822 = vmatprep.subr.mxu1 %v6611_v8  ;;  %10337 = vst [vmem:[#allocation10_spill] sm:$0xff] %v6813_v6 }
  0x4e   :  { %756 = vmatpush1.msra.mxu0 %v6616_v9  ;;  %823 = vmatpush1.msra.mxu1 %v6621_v10 }
  0x4f   :  { %347 = vmatmul.mubr.f32.gmra.mxu0 %v55_v11  ;;  %508 = vmatmul.mubr.f32.gmra.mxu1 %v55_v11  ;;  %v67_v11 = vld [vmem:[%s10140_s0 + $0xd0] sm:$0xff] }
  0x50   :  { %5160 = vmatprep.mubr.msk.f32.mxu0 %vm191_vm0, %v58_v12  ;;  %5176 = vmatprep.mubr.msk.f32.mxu1 %vm191_vm0, %v58_v12  ;;  %v70_v12 = vld [vmem:[%s10140_s0 + $0xe8] sm:$0xff] }
  0x51   :  { %757 = vmatprep.subr.mxu0 %v6637_v13  ;;  %824 = vmatprep.subr.mxu1 %v6643_v14 }
  0x52   :  { %758 = vmatpush1.msra.mxu0 %v6648_v15  ;;  %825 = vmatpush1.msra.mxu1 %v6653_v16 }
  0x53   :  { %353 = vmatmul.mubr.f32.gmra.mxu0 %v57_v17  ;;  %514 = vmatmul.mubr.f32.gmra.mxu1 %v57_v17  ;;  %v6830_v17 = vld [vmem:[%s10141_s3 + $0x28] sm:$0xff] }
  0x54   :  { %5161 = vmatprep.mubr.msk.f32.mxu0 %vm191_vm0, %v60_v18  ;;  %5177 = vmatprep.mubr.msk.f32.mxu1 %vm191_vm0, %v60_v18  ;;  %10338 = vst [vmem:[#allocation11_spill] sm:$0xff] %v6830_v17  ;;  %v6835_v18 = vld [vmem:[%s10141_s3 + $0x78] sm:$0xff] }
  0x55   :  { %759 = vmatprep.subr.mxu0 %v6669_v19  ;;  %826 = vmatprep.subr.mxu1 %v6675_v20  ;;  %10339 = vst [vmem:[#allocation12_spill] sm:$0xff] %v6835_v18 }
  0x56   :  { %760 = vmatpush1.msra.mxu0 %v6680_v21  ;;  %827 = vmatpush1.msra.mxu1 %v6685_v22 }
  0x57   :  { %359 = vmatmul.mubr.f32.gmra.mxu0 %v59_v23  ;;  %520 = vmatmul.mubr.f32.gmra.mxu1 %v59_v23  ;;  %v6840_v23 = vld [vmem:[%s10141_s3 + $0x20] sm:$0xff] }
  0x58   :  { %5162 = vmatprep.mubr.msk.f32.mxu0 %vm191_vm0, %v62_v24  ;;  %5178 = vmatprep.mubr.msk.f32.mxu1 %vm191_vm0, %v62_v24  ;;  %10340 = vst [vmem:[#allocation13_spill] sm:$0xff] %v6840_v23  ;;  %v6845_v24 = vld [vmem:[%s10141_s3 + $0x70] sm:$0xff] }
  0x59   :  { %761 = vmatprep.subr.mxu0 %v6701_v25  ;;  %828 = vmatprep.subr.mxu1 %v6707_v26  ;;  %10341 = vst [vmem:[#allocation14_spill] sm:$0xff] %v6845_v24 }
  0x5a   :  { %762 = vmatpush1.msra.mxu0 %v6712_v27  ;;  %829 = vmatpush1.msra.mxu1 %v6717_v28 }
  0x5b   :  { %365 = vmatmul.mubr.f32.gmra.mxu0 %v61_v29  ;;  %526 = vmatmul.mubr.f32.gmra.mxu1 %v61_v29  ;;  %v69_v29 = vld [vmem:[%s10140_s0 + $0xe0] sm:$0xff] }
  0x5c   :  { %5163 = vmatprep.mubr.msk.f32.mxu0 %vm191_vm0, %v64_v30  ;;  %5179 = vmatprep.mubr.msk.f32.mxu1 %vm191_vm0, %v64_v30  ;;  %v6857_v30 = vld [vmem:[%s10141_s3 + $0x58] sm:$0xff] }
  0x5d   :  { %763 = vmatprep.subr.mxu0 %v6733_v31  ;;  %830 = vmatprep.subr.mxu1 %v6739_v32  ;;  %10342 = vst [vmem:[#allocation15_spill] sm:$0xff] %v6857_v30 }
  0x5e   :  { %764 = vmatpush1.msra.mxu0 %v6744_v33  ;;  %831 = vmatpush1.msra.mxu1 %v6749_v35 }
  0x5f   :  { %371 = vmatmul.mubr.f32.gmra.mxu0 %v63_v39  ;;  %532 = vmatmul.mubr.f32.gmra.mxu1 %v63_v39  ;;  %v72_v39 = vld [vmem:[%s10140_s0 + $0xf8] sm:$0xff] }
  0x60   :  { %5164 = vmatprep.mubr.msk.f32.mxu0 %vm191_vm0, %v66_v41  ;;  %5180 = vmatprep.mubr.msk.f32.mxu1 %vm191_vm0, %v66_v41  ;;  %v6867_v41 = vld [vmem:[%s10141_s3 + $0x50] sm:$0xff] }
  0x61   :  { %765 = vmatprep.subr.mxu0 %v6765_v45  ;;  %832 = vmatprep.subr.mxu1 %v6771_v46  ;;  %10343 = vst [vmem:[#allocation16_spill] sm:$0xff] %v6867_v41 }
  0x62   :  { %766 = vmatpush1.msra.mxu0 %v6776_v51  ;;  %833 = vmatpush1.msra.mxu1 %v6781_v52 }
  0x63   :  { %377 = vmatmul.mubr.f32.gmra.mxu0 %v65_v57  ;;  %538 = vmatmul.mubr.f32.gmra.mxu1 %v65_v57  ;;  %v6872_v57 = vld [vmem:[%s10141_s3 + $0x8] sm:$0xff] }
  0x64   :  { %5165 = vmatprep.mubr.msk.f32.mxu0 %vm191_vm0, %v68_v58  ;;  %5181 = vmatprep.mubr.msk.f32.mxu1 %vm191_vm0, %v68_v58  ;;  %10344 = vst [vmem:[#allocation17_spill] sm:$0xff] %v6872_v57  ;;  %v6877_v58 = vld [vmem:[%s10141_s3 + $0x38] sm:$0xff] }
  0x65   :  { %767 = vmatprep.subr.mxu0 %v6797_v63  ;;  %834 = vmatprep.subr.mxu1 %v6803_v0  ;;  %10345 = vst [vmem:[#allocation18_spill] sm:$0xff] %v6877_v58 }
  0x66   :  { %768 = vmatpush1.msra.mxu0 %v6808_v5  ;;  %835 = vmatpush1.msra.mxu1 %v6813_v6 }
  0x67   :  { %383 = vmatmul.mubr.f32.gmra.mxu0 %v67_v11  ;;  %544 = vmatmul.mubr.f32.gmra.mxu1 %v67_v11  ;;  %v71_v11 = vld [vmem:[%s10140_s0 + $0xf0] sm:$0xff] }
  0x68   :  { %5166 = vmatprep.mubr.msk.f32.mxu0 %vm191_vm0, %v70_v12  ;;  %5182 = vmatprep.mubr.msk.f32.mxu1 %vm191_vm0, %v70_v12  ;;  %v6889_v12 = vld [vmem:[%s10141_s3] sm:$0xff] }
  0x69   :  { %769 = vmatprep.subr.mxu0 %v6830_v17  ;;  %836 = vmatprep.subr.mxu1 %v6835_v18  ;;  %10346 = vst [vmem:[#allocation19_spill] sm:$0xff] %v6889_v12 }
  0x6a   :  { %770 = vmatpush1.msra.mxu0 %v6840_v23  ;;  %837 = vmatpush1.msra.mxu1 %v6845_v24  ;;  %v6906_v23 = vld [vmem:[%s10141_s3 + $0x10] sm:$0xff] }
  0x6b   :  { %389 = vmatmul.mubr.f32.gmra.mxu0 %v69_v29  ;;  %550 = vmatmul.mubr.f32.gmra.mxu1 %v69_v29  ;;  %v6894_v29 = vld [vmem:[%s10141_s3 + $0x30] sm:$0xff]  ;;  %10349 = vst [vmem:[#allocation22_spill] sm:$0xff] %v6906_v23 }
  0x6c   :  { %838 = vmatprep.subr.mxu1 %v6857_v30  ;;  %5167 = vmatprep.mubr.msk.f32.mxu0 %vm191_vm0, %v72_v39  ;;  %10347 = vst [vmem:[#allocation20_spill] sm:$0xff] %v6894_v29 }
  0x6d   :  { %5183 = vmatprep.mubr.msk.f32.mxu1 %vm191_vm0, %v72_v39  ;;  %839 = vmatpush1.msra.mxu1 %v6867_v41  ;;  %v6901_v39 = vld [vmem:[%s10141_s3 + $0x18] sm:$0xff] }
  0x6e   :  { %771 = vmatprep.subr.mxu0 %v6872_v57  ;;  %840 = vmatprep.subr.mxu1 %v6877_v58  ;;  %10348 = vst [vmem:[#allocation21_spill] sm:$0xff] %v6901_v39  ;;  %v10156_v57 = vmov 0.0  }
  0x6f   :  { %395 = vmatmul.mubr.f32.gmra.mxu0 %v71_v11  ;;  %556 = vmatmul.mubr.f32.gmra.mxu1 %v71_v11  ;;  %v10350_v11 = vld [vmem:[#allocation13_spill] sm:$0xff] }
  0x70   :  { %772 = vmatpush1.msra.mxu0 %v6889_v12  ;;  %841 = vmatpush1.msra.mxu1 %v6894_v29 }
  0x71   :  { %842 = vmatprep.subr.mxu1 %v6901_v39  ;;  %805 = vmatprep.mubr.f32.mxu0 %v10156_v57 }
  0x72   :  { %843 = vmatpush1.msra.mxu1 %v6906_v23  ;;  %876 = vmatprep.mubr.f32.mxu1 %v10156_v57 }
  0x73   :  { %806 = vmatmul.mubr.f32.vlgmr.msra.gmra.mxu0 %v10156_v57  ;;  %877 = vmatmul.mubr.f32.vlgmr.msra.gmra.mxu1 %v10156_v57  ;;  %v10351_v57 = vld [vmem:[#allocation17_spill] sm:$0xff] }
  0x74   :  { %918 = vmatprep.subr.mxu0 %v6410_v34  ;;  %989 = vmatprep.subr.mxu1 %v6429_v38 }
  0x75   :  { %919 = vmatpush1.msra.mxu0 %v6419_v36  ;;  %990 = vmatpush1.msra.mxu1 %v6461_v44 }
  0x76   :  { %920 = vmatprep.subr.mxu0 %v6424_v37  ;;  %991 = vmatprep.subr.mxu1 %v6483_v48 }
  0x77   :  { %921 = vmatpush1.msra.mxu0 %v6441_v40  ;;  %992 = vmatpush1.msra.mxu1 %v6493_v50 }
  0x78   :  { %922 = vmatprep.subr.mxu0 %v6450_v42  ;;  %993 = vmatprep.subr.mxu1 %v6515_v54 }
  0x79   :  { %923 = vmatpush1.msra.mxu0 %v6456_v43  ;;  %994 = vmatpush1.msra.mxu1 %v6525_v56 }
  0x7a   :  { %924 = vmatprep.subr.mxu0 %v6477_v47  ;;  %995 = vmatprep.subr.mxu1 %v6547_v60 }
  0x7b   :  { %925 = vmatpush1.msra.mxu0 %v6488_v49  ;;  %996 = vmatpush1.msra.mxu1 %v6557_v62 }
  0x7c   :  { %926 = vmatprep.subr.mxu0 %v6509_v53  ;;  %997 = vmatprep.subr.mxu1 %v6579_v2 }
  0x7d   :  { %927 = vmatpush1.msra.mxu0 %v6520_v55  ;;  %998 = vmatpush1.msra.mxu1 %v6589_v4 }
  0x7e   :  { %928 = vmatprep.subr.mxu0 %v6541_v59  ;;  %999 = vmatprep.subr.mxu1 %v6611_v8 }
  0x7f   :  { %929 = vmatpush1.msra.mxu0 %v6552_v61  ;;  %1000 = vmatpush1.msra.mxu1 %v6621_v10 }
  0x80   :  { %930 = vmatprep.subr.mxu0 %v6573_v1  ;;  %1001 = vmatprep.subr.mxu1 %v6643_v14 }
  0x81   :  { %931 = vmatpush1.msra.mxu0 %v6584_v3  ;;  %1002 = vmatpush1.msra.mxu1 %v6653_v16 }
  0x82   :  { %932 = vmatprep.subr.mxu0 %v6605_v7  ;;  %1003 = vmatprep.subr.mxu1 %v6675_v20 }
  0x83   :  { %933 = vmatpush1.msra.mxu0 %v6616_v9  ;;  %1004 = vmatpush1.msra.mxu1 %v6685_v22 }
  0x84   :  { %934 = vmatprep.subr.mxu0 %v6637_v13  ;;  %1005 = vmatprep.subr.mxu1 %v6707_v26 }
  0x85   :  { %935 = vmatpush1.msra.mxu0 %v6648_v15  ;;  %1006 = vmatpush1.msra.mxu1 %v6717_v28 }
  0x86   :  { %936 = vmatprep.subr.mxu0 %v6669_v19  ;;  %1007 = vmatprep.subr.mxu1 %v6739_v32 }
  0x87   :  { %937 = vmatpush1.msra.mxu0 %v6680_v21  ;;  %1008 = vmatpush1.msra.mxu1 %v6749_v35 }
  0x88   :  { %938 = vmatprep.subr.mxu0 %v6701_v25  ;;  %1009 = vmatprep.subr.mxu1 %v6771_v46 }
  0x89   :  { %939 = vmatpush1.msra.mxu0 %v6712_v27  ;;  %1010 = vmatpush1.msra.mxu1 %v6781_v52 }
  0x8a   :  { %940 = vmatprep.subr.mxu0 %v6733_v31  ;;  %1011 = vmatprep.subr.mxu1 %v6803_v0 }
  0x8b   :  { %941 = vmatpush1.msra.mxu0 %v6744_v33  ;;  %1012 = vmatpush1.msra.mxu1 %v6813_v6 }
  0x8c   :  { %942 = vmatprep.subr.mxu0 %v6765_v45  ;;  %1013 = vmatprep.subr.mxu1 %v6835_v18 }
  0x8d   :  { %943 = vmatpush1.msra.mxu0 %v6776_v51  ;;  %1014 = vmatpush1.msra.mxu1 %v6845_v24 }
  0x8e   :  { %944 = vmatprep.subr.mxu0 %v6797_v63  ;;  %1015 = vmatprep.subr.mxu1 %v6857_v30  ;;  %v10352_v63 = vmov 0.0  }
  0x8f   :  { %945 = vmatpush1.msra.mxu0 %v6808_v5  ;;  %1016 = vmatpush1.msra.mxu1 %v6867_v41 }
  0x90   :  { %946 = vmatprep.subr.mxu0 %v6830_v17  ;;  %1017 = vmatprep.subr.mxu1 %v6877_v58  ;;  %v10177_v58 = vlaneseq }
  0x91   :  { %947 = vmatpush1.msra.mxu0 %v10350_v11  ;;  %1018 = vmatpush1.msra.mxu1 %v6894_v29 }
  0x92   :  { %948 = vmatprep.subr.mxu0 %v10351_v57  ;;  %1019 = vmatprep.subr.mxu1 %v6901_v39  ;;  %v172_v11 = vshrl.u32 %v10177_v58, 7  ;;  %v169_v39 = vld [vmem:[%s10142_s2] sm:$0xf] }
  0x93   :  { %949 = vmatpush1.msra.mxu0 %v6889_v12  ;;  %982 = vmatprep.mubr.f32.mxu0 %v10352_v63 }
  0x94   :  { %1020 = vmatpush1.msra.mxu1 %v6906_v23  ;;  %1053 = vmatprep.mubr.f32.mxu1 %v10352_v63  ;;  %v173_v29 = vsub.s32 0, %v172_v11  ;;  %v181_v17 = vsub.s32 2, %v172_v11  ;;  %v177_v23 = vsub.s32 1, %v172_v11  ;;  %v185_v41 = vsub.s32 3, %v172_v11 }
  0x95   :  { %1095 = vmatprep.subr.mxu0 %v6410_v34  ;;  %1166 = vmatprep.subr.mxu1 %v6429_v38 }
  0x96   :  { %v6996_v38 = vrot.slane %v169_v39, %v173_v29  ;;  %v6998_v5 = vrot.slane %v169_v39, %v181_v17  ;;  %v7000_v24 = vrot.slane %v169_v39, %v177_v23  ;;  %v7002_v51 = vrot.slane %v169_v39, %v185_v41 }
  0xf3   :  { %v6988_v12 = vpop.f32.mrf.mxu0  ;;  %v6990_v57 = vpop.f32.mrf.mxu1 }
  0xf5   :  { %v6992_v63 = vpop.f32.mrf.mxu0  ;;  %v6994_v34 = vpop.f32.mrf.mxu1 }
  0xf7   :  { %v312_v58 = vpop.f32.mrf.mxu0  ;;  %v473_v30 = vpop.f32.mrf.mxu1 }
  0xf8   :  { %v7005_v18 = vadd.f32 %v312_v58, %v6996_v38  ;;  %v7008_v45 = vadd.f32 %v473_v30, %v6998_v5 }
  0xf9   :  { %v314_v11 = vpop.f32.mrf.mxu0  ;;  %v475_v6 = vpop.f32.mrf.mxu1 }
  0xfa   :  { %10353 = vst [vmem:[#allocation23_spill] sm:$0xff] %v7005_v18  ;;  %10354 = vst [vmem:[#allocation24_spill] sm:$0xff] %v7008_v45  ;;  %v7011_v33 = vadd.f32 %v314_v11, %v7000_v24  ;;  %v7014_v17 = vadd.f32 %v475_v6, %v7002_v51 }
  0xfb   :  { %v318_v29 = vpop.f32.mrf.mxu0  ;;  %v479_v0 = vpop.f32.mrf.mxu1 }
  0xfc   :  { %10355 = vst [vmem:[#allocation25_spill] sm:$0xff] %v7011_v33  ;;  %10356 = vst [vmem:[#allocation26_spill] sm:$0xff] %v7014_v17  ;;  %v7017_v23 = vadd.f32 %v318_v29, %v6996_v38  ;;  %v7020_v41 = vadd.f32 %v479_v0, %v6998_v5 }
  0xfd   :  { %v320_v58 = vpop.f32.mrf.mxu0  ;;  %v481_v39 = vpop.f32.mrf.mxu1 }
  0xfe   :  { %10357 = vst [vmem:[#allocation27_spill] sm:$0xff] %v7017_v23  ;;  %10358 = vst [vmem:[#allocation28_spill] sm:$0xff] %v7020_v41  ;;  %v7023_v30 = vadd.f32 %v320_v58, %v7000_v24  ;;  %v7026_v45 = vadd.f32 %v481_v39, %v7002_v51 }
  0xff   :  { %v324_v11 = vpop.f32.mrf.mxu0  ;;  %v485_v33 = vpop.f32.mrf.mxu1 }
 0x100   :  { %10359 = vst [vmem:[#allocation29_spill] sm:$0xff] %v7023_v30  ;;  %10360 = vst [vmem:[#allocation30_spill] sm:$0xff] %v7026_v45  ;;  %v7029_v6 = vadd.f32 %v324_v11, %v6996_v38  ;;  %v7032_v17 = vadd.f32 %v485_v33, %v6998_v5 }
 0x101   :  { %v326_v29 = vpop.f32.mrf.mxu0  ;;  %v487_v23 = vpop.f32.mrf.mxu1 }
 0x102   :  { %10361 = vst [vmem:[#allocation31_spill] sm:$0xff] %v7029_v6  ;;  %10362 = vst [vmem:[#allocation32_spill] sm:$0xff] %v7032_v17  ;;  %v7035_v0 = vadd.f32 %v326_v29, %v7000_v24  ;;  %v7038_v41 = vadd.f32 %v487_v23, %v7002_v51 }
 0x103   :  { %v330_v58 = vpop.f32.mrf.mxu0  ;;  %v491_v30 = vpop.f32.mrf.mxu1 }
 0x104   :  { %10363 = vst [vmem:[#allocation33_spill] sm:$0xff] %v7035_v0  ;;  %10364 = vst [vmem:[#allocation34_spill] sm:$0xff] %v7038_v41  ;;  %v7041_v39 = vadd.f32 %v330_v58, %v6996_v38  ;;  %v7044_v45 = vadd.f32 %v491_v30, %v6998_v5 }
 0x105   :  { %v332_v11 = vpop.f32.mrf.mxu0  ;;  %v493_v6 = vpop.f32.mrf.mxu1 }
 0x106   :  { %10365 = vst [vmem:[#allocation35_spill] sm:$0xff] %v7041_v39  ;;  %10366 = vst [vmem:[#allocation36_spill] sm:$0xff] %v7044_v45  ;;  %v7047_v33 = vadd.f32 %v332_v11, %v7000_v24  ;;  %v7050_v17 = vadd.f32 %v493_v6, %v7002_v51 }
 0x107   :  { %v336_v29 = vpop.f32.mrf.mxu0  ;;  %v497_v0 = vpop.f32.mrf.mxu1 }
 0x108   :  { %10367 = vst [vmem:[#allocation37_spill] sm:$0xff] %v7047_v33  ;;  %10368 = vst [vmem:[#allocation38_spill] sm:$0xff] %v7050_v17  ;;  %v7053_v23 = vadd.f32 %v336_v29, %v6996_v38  ;;  %v7056_v41 = vadd.f32 %v497_v0, %v6998_v5 }
 0x109   :  { %v338_v58 = vpop.f32.mrf.mxu0  ;;  %v499_v39 = vpop.f32.mrf.mxu1 }
 0x10a   :  { %10369 = vst [vmem:[#allocation39_spill] sm:$0xff] %v7053_v23  ;;  %10370 = vst [vmem:[#allocation40_spill] sm:$0xff] %v7056_v41  ;;  %v7059_v30 = vadd.f32 %v338_v58, %v7000_v24  ;;  %v7062_v45 = vadd.f32 %v499_v39, %v7002_v51 }
 0x10b   :  { %v342_v11 = vpop.f32.mrf.mxu0  ;;  %v503_v33 = vpop.f32.mrf.mxu1 }
 0x10c   :  { %10371 = vst [vmem:[#allocation41_spill] sm:$0xff] %v7059_v30  ;;  %10372 = vst [vmem:[#allocation42_spill] sm:$0xff] %v7062_v45  ;;  %v7065_v6 = vadd.f32 %v342_v11, %v6996_v38  ;;  %v7068_v17 = vadd.f32 %v503_v33, %v6998_v5 }
 0x10d   :  { %v344_v29 = vpop.f32.mrf.mxu0  ;;  %v505_v23 = vpop.f32.mrf.mxu1 }
 0x10e   :  { %10373 = vst [vmem:[#allocation43_spill] sm:$0xff] %v7065_v6  ;;  %10374 = vst [vmem:[#allocation44_spill] sm:$0xff] %v7068_v17  ;;  %v7071_v0 = vadd.f32 %v344_v29, %v7000_v24  ;;  %v7074_v41 = vadd.f32 %v505_v23, %v7002_v51 }
 0x10f   :  { %v348_v58 = vpop.f32.mrf.mxu0  ;;  %v509_v30 = vpop.f32.mrf.mxu1 }
 0x110   :  { %10375 = vst [vmem:[#allocation45_spill] sm:$0xff] %v7071_v0  ;;  %10376 = vst [vmem:[#allocation46_spill] sm:$0xff] %v7074_v41  ;;  %v7077_v39 = vadd.f32 %v348_v58, %v6996_v38  ;;  %v7080_v45 = vadd.f32 %v509_v30, %v6998_v5 }
 0x111   :  { %v350_v11 = vpop.f32.mrf.mxu0  ;;  %v511_v6 = vpop.f32.mrf.mxu1 }
 0x112   :  { %10377 = vst [vmem:[#allocation47_spill] sm:$0xff] %v7077_v39  ;;  %10378 = vst [vmem:[#allocation48_spill] sm:$0xff] %v7080_v45  ;;  %v7083_v33 = vadd.f32 %v350_v11, %v7000_v24  ;;  %v7086_v17 = vadd.f32 %v511_v6, %v7002_v51 }
 0x113   :  { %v354_v29 = vpop.f32.mrf.mxu0  ;;  %v515_v0 = vpop.f32.mrf.mxu1 }
 0x114   :  { %10379 = vst [vmem:[#allocation49_spill] sm:$0xff] %v7083_v33  ;;  %10380 = vst [vmem:[#allocation50_spill] sm:$0xff] %v7086_v17  ;;  %v7089_v23 = vadd.f32 %v354_v29, %v6996_v38  ;;  %v7092_v41 = vadd.f32 %v515_v0, %v6998_v5 }
 0x115   :  { %v356_v58 = vpop.f32.mrf.mxu0  ;;  %v517_v39 = vpop.f32.mrf.mxu1 }
 0x116   :  { %10381 = vst [vmem:[#allocation51_spill] sm:$0xff] %v7089_v23  ;;  %10382 = vst [vmem:[#allocation52_spill] sm:$0xff] %v7092_v41  ;;  %v7095_v30 = vadd.f32 %v356_v58, %v7000_v24  ;;  %v7098_v45 = vadd.f32 %v517_v39, %v7002_v51 }
 0x117   :  { %v360_v11 = vpop.f32.mrf.mxu0  ;;  %v521_v33 = vpop.f32.mrf.mxu1 }
 0x118   :  { %10383 = vst [vmem:[#allocation53_spill] sm:$0xff] %v7095_v30  ;;  %10384 = vst [vmem:[#allocation54_spill] sm:$0xff] %v7098_v45  ;;  %v7101_v6 = vadd.f32 %v360_v11, %v6996_v38  ;;  %v7104_v17 = vadd.f32 %v521_v33, %v6998_v5 }
 0x119   :  { %v362_v29 = vpop.f32.mrf.mxu0  ;;  %v523_v23 = vpop.f32.mrf.mxu1 }
 0x11a   :  { %10385 = vst [vmem:[#allocation55_spill] sm:$0xff] %v7101_v6  ;;  %10386 = vst [vmem:[#allocation56_spill] sm:$0xff] %v7104_v17  ;;  %v7107_v0 = vadd.f32 %v362_v29, %v7000_v24  ;;  %v7110_v41 = vadd.f32 %v523_v23, %v7002_v51 }
 0x11b   :  { %v366_v58 = vpop.f32.mrf.mxu0  ;;  %v527_v30 = vpop.f32.mrf.mxu1 }
 0x11c   :  { %10387 = vst [vmem:[#allocation57_spill] sm:$0xff] %v7107_v0  ;;  %10388 = vst [vmem:[#allocation58_spill] sm:$0xff] %v7110_v41  ;;  %v7113_v39 = vadd.f32 %v366_v58, %v6996_v38  ;;  %v7116_v45 = vadd.f32 %v527_v30, %v6998_v5 }
 0x11d   :  { %v368_v11 = vpop.f32.mrf.mxu0  ;;  %v529_v6 = vpop.f32.mrf.mxu1 }
 0x11e   :  { %10389 = vst [vmem:[#allocation59_spill] sm:$0xff] %v7113_v39  ;;  %10390 = vst [vmem:[#allocation60_spill] sm:$0xff] %v7116_v45  ;;  %v7119_v33 = vadd.f32 %v368_v11, %v7000_v24  ;;  %v7122_v17 = vadd.f32 %v529_v6, %v7002_v51 }
 0x11f   :  { %v372_v29 = vpop.f32.mrf.mxu0  ;;  %v533_v0 = vpop.f32.mrf.mxu1 }
 0x120   :  { %10391 = vst [vmem:[#allocation61_spill] sm:$0xff] %v7119_v33  ;;  %10392 = vst [vmem:[#allocation62_spill] sm:$0xff] %v7122_v17  ;;  %v7125_v23 = vadd.f32 %v372_v29, %v6996_v38  ;;  %v7128_v41 = vadd.f32 %v533_v0, %v6998_v5 }
 0x121   :  { %v374_v58 = vpop.f32.mrf.mxu0  ;;  %v535_v39 = vpop.f32.mrf.mxu1 }
 0x122   :  { %10393 = vst [vmem:[#allocation63_spill] sm:$0xff] %v7125_v23  ;;  %10394 = vst [vmem:[#allocation64_spill] sm:$0xff] %v7128_v41  ;;  %v7131_v30 = vadd.f32 %v374_v58, %v7000_v24  ;;  %v7134_v45 = vadd.f32 %v535_v39, %v7002_v51 }
 0x123   :  { %v378_v11 = vpop.f32.mrf.mxu0  ;;  %v539_v33 = vpop.f32.mrf.mxu1 }
 0x124   :  { %10395 = vst [vmem:[#allocation65_spill] sm:$0xff] %v7131_v30  ;;  %10396 = vst [vmem:[#allocation66_spill] sm:$0xff] %v7134_v45  ;;  %v7137_v6 = vadd.f32 %v378_v11, %v6996_v38  ;;  %v7140_v17 = vadd.f32 %v539_v33, %v6998_v5 }
 0x125   :  { %v380_v29 = vpop.f32.mrf.mxu0  ;;  %v541_v23 = vpop.f32.mrf.mxu1 }
 0x126   :  { %10397 = vst [vmem:[#allocation67_spill] sm:$0xff] %v7137_v6  ;;  %10398 = vst [vmem:[#allocation68_spill] sm:$0xff] %v7140_v17  ;;  %v7143_v0 = vadd.f32 %v380_v29, %v7000_v24  ;;  %v7146_v41 = vadd.f32 %v541_v23, %v7002_v51 }
 0x127   :  { %v384_v58 = vpop.f32.mrf.mxu0  ;;  %v545_v30 = vpop.f32.mrf.mxu1 }
 0x128   :  { %10399 = vst [vmem:[#allocation69_spill] sm:$0xff] %v7143_v0  ;;  %10400 = vst [vmem:[#allocation70_spill] sm:$0xff] %v7146_v41  ;;  %v7149_v39 = vadd.f32 %v384_v58, %v6996_v38  ;;  %v7152_v45 = vadd.f32 %v545_v30, %v6998_v5 }
 0x129   :  { %v386_v11 = vpop.f32.mrf.mxu0  ;;  %v547_v6 = vpop.f32.mrf.mxu1 }
 0x12a   :  { %10401 = vst [vmem:[#allocation71_spill] sm:$0xff] %v7149_v39  ;;  %10402 = vst [vmem:[#allocation72_spill] sm:$0xff] %v7152_v45  ;;  %v7155_v33 = vadd.f32 %v386_v11, %v7000_v24  ;;  %v7158_v17 = vadd.f32 %v547_v6, %v7002_v51 }
 0x12b   :  { %v390_v29 = vpop.f32.mrf.mxu0  ;;  %v551_v0 = vpop.f32.mrf.mxu1 }
 0x12c   :  { %10403 = vst [vmem:[#allocation73_spill] sm:$0xff] %v7155_v33  ;;  %10404 = vst [vmem:[#allocation74_spill] sm:$0xff] %v7158_v17  ;;  %v7161_v23 = vadd.f32 %v390_v29, %v6996_v38  ;;  %v7164_v41 = vadd.f32 %v551_v0, %v6998_v5  ;;  %v307_v0 = vadd.f32 %v6988_v12, %v6996_v38 }
 0x12d   :  { %v392_v58 = vpop.f32.mrf.mxu0  ;;  %v553_v39 = vpop.f32.mrf.mxu1  ;;  %v470_v12 = vadd.f32 %v6994_v34, %v7002_v51 }
 0x12e   :  { %10405 = vst [vmem:[#allocation75_spill] sm:$0xff] %v7161_v23  ;;  %10406 = vst [vmem:[#allocation76_spill] sm:$0xff] %v7164_v41  ;;  %v7167_v30 = vadd.f32 %v392_v58, %v7000_v24  ;;  %v7170_v45 = vadd.f32 %v553_v39, %v7002_v51 }
 0x12f   :  { %v396_v11 = vpop.f32.mrf.mxu0  ;;  %v557_v33 = vpop.f32.mrf.mxu1 }
 0x130   :  { %10407 = vst [vmem:[#allocation77_spill] sm:$0xff] %v7167_v30  ;;  %10408 = vst [vmem:[#allocation78_spill] sm:$0xff] %v7170_v45  ;;  %v7173_v6 = vadd.f32 %v396_v11, %v6996_v38  ;;  %v7176_v17 = vadd.f32 %v557_v33, %v6998_v5  ;;  %v309_v45 = vadd.f32 %v6992_v63, %v7000_v24 }
 0x131   :  { %v398_v29 = vpop.f32.mrf.mxu0  ;;  %v559_v23 = vpop.f32.mrf.mxu1 }
 0x132   :  { %10409 = vst [vmem:[#allocation79_spill] sm:$0xff] %v7173_v6  ;;  %10410 = vst [vmem:[#allocation80_spill] sm:$0xff] %v7176_v17  ;;  %v7181_v41 = vadd.f32 %v398_v29, %v7000_v24  ;;  %v7184_v58 = vadd.f32 %v559_v23, %v7002_v51  ;;  %v468_v23 = vadd.f32 %v6990_v57, %v6998_v5 }
 0x133   :  { %v807_v39 = vpop.f32.mrf.mxu0  ;;  %v878_v17 = vpop.f32.mrf.mxu1 }
 0x134   :  { %10411 = vst [vmem:[#allocation81_spill] sm:$0xff] %v7181_v41  ;;  %10412 = vst [vmem:[#allocation82_spill] sm:$0xff] %v7184_v58  ;;  %v883_v11 = vadd.f32 %v807_v39, %v307_v0  ;;  %v885_v29 = vadd.f32 %v878_v17, %v468_v23 }
 0x135   :  { %v809_v6 = vpop.f32.mrf.mxu0  ;;  %v880_v31 = vpop.f32.mrf.mxu1 }
 0x136   :  { %v5184_v30 = vmul.f32 -1.442695, %v883_v11  ;;  %v884_v33 = vadd.f32 %v809_v6, %v309_v45  ;;  %v886_v38 = vadd.f32 %v880_v31, %v470_v12 }
 0x138   :  { %5594 = vpow2.f32 %v5184_v30  ;;  %v5185_v18 = vmul.f32 -1.442695, %v884_v33  ;;  %v5186_v58 = vmul.f32 -1.442695, %v886_v38  ;;  %v10438_v38 = vld [vmem:[#allocation25_spill] sm:$0xff] }
 0x13a   :  { %5596 = vpow2.f32 %v5185_v18 }
 0x13b   :  { %5598 = vtanh.f32 %v885_v29 }
 0x13c   :  { %5600 = vpow2.f32 %v5186_v58  ;;  %v10437_v58 = vld [vmem:[#allocation23_spill] sm:$0xff] }
 0x145   :  { %v5595_v41 = vpop.eup %5594 }
 0x146   :  { %v890_v63 = vadd.f32 1.0, %v5595_v41 }
 0x147   :  { %v5597_v24 = vpop.eup %5596 }
 0x148   :  { %5602 = vrcp.f32 %v890_v63  ;;  %v896_v45 = vadd.f32 1.0, %v5597_v24  ;;  %v5599_v30 = vpop.eup %5598 }
 0x149   :  { %v5601_v18 = vpop.eup %5600 }
 0x14a   :  { %5604 = vrcp.f32 %v896_v45  ;;  %v903_v51 = vadd.f32 1.0, %v5601_v18  ;;  %v10439_v45 = vld [vmem:[#allocation26_spill] sm:$0xff]  ;;  %v10440_v18 = vld [vmem:[#allocation24_spill] sm:$0xff] }
 0x14c   :  { %5606 = vrcp.f32 %v903_v51 }
 0x155   :  { %v5603_v6 = vpop.eup %5602 }
 0x156   :  { %v907_v0 = vmul.f32 %v5603_v6, %v5599_v30 }
 0x157   :  { %v5605_v39 = vpop.eup %5604 }
 0x158   :  { %v906_v31 = vmul.f32 0.0, %v5605_v39 }
 0x159   :  { %v5607_v5 = vpop.eup %5606 }
 0x15a   :  { %v7192_v34 = vadd.f32 %v907_v0, %v906_v31 }
 0x15c   :  { %5608 = vtanh.f32 %v7192_v34 }
 0x169   :  { %v5609_v57 = vpop.eup %5608 }
 0x16a   :  { %v7195_v17 = vmul.f32 %v5609_v57, %v5607_v5 }
 0x16c   :  { %10413 = vst [vmem:[#allocation83_spill] sm:$0xff] %v7195_v17  ;;  %983 = vmatmul.mubr.f32.vlgmr.msra.gmra.mxu0 %v7195_v17  ;;  %1054 = vmatmul.mubr.f32.vlgmr.msra.gmra.mxu1 %v7195_v17 }
 0x16d   :  { %1096 = vmatpush1.msra.mxu0 %v6419_v36  ;;  %1167 = vmatpush1.msra.mxu1 %v6461_v44  ;;  %v10414_v36 = vld [vmem:[#allocation3_spill] sm:$0xff]  ;;  %v10419_v44 = vld [vmem:[#allocation12_spill] sm:$0xff] }
 0x16e   :  { %1097 = vmatprep.subr.mxu0 %v6424_v37  ;;  %1168 = vmatprep.subr.mxu1 %v6483_v48  ;;  %v10415_v37 = vld [vmem:[#allocation8_spill] sm:$0xff]  ;;  %v10421_v48 = vld [vmem:[#allocation14_spill] sm:$0xff] }
 0x16f   :  { %1098 = vmatpush1.msra.mxu0 %v6441_v40  ;;  %1169 = vmatpush1.msra.mxu1 %v6493_v50  ;;  %v10416_v40 = vld [vmem:[#allocation4_spill] sm:$0xff]  ;;  %v10423_v50 = vld [vmem:[#allocation15_spill] sm:$0xff] }
 0x170   :  { %1099 = vmatprep.subr.mxu0 %v6450_v42  ;;  %1170 = vmatprep.subr.mxu1 %v6515_v54  ;;  %v10417_v42 = vld [vmem:[#allocation10_spill] sm:$0xff]  ;;  %v10425_v54 = vld [vmem:[#allocation16_spill] sm:$0xff] }
 0x171   :  { %1100 = vmatpush1.msra.mxu0 %v6456_v43  ;;  %1171 = vmatpush1.msra.mxu1 %v6525_v56  ;;  %v10418_v43 = vld [vmem:[#allocation5_spill] sm:$0xff]  ;;  %v10427_v56 = vld [vmem:[#allocation18_spill] sm:$0xff] }
 0x172   :  { %1101 = vmatprep.subr.mxu0 %v6477_v47  ;;  %1172 = vmatprep.subr.mxu1 %v6547_v60  ;;  %v10420_v47 = vld [vmem:[#allocation6_spill] sm:$0xff]  ;;  %v10429_v60 = vld [vmem:[#allocation20_spill] sm:$0xff] }
 0x173   :  { %1102 = vmatpush1.msra.mxu0 %v6488_v49  ;;  %1173 = vmatpush1.msra.mxu1 %v6557_v62  ;;  %v10422_v49 = vld [vmem:[#allocation7_spill] sm:$0xff]  ;;  %v10431_v62 = vld [vmem:[#allocation21_spill] sm:$0xff] }
 0x174   :  { %1103 = vmatprep.subr.mxu0 %v6509_v53  ;;  %1174 = vmatprep.subr.mxu1 %v6579_v2  ;;  %v10424_v53 = vld [vmem:[#allocation9_spill] sm:$0xff]  ;;  %v10433_v2 = vmov 0.0  }
 0x175   :  { %1104 = vmatpush1.msra.mxu0 %v6520_v55  ;;  %1175 = vmatpush1.msra.mxu1 %v6589_v4  ;;  %v10426_v55 = vld [vmem:[#allocation11_spill] sm:$0xff]  ;;  %v7266_v4 = vld [vmem:[%s10141_s3 + $0x1e8] sm:$0xff] }
 0x176   :  { %1105 = vmatprep.subr.mxu0 %v6541_v59  ;;  %1176 = vmatprep.subr.mxu1 %v6611_v8  ;;  %v10428_v59 = vld [vmem:[#allocation13_spill] sm:$0xff]  ;;  %10435 = vst [vmem:[#allocation3_spill] sm:$0xff] %v7266_v4 }
 0x177   :  { %1106 = vmatpush1.msra.mxu0 %v6552_v61  ;;  %1177 = vmatpush1.msra.mxu1 %v6621_v10  ;;  %v10430_v61 = vld [vmem:[#allocation17_spill] sm:$0xff] }
 0x178   :  { %1107 = vmatprep.subr.mxu0 %v6573_v1  ;;  %1178 = vmatprep.subr.mxu1 %v6643_v14  ;;  %v10432_v1 = vld [vmem:[#allocation19_spill] sm:$0xff] }
 0x179   :  { %1108 = vmatpush1.msra.mxu0 %v6584_v3  ;;  %1179 = vmatpush1.msra.mxu1 %v6653_v16  ;;  %v10434_v3 = vld [vmem:[#allocation22_spill] sm:$0xff] }
 0x17a   :  { %1109 = vmatprep.subr.mxu0 %v6605_v7  ;;  %1180 = vmatprep.subr.mxu1 %v6675_v20  ;;  %v7272_v7 = vld [vmem:[%s10141_s3 + $0x1f8] sm:$0xff] }
 0x17b   :  { %1110 = vmatpush1.msra.mxu0 %v6616_v9  ;;  %1181 = vmatpush1.msra.mxu1 %v6685_v22  ;;  %10436 = vst [vmem:[#allocation8_spill] sm:$0xff] %v7272_v7 }
 0x17c   :  { %1111 = vmatprep.subr.mxu0 %v6637_v13  ;;  %1182 = vmatprep.subr.mxu1 %v6707_v26 }
 0x17d   :  { %1112 = vmatpush1.msra.mxu0 %v6648_v15  ;;  %1183 = vmatpush1.msra.mxu1 %v6717_v28 }
 0x17e   :  { %1113 = vmatprep.subr.mxu0 %v6669_v19  ;;  %1184 = vmatprep.subr.mxu1 %v6739_v32 }
 0x17f   :  { %1114 = vmatpush1.msra.mxu0 %v6680_v21  ;;  %1185 = vmatpush1.msra.mxu1 %v6749_v35 }
 0x180   :  { %1115 = vmatprep.subr.mxu0 %v6701_v25  ;;  %1186 = vmatprep.subr.mxu1 %v6771_v46 }
 0x181   :  { %1116 = vmatpush1.msra.mxu0 %v6712_v27  ;;  %1187 = vmatpush1.msra.mxu1 %v6781_v52 }
 0x182   :  { %1117 = vmatprep.subr.mxu0 %v10414_v36  ;;  %1188 = vmatprep.subr.mxu1 %v10415_v37 }
 0x183   :  { %1118 = vmatpush1.msra.mxu0 %v10416_v40  ;;  %1189 = vmatpush1.msra.mxu1 %v10417_v42 }
 0x184   :  { %1119 = vmatprep.subr.mxu0 %v10418_v43  ;;  %1190 = vmatprep.subr.mxu1 %v10419_v44 }
 0x185   :  { %1120 = vmatpush1.msra.mxu0 %v10420_v47  ;;  %1191 = vmatpush1.msra.mxu1 %v10421_v48 }
 0x186   :  { %1121 = vmatprep.subr.mxu0 %v10422_v49  ;;  %1192 = vmatprep.subr.mxu1 %v10423_v50 }
 0x187   :  { %1122 = vmatpush1.msra.mxu0 %v10424_v53  ;;  %1193 = vmatpush1.msra.mxu1 %v10425_v54 }
 0x188   :  { %1123 = vmatprep.subr.mxu0 %v10426_v55  ;;  %1194 = vmatprep.subr.mxu1 %v10427_v56 }
 0x189   :  { %1124 = vmatpush1.msra.mxu0 %v10428_v59  ;;  %1195 = vmatpush1.msra.mxu1 %v10429_v60 }
 0x18a   :  { %1125 = vmatprep.subr.mxu0 %v10430_v61  ;;  %1196 = vmatprep.subr.mxu1 %v10431_v62 }
 0x18b   :  { %1126 = vmatpush1.msra.mxu0 %v10432_v1  ;;  %1159 = vmatprep.mubr.f32.mxu0 %v10433_v2 }
 0x18c   :  { %1197 = vmatpush1.msra.mxu1 %v10434_v3  ;;  %1230 = vmatprep.mubr.f32.mxu1 %v10433_v2 }
 0x18d   :  { %1272 = vmatprep.subr.mxu0 %v7266_v4  ;;  %1343 = vmatprep.subr.mxu1 %v7272_v7 }
 0x22c   :  { %v984_v41 = vpop.f32.mrf.mxu0  ;;  %v1055_v29 = vpop.f32.mrf.mxu1 }
 0x22d   :  { %v1060_v11 = vadd.f32 %v984_v41, %v10437_v58  ;;  %v1062_v6 = vadd.f32 %v1055_v29, %v10440_v18  ;;  %v7308_v18 = vld [vmem:[%s10141_s3 + $0x1d8] sm:$0xff] }
 0x22e   :  { %v986_v33 = vpop.f32.mrf.mxu0  ;;  %v1057_v24 = vpop.f32.mrf.mxu1 }
 0x22f   :  { %v5187_v12 = vmul.f32 -1.442695, %v1060_v11  ;;  %v1061_v23 = vadd.f32 %v986_v33, %v10438_v38  ;;  %v1063_v30 = vadd.f32 %v1057_v24, %v10439_v45  ;;  %v7290_v45 = vld [vmem:[%s10141_s3 + $0x1e0] sm:$0xff] }
 0x231   :  { %5610 = vpow2.f32 %v5187_v12  ;;  %v5188_v63 = vmul.f32 -1.442695, %v1061_v23  ;;  %v5189_v0 = vmul.f32 -1.442695, %v1063_v30  ;;  %v7302_v30 = vld [vmem:[%s10141_s3 + $0x1c8] sm:$0xff] }
 0x233   :  { %5612 = vpow2.f32 %v5188_v63 }
 0x234   :  { %5614 = vtanh.f32 %v1062_v6  ;;  %v7314_v6 = vld [vmem:[%s10141_s3 + $0x1c0] sm:$0xff] }
 0x235   :  { %5616 = vpow2.f32 %v5189_v0  ;;  %v7320_v0 = vld [vmem:[%s10141_s3 + $0x1d0] sm:$0xff] }
 0x23e   :  { %v5611_v39 = vpop.eup %5610 }
 0x23f   :  { %v1067_v51 = vadd.f32 1.0, %v5611_v39  ;;  %v7326_v39 = vld [vmem:[%s10141_s3 + $0x1a8] sm:$0xff] }
 0x240   :  { %v5613_v31 = vpop.eup %5612 }
 0x241   :  { %5618 = vrcp.f32 %v1067_v51  ;;  %v1073_v5 = vadd.f32 1.0, %v5613_v31  ;;  %v5615_v57 = vpop.eup %5614  ;;  %v7332_v51 = vld [vmem:[%s10141_s3 + $0x1b8] sm:$0xff]  ;;  %v7338_v31 = vld [vmem:[%s10141_s3 + $0x1a0] sm:$0xff] }
 0x242   :  { %v5617_v41 = vpop.eup %5616 }
 0x243   :  { %5620 = vrcp.f32 %v1073_v5  ;;  %v1080_v12 = vadd.f32 1.0, %v5617_v41  ;;  %v7344_v5 = vld [vmem:[%s10141_s3 + $0x1b0] sm:$0xff]  ;;  %v7356_v41 = vld [vmem:[%s10141_s3 + $0x198] sm:$0xff] }
 0x245   :  { %5622 = vrcp.f32 %v1080_v12  ;;  %v7380_v12 = vld [vmem:[%s10141_s3 + $0x178] sm:$0xff] }
 0x24e   :  { %v5619_v58 = vpop.eup %5618 }
 0x24f   :  { %v1084_v11 = vmul.f32 %v5619_v58, %v5615_v57  ;;  %v7350_v57 = vld [vmem:[%s10141_s3 + $0x188] sm:$0xff]  ;;  %v7362_v58 = vld [vmem:[%s10141_s3 + $0x180] sm:$0xff] }
 0x250   :  { %v5621_v33 = vpop.eup %5620 }
 0x251   :  { %v1083_v38 = vmul.f32 %v5621_v33, %v7192_v34  ;;  %v7296_v34 = vld [vmem:[%s10141_s3 + $0x1f0] sm:$0xff]  ;;  %v7374_v33 = vld [vmem:[%s10141_s3 + $0x168] sm:$0xff] }
 0x252   :  { %v5623_v29 = vpop.eup %5622 }
 0x253   :  { %v7280_v23 = vadd.f32 %v1084_v11, %v1083_v38  ;;  %v7368_v11 = vld [vmem:[%s10141_s3 + $0x190] sm:$0xff]  ;;  %v7386_v38 = vld [vmem:[%s10141_s3 + $0x160] sm:$0xff] }
 0x254   :  { %10441 = vst [vmem:[#allocation4_spill] sm:$0xff] %v7386_v38 }
 0x255   :  { %5624 = vtanh.f32 %v7280_v23 }
 0x262   :  { %v5625_v63 = vpop.eup %5624 }
 0x263   :  { %v7283_v24 = vmul.f32 %v5625_v63, %v5623_v29  ;;  %v7392_v29 = vld [vmem:[%s10141_s3 + $0x170] sm:$0xff]  ;;  %v7398_v63 = vld [vmem:[%s10141_s3 + $0x148] sm:$0xff] }
 0x264   :  { %10442 = vst [vmem:[#allocation10_spill] sm:$0xff] %v7392_v29 }
 0x265   :  { %1160 = vmatmul.mubr.f32.vlgmr.msra.gmra.mxu0 %v7283_v24  ;;  %1231 = vmatmul.mubr.f32.vlgmr.msra.gmra.mxu1 %v7283_v24 }
 0x266   :  { %1273 = vmatpush1.msra.mxu0 %v7290_v45  ;;  %1344 = vmatpush1.msra.mxu1 %v7296_v34 }
 0x267   :  { %1274 = vmatprep.subr.mxu0 %v7302_v30  ;;  %1345 = vmatprep.subr.mxu1 %v7308_v18 }
 0x268   :  { %1275 = vmatpush1.msra.mxu0 %v7314_v6  ;;  %1346 = vmatpush1.msra.mxu1 %v7320_v0 }
 0x269   :  { %1276 = vmatprep.subr.mxu0 %v7326_v39  ;;  %1347 = vmatprep.subr.mxu1 %v7332_v51 }
 0x26a   :  { %1277 = vmatpush1.msra.mxu0 %v7338_v31  ;;  %1348 = vmatpush1.msra.mxu1 %v7344_v5 }
 0x26b   :  { %1278 = vmatprep.subr.mxu0 %v7350_v57  ;;  %1349 = vmatprep.subr.mxu1 %v7356_v41 }
 0x26c   :  { %1279 = vmatpush1.msra.mxu0 %v7362_v58  ;;  %1350 = vmatpush1.msra.mxu1 %v7368_v11 }
 0x26d   :  { %1280 = vmatprep.subr.mxu0 %v7374_v33  ;;  %1351 = vmatprep.subr.mxu1 %v7380_v12 }
 0x26e   :  { %1281 = vmatpush1.msra.mxu0 %v7386_v38  ;;  %1352 = vmatpush1.msra.mxu1 %v7392_v29  ;;  %v7405_v38 = vld [vmem:[%s10141_s3 + $0x140] sm:$0xff]  ;;  %v7412_v29 = vld [vmem:[%s10141_s3 + $0x128] sm:$0xff] }
 0x26f   :  { %1282 = vmatprep.subr.mxu0 %v7398_v63  ;;  %1353 = vmatprep.subr.mxu1 %v6611_v8  ;;  %v7419_v8 = vld [vmem:[%s10141_s3 + $0x120] sm:$0xff] }
 0x270   :  { %1283 = vmatpush1.msra.mxu0 %v7405_v38  ;;  %1354 = vmatpush1.msra.mxu1 %v6621_v10  ;;  %v7426_v10 = vld [vmem:[%s10141_s3 + $0x108] sm:$0xff] }
 0x271   :  { %1284 = vmatprep.subr.mxu0 %v7412_v29  ;;  %1355 = vmatprep.subr.mxu1 %v6643_v14 }
 0x272   :  { %1285 = vmatpush1.msra.mxu0 %v7419_v8  ;;  %1356 = vmatpush1.msra.mxu1 %v6653_v16 }
 0x273   :  { %1286 = vmatprep.subr.mxu0 %v7426_v10  ;;  %1357 = vmatprep.subr.mxu1 %v6675_v20 }
 0x274   :  { %1287 = vmatpush1.msra.mxu0 %v6616_v9  ;;  %1358 = vmatpush1.msra.mxu1 %v6685_v22 }
 0x275   :  { %1288 = vmatprep.subr.mxu0 %v6637_v13  ;;  %1359 = vmatprep.subr.mxu1 %v6707_v26  ;;  %v10443_v13 = vld [vmem:[#allocation27_spill] sm:$0xff]  ;;  %v10445_v26 = vld [vmem:[#allocation30_spill] sm:$0xff] }
 0x276   :  { %1289 = vmatpush1.msra.mxu0 %v6648_v15  ;;  %1360 = vmatpush1.msra.mxu1 %v6717_v28  ;;  %v10446_v28 = vld [vmem:[#allocation28_spill] sm:$0xff] }
 0x277   :  { %1290 = vmatprep.subr.mxu0 %v6669_v19  ;;  %1361 = vmatprep.subr.mxu1 %v6739_v32  ;;  %v10444_v19 = vld [vmem:[#allocation29_spill] sm:$0xff] }
 0x278   :  { %1291 = vmatpush1.msra.mxu0 %v6680_v21  ;;  %1362 = vmatpush1.msra.mxu1 %v6749_v35 }
 0x279   :  { %1292 = vmatprep.subr.mxu0 %v6701_v25  ;;  %1363 = vmatprep.subr.mxu1 %v6771_v46 }
 0x27a   :  { %1293 = vmatpush1.msra.mxu0 %v6712_v27  ;;  %1364 = vmatpush1.msra.mxu1 %v6781_v52 }
 0x27b   :  { %1294 = vmatprep.subr.mxu0 %v10414_v36  ;;  %1365 = vmatprep.subr.mxu1 %v10415_v37 }
 0x27c   :  { %1295 = vmatpush1.msra.mxu0 %v10416_v40  ;;  %1366 = vmatpush1.msra.mxu1 %v10417_v42  ;;  %v10447_v40 = vlaneseq }
 0x27d   :  { %1296 = vmatprep.subr.mxu0 %v10418_v43  ;;  %1367 = vmatprep.subr.mxu1 %v10419_v44 }
 0x27e   :  { %1297 = vmatpush1.msra.mxu0 %v10420_v47  ;;  %1368 = vmatpush1.msra.mxu1 %v10421_v48  ;;  %v7473_v42 = vand.u32 127, %v10447_v40  ;;  %v7610_v40 = vld [vmem:[%s10141_s3 + $0xd8] sm:$0xff] }
 0x27f   :  { %1298 = vmatprep.subr.mxu0 %v10422_v49  ;;  %1369 = vmatprep.subr.mxu1 %v10423_v50 }
 0x280   :  { %1299 = vmatpush1.msra.mxu0 %v10424_v53  ;;  %1370 = vmatpush1.msra.mxu1 %v10425_v54  ;;  %10448 = vst [vmem:[#allocation5_spill] sm:$0xff] %v7473_v42  ;;  %vm628_vm1 = vcmp.ge.s32.totalorder %v7473_v42, 16  ;;  %vm629_vm2 = vcmp.lt.s32.totalorder %v7473_v42, 32  ;;  %vm633_vm3 = vcmp.ge.s32.totalorder %v7473_v42, 48  ;;  %vm634_vm4 = vcmp.lt.s32.totalorder %v7473_v42, 64 }
 0x281   :  { %1300 = vmatprep.subr.mxu0 %v10426_v55  ;;  %1371 = vmatprep.subr.mxu1 %v10427_v56  ;;  %vm630_vm5 = vmand %vm628_vm1, %vm629_vm2  ;;  %vm638_vm7 = vcmp.ge.s32.totalorder %v7473_v42, 64  ;;  %vm639_vm8 = vcmp.lt.s32.totalorder %v7473_v42, 80  ;;  %vm643_vm10 = vcmp.ge.s32.totalorder %v7473_v42, 80  ;;  %vm644_vm11 = vcmp.lt.s32.totalorder %v7473_v42, 96  ;;  %v7742_v42 = vld [vmem:[%s10141_s3 + $0x30] sm:$0xff] }
 0x282   :  { %1301 = vmatpush1.msra.mxu0 %v10428_v59  ;;  %1372 = vmatpush1.msra.mxu1 %v10429_v60  ;;  %vm635_vm6 = vmand %vm633_vm3, %vm634_vm4  ;;  %v7485_v55 = vsel %vm630_vm5, 1.0, %v10433_v2  ;;  %10469 = vst [vmem:[#allocation24_spill] sm:$0xff] %v7742_v42  ;;  %vm3603_vm2 = vcmask 261120   ;;  %vm6043_vm3 = vmmov 0   ;;  %vm4664_vm5 = vcmask 1041409  }
 0x283   :  { %1302 = vmatprep.subr.mxu0 %v10430_v61  ;;  %1373 = vmatprep.subr.mxu1 %v10431_v62  ;;  %10449 = vst [vmem:[#allocation12_spill] sm:$0xff] %v7485_v55  ;;  %v7488_v56 = vsel %vm635_vm6, 1.0, %v10433_v2  ;;  %vm640_vm9 = vmand %vm638_vm7, %vm639_vm8  ;;  %vm4666_vm6 = vcmask 1042434   ;;  %vm4668_vm7 = vcmask 1043459   ;;  %vm4670_vm8 = vcmask 1044484  }
 0x284   :  { %1303 = vmatpush1.msra.mxu0 %v10432_v1  ;;  %1336 = vmatprep.mubr.f32.mxu0 %v10433_v2  ;;  %10450 = vst [vmem:[#allocation6_spill] sm:$0xff] %v7488_v56  ;;  %v637_v59 = vadd.f32 %v7488_v56, %v7485_v55  ;;  %v7496_v60 = vsel %vm640_vm9, 1.0, %v10433_v2  ;;  %vm645_vm12 = vmand %vm643_vm10, %vm644_vm11  ;;  %v7718_v56 = vld [vmem:[%s10141_s3 + $0x50] sm:$0xff]  ;;  %v7724_v55 = vld [vmem:[%s10141_s3 + $0x28] sm:$0xff]  ;;  %vm4672_vm9 = vcmask 1045509   ;;  %vm4674_vm10 = vcmask 1046534  }
 0x285   :  { %1374 = vmatpush1.msra.mxu1 %v10434_v3  ;;  %1407 = vmatprep.mubr.f32.mxu1 %v10433_v2  ;;  %10451 = vst [vmem:[#allocation14_spill] sm:$0xff] %v7496_v60  ;;  %v7500_v62 = vsel %vm645_vm12, 1.0, %v10433_v2  ;;  %10465 = vst [vmem:[#allocation22_spill] sm:$0xff] %v7718_v56  ;;  %vm4676_vm11 = vcmask 1047559   ;;  %vm4696_vm12 = vcmask 785408  }
 0x286   :  { %1449 = vmatprep.subr.mxu0 %v7266_v4  ;;  %1520 = vmatprep.subr.mxu1 %v7272_v7  ;;  %v642_v61 = vadd.f32 %v7496_v60, %v637_v59  ;;  %10452 = vst [vmem:[#allocation7_spill] sm:$0xff] %v7500_v62  ;;  %v7658_v59 = vld [vmem:[%s10141_s3 + $0x98] sm:$0xff]  ;;  %10466 = vst [vmem:[#allocation23_spill] sm:$0xff] %v7724_v55  ;;  %v7736_v60 = vld [vmem:[%s10141_s3 + $0x20] sm:$0xff] }
 0x287   :  { %10455 = vst [vmem:[#allocation15_spill] sm:$0xff] %v7658_v59  ;;  %10468 = vst [vmem:[#allocation26_spill] sm:$0xff] %v7736_v60 }
 0x288   :  { %v7503_v1 = vadd.f32 %v7500_v62, %v642_v61  ;;  %v7664_v61 = vld [vmem:[%s10141_s3 + $0x80] sm:$0xff]  ;;  %v7730_v62 = vld [vmem:[%s10141_s3 + $0x38] sm:$0xff] }
 0x289   :  { %10456 = vst [vmem:[#allocation9_spill] sm:$0xff] %v7664_v61  ;;  %10467 = vst [vmem:[#allocation25_spill] sm:$0xff] %v7730_v62 }
 0x325   :  { %v1161_v9 = vpop.f32.mrf.mxu0  ;;  %v1232_v21 = vpop.f32.mrf.mxu1 }
 0x326   :  { %v1237_v14 = vadd.f32 %v1161_v9, %v10443_v13  ;;  %v1239_v32 = vadd.f32 %v1232_v21, %v10446_v28  ;;  %v7534_v21 = vld [vmem:[%s10141_s3 + $0x158] sm:$0xff]  ;;  %v7568_v28 = vld [vmem:[%s10141_s3 + $0x100] sm:$0xff] }
 0x327   :  { %v1163_v15 = vpop.f32.mrf.mxu0  ;;  %v1234_v25 = vpop.f32.mrf.mxu1 }
 0x328   :  { %v5190_v16 = vmul.f32 -1.442695, %v1237_v14  ;;  %v1238_v20 = vadd.f32 %v1163_v15, %v10444_v19  ;;  %v1240_v27 = vadd.f32 %v1234_v25, %v10445_v26  ;;  %v911_v14 = vmul.f32 %v7195_v17, %v7503_v1  ;;  %v7548_v25 = vld [vmem:[%s10141_s3 + $0x138] sm:$0xff]  ;;  %v7555_v26 = vld [vmem:[%s10141_s3 + $0x130] sm:$0xff]  ;;  %v7712_v17 = vld [vmem:[%s10141_s3 + $0x40] sm:$0xff] }
 0x329   :  { %10464 = vst [vmem:[#allocation19_spill] sm:$0xff] %v7712_v17 }
 0x32a   :  { %5626 = vpow2.f32 %v5190_v16  ;;  %v5191_v22 = vmul.f32 -1.442695, %v1238_v20  ;;  %v5192_v35 = vmul.f32 -1.442695, %v1240_v27  ;;  %v10454_v20 = vld [vmem:[#allocation10_spill] sm:$0xff] }
 0x32b   :  { %v7562_v27 = vld [vmem:[%s10141_s3 + $0x118] sm:$0xff] }
 0x32c   :  { %5628 = vpow2.f32 %v5191_v22  ;;  %v7541_v22 = vld [vmem:[%s10141_s3 + $0x150] sm:$0xff] }
 0x32d   :  { %5630 = vtanh.f32 %v1239_v32  ;;  %v7574_v32 = vld [vmem:[%s10141_s3 + $0x110] sm:$0xff] }
 0x32e   :  { %5632 = vpow2.f32 %v5192_v35  ;;  %v7580_v35 = vld [vmem:[%s10141_s3 + $0xe8] sm:$0xff] }
 0x337   :  { %v5627_v46 = vpop.eup %5626 }
 0x338   :  { %v1244_v52 = vadd.f32 1.0, %v5627_v46  ;;  %v7586_v46 = vld [vmem:[%s10141_s3 + $0xf8] sm:$0xff] }
 0x339   :  { %v5629_v36 = vpop.eup %5628 }
 0x33a   :  { %5634 = vrcp.f32 %v1244_v52  ;;  %v1250_v37 = vadd.f32 1.0, %v5629_v36  ;;  %v5631_v43 = vpop.eup %5630  ;;  %v7592_v52 = vld [vmem:[%s10141_s3 + $0xe0] sm:$0xff]  ;;  %v7598_v36 = vld [vmem:[%s10141_s3 + $0xf0] sm:$0xff] }
 0x33b   :  { %v5633_v44 = vpop.eup %5632 }
 0x33c   :  { %5636 = vrcp.f32 %v1250_v37  ;;  %v1257_v50 = vadd.f32 1.0, %v5633_v44  ;;  %v7604_v37 = vld [vmem:[%s10141_s3 + $0xc8] sm:$0xff]  ;;  %v7622_v44 = vld [vmem:[%s10141_s3 + $0xd0] sm:$0xff] }
 0x33e   :  { %5638 = vrcp.f32 %v1257_v50  ;;  %v7646_v50 = vld [vmem:[%s10141_s3 + $0xb0] sm:$0xff] }
 0x347   :  { %v5635_v47 = vpop.eup %5634 }
 0x348   :  { %v1261_v48 = vmul.f32 %v5635_v47, %v5631_v43  ;;  %v7616_v43 = vld [vmem:[%s10141_s3 + $0xc0] sm:$0xff]  ;;  %v7628_v47 = vld [vmem:[%s10141_s3 + $0xa8] sm:$0xff] }
 0x349   :  { %v5637_v49 = vpop.eup %5636 }
 0x34a   :  { %v1260_v53 = vmul.f32 %v5637_v49, %v7280_v23  ;;  %v1088_v23 = vmul.f32 %v7283_v24, %v7503_v1  ;;  %v10453_v24 = vld [vmem:[#allocation4_spill] sm:$0xff]  ;;  %v7640_v49 = vld [vmem:[%s10141_s3 + $0xa0] sm:$0xff] }
 0x34b   :  { %v5639_v3 = vpop.eup %5638 }
 0x34c   :  { %v7482_v54 = vadd.f32 %v1261_v48, %v1260_v53  ;;  %v1089_v15 = vadd.f32 %v1088_v23, %v911_v14  ;;  %v7634_v48 = vld [vmem:[%s10141_s3 + $0xb8] sm:$0xff]  ;;  %v7652_v53 = vld [vmem:[%s10141_s3 + $0x88] sm:$0xff]  ;;  %v7694_v14 = vld [vmem:[%s10141_s3 + $0x70] sm:$0xff] }
 0x34d   :  { %v7676_v23 = vld [vmem:[%s10141_s3 + $0x68] sm:$0xff]  ;;  %10461 = vst [vmem:[#allocation20_spill] sm:$0xff] %v7694_v14 }
 0x34e   :  { %5640 = vtanh.f32 %v7482_v54  ;;  %10458 = vst [vmem:[#allocation11_spill] sm:$0xff] %v7676_v23 }
 0x35b   :  { %v5641_v9 = vpop.eup %5640 }
 0x35c   :  { %v1264_v13 = vmul.f32 %v5641_v9, %v5639_v3  ;;  %v7670_v3 = vld [vmem:[%s10141_s3 + $0x90] sm:$0xff]  ;;  %v7682_v9 = vld [vmem:[%s10141_s3 + $0x78] sm:$0xff] }
 0x35d   :  { %10457 = vst [vmem:[#allocation16_spill] sm:$0xff] %v7670_v3  ;;  %10459 = vst [vmem:[#allocation18_spill] sm:$0xff] %v7682_v9 }
 0x35e   :  { %1337 = vmatmul.mubr.f32.vlgmr.msra.gmra.mxu0 %v1264_v13  ;;  %1408 = vmatmul.mubr.f32.vlgmr.msra.gmra.mxu1 %v1264_v13  ;;  %v1265_v16 = vmul.f32 %v1264_v13, %v7503_v1  ;;  %v7688_v13 = vld [vmem:[%s10141_s3 + $0x60] sm:$0xff] }
 0x35f   :  { %1450 = vmatpush1.msra.mxu0 %v7290_v45  ;;  %1521 = vmatpush1.msra.mxu1 %v7296_v34  ;;  %10460 = vst [vmem:[#allocation13_spill] sm:$0xff] %v7688_v13 }
 0x360   :  { %1451 = vmatprep.subr.mxu0 %v7302_v30  ;;  %1522 = vmatprep.subr.mxu1 %v7308_v18  ;;  %v7514_v19 = vadd.f32 %v1265_v16, %v1089_v15  ;;  %v7700_v15 = vld [vmem:[%s10141_s3 + $0x48] sm:$0xff]  ;;  %v7706_v16 = vld [vmem:[%s10141_s3 + $0x58] sm:$0xff] }
 0x361   :  { %1452 = vmatpush1.msra.mxu0 %v7314_v6  ;;  %1523 = vmatpush1.msra.mxu1 %v7320_v0  ;;  %10462 = vst [vmem:[#allocation17_spill] sm:$0xff] %v7700_v15  ;;  %10463 = vst [vmem:[#allocation21_spill] sm:$0xff] %v7706_v16 }
 0x362   :  { %1453 = vmatprep.subr.mxu0 %v7326_v39  ;;  %1524 = vmatprep.subr.mxu1 %v7332_v51 }
 0x363   :  { %1454 = vmatpush1.msra.mxu0 %v7338_v31  ;;  %1525 = vmatpush1.msra.mxu1 %v7344_v5 }
 0x364   :  { %1455 = vmatprep.subr.mxu0 %v7350_v57  ;;  %1526 = vmatprep.subr.mxu1 %v7356_v41 }
 0x365   :  { %1456 = vmatpush1.msra.mxu0 %v7362_v58  ;;  %1527 = vmatpush1.msra.mxu1 %v7368_v11 }
 0x366   :  { %1457 = vmatprep.subr.mxu0 %v7374_v33  ;;  %1528 = vmatprep.subr.mxu1 %v7380_v12 }
 0x367   :  { %1458 = vmatpush1.msra.mxu0 %v10453_v24  ;;  %1529 = vmatpush1.msra.mxu1 %v10454_v20 }
 0x368   :  { %1459 = vmatprep.subr.mxu0 %v7398_v63  ;;  %1530 = vmatprep.subr.mxu1 %v7534_v21 }
 0x369   :  { %1460 = vmatpush1.msra.mxu0 %v7405_v38  ;;  %1531 = vmatpush1.msra.mxu1 %v7541_v22 }
 0x36a   :  { %1461 = vmatprep.subr.mxu0 %v7412_v29  ;;  %1532 = vmatprep.subr.mxu1 %v7548_v25 }
 0x36b   :  { %1462 = vmatpush1.msra.mxu0 %v7419_v8  ;;  %1533 = vmatpush1.msra.mxu1 %v7555_v26 }
 0x36c   :  { %1463 = vmatprep.subr.mxu0 %v7426_v10  ;;  %1534 = vmatprep.subr.mxu1 %v7562_v27 }
 0x36d   :  { %1464 = vmatpush1.msra.mxu0 %v7568_v28  ;;  %1535 = vmatpush1.msra.mxu1 %v7574_v32 }
 0x36e   :  { %1465 = vmatprep.subr.mxu0 %v7580_v35  ;;  %1536 = vmatprep.subr.mxu1 %v7586_v46 }
 0x36f   :  { %1466 = vmatpush1.msra.mxu0 %v7592_v52  ;;  %1537 = vmatpush1.msra.mxu1 %v7598_v36 }
 0x370   :  { %1467 = vmatprep.subr.mxu0 %v7604_v37  ;;  %1538 = vmatprep.subr.mxu1 %v7610_v40 }
 0x371   :  { %1468 = vmatpush1.msra.mxu0 %v7616_v43  ;;  %1539 = vmatpush1.msra.mxu1 %v7622_v44 }
 0x372   :  { %1469 = vmatprep.subr.mxu0 %v7628_v47  ;;  %1540 = vmatprep.subr.mxu1 %v7634_v48 }
 0x373   :  { %1470 = vmatpush1.msra.mxu0 %v7640_v49  ;;  %1541 = vmatpush1.msra.mxu1 %v7646_v50 }
 0x374   :  { %1471 = vmatprep.subr.mxu0 %v7652_v53  ;;  %1542 = vmatprep.subr.mxu1 %v7658_v59 }
 0x375   :  { %1472 = vmatpush1.msra.mxu0 %v7664_v61  ;;  %1543 = vmatpush1.msra.mxu1 %v7670_v3  ;;  %v10477_v3 = vld [vmem:[#allocation32_spill] sm:$0xff] }
 0x376   :  { %1473 = vmatprep.subr.mxu0 %v7676_v23  ;;  %1544 = vmatprep.subr.mxu1 %v7682_v9  ;;  %v10476_v23 = vld [vmem:[#allocation34_spill] sm:$0xff] }
 0x377   :  { %1474 = vmatpush1.msra.mxu0 %v7688_v13  ;;  %1545 = vmatpush1.msra.mxu1 %v7694_v14 }
 0x378   :  { %1475 = vmatprep.subr.mxu0 %v7700_v15  ;;  %1546 = vmatprep.subr.mxu1 %v7706_v16  ;;  %v10475_v16 = vld [vmem:[#allocation33_spill] sm:$0xff] }
 0x379   :  { %1476 = vmatpush1.msra.mxu0 %v7712_v17  ;;  %1547 = vmatpush1.msra.mxu1 %v7718_v56 }
 0x37a   :  { %1477 = vmatprep.subr.mxu0 %v7724_v55  ;;  %1548 = vmatprep.subr.mxu1 %v7730_v62  ;;  %v7748_v55 = vld [vmem:[%s10141_s3 + $0x8] sm:$0xff]  ;;  %v7754_v62 = vld [vmem:[%s10141_s3 + $0x18] sm:$0xff] }
 0x37b   :  { %1478 = vmatpush1.msra.mxu0 %v7736_v60  ;;  %1549 = vmatpush1.msra.mxu1 %v7742_v42  ;;  %10470 = vst [vmem:[#allocation27_spill] sm:$0xff] %v7748_v55  ;;  %10471 = vst [vmem:[#allocation29_spill] sm:$0xff] %v7754_v62  ;;  %v7760_v60 = vld [vmem:[%s10141_s3] sm:$0xff] }
 0x37c   :  { %1479 = vmatprep.subr.mxu0 %v7748_v55  ;;  %1550 = vmatprep.subr.mxu1 %v7754_v62  ;;  %10472 = vst [vmem:[#allocation30_spill] sm:$0xff] %v7760_v60  ;;  %v7767_v55 = vld [vmem:[%s10141_s3 + $0x10] sm:$0xff]  ;;  %v10474_v42 = vld [vmem:[#allocation31_spill] sm:$0xff] }
 0x37d   :  { %1480 = vmatpush1.msra.mxu0 %v7760_v60  ;;  %1513 = vmatprep.mubr.f32.mxu0 %v10433_v2  ;;  %10473 = vst [vmem:[#allocation28_spill] sm:$0xff] %v7767_v55 }
 0x37e   :  { %1551 = vmatpush1.msra.mxu1 %v7767_v55  ;;  %1584 = vmatprep.mubr.f32.mxu1 %v10433_v2 }
 0x37f   :  { %1626 = vmatprep.subr.mxu0 %v7266_v4  ;;  %1697 = vmatprep.subr.mxu1 %v7272_v7 }
 0x41e   :  { %v1338_v62 = vpop.f32.mrf.mxu0  ;;  %v1409_v14 = vpop.f32.mrf.mxu1 }
 0x41f   :  { %v1414_v56 = vadd.f32 %v1338_v62, %v10474_v42  ;;  %v1416_v2 = vadd.f32 %v1409_v14, %v10477_v3  ;;  %v10481_v3 = vld [vmem:[#allocation11_spill] sm:$0xff]  ;;  %v10483_v14 = vld [vmem:[#allocation13_spill] sm:$0xff] }
 0x420   :  { %v1340_v17 = vpop.f32.mrf.mxu0  ;;  %v1411_v9 = vpop.f32.mrf.mxu1 }
 0x421   :  { %v5193_v60 = vmul.f32 -1.442695, %v1414_v56  ;;  %v1415_v15 = vadd.f32 %v1340_v17, %v10475_v16  ;;  %v1417_v55 = vadd.f32 %v1411_v9, %v10476_v23  ;;  %v10482_v9 = vld [vmem:[#allocation18_spill] sm:$0xff] }
 0x423   :  { %5642 = vpow2.f32 %v5193_v60  ;;  %v5194_v13 = vmul.f32 -1.442695, %v1415_v15  ;;  %v5195_v61 = vmul.f32 -1.442695, %v1417_v55 }
 0x425   :  { %5644 = vpow2.f32 %v5194_v13 }
 0x426   :  { %5646 = vtanh.f32 %v1416_v2 }
 0x427   :  { %5648 = vpow2.f32 %v5195_v61  ;;  %v10480_v61 = vld [vmem:[#allocation16_spill] sm:$0xff] }
 0x430   :  { %v5643_v4 = vpop.eup %5642 }
 0x431   :  { %v1421_v59 = vadd.f32 1.0, %v5643_v4 }
 0x432   :  { %v5645_v7 = vpop.eup %5644 }
 0x433   :  { %5650 = vrcp.f32 %v1421_v59  ;;  %v1427_v42 = vadd.f32 1.0, %v5645_v7  ;;  %v5647_v56 = vpop.eup %5646  ;;  %v10479_v59 = vld [vmem:[#allocation9_spill] sm:$0xff] }
 0x434   :  { %v5649_v17 = vpop.eup %5648 }
 0x435   :  { %5652 = vrcp.f32 %v1427_v42  ;;  %v1434_v13 = vadd.f32 1.0, %v5649_v17  ;;  %v10484_v42 = vld [vmem:[#allocation20_spill] sm:$0xff]  ;;  %v10486_v17 = vld [vmem:[#allocation21_spill] sm:$0xff] }
 0x437   :  { %5654 = vrcp.f32 %v1434_v13  ;;  %v10490_v13 = vld [vmem:[#allocation25_spill] sm:$0xff] }
 0x440   :  { %v5651_v60 = vpop.eup %5650 }
 0x441   :  { %v1438_v62 = vmul.f32 %v5651_v60, %v5647_v56  ;;  %v10485_v56 = vld [vmem:[#allocation17_spill] sm:$0xff]  ;;  %v10487_v60 = vld [vmem:[#allocation19_spill] sm:$0xff] }
 0x442   :  { %v5653_v15 = vpop.eup %5652 }
 0x443   :  { %v1437_v16 = vmul.f32 %v5653_v15, %v7482_v54  ;;  %v10489_v15 = vld [vmem:[#allocation23_spill] sm:$0xff] }
 0x444   :  { %v5655_v4 = vpop.eup %5654 }
 0x445   :  { %v7778_v23 = vadd.f32 %v1438_v62, %v1437_v16  ;;  %v10488_v62 = vld [vmem:[#allocation22_spill] sm:$0xff] }
 0x446   :  { %v10491_v16 = vld [vmem:[#allocation26_spill] sm:$0xff] }
 0x447   :  { %5656 = vtanh.f32 %v7778_v23 }
 0x454   :  { %v5657_v2 = vpop.eup %5656 }
 0x455   :  { %v1441_v55 = vmul.f32 %v5657_v2, %v5655_v4  ;;  %v10492_v4 = vld [vmem:[#allocation24_spill] sm:$0xff]  ;;  %v10493_v2 = vld [vmem:[#allocation27_spill] sm:$0xff] }
 0x457   :  { %1514 = vmatmul.mubr.f32.vlgmr.msra.gmra.mxu0 %v1441_v55  ;;  %1585 = vmatmul.mubr.f32.vlgmr.msra.gmra.mxu1 %v1441_v55  ;;  %v1442_v7 = vmul.f32 %v1441_v55, %v7503_v1  ;;  %v10494_v55 = vld [vmem:[#allocation29_spill] sm:$0xff] }
 0x458   :  { %1627 = vmatpush1.msra.mxu0 %v7290_v45  ;;  %1698 = vmatpush1.msra.mxu1 %v7296_v34 }
 0x459   :  { %1628 = vmatprep.subr.mxu0 %v7302_v30  ;;  %1699 = vmatprep.subr.mxu1 %v7308_v18  ;;  %v7787_v54 = vadd.f32 %v1442_v7, %v7514_v19  ;;  %v10478_v19 = vld [vmem:[#allocation15_spill] sm:$0xff]  ;;  %v10495_v7 = vld [vmem:[#allocation30_spill] sm:$0xff] }
 0x45a   :  { %1629 = vmatpush1.msra.mxu0 %v7314_v6  ;;  %1700 = vmatpush1.msra.mxu1 %v7320_v0 }
 0x45b   :  { %1630 = vmatprep.subr.mxu0 %v7326_v39  ;;  %1701 = vmatprep.subr.mxu1 %v7332_v51 }
 0x45c   :  { %1631 = vmatpush1.msra.mxu0 %v7338_v31  ;;  %1702 = vmatpush1.msra.mxu1 %v7344_v5 }
 0x45d   :  { %1632 = vmatprep.subr.mxu0 %v7350_v57  ;;  %1703 = vmatprep.subr.mxu1 %v7356_v41 }
 0x45e   :  { %1633 = vmatpush1.msra.mxu0 %v7362_v58  ;;  %1704 = vmatpush1.msra.mxu1 %v7368_v11 }
 0x45f   :  { %1634 = vmatprep.subr.mxu0 %v7374_v33  ;;  %1705 = vmatprep.subr.mxu1 %v7380_v12 }
 0x460   :  { %1635 = vmatpush1.msra.mxu0 %v10453_v24  ;;  %1706 = vmatpush1.msra.mxu1 %v10454_v20 }
 0x461   :  { %1636 = vmatprep.subr.mxu0 %v7398_v63  ;;  %1707 = vmatprep.subr.mxu1 %v7534_v21 }
 0x462   :  { %1637 = vmatpush1.msra.mxu0 %v7405_v38  ;;  %1708 = vmatpush1.msra.mxu1 %v7541_v22 }
 0x463   :  { %1638 = vmatprep.subr.mxu0 %v7412_v29  ;;  %1709 = vmatprep.subr.mxu1 %v7548_v25 }
 0x464   :  { %1639 = vmatpush1.msra.mxu0 %v7419_v8  ;;  %1710 = vmatpush1.msra.mxu1 %v7555_v26 }
 0x465   :  { %1640 = vmatprep.subr.mxu0 %v7426_v10  ;;  %1711 = vmatprep.subr.mxu1 %v7562_v27 }
 0x466   :  { %1641 = vmatpush1.msra.mxu0 %v7568_v28  ;;  %1712 = vmatpush1.msra.mxu1 %v7574_v32 }
 0x467   :  { %1642 = vmatprep.subr.mxu0 %v7580_v35  ;;  %1713 = vmatprep.subr.mxu1 %v7586_v46 }
 0x468   :  { %1643 = vmatpush1.msra.mxu0 %v7592_v52  ;;  %1714 = vmatpush1.msra.mxu1 %v7598_v36 }
 0x469   :  { %1644 = vmatprep.subr.mxu0 %v7604_v37  ;;  %1715 = vmatprep.subr.mxu1 %v7610_v40 }
 0x46a   :  { %1645 = vmatpush1.msra.mxu0 %v7616_v43  ;;  %1716 = vmatpush1.msra.mxu1 %v7622_v44 }
 0x46b   :  { %1646 = vmatprep.subr.mxu0 %v7628_v47  ;;  %1717 = vmatprep.subr.mxu1 %v7634_v48 }
 0x46c   :  { %1647 = vmatpush1.msra.mxu0 %v7640_v49  ;;  %1718 = vmatpush1.msra.mxu1 %v7646_v50 }
 0x46d   :  { %1648 = vmatprep.subr.mxu0 %v7652_v53  ;;  %1719 = vmatprep.subr.mxu1 %v10478_v19 }
 0x46e   :  { %1649 = vmatpush1.msra.mxu0 %v10479_v59  ;;  %1720 = vmatpush1.msra.mxu1 %v10480_v61  ;;  %v10503_v61 = vld [vmem:[#allocation36_spill] sm:$0xff] }
 0x46f   :  { %1650 = vmatprep.subr.mxu0 %v10481_v3  ;;  %1721 = vmatprep.subr.mxu1 %v10482_v9  ;;  %v10502_v3 = vld [vmem:[#allocation38_spill] sm:$0xff] }
 0x470   :  { %1651 = vmatpush1.msra.mxu0 %v10483_v14  ;;  %1722 = vmatpush1.msra.mxu1 %v10484_v42 }
 0x471   :  { %1652 = vmatprep.subr.mxu0 %v10485_v56  ;;  %1723 = vmatprep.subr.mxu1 %v10486_v17  ;;  %v10496_v56 = vmov 0.0   ;;  %v10497_v17 = vld [vmem:[#allocation28_spill] sm:$0xff] }
 0x472   :  { %1653 = vmatpush1.msra.mxu0 %v10487_v60  ;;  %1724 = vmatpush1.msra.mxu1 %v10488_v62  ;;  %v10498_v62 = vld [vmem:[#allocation3_spill] sm:$0xff] }
 0x473   :  { %1654 = vmatprep.subr.mxu0 %v10489_v15  ;;  %1725 = vmatprep.subr.mxu1 %v10490_v13  ;;  %v10499_v15 = vld [vmem:[#allocation8_spill] sm:$0xff] }
 0x474   :  { %1655 = vmatpush1.msra.mxu0 %v10491_v16  ;;  %1726 = vmatpush1.msra.mxu1 %v10492_v4  ;;  %v10500_v16 = vld [vmem:[#allocation35_spill] sm:$0xff] }
 0x475   :  { %1656 = vmatprep.subr.mxu0 %v10493_v2  ;;  %1727 = vmatprep.subr.mxu1 %v10494_v55  ;;  %v10501_v2 = vld [vmem:[#allocation37_spill] sm:$0xff] }
 0x476   :  { %1657 = vmatpush1.msra.mxu0 %v10495_v7  ;;  %1690 = vmatprep.mubr.f32.mxu0 %v10496_v56 }
 0x477   :  { %1728 = vmatpush1.msra.mxu1 %v10497_v17  ;;  %1761 = vmatprep.mubr.f32.mxu1 %v10496_v56 }
 0x478   :  { %1803 = vmatprep.subr.mxu0 %v10498_v62  ;;  %1874 = vmatprep.subr.mxu1 %v10499_v15 }
 0x517   :  { %v1515_v13 = vpop.f32.mrf.mxu0  ;;  %v1586_v55 = vpop.f32.mrf.mxu1 }
 0x518   :  { %v1591_v60 = vadd.f32 %v1515_v13, %v10500_v16  ;;  %v1593_v56 = vadd.f32 %v1586_v55, %v10503_v61  ;;  %v10509_v55 = vld [vmem:[#allocation13_spill] sm:$0xff] }
 0x519   :  { %v1517_v4 = vpop.f32.mrf.mxu0  ;;  %v1588_v9 = vpop.f32.mrf.mxu1 }
 0x51a   :  { %v5196_v42 = vmul.f32 -1.442695, %v1591_v60  ;;  %v1592_v14 = vadd.f32 %v1517_v4, %v10501_v2  ;;  %v1594_v17 = vadd.f32 %v1588_v9, %v10502_v3 }
 0x51c   :  { %5658 = vpow2.f32 %v5196_v42  ;;  %v5197_v7 = vmul.f32 -1.442695, %v1592_v14  ;;  %v5198_v59 = vmul.f32 -1.442695, %v1594_v17  ;;  %v10506_v17 = vld [vmem:[#allocation16_spill] sm:$0xff] }
 0x51e   :  { %5660 = vpow2.f32 %v5197_v7 }
 0x51f   :  { %5662 = vtanh.f32 %v1593_v56 }
 0x520   :  { %5664 = vpow2.f32 %v5198_v59  ;;  %v10505_v59 = vld [vmem:[#allocation9_spill] sm:$0xff] }
 0x529   :  { %v5659_v62 = vpop.eup %5658 }
 0x52a   :  { %v1598_v19 = vadd.f32 1.0, %v5659_v62  ;;  %v10507_v62 = vld [vmem:[#allocation11_spill] sm:$0xff] }
 0x52b   :  { %v5661_v15 = vpop.eup %5660 }
 0x52c   :  { %5666 = vrcp.f32 %v1598_v19  ;;  %v1604_v13 = vadd.f32 1.0, %v5661_v15  ;;  %v5663_v60 = vpop.eup %5662  ;;  %v10508_v15 = vld [vmem:[#allocation18_spill] sm:$0xff] }
 0x52d   :  { %v5665_v16 = vpop.eup %5664 }
 0x52e   :  { %5668 = vrcp.f32 %v1604_v13  ;;  %v1611_v2 = vadd.f32 1.0, %v5665_v16  ;;  %v10510_v13 = vld [vmem:[#allocation20_spill] sm:$0xff]  ;;  %v10512_v16 = vld [vmem:[#allocation21_spill] sm:$0xff] }
 0x530   :  { %5670 = vrcp.f32 %v1611_v2  ;;  %v10516_v2 = vld [vmem:[#allocation25_spill] sm:$0xff] }
 0x539   :  { %v5667_v42 = vpop.eup %5666 }
 0x53a   :  { %v1615_v4 = vmul.f32 %v5667_v42, %v5663_v60  ;;  %v10511_v60 = vld [vmem:[#allocation17_spill] sm:$0xff]  ;;  %v10513_v42 = vld [vmem:[#allocation19_spill] sm:$0xff] }
 0x53b   :  { %v5669_v14 = vpop.eup %5668 }
 0x53c   :  { %v1614_v7 = vmul.f32 %v5669_v14, %v7778_v23  ;;  %v10515_v14 = vld [vmem:[#allocation23_spill] sm:$0xff] }
 0x53d   :  { %v5671_v61 = vpop.eup %5670 }
 0x53e   :  { %v7856_v3 = vadd.f32 %v1615_v4, %v1614_v7  ;;  %v10514_v4 = vld [vmem:[#allocation22_spill] sm:$0xff] }
 0x53f   :  { %v10517_v7 = vld [vmem:[#allocation26_spill] sm:$0xff] }
 0x540   :  { %5672 = vtanh.f32 %v7856_v3 }
 0x54d   :  { %v5673_v9 = vpop.eup %5672 }
 0x54e   :  { %v1618_v56 = vmul.f32 %v5673_v9, %v5671_v61  ;;  %v10518_v61 = vld [vmem:[#allocation24_spill] sm:$0xff]  ;;  %v10519_v9 = vld [vmem:[#allocation27_spill] sm:$0xff] }
 0x550   :  { %1691 = vmatmul.mubr.f32.vlgmr.msra.gmra.mxu0 %v1618_v56  ;;  %1762 = vmatmul.mubr.f32.vlgmr.msra.gmra.mxu1 %v1618_v56  ;;  %v1619_v19 = vmul.f32 %v1618_v56, %v7503_v1  ;;  %v10520_v56 = vld [vmem:[#allocation29_spill] sm:$0xff] }
 0x551   :  { %1804 = vmatpush1.msra.mxu0 %v7290_v45  ;;  %1875 = vmatpush1.msra.mxu1 %v7296_v34 }
 0x552   :  { %1805 = vmatprep.subr.mxu0 %v7302_v30  ;;  %1876 = vmatprep.subr.mxu1 %v7308_v18  ;;  %v7865_v23 = vadd.f32 %v1619_v19, %v7787_v54  ;;  %v10504_v54 = vld [vmem:[#allocation15_spill] sm:$0xff]  ;;  %v10521_v19 = vld [vmem:[#allocation30_spill] sm:$0xff] }
 0x553   :  { %1806 = vmatpush1.msra.mxu0 %v7314_v6  ;;  %1877 = vmatpush1.msra.mxu1 %v7320_v0 }
 0x554   :  { %1807 = vmatprep.subr.mxu0 %v7326_v39  ;;  %1878 = vmatprep.subr.mxu1 %v7332_v51 }
 0x555   :  { %1808 = vmatpush1.msra.mxu0 %v7338_v31  ;;  %1879 = vmatpush1.msra.mxu1 %v7344_v5 }
 0x556   :  { %1809 = vmatprep.subr.mxu0 %v7350_v57  ;;  %1880 = vmatprep.subr.mxu1 %v7356_v41 }
 0x557   :  { %1810 = vmatpush1.msra.mxu0 %v7362_v58  ;;  %1881 = vmatpush1.msra.mxu1 %v7368_v11 }
 0x558   :  { %1811 = vmatprep.subr.mxu0 %v7374_v33  ;;  %1882 = vmatprep.subr.mxu1 %v7380_v12 }
 0x559   :  { %1812 = vmatpush1.msra.mxu0 %v10453_v24  ;;  %1883 = vmatpush1.msra.mxu1 %v10454_v20 }
 0x55a   :  { %1813 = vmatprep.subr.mxu0 %v7398_v63  ;;  %1884 = vmatprep.subr.mxu1 %v7534_v21 }
 0x55b   :  { %1814 = vmatpush1.msra.mxu0 %v7405_v38  ;;  %1885 = vmatpush1.msra.mxu1 %v7541_v22 }
 0x55c   :  { %1815 = vmatprep.subr.mxu0 %v7412_v29  ;;  %1886 = vmatprep.subr.mxu1 %v7548_v25 }
 0x55d   :  { %1816 = vmatpush1.msra.mxu0 %v7419_v8  ;;  %1887 = vmatpush1.msra.mxu1 %v7555_v26 }
 0x55e   :  { %1817 = vmatprep.subr.mxu0 %v7426_v10  ;;  %1888 = vmatprep.subr.mxu1 %v7562_v27 }
 0x55f   :  { %1818 = vmatpush1.msra.mxu0 %v7568_v28  ;;  %1889 = vmatpush1.msra.mxu1 %v7574_v32 }
 0x560   :  { %1819 = vmatprep.subr.mxu0 %v7580_v35  ;;  %1890 = vmatprep.subr.mxu1 %v7586_v46 }
 0x561   :  { %1820 = vmatpush1.msra.mxu0 %v7592_v52  ;;  %1891 = vmatpush1.msra.mxu1 %v7598_v36 }
 0x562   :  { %1821 = vmatprep.subr.mxu0 %v7604_v37  ;;  %1892 = vmatprep.subr.mxu1 %v7610_v40 }
 0x563   :  { %1822 = vmatpush1.msra.mxu0 %v7616_v43  ;;  %1893 = vmatpush1.msra.mxu1 %v7622_v44 }
 0x564   :  { %1823 = vmatprep.subr.mxu0 %v7628_v47  ;;  %1894 = vmatprep.subr.mxu1 %v7634_v48 }
 0x565   :  { %1824 = vmatpush1.msra.mxu0 %v7640_v49  ;;  %1895 = vmatpush1.msra.mxu1 %v7646_v50 }
 0x566   :  { %1825 = vmatprep.subr.mxu0 %v7652_v53  ;;  %1896 = vmatprep.subr.mxu1 %v10504_v54 }
 0x567   :  { %1826 = vmatpush1.msra.mxu0 %v10505_v59  ;;  %1897 = vmatpush1.msra.mxu1 %v10506_v17  ;;  %v10529_v17 = vld [vmem:[#allocation40_spill] sm:$0xff] }
 0x568   :  { %1827 = vmatprep.subr.mxu0 %v10507_v62  ;;  %1898 = vmatprep.subr.mxu1 %v10508_v15  ;;  %v10528_v62 = vld [vmem:[#allocation42_spill] sm:$0xff] }
 0x569   :  { %1828 = vmatpush1.msra.mxu0 %v10509_v55  ;;  %1899 = vmatpush1.msra.mxu1 %v10510_v13 }
 0x56a   :  { %1829 = vmatprep.subr.mxu0 %v10511_v60  ;;  %1900 = vmatprep.subr.mxu1 %v10512_v16  ;;  %v10522_v60 = vmov 0.0   ;;  %v10523_v16 = vld [vmem:[#allocation28_spill] sm:$0xff] }
 0x56b   :  { %1830 = vmatpush1.msra.mxu0 %v10513_v42  ;;  %1901 = vmatpush1.msra.mxu1 %v10514_v4  ;;  %v10524_v4 = vld [vmem:[#allocation3_spill] sm:$0xff] }
 0x56c   :  { %1831 = vmatprep.subr.mxu0 %v10515_v14  ;;  %1902 = vmatprep.subr.mxu1 %v10516_v2  ;;  %v10525_v14 = vld [vmem:[#allocation8_spill] sm:$0xff] }
 0x56d   :  { %1832 = vmatpush1.msra.mxu0 %v10517_v7  ;;  %1903 = vmatpush1.msra.mxu1 %v10518_v61  ;;  %v10526_v7 = vld [vmem:[#allocation39_spill] sm:$0xff] }
 0x56e   :  { %1833 = vmatprep.subr.mxu0 %v10519_v9  ;;  %1904 = vmatprep.subr.mxu1 %v10520_v56  ;;  %v10527_v9 = vld [vmem:[#allocation41_spill] sm:$0xff] }
 0x56f   :  { %1834 = vmatpush1.msra.mxu0 %v10521_v19  ;;  %1867 = vmatprep.mubr.f32.mxu0 %v10522_v60 }
 0x570   :  { %1905 = vmatpush1.msra.mxu1 %v10523_v16  ;;  %1938 = vmatprep.mubr.f32.mxu1 %v10522_v60 }
 0x571   :  { %1980 = vmatprep.subr.mxu0 %v10524_v4  ;;  %2051 = vmatprep.subr.mxu1 %v10525_v14 }
 0x610   :  { %v1692_v2 = vpop.f32.mrf.mxu0  ;;  %v1763_v56 = vpop.f32.mrf.mxu1 }
 0x611   :  { %v1768_v42 = vadd.f32 %v1692_v2, %v10526_v7  ;;  %v1770_v60 = vadd.f32 %v1763_v56, %v10529_v17 }
 0x612   :  { %v1694_v61 = vpop.f32.mrf.mxu0  ;;  %v1765_v15 = vpop.f32.mrf.mxu1 }
 0x613   :  { %v5199_v13 = vmul.f32 -1.442695, %v1768_v42  ;;  %v1769_v55 = vadd.f32 %v1694_v61, %v10527_v9  ;;  %v1771_v16 = vadd.f32 %v1765_v15, %v10528_v62 }
 0x615   :  { %5674 = vpow2.f32 %v5199_v13  ;;  %v5200_v19 = vmul.f32 -1.442695, %v1769_v55  ;;  %v5201_v59 = vmul.f32 -1.442695, %v1771_v16 }
 0x617   :  { %5676 = vpow2.f32 %v5200_v19 }
 0x618   :  { %5678 = vtanh.f32 %v1770_v60 }
 0x619   :  { %5680 = vpow2.f32 %v5201_v59 }
 0x622   :  { %v5675_v4 = vpop.eup %5674 }
 0x623   :  { %v1775_v54 = vadd.f32 1.0, %v5675_v4  ;;  %v10553_v4 = vld [vmem:[#allocation45_spill] sm:$0xff] }
 0x624   :  { %v5677_v14 = vpop.eup %5676 }
 0x625   :  { %5682 = vrcp.f32 %v1775_v54  ;;  %v1781_v2 = vadd.f32 1.0, %v5677_v14  ;;  %v5679_v42 = vpop.eup %5678 }
 0x626   :  { %v5681_v7 = vpop.eup %5680 }
 0x627   :  { %5684 = vrcp.f32 %v1781_v2  ;;  %v1788_v9 = vadd.f32 1.0, %v5681_v7 }
 0x629   :  { %5686 = vrcp.f32 %v1788_v9 }
 0x632   :  { %v5683_v13 = vpop.eup %5682 }
 0x633   :  { %v1792_v61 = vmul.f32 %v5683_v13, %v5679_v42  ;;  %v10554_v13 = vld [vmem:[#allocation46_spill] sm:$0xff] }
 0x634   :  { %v5685_v55 = vpop.eup %5684 }
 0x635   :  { %v1791_v19 = vmul.f32 %v5685_v55, %v7856_v3  ;;  %v10555_v55 = vld [vmem:[#allocation44_spill] sm:$0xff] }
 0x636   :  { %v5687_v17 = vpop.eup %5686 }
 0x637   :  { %v7934_v62 = vadd.f32 %v1792_v61, %v1791_v19 }
 0x639   :  { %5688 = vtanh.f32 %v7934_v62 }
 0x646   :  { %v5689_v15 = vpop.eup %5688 }
 0x647   :  { %v1795_v60 = vmul.f32 %v5689_v15, %v5687_v17 }
 0x649   :  { %1868 = vmatmul.mubr.f32.vlgmr.msra.gmra.mxu0 %v1795_v60  ;;  %1939 = vmatmul.mubr.f32.vlgmr.msra.gmra.mxu1 %v1795_v60  ;;  %v1796_v54 = vmul.f32 %v1795_v60, %v7503_v1 }
 0x64a   :  { %1981 = vmatpush1.msra.mxu0 %v7290_v45  ;;  %2052 = vmatpush1.msra.mxu1 %v7296_v34  ;;  %v10530_v45 = vld [vmem:[#allocation15_spill] sm:$0xff]  ;;  %v10531_v34 = vld [vmem:[#allocation9_spill] sm:$0xff] }
 0x64b   :  { %1982 = vmatprep.subr.mxu0 %v7302_v30  ;;  %2053 = vmatprep.subr.mxu1 %v7308_v18  ;;  %v7943_v3 = vadd.f32 %v1796_v54, %v7865_v23  ;;  %v10532_v30 = vld [vmem:[#allocation16_spill] sm:$0xff]  ;;  %v10533_v18 = vld [vmem:[#allocation11_spill] sm:$0xff] }
 0x64c   :  { %1983 = vmatpush1.msra.mxu0 %v7314_v6  ;;  %2054 = vmatpush1.msra.mxu1 %v7320_v0  ;;  %v10534_v6 = vld [vmem:[#allocation18_spill] sm:$0xff]  ;;  %v10535_v0 = vld [vmem:[#allocation13_spill] sm:$0xff]  ;;  %v10552_v23 = vld [vmem:[#allocation43_spill] sm:$0xff] }
 0x64d   :  { %1984 = vmatprep.subr.mxu0 %v7326_v39  ;;  %2055 = vmatprep.subr.mxu1 %v7332_v51  ;;  %v10536_v39 = vld [vmem:[#allocation20_spill] sm:$0xff]  ;;  %v10537_v51 = vld [vmem:[#allocation17_spill] sm:$0xff] }
 0x64e   :  { %1985 = vmatpush1.msra.mxu0 %v7338_v31  ;;  %2056 = vmatpush1.msra.mxu1 %v7344_v5  ;;  %v10538_v31 = vld [vmem:[#allocation21_spill] sm:$0xff]  ;;  %v10539_v5 = vld [vmem:[#allocation19_spill] sm:$0xff] }
 0x64f   :  { %1986 = vmatprep.subr.mxu0 %v7350_v57  ;;  %2057 = vmatprep.subr.mxu1 %v7356_v41  ;;  %v10540_v57 = vld [vmem:[#allocation22_spill] sm:$0xff]  ;;  %v10541_v41 = vld [vmem:[#allocation23_spill] sm:$0xff] }
 0x650   :  { %1987 = vmatpush1.msra.mxu0 %v7362_v58  ;;  %2058 = vmatpush1.msra.mxu1 %v7368_v11  ;;  %v10542_v58 = vld [vmem:[#allocation25_spill] sm:$0xff]  ;;  %v10543_v11 = vld [vmem:[#allocation26_spill] sm:$0xff] }
 0x651   :  { %1988 = vmatprep.subr.mxu0 %v7374_v33  ;;  %2059 = vmatprep.subr.mxu1 %v7380_v12  ;;  %v10544_v33 = vld [vmem:[#allocation24_spill] sm:$0xff]  ;;  %v10545_v12 = vld [vmem:[#allocation27_spill] sm:$0xff] }
 0x652   :  { %1989 = vmatpush1.msra.mxu0 %v10453_v24  ;;  %2060 = vmatpush1.msra.mxu1 %v10454_v20  ;;  %v8014_v24 = vld [vmem:[%s10141_s3 + $0x1f8] sm:$0xff] }
 0x653   :  { %1990 = vmatprep.subr.mxu0 %v7398_v63  ;;  %2061 = vmatprep.subr.mxu1 %v7534_v21  ;;  %v10548_v63 = vmov 0.0   ;;  %10551 = vst [vmem:[#allocation10_spill] sm:$0xff] %v8014_v24 }
 0x654   :  { %1991 = vmatpush1.msra.mxu0 %v7405_v38  ;;  %2062 = vmatpush1.msra.mxu1 %v7541_v22  ;;  %v10546_v38 = vld [vmem:[#allocation29_spill] sm:$0xff] }
 0x655   :  { %1992 = vmatprep.subr.mxu0 %v7412_v29  ;;  %2063 = vmatprep.subr.mxu1 %v7548_v25  ;;  %v10547_v29 = vld [vmem:[#allocation30_spill] sm:$0xff] }
 0x656   :  { %1993 = vmatpush1.msra.mxu0 %v7419_v8  ;;  %2064 = vmatpush1.msra.mxu1 %v7555_v26  ;;  %v10549_v8 = vld [vmem:[#allocation28_spill] sm:$0xff] }
 0x657   :  { %1994 = vmatprep.subr.mxu0 %v7426_v10  ;;  %2065 = vmatprep.subr.mxu1 %v7562_v27  ;;  %v8008_v10 = vld [vmem:[%s10141_s3 + $0x1e8] sm:$0xff] }
 0x658   :  { %1995 = vmatpush1.msra.mxu0 %v7568_v28  ;;  %2066 = vmatpush1.msra.mxu1 %v7574_v32  ;;  %10550 = vst [vmem:[#allocation4_spill] sm:$0xff] %v8008_v10 }
 0x659   :  { %1996 = vmatprep.subr.mxu0 %v7580_v35  ;;  %2067 = vmatprep.subr.mxu1 %v7586_v46 }
 0x65a   :  { %1997 = vmatpush1.msra.mxu0 %v7592_v52  ;;  %2068 = vmatpush1.msra.mxu1 %v7598_v36 }
 0x65b   :  { %1998 = vmatprep.subr.mxu0 %v7604_v37  ;;  %2069 = vmatprep.subr.mxu1 %v7610_v40 }
 0x65c   :  { %1999 = vmatpush1.msra.mxu0 %v7616_v43  ;;  %2070 = vmatpush1.msra.mxu1 %v7622_v44 }
 0x65d   :  { %2000 = vmatprep.subr.mxu0 %v7628_v47  ;;  %2071 = vmatprep.subr.mxu1 %v7634_v48 }
 0x65e   :  { %2001 = vmatpush1.msra.mxu0 %v7640_v49  ;;  %2072 = vmatpush1.msra.mxu1 %v7646_v50 }
 0x65f   :  { %2002 = vmatprep.subr.mxu0 %v7652_v53  ;;  %2073 = vmatprep.subr.mxu1 %v10530_v45 }
 0x660   :  { %2003 = vmatpush1.msra.mxu0 %v10531_v34  ;;  %2074 = vmatpush1.msra.mxu1 %v10532_v30 }
 0x661   :  { %2004 = vmatprep.subr.mxu0 %v10533_v18  ;;  %2075 = vmatprep.subr.mxu1 %v10534_v6 }
 0x662   :  { %2005 = vmatpush1.msra.mxu0 %v10535_v0  ;;  %2076 = vmatpush1.msra.mxu1 %v10536_v39 }
 0x663   :  { %2006 = vmatprep.subr.mxu0 %v10537_v51  ;;  %2077 = vmatprep.subr.mxu1 %v10538_v31 }
 0x664   :  { %2007 = vmatpush1.msra.mxu0 %v10539_v5  ;;  %2078 = vmatpush1.msra.mxu1 %v10540_v57 }
 0x665   :  { %2008 = vmatprep.subr.mxu0 %v10541_v41  ;;  %2079 = vmatprep.subr.mxu1 %v10542_v58 }
 0x666   :  { %2009 = vmatpush1.msra.mxu0 %v10543_v11  ;;  %2080 = vmatpush1.msra.mxu1 %v10544_v33 }
 0x667   :  { %2010 = vmatprep.subr.mxu0 %v10545_v12  ;;  %2081 = vmatprep.subr.mxu1 %v10546_v38 }
 0x668   :  { %2011 = vmatpush1.msra.mxu0 %v10547_v29  ;;  %2044 = vmatprep.mubr.f32.mxu0 %v10548_v63 }
 0x669   :  { %2082 = vmatpush1.msra.mxu1 %v10549_v8  ;;  %2115 = vmatprep.mubr.f32.mxu1 %v10548_v63 }
 0x66a   :  { %2159 = vmatprep.subr.mxu0 %v8008_v10  ;;  %2230 = vmatprep.subr.mxu1 %v8014_v24 }
 0x709   :  { %v1869_v20 = vpop.f32.mrf.mxu0  ;;  %v1940_v2 = vpop.f32.mrf.mxu1 }
 0x70a   :  { %v1945_v59 = vadd.f32 %v1869_v20, %v10552_v23  ;;  %v1947_v9 = vadd.f32 %v1940_v2, %v10555_v55  ;;  %v8029_v55 = vld [vmem:[%s10141_s3 + $0x1e0] sm:$0xff] }
 0x70b   :  { %v1871_v16 = vpop.f32.mrf.mxu0  ;;  %v1942_v7 = vpop.f32.mrf.mxu1 }
 0x70c   :  { %v5202_v56 = vmul.f32 -1.442695, %v1945_v59  ;;  %v1946_v14 = vadd.f32 %v1871_v16, %v10553_v4  ;;  %v1948_v61 = vadd.f32 %v1942_v7, %v10554_v13 }
 0x70e   :  { %5690 = vpow2.f32 %v5202_v56  ;;  %v5203_v42 = vmul.f32 -1.442695, %v1946_v14  ;;  %v5204_v19 = vmul.f32 -1.442695, %v1948_v61 }
 0x710   :  { %5692 = vpow2.f32 %v5203_v42 }
 0x711   :  { %5694 = vtanh.f32 %v1947_v9  ;;  %v8041_v9 = vld [vmem:[%s10141_s3 + $0x1c8] sm:$0xff] }
 0x712   :  { %5696 = vpow2.f32 %v5204_v19  ;;  %v8047_v19 = vld [vmem:[%s10141_s3 + $0x1d8] sm:$0xff] }
 0x71b   :  { %v5691_v17 = vpop.eup %5690 }
 0x71c   :  { %v1952_v15 = vadd.f32 1.0, %v5691_v17 }
 0x71d   :  { %v5693_v60 = vpop.eup %5692 }
 0x71e   :  { %5698 = vrcp.f32 %v1952_v15  ;;  %v1958_v54 = vadd.f32 1.0, %v5693_v60  ;;  %v5695_v20 = vpop.eup %5694  ;;  %v8056_v15 = vld [vmem:[%s10141_s3 + $0x1c0] sm:$0xff]  ;;  %v8062_v60 = vld [vmem:[%s10141_s3 + $0x1d0] sm:$0xff] }
 0x71f   :  { %v5697_v23 = vpop.eup %5696 }
 0x720   :  { %5700 = vrcp.f32 %v1958_v54  ;;  %v1965_v4 = vadd.f32 1.0, %v5697_v23  ;;  %v8068_v54 = vld [vmem:[%s10141_s3 + $0x1a8] sm:$0xff]  ;;  %v8086_v23 = vld [vmem:[%s10141_s3 + $0x1b0] sm:$0xff] }
 0x722   :  { %5702 = vrcp.f32 %v1965_v4  ;;  %v8110_v4 = vld [vmem:[%s10141_s3 + $0x190] sm:$0xff] }
 0x72b   :  { %v5699_v59 = vpop.eup %5698 }
 0x72c   :  { %v1969_v16 = vmul.f32 %v5699_v59, %v5695_v20  ;;  %v8080_v20 = vld [vmem:[%s10141_s3 + $0x1a0] sm:$0xff]  ;;  %v8092_v59 = vld [vmem:[%s10141_s3 + $0x188] sm:$0xff] }
 0x72d   :  { %v5701_v56 = vpop.eup %5700 }
 0x72e   :  { %v1968_v14 = vmul.f32 %v5701_v56, %v7934_v62  ;;  %v8035_v62 = vld [vmem:[%s10141_s3 + $0x1f0] sm:$0xff]  ;;  %v8104_v56 = vld [vmem:[%s10141_s3 + $0x180] sm:$0xff] }
 0x72f   :  { %v5703_v2 = vpop.eup %5702 }
 0x730   :  { %v8022_v42 = vadd.f32 %v1969_v16, %v1968_v14  ;;  %v8098_v16 = vld [vmem:[%s10141_s3 + $0x198] sm:$0xff]  ;;  %v8116_v14 = vld [vmem:[%s10141_s3 + $0x168] sm:$0xff] }
 0x732   :  { %5704 = vtanh.f32 %v8022_v42 }
 0x73f   :  { %v5705_v7 = vpop.eup %5704 }
 0x740   :  { %v1972_v13 = vmul.f32 %v5705_v7, %v5703_v2  ;;  %v8122_v2 = vld [vmem:[%s10141_s3 + $0x178] sm:$0xff]  ;;  %v8128_v7 = vld [vmem:[%s10141_s3 + $0x160] sm:$0xff] }
 0x741   :  { %10556 = vst [vmem:[#allocation31_spill] sm:$0xff] %v8128_v7 }
 0x742   :  { %2045 = vmatmul.mubr.f32.vlgmr.msra.gmra.mxu0 %v1972_v13  ;;  %2116 = vmatmul.mubr.f32.vlgmr.msra.gmra.mxu1 %v1972_v13  ;;  %v1973_v61 = vmul.f32 %v1972_v13, %v7503_v1  ;;  %v8134_v13 = vld [vmem:[%s10141_s3 + $0x170] sm:$0xff] }
 0x743   :  { %2160 = vmatpush1.msra.mxu0 %v8029_v55  ;;  %2231 = vmatpush1.msra.mxu1 %v8035_v62  ;;  %10557 = vst [vmem:[#allocation33_spill] sm:$0xff] %v8134_v13 }
 0x744   :  { %2161 = vmatprep.subr.mxu0 %v8041_v9  ;;  %2232 = vmatprep.subr.mxu1 %v8047_v19  ;;  %v8051_v17 = vadd.f32 %v1973_v61, %v7943_v3  ;;  %v8074_v3 = vld [vmem:[%s10141_s3 + $0x1b8] sm:$0xff]  ;;  %v8140_v61 = vld [vmem:[%s10141_s3 + $0x148] sm:$0xff] }
 0x745   :  { %2162 = vmatpush1.msra.mxu0 %v8056_v15  ;;  %2233 = vmatpush1.msra.mxu1 %v8062_v60 }
 0x746   :  { %2163 = vmatprep.subr.mxu0 %v8068_v54  ;;  %2234 = vmatprep.subr.mxu1 %v8074_v3 }
 0x747   :  { %2164 = vmatpush1.msra.mxu0 %v8080_v20  ;;  %2235 = vmatpush1.msra.mxu1 %v8086_v23 }
 0x748   :  { %2165 = vmatprep.subr.mxu0 %v8092_v59  ;;  %2236 = vmatprep.subr.mxu1 %v8098_v16 }
 0x749   :  { %2166 = vmatpush1.msra.mxu0 %v8104_v56  ;;  %2237 = vmatpush1.msra.mxu1 %v8110_v4 }
 0x74a   :  { %2167 = vmatprep.subr.mxu0 %v8116_v14  ;;  %2238 = vmatprep.subr.mxu1 %v8122_v2 }
 0x74b   :  { %2168 = vmatpush1.msra.mxu0 %v8128_v7  ;;  %2239 = vmatpush1.msra.mxu1 %v8134_v13  ;;  %v8147_v7 = vld [vmem:[%s10141_s3 + $0x140] sm:$0xff]  ;;  %v8154_v13 = vld [vmem:[%s10141_s3 + $0x128] sm:$0xff] }
 0x74c   :  { %2169 = vmatprep.subr.mxu0 %v8140_v61  ;;  %2240 = vmatprep.subr.mxu1 %v7534_v21  ;;  %v8161_v21 = vld [vmem:[%s10141_s3 + $0x120] sm:$0xff] }
 0x74d   :  { %2170 = vmatpush1.msra.mxu0 %v8147_v7  ;;  %2241 = vmatpush1.msra.mxu1 %v7541_v22  ;;  %v8168_v22 = vld [vmem:[%s10141_s3 + $0x108] sm:$0xff] }
 0x74e   :  { %2171 = vmatprep.subr.mxu0 %v8154_v13  ;;  %2242 = vmatprep.subr.mxu1 %v7548_v25 }
 0x74f   :  { %2172 = vmatpush1.msra.mxu0 %v8161_v21  ;;  %2243 = vmatpush1.msra.mxu1 %v7555_v26  ;;  %v10558_v26 = vld [vmem:[#allocation47_spill] sm:$0xff] }
 0x750   :  { %2173 = vmatprep.subr.mxu0 %v8168_v22  ;;  %2244 = vmatprep.subr.mxu1 %v7562_v27 }
 0x751   :  { %2174 = vmatpush1.msra.mxu0 %v7568_v28  ;;  %2245 = vmatpush1.msra.mxu1 %v7574_v32 }
 0x752   :  { %2175 = vmatprep.subr.mxu0 %v7580_v35  ;;  %2246 = vmatprep.subr.mxu1 %v7586_v46  ;;  %v10559_v35 = vld [vmem:[#allocation49_spill] sm:$0xff] }
 0x753   :  { %2176 = vmatpush1.msra.mxu0 %v7592_v52  ;;  %2247 = vmatpush1.msra.mxu1 %v7598_v36 }
 0x754   :  { %2177 = vmatprep.subr.mxu0 %v7604_v37  ;;  %2248 = vmatprep.subr.mxu1 %v7610_v40  ;;  %v10560_v40 = vld [vmem:[#allocation50_spill] sm:$0xff] }
 0x755   :  { %2178 = vmatpush1.msra.mxu0 %v7616_v43  ;;  %2249 = vmatpush1.msra.mxu1 %v7622_v44  ;;  %v10561_v44 = vld [vmem:[#allocation48_spill] sm:$0xff] }
 0x756   :  { %2179 = vmatprep.subr.mxu0 %v7628_v47  ;;  %2250 = vmatprep.subr.mxu1 %v7634_v48 }
 0x757   :  { %2180 = vmatpush1.msra.mxu0 %v7640_v49  ;;  %2251 = vmatpush1.msra.mxu1 %v7646_v50 }
 0x758   :  { %2181 = vmatprep.subr.mxu0 %v7652_v53  ;;  %2252 = vmatprep.subr.mxu1 %v10530_v45 }
 0x759   :  { %2182 = vmatpush1.msra.mxu0 %v10531_v34  ;;  %2253 = vmatpush1.msra.mxu1 %v10532_v30  ;;  %v10562_v34 = vld [vmem:[#allocation5_spill] sm:$0xff] }
 0x75a   :  { %2183 = vmatprep.subr.mxu0 %v10533_v18  ;;  %2254 = vmatprep.subr.mxu1 %v10534_v6  ;;  %vm653_vm13 = vcmp.ge.s32.totalorder %v10562_v34, 32  ;;  %vm654_vm14 = vcmp.lt.s32.totalorder %v10562_v34, 48  ;;  %vm649_vm15 = vcmp.lt.s32.totalorder %v10562_v34, 16  ;;  %v8369_v34 = vld [vmem:[%s10141_s3 + $0xb0] sm:$0xff] }
 0x75b   :  { %2184 = vmatpush1.msra.mxu0 %v10535_v0  ;;  %2255 = vmatpush1.msra.mxu1 %v10536_v39  ;;  %vm655_vm1 = vmand %vm653_vm13, %vm654_vm14  ;;  %v8218_v30 = vsel %vm649_vm15, 1.0, %v10548_v63 }
 0x75c   :  { %2185 = vmatprep.subr.mxu0 %v10537_v51  ;;  %2256 = vmatprep.subr.mxu1 %v10538_v31  ;;  %10563 = vst [vmem:[#allocation34_spill] sm:$0xff] %v8218_v30  ;;  %v8221_v18 = vsel %vm655_vm1, 1.0, %v10548_v63 }
 0x75d   :  { %2186 = vmatpush1.msra.mxu0 %v10539_v5  ;;  %2257 = vmatpush1.msra.mxu1 %v10540_v57  ;;  %10564 = vst [vmem:[#allocation32_spill] sm:$0xff] %v8221_v18  ;;  %v8225_v39 = vadd.f32 %v8221_v18, %v8218_v30  ;;  %v8459_v18 = vld [vmem:[%s10141_s3 + $0x20] sm:$0xff]  ;;  %v8465_v30 = vld [vmem:[%s10141_s3 + $0x30] sm:$0xff] }
 0x75e   :  { %2187 = vmatprep.subr.mxu0 %v10541_v41  ;;  %2258 = vmatprep.subr.mxu1 %v10542_v58  ;;  %10580 = vst [vmem:[#allocation11_spill] sm:$0xff] %v8459_v18  ;;  %10581 = vst [vmem:[#allocation18_spill] sm:$0xff] %v8465_v30 }
 0x75f   :  { %2188 = vmatpush1.msra.mxu0 %v10543_v11  ;;  %2259 = vmatpush1.msra.mxu1 %v10544_v33  ;;  %v660_v41 = vsub.f32 1.0, %v8225_v39 }
 0x760   :  { %2189 = vmatprep.subr.mxu0 %v10545_v12  ;;  %2260 = vmatprep.subr.mxu1 %v10546_v38 }
 0x761   :  { %2190 = vmatpush1.msra.mxu0 %v10547_v29  ;;  %2223 = vmatprep.mubr.f32.mxu0 %v10548_v63 }
 0x762   :  { %2261 = vmatpush1.msra.mxu1 %v10549_v8  ;;  %2294 = vmatprep.mubr.f32.mxu1 %v10548_v63 }
 0x763   :  { %2336 = vmatprep.subr.mxu0 %v8008_v10  ;;  %2407 = vmatprep.subr.mxu1 %v8014_v24 }
 0x802   :  { %v2046_v25 = vpop.f32.mrf.mxu0  ;;  %v2117_v52 = vpop.f32.mrf.mxu1 }
 0x803   :  { %v2122_v27 = vadd.f32 %v2046_v25, %v10558_v26  ;;  %v2124_v47 = vadd.f32 %v2117_v52, %v10561_v44  ;;  %v8297_v52 = vld [vmem:[%s10141_s3 + $0x110] sm:$0xff]  ;;  %v8327_v44 = vld [vmem:[%s10141_s3 + $0xc8] sm:$0xff] }
 0x804   :  { %v2048_v28 = vpop.f32.mrf.mxu0  ;;  %v2119_v37 = vpop.f32.mrf.mxu1 }
 0x805   :  { %v5205_v32 = vmul.f32 -1.442695, %v2122_v27  ;;  %v2123_v46 = vadd.f32 %v2048_v28, %v10559_v35  ;;  %v2125_v43 = vadd.f32 %v2119_v37, %v10560_v40  ;;  %v8264_v27 = vld [vmem:[%s10141_s3 + $0x150] sm:$0xff]  ;;  %v8271_v28 = vld [vmem:[%s10141_s3 + $0x138] sm:$0xff]  ;;  %v8315_v40 = vld [vmem:[%s10141_s3 + $0xe0] sm:$0xff] }
 0x806   :  { %v8285_v35 = vld [vmem:[%s10141_s3 + $0x118] sm:$0xff] }
 0x807   :  { %5706 = vpow2.f32 %v5205_v32  ;;  %v5206_v36 = vmul.f32 -1.442695, %v2123_v46  ;;  %v5207_v48 = vmul.f32 -1.442695, %v2125_v43  ;;  %v8278_v32 = vld [vmem:[%s10141_s3 + $0x130] sm:$0xff]  ;;  %v8291_v46 = vld [vmem:[%s10141_s3 + $0x100] sm:$0xff] }
 0x808   :  { %v8309_v37 = vld [vmem:[%s10141_s3 + $0xf8] sm:$0xff]  ;;  %v8321_v43 = vld [vmem:[%s10141_s3 + $0xf0] sm:$0xff] }
 0x809   :  { %5708 = vpow2.f32 %v5206_v36  ;;  %v8303_v36 = vld [vmem:[%s10141_s3 + $0xe8] sm:$0xff] }
 0x80a   :  { %5710 = vtanh.f32 %v2124_v47  ;;  %v8333_v47 = vld [vmem:[%s10141_s3 + $0xd8] sm:$0xff] }
 0x80b   :  { %5712 = vpow2.f32 %v5207_v48  ;;  %v8339_v48 = vld [vmem:[%s10141_s3 + $0xc0] sm:$0xff] }
 0x814   :  { %v5707_v49 = vpop.eup %5706 }
 0x815   :  { %v2129_v50 = vadd.f32 1.0, %v5707_v49  ;;  %v8345_v49 = vld [vmem:[%s10141_s3 + $0xd0] sm:$0xff] }
 0x816   :  { %v5709_v53 = vpop.eup %5708 }
 0x817   :  { %5714 = vrcp.f32 %v2129_v50  ;;  %v2135_v45 = vadd.f32 1.0, %v5709_v53  ;;  %v5711_v6 = vpop.eup %5710  ;;  %v8351_v50 = vld [vmem:[%s10141_s3 + $0xa8] sm:$0xff]  ;;  %v8357_v53 = vld [vmem:[%s10141_s3 + $0xb8] sm:$0xff] }
 0x818   :  { %v5713_v0 = vpop.eup %5712 }
 0x819   :  { %5716 = vrcp.f32 %v2135_v45  ;;  %v2142_v57 = vadd.f32 1.0, %v5713_v0  ;;  %v8363_v45 = vld [vmem:[%s10141_s3 + $0xa0] sm:$0xff]  ;;  %v8381_v0 = vld [vmem:[%s10141_s3 + $0x98] sm:$0xff] }
 0x81a   :  { %10567 = vst [vmem:[#allocation35_spill] sm:$0xff] %v8381_v0 }
 0x81b   :  { %5718 = vrcp.f32 %v2142_v57  ;;  %v8405_v57 = vld [vmem:[%s10141_s3 + $0x78] sm:$0xff] }
 0x81c   :  { %10571 = vst [vmem:[#allocation3_spill] sm:$0xff] %v8405_v57 }
 0x824   :  { %v5715_v51 = vpop.eup %5714 }
 0x825   :  { %v2146_v31 = vmul.f32 %v5715_v51, %v5711_v6  ;;  %v8375_v6 = vld [vmem:[%s10141_s3 + $0x88] sm:$0xff]  ;;  %v8387_v51 = vld [vmem:[%s10141_s3 + $0x80] sm:$0xff] }
 0x826   :  { %v5717_v5 = vpop.eup %5716  ;;  %10568 = vst [vmem:[#allocation37_spill] sm:$0xff] %v8387_v51 }
 0x827   :  { %v2145_v58 = vmul.f32 %v5717_v5, %v8022_v42  ;;  %v10566_v42 = vld [vmem:[#allocation33_spill] sm:$0xff]  ;;  %v8399_v5 = vld [vmem:[%s10141_s3 + $0x68] sm:$0xff] }
 0x828   :  { %v5719_v12 = vpop.eup %5718  ;;  %10570 = vst [vmem:[#allocation36_spill] sm:$0xff] %v8399_v5 }
 0x829   :  { %v2147_v11 = vadd.f32 %v2146_v31, %v2145_v58  ;;  %v8393_v31 = vld [vmem:[%s10141_s3 + $0x90] sm:$0xff] }
 0x82a   :  { %10569 = vst [vmem:[#allocation38_spill] sm:$0xff] %v8393_v31  ;;  %v8417_v58 = vld [vmem:[%s10141_s3 + $0x70] sm:$0xff] }
 0x82b   :  { %5720 = vtanh.f32 %v2147_v11  ;;  %v8229_v33 = vmul.f32 %v2147_v11, %v660_v41  ;;  %10573 = vst [vmem:[#allocation39_spill] sm:$0xff] %v8417_v58  ;;  %v8423_v11 = vld [vmem:[%s10141_s3 + $0x48] sm:$0xff] }
 0x82c   :  { %10574 = vst [vmem:[#allocation41_spill] sm:$0xff] %v8423_v11 }
 0x838   :  { %v5721_v38 = vpop.eup %5720 }
 0x839   :  { %v2149_v29 = vmul.f32 %v5721_v38, %v5719_v12  ;;  %v8429_v12 = vld [vmem:[%s10141_s3 + $0x58] sm:$0xff]  ;;  %v8435_v38 = vld [vmem:[%s10141_s3 + $0x40] sm:$0xff] }
 0x83a   :  { %10575 = vst [vmem:[#allocation42_spill] sm:$0xff] %v8429_v12  ;;  %10576 = vst [vmem:[#allocation40_spill] sm:$0xff] %v8435_v38 }
 0x83b   :  { %v2152_v8 = vmul.f32 %v2149_v29, %v660_v41  ;;  %v2150_v25 = vmul.f32 %v2149_v29, %v7503_v1  ;;  %v10565_v1 = vld [vmem:[#allocation31_spill] sm:$0xff]  ;;  %v8441_v29 = vld [vmem:[%s10141_s3 + $0x50] sm:$0xff] }
 0x83c   :  { %v8411_v41 = vld [vmem:[%s10141_s3 + $0x60] sm:$0xff]  ;;  %10577 = vst [vmem:[#allocation15_spill] sm:$0xff] %v8441_v29 }
 0x83d   :  { %2224 = vmatmul.mubr.f32.vlgmr.msra.gmra.mxu0 %v2152_v8  ;;  %2295 = vmatmul.mubr.f32.vlgmr.msra.gmra.mxu1 %v2152_v8  ;;  %v8233_v26 = vadd.f32 %v2150_v25, %v8051_v17  ;;  %v8257_v17 = vld [vmem:[%s10141_s3 + $0x158] sm:$0xff]  ;;  %10572 = vst [vmem:[#allocation8_spill] sm:$0xff] %v8411_v41  ;;  %v8447_v8 = vld [vmem:[%s10141_s3 + $0x28] sm:$0xff] }
 0x83e   :  { %2337 = vmatpush1.msra.mxu0 %v8029_v55  ;;  %2408 = vmatpush1.msra.mxu1 %v8035_v62  ;;  %10578 = vst [vmem:[#allocation9_spill] sm:$0xff] %v8447_v8  ;;  %v8453_v25 = vld [vmem:[%s10141_s3 + $0x38] sm:$0xff] }
 0x83f   :  { %2338 = vmatprep.subr.mxu0 %v8041_v9  ;;  %2409 = vmatprep.subr.mxu1 %v8047_v19  ;;  %10579 = vst [vmem:[#allocation16_spill] sm:$0xff] %v8453_v25 }
 0x840   :  { %2339 = vmatpush1.msra.mxu0 %v8056_v15  ;;  %2410 = vmatpush1.msra.mxu1 %v8062_v60 }
 0x841   :  { %2340 = vmatprep.subr.mxu0 %v8068_v54  ;;  %2411 = vmatprep.subr.mxu1 %v8074_v3 }
 0x842   :  { %2341 = vmatpush1.msra.mxu0 %v8080_v20  ;;  %2412 = vmatpush1.msra.mxu1 %v8086_v23 }
 0x843   :  { %2342 = vmatprep.subr.mxu0 %v8092_v59  ;;  %2413 = vmatprep.subr.mxu1 %v8098_v16 }
 0x844   :  { %2343 = vmatpush1.msra.mxu0 %v8104_v56  ;;  %2414 = vmatpush1.msra.mxu1 %v8110_v4 }
 0x845   :  { %2344 = vmatprep.subr.mxu0 %v8116_v14  ;;  %2415 = vmatprep.subr.mxu1 %v8122_v2 }
 0x846   :  { %2345 = vmatpush1.msra.mxu0 %v10565_v1  ;;  %2416 = vmatpush1.msra.mxu1 %v10566_v42 }
 0x847   :  { %2346 = vmatprep.subr.mxu0 %v8140_v61  ;;  %2417 = vmatprep.subr.mxu1 %v8257_v17 }
 0x848   :  { %2347 = vmatpush1.msra.mxu0 %v8147_v7  ;;  %2418 = vmatpush1.msra.mxu1 %v8264_v27 }
 0x849   :  { %2348 = vmatprep.subr.mxu0 %v8154_v13  ;;  %2419 = vmatprep.subr.mxu1 %v8271_v28 }
 0x84a   :  { %2349 = vmatpush1.msra.mxu0 %v8161_v21  ;;  %2420 = vmatpush1.msra.mxu1 %v8278_v32 }
 0x84b   :  { %2350 = vmatprep.subr.mxu0 %v8168_v22  ;;  %2421 = vmatprep.subr.mxu1 %v8285_v35 }
 0x84c   :  { %2351 = vmatpush1.msra.mxu0 %v8291_v46  ;;  %2422 = vmatpush1.msra.mxu1 %v8297_v52 }
 0x84d   :  { %2352 = vmatprep.subr.mxu0 %v8303_v36  ;;  %2423 = vmatprep.subr.mxu1 %v8309_v37 }
 0x84e   :  { %2353 = vmatpush1.msra.mxu0 %v8315_v40  ;;  %2424 = vmatpush1.msra.mxu1 %v8321_v43 }
 0x84f   :  { %2354 = vmatprep.subr.mxu0 %v8327_v44  ;;  %2425 = vmatprep.subr.mxu1 %v8333_v47 }
 0x850   :  { %2355 = vmatpush1.msra.mxu0 %v8339_v48  ;;  %2426 = vmatpush1.msra.mxu1 %v8345_v49 }
 0x851   :  { %2356 = vmatprep.subr.mxu0 %v8351_v50  ;;  %2427 = vmatprep.subr.mxu1 %v8357_v53 }
 0x852   :  { %2357 = vmatpush1.msra.mxu0 %v8363_v45  ;;  %2428 = vmatpush1.msra.mxu1 %v8369_v34 }
 0x853   :  { %2358 = vmatprep.subr.mxu0 %v8375_v6  ;;  %2429 = vmatprep.subr.mxu1 %v8381_v0 }
 0x854   :  { %2359 = vmatpush1.msra.mxu0 %v8387_v51  ;;  %2430 = vmatpush1.msra.mxu1 %v8393_v31  ;;  %v10589_v31 = vld [vmem:[#allocation52_spill] sm:$0xff] }
 0x855   :  { %2360 = vmatprep.subr.mxu0 %v8399_v5  ;;  %2431 = vmatprep.subr.mxu1 %v8405_v57  ;;  %v10588_v5 = vld [vmem:[#allocation54_spill] sm:$0xff] }
 0x856   :  { %2361 = vmatpush1.msra.mxu0 %v8411_v41  ;;  %2432 = vmatpush1.msra.mxu1 %v8417_v58 }
 0x857   :  { %2362 = vmatprep.subr.mxu0 %v8423_v11  ;;  %2433 = vmatprep.subr.mxu1 %v8429_v12  ;;  %v10587_v12 = vld [vmem:[#allocation53_spill] sm:$0xff] }
 0x858   :  { %2363 = vmatpush1.msra.mxu0 %v8435_v38  ;;  %2434 = vmatpush1.msra.mxu1 %v8441_v29 }
 0x859   :  { %2364 = vmatprep.subr.mxu0 %v8447_v8  ;;  %2435 = vmatprep.subr.mxu1 %v8453_v25  ;;  %v8471_v8 = vld [vmem:[%s10141_s3 + $0x8] sm:$0xff]  ;;  %v8477_v25 = vld [vmem:[%s10141_s3 + $0x18] sm:$0xff] }
 0x85a   :  { %2365 = vmatpush1.msra.mxu0 %v8459_v18  ;;  %2436 = vmatpush1.msra.mxu1 %v8465_v30  ;;  %10582 = vst [vmem:[#allocation13_spill] sm:$0xff] %v8471_v8  ;;  %10583 = vst [vmem:[#allocation20_spill] sm:$0xff] %v8477_v25  ;;  %v8483_v18 = vld [vmem:[%s10141_s3] sm:$0xff] }
 0x85b   :  { %2366 = vmatprep.subr.mxu0 %v8471_v8  ;;  %2437 = vmatprep.subr.mxu1 %v8477_v25  ;;  %10584 = vst [vmem:[#allocation17_spill] sm:$0xff] %v8483_v18  ;;  %v8490_v8 = vld [vmem:[%s10141_s3 + $0x10] sm:$0xff]  ;;  %v10586_v30 = vld [vmem:[#allocation51_spill] sm:$0xff] }
 0x85c   :  { %2367 = vmatpush1.msra.mxu0 %v8483_v18  ;;  %2400 = vmatprep.mubr.f32.mxu0 %v10548_v63  ;;  %10585 = vst [vmem:[#allocation21_spill] sm:$0xff] %v8490_v8 }
 0x85d   :  { %2438 = vmatpush1.msra.mxu1 %v8490_v8  ;;  %2471 = vmatprep.mubr.f32.mxu1 %v10548_v63 }
 0x85e   :  { %2513 = vmatprep.subr.mxu0 %v8008_v10  ;;  %2584 = vmatprep.subr.mxu1 %v8014_v24 }
 0x8fd   :  { %v2225_v25 = vpop.f32.mrf.mxu0  ;;  %v2296_v58 = vpop.f32.mrf.mxu1 }
 0x8fe   :  { %v2301_v29 = vadd.f32 %v2225_v25, %v10586_v30  ;;  %v2303_v63 = vadd.f32 %v2296_v58, %v10589_v31  ;;  %v10594_v58 = vld [vmem:[#allocation37_spill] sm:$0xff] }
 0x8ff   :  { %v2227_v38 = vpop.f32.mrf.mxu0  ;;  %v2298_v57 = vpop.f32.mrf.mxu1 }
 0x900   :  { %v5208_v18 = vmul.f32 -1.442695, %v2301_v29  ;;  %v2302_v11 = vadd.f32 %v2227_v38, %v10587_v12  ;;  %v2304_v8 = vadd.f32 %v2298_v57, %v10588_v5 }
 0x902   :  { %5722 = vpow2.f32 %v5208_v18  ;;  %v5209_v41 = vmul.f32 -1.442695, %v2302_v11  ;;  %v5210_v51 = vmul.f32 -1.442695, %v2304_v8  ;;  %v10595_v8 = vld [vmem:[#allocation38_spill] sm:$0xff] }
 0x904   :  { %5724 = vpow2.f32 %v5209_v41 }
 0x905   :  { %5726 = vtanh.f32 %v2303_v63 }
 0x906   :  { %5728 = vpow2.f32 %v5210_v51 }
 0x90f   :  { %v5723_v10 = vpop.eup %5722 }
 0x910   :  { %v2308_v0 = vadd.f32 1.0, %v5723_v10  ;;  %v10590_v10 = vld [vmem:[#allocation14_spill] sm:$0xff] }
 0x911   :  { %v5725_v24 = vpop.eup %5724  ;;  %v8506_v63 = vadd.f32 %v8225_v39, %v10590_v10  ;;  %v10610_v10 = vld [vmem:[#allocation17_spill] sm:$0xff] }
 0x912   :  { %5730 = vrcp.f32 %v2308_v0  ;;  %v2314_v30 = vadd.f32 1.0, %v5725_v24  ;;  %v5727_v29 = vpop.eup %5726  ;;  %v10592_v24 = vld [vmem:[#allocation7_spill] sm:$0xff] }
 0x913   :  { %v5729_v12 = vpop.eup %5728  ;;  %10591 = vst [vmem:[#allocation19_spill] sm:$0xff] %v8506_v63  ;;  %v8510_v51 = vadd.f32 %v8506_v63, %v10592_v24  ;;  %v10608_v63 = vld [vmem:[#allocation13_spill] sm:$0xff]  ;;  %v10609_v24 = vld [vmem:[#allocation20_spill] sm:$0xff] }
 0x914   :  { %5732 = vrcp.f32 %v2314_v30  ;;  %v2321_v41 = vadd.f32 1.0, %v5729_v12  ;;  %v10596_v30 = vld [vmem:[#allocation36_spill] sm:$0xff] }
 0x915   :  { %v10598_v12 = vld [vmem:[#allocation8_spill] sm:$0xff] }
 0x916   :  { %5734 = vrcp.f32 %v2321_v41  ;;  %v10602_v41 = vld [vmem:[#allocation40_spill] sm:$0xff] }
 0x91f   :  { %v5731_v18 = vpop.eup %5730 }
 0x920   :  { %v2325_v38 = vmul.f32 %v5731_v18, %v5727_v29  ;;  %v10597_v29 = vld [vmem:[#allocation3_spill] sm:$0xff] }
 0x921   :  { %v5733_v11 = vpop.eup %5732  ;;  %v10599_v18 = vld [vmem:[#allocation39_spill] sm:$0xff] }
 0x922   :  { %v2324_v25 = vmul.f32 %v5733_v11, %v8229_v33  ;;  %v10601_v11 = vld [vmem:[#allocation42_spill] sm:$0xff] }
 0x923   :  { %v5735_v0 = vpop.eup %5734 }
 0x924   :  { %v8501_v5 = vadd.f32 %v2325_v38, %v2324_v25  ;;  %v10600_v38 = vld [vmem:[#allocation41_spill] sm:$0xff]  ;;  %v10603_v25 = vld [vmem:[#allocation15_spill] sm:$0xff] }
 0x926   :  { %5736 = vtanh.f32 %v8501_v5 }
 0x933   :  { %v5737_v31 = vpop.eup %5736 }
 0x934   :  { %v2328_v57 = vmul.f32 %v5737_v31, %v5735_v0  ;;  %v10604_v0 = vld [vmem:[#allocation9_spill] sm:$0xff]  ;;  %v10605_v31 = vld [vmem:[#allocation16_spill] sm:$0xff] }
 0x936   :  { %2401 = vmatmul.mubr.f32.vlgmr.msra.gmra.mxu0 %v2328_v57  ;;  %2472 = vmatmul.mubr.f32.vlgmr.msra.gmra.mxu1 %v2328_v57  ;;  %v2329_v33 = vmul.f32 %v2328_v57, %v8510_v51  ;;  %v10606_v57 = vld [vmem:[#allocation11_spill] sm:$0xff] }
 0x937   :  { %2514 = vmatpush1.msra.mxu0 %v8029_v55  ;;  %2585 = vmatpush1.msra.mxu1 %v8035_v62 }
 0x938   :  { %2515 = vmatprep.subr.mxu0 %v8041_v9  ;;  %2586 = vmatprep.subr.mxu1 %v8047_v19  ;;  %v8518_v39 = vadd.f32 %v2329_v33, %v8233_v26  ;;  %v10593_v26 = vld [vmem:[#allocation35_spill] sm:$0xff]  ;;  %v10607_v33 = vld [vmem:[#allocation18_spill] sm:$0xff] }
 0x939   :  { %2516 = vmatpush1.msra.mxu0 %v8056_v15  ;;  %2587 = vmatpush1.msra.mxu1 %v8062_v60 }
 0x93a   :  { %2517 = vmatprep.subr.mxu0 %v8068_v54  ;;  %2588 = vmatprep.subr.mxu1 %v8074_v3 }
 0x93b   :  { %2518 = vmatpush1.msra.mxu0 %v8080_v20  ;;  %2589 = vmatpush1.msra.mxu1 %v8086_v23 }
 0x93c   :  { %2519 = vmatprep.subr.mxu0 %v8092_v59  ;;  %2590 = vmatprep.subr.mxu1 %v8098_v16 }
 0x93d   :  { %2520 = vmatpush1.msra.mxu0 %v8104_v56  ;;  %2591 = vmatpush1.msra.mxu1 %v8110_v4 }
 0x93e   :  { %2521 = vmatprep.subr.mxu0 %v8116_v14  ;;  %2592 = vmatprep.subr.mxu1 %v8122_v2 }
 0x93f   :  { %2522 = vmatpush1.msra.mxu0 %v10565_v1  ;;  %2593 = vmatpush1.msra.mxu1 %v10566_v42 }
 0x940   :  { %2523 = vmatprep.subr.mxu0 %v8140_v61  ;;  %2594 = vmatprep.subr.mxu1 %v8257_v17 }
 0x941   :  { %2524 = vmatpush1.msra.mxu0 %v8147_v7  ;;  %2595 = vmatpush1.msra.mxu1 %v8264_v27 }
 0x942   :  { %2525 = vmatprep.subr.mxu0 %v8154_v13  ;;  %2596 = vmatprep.subr.mxu1 %v8271_v28 }
 0x943   :  { %2526 = vmatpush1.msra.mxu0 %v8161_v21  ;;  %2597 = vmatpush1.msra.mxu1 %v8278_v32 }
 0x944   :  { %2527 = vmatprep.subr.mxu0 %v8168_v22  ;;  %2598 = vmatprep.subr.mxu1 %v8285_v35 }
 0x945   :  { %2528 = vmatpush1.msra.mxu0 %v8291_v46  ;;  %2599 = vmatpush1.msra.mxu1 %v8297_v52 }
 0x946   :  { %2529 = vmatprep.subr.mxu0 %v8303_v36  ;;  %2600 = vmatprep.subr.mxu1 %v8309_v37 }
 0x947   :  { %2530 = vmatpush1.msra.mxu0 %v8315_v40  ;;  %2601 = vmatpush1.msra.mxu1 %v8321_v43 }
 0x948   :  { %2531 = vmatprep.subr.mxu0 %v8327_v44  ;;  %2602 = vmatprep.subr.mxu1 %v8333_v47 }
 0x949   :  { %2532 = vmatpush1.msra.mxu0 %v8339_v48  ;;  %2603 = vmatpush1.msra.mxu1 %v8345_v49 }
 0x94a   :  { %2533 = vmatprep.subr.mxu0 %v8351_v50  ;;  %2604 = vmatprep.subr.mxu1 %v8357_v53 }
 0x94b   :  { %2534 = vmatpush1.msra.mxu0 %v8363_v45  ;;  %2605 = vmatpush1.msra.mxu1 %v8369_v34 }
 0x94c   :  { %2535 = vmatprep.subr.mxu0 %v8375_v6  ;;  %2606 = vmatprep.subr.mxu1 %v10593_v26 }
 0x94d   :  { %2536 = vmatpush1.msra.mxu0 %v10594_v58  ;;  %2607 = vmatpush1.msra.mxu1 %v10595_v8  ;;  %v10618_v8 = vld [vmem:[#allocation56_spill] sm:$0xff] }
 0x94e   :  { %2537 = vmatprep.subr.mxu0 %v10596_v30  ;;  %2608 = vmatprep.subr.mxu1 %v10597_v29  ;;  %v10617_v30 = vld [vmem:[#allocation58_spill] sm:$0xff] }
 0x94f   :  { %2538 = vmatpush1.msra.mxu0 %v10598_v12  ;;  %2609 = vmatpush1.msra.mxu1 %v10599_v18 }
 0x950   :  { %2539 = vmatprep.subr.mxu0 %v10600_v38  ;;  %2610 = vmatprep.subr.mxu1 %v10601_v11  ;;  %v10611_v38 = vmov 0.0   ;;  %v10612_v11 = vld [vmem:[#allocation21_spill] sm:$0xff] }
 0x951   :  { %2540 = vmatpush1.msra.mxu0 %v10602_v41  ;;  %2611 = vmatpush1.msra.mxu1 %v10603_v25  ;;  %v10613_v25 = vld [vmem:[#allocation4_spill] sm:$0xff] }
 0x952   :  { %2541 = vmatprep.subr.mxu0 %v10604_v0  ;;  %2612 = vmatprep.subr.mxu1 %v10605_v31  ;;  %v10614_v0 = vld [vmem:[#allocation10_spill] sm:$0xff] }
 0x953   :  { %2542 = vmatpush1.msra.mxu0 %v10606_v57  ;;  %2613 = vmatpush1.msra.mxu1 %v10607_v33  ;;  %v10615_v57 = vld [vmem:[#allocation55_spill] sm:$0xff] }
 0x954   :  { %2543 = vmatprep.subr.mxu0 %v10608_v63  ;;  %2614 = vmatprep.subr.mxu1 %v10609_v24  ;;  %v10616_v63 = vld [vmem:[#allocation57_spill] sm:$0xff] }
 0x955   :  { %2544 = vmatpush1.msra.mxu0 %v10610_v10  ;;  %2577 = vmatprep.mubr.f32.mxu0 %v10611_v38 }
 0x956   :  { %2615 = vmatpush1.msra.mxu1 %v10612_v11  ;;  %2648 = vmatprep.mubr.f32.mxu1 %v10611_v38 }
 0x957   :  { %2690 = vmatprep.subr.mxu0 %v10613_v25  ;;  %2761 = vmatprep.subr.mxu1 %v10614_v0 }
 0x9f6   :  { %v2402_v31 = vpop.f32.mrf.mxu0  ;;  %v2473_v24 = vpop.f32.mrf.mxu1 }
 0x9f7   :  { %v2478_v41 = vadd.f32 %v2402_v31, %v10615_v57  ;;  %v2480_v38 = vadd.f32 %v2473_v24, %v10618_v8 }
 0x9f8   :  { %v2404_v33 = vpop.f32.mrf.mxu0  ;;  %v2475_v29 = vpop.f32.mrf.mxu1 }
 0x9f9   :  { %v5211_v18 = vmul.f32 -1.442695, %v2478_v41  ;;  %v2479_v12 = vadd.f32 %v2404_v33, %v10616_v63  ;;  %v2481_v11 = vadd.f32 %v2475_v29, %v10617_v30 }
 0x9fb   :  { %5738 = vpow2.f32 %v5211_v18  ;;  %v5212_v10 = vmul.f32 -1.442695, %v2479_v12  ;;  %v5213_v58 = vmul.f32 -1.442695, %v2481_v11  ;;  %v10622_v11 = vld [vmem:[#allocation36_spill] sm:$0xff] }
 0x9fd   :  { %5740 = vpow2.f32 %v5212_v10 }
 0x9fe   :  { %5742 = vtanh.f32 %v2480_v38  ;;  %v10621_v38 = vld [vmem:[#allocation38_spill] sm:$0xff] }
 0x9ff   :  { %5744 = vpow2.f32 %v5213_v58  ;;  %v10620_v58 = vld [vmem:[#allocation37_spill] sm:$0xff] }
 0xa08   :  { %v5739_v25 = vpop.eup %5738 }
 0xa09   :  { %v2485_v26 = vadd.f32 1.0, %v5739_v25  ;;  %v10623_v25 = vld [vmem:[#allocation3_spill] sm:$0xff] }
 0xa0a   :  { %v5741_v0 = vpop.eup %5740 }
 0xa0b   :  { %5746 = vrcp.f32 %v2485_v26  ;;  %v2491_v31 = vadd.f32 1.0, %v5741_v0  ;;  %v5743_v41 = vpop.eup %5742  ;;  %v10624_v0 = vld [vmem:[#allocation8_spill] sm:$0xff] }
 0xa0c   :  { %v5745_v63 = vpop.eup %5744 }
 0xa0d   :  { %5748 = vrcp.f32 %v2491_v31  ;;  %v2498_v10 = vadd.f32 1.0, %v5745_v63  ;;  %v10625_v31 = vld [vmem:[#allocation39_spill] sm:$0xff]  ;;  %v10627_v63 = vld [vmem:[#allocation42_spill] sm:$0xff] }
 0xa0f   :  { %5750 = vrcp.f32 %v2498_v10  ;;  %v10631_v10 = vld [vmem:[#allocation16_spill] sm:$0xff] }
 0xa18   :  { %v5747_v18 = vpop.eup %5746 }
 0xa19   :  { %v2502_v57 = vmul.f32 %v5747_v18, %v5743_v41  ;;  %v10626_v41 = vld [vmem:[#allocation41_spill] sm:$0xff]  ;;  %v10628_v18 = vld [vmem:[#allocation40_spill] sm:$0xff] }
 0xa1a   :  { %v5749_v12 = vpop.eup %5748 }
 0xa1b   :  { %v2501_v33 = vmul.f32 %v5749_v12, %v8501_v5  ;;  %v10630_v12 = vld [vmem:[#allocation9_spill] sm:$0xff] }
 0xa1c   :  { %v5751_v24 = vpop.eup %5750 }
 0xa1d   :  { %v8587_v30 = vadd.f32 %v2502_v57, %v2501_v33  ;;  %v10629_v57 = vld [vmem:[#allocation15_spill] sm:$0xff] }
 0xa1e   :  { %v10632_v33 = vld [vmem:[#allocation11_spill] sm:$0xff] }
 0xa1f   :  { %5752 = vtanh.f32 %v8587_v30 }
 0xa2c   :  { %v5753_v8 = vpop.eup %5752 }
 0xa2d   :  { %v2505_v29 = vmul.f32 %v5753_v8, %v5751_v24  ;;  %v10633_v24 = vld [vmem:[#allocation18_spill] sm:$0xff]  ;;  %v10634_v8 = vld [vmem:[#allocation13_spill] sm:$0xff] }
 0xa2f   :  { %2578 = vmatmul.mubr.f32.vlgmr.msra.gmra.mxu0 %v2505_v29  ;;  %2649 = vmatmul.mubr.f32.vlgmr.msra.gmra.mxu1 %v2505_v29  ;;  %v2506_v26 = vmul.f32 %v2505_v29, %v8510_v51  ;;  %v10635_v29 = vld [vmem:[#allocation20_spill] sm:$0xff] }
 0xa30   :  { %2691 = vmatpush1.msra.mxu0 %v8029_v55  ;;  %2762 = vmatpush1.msra.mxu1 %v8035_v62 }
 0xa31   :  { %2692 = vmatprep.subr.mxu0 %v8041_v9  ;;  %2763 = vmatprep.subr.mxu1 %v8047_v19  ;;  %v8596_v5 = vadd.f32 %v2506_v26, %v8518_v39  ;;  %v10619_v39 = vld [vmem:[#allocation35_spill] sm:$0xff]  ;;  %v10636_v26 = vld [vmem:[#allocation17_spill] sm:$0xff] }
 0xa32   :  { %2693 = vmatpush1.msra.mxu0 %v8056_v15  ;;  %2764 = vmatpush1.msra.mxu1 %v8062_v60 }
 0xa33   :  { %2694 = vmatprep.subr.mxu0 %v8068_v54  ;;  %2765 = vmatprep.subr.mxu1 %v8074_v3 }
 0xa34   :  { %2695 = vmatpush1.msra.mxu0 %v8080_v20  ;;  %2766 = vmatpush1.msra.mxu1 %v8086_v23 }
 0xa35   :  { %2696 = vmatprep.subr.mxu0 %v8092_v59  ;;  %2767 = vmatprep.subr.mxu1 %v8098_v16 }
 0xa36   :  { %2697 = vmatpush1.msra.mxu0 %v8104_v56  ;;  %2768 = vmatpush1.msra.mxu1 %v8110_v4 }
 0xa37   :  { %2698 = vmatprep.subr.mxu0 %v8116_v14  ;;  %2769 = vmatprep.subr.mxu1 %v8122_v2 }
 0xa38   :  { %2699 = vmatpush1.msra.mxu0 %v10565_v1  ;;  %2770 = vmatpush1.msra.mxu1 %v10566_v42 }
 0xa39   :  { %2700 = vmatprep.subr.mxu0 %v8140_v61  ;;  %2771 = vmatprep.subr.mxu1 %v8257_v17 }
 0xa3a   :  { %2701 = vmatpush1.msra.mxu0 %v8147_v7  ;;  %2772 = vmatpush1.msra.mxu1 %v8264_v27 }
 0xa3b   :  { %2702 = vmatprep.subr.mxu0 %v8154_v13  ;;  %2773 = vmatprep.subr.mxu1 %v8271_v28 }
 0xa3c   :  { %2703 = vmatpush1.msra.mxu0 %v8161_v21  ;;  %2774 = vmatpush1.msra.mxu1 %v8278_v32 }
 0xa3d   :  { %2704 = vmatprep.subr.mxu0 %v8168_v22  ;;  %2775 = vmatprep.subr.mxu1 %v8285_v35 }
 0xa3e   :  { %2705 = vmatpush1.msra.mxu0 %v8291_v46  ;;  %2776 = vmatpush1.msra.mxu1 %v8297_v52 }
 0xa3f   :  { %2706 = vmatprep.subr.mxu0 %v8303_v36  ;;  %2777 = vmatprep.subr.mxu1 %v8309_v37 }
 0xa40   :  { %2707 = vmatpush1.msra.mxu0 %v8315_v40  ;;  %2778 = vmatpush1.msra.mxu1 %v8321_v43 }
 0xa41   :  { %2708 = vmatprep.subr.mxu0 %v8327_v44  ;;  %2779 = vmatprep.subr.mxu1 %v8333_v47 }
 0xa42   :  { %2709 = vmatpush1.msra.mxu0 %v8339_v48  ;;  %2780 = vmatpush1.msra.mxu1 %v8345_v49 }
 0xa43   :  { %2710 = vmatprep.subr.mxu0 %v8351_v50  ;;  %2781 = vmatprep.subr.mxu1 %v8357_v53 }
 0xa44   :  { %2711 = vmatpush1.msra.mxu0 %v8363_v45  ;;  %2782 = vmatpush1.msra.mxu1 %v8369_v34 }
 0xa45   :  { %2712 = vmatprep.subr.mxu0 %v8375_v6  ;;  %2783 = vmatprep.subr.mxu1 %v10619_v39 }
 0xa46   :  { %2713 = vmatpush1.msra.mxu0 %v10620_v58  ;;  %2784 = vmatpush1.msra.mxu1 %v10621_v38  ;;  %v10644_v38 = vld [vmem:[#allocation60_spill] sm:$0xff] }
 0xa47   :  { %2714 = vmatprep.subr.mxu0 %v10622_v11  ;;  %2785 = vmatprep.subr.mxu1 %v10623_v25  ;;  %v10643_v11 = vld [vmem:[#allocation62_spill] sm:$0xff] }
 0xa48   :  { %2715 = vmatpush1.msra.mxu0 %v10624_v0  ;;  %2786 = vmatpush1.msra.mxu1 %v10625_v31 }
 0xa49   :  { %2716 = vmatprep.subr.mxu0 %v10626_v41  ;;  %2787 = vmatprep.subr.mxu1 %v10627_v63  ;;  %v10637_v41 = vmov 0.0   ;;  %v10638_v63 = vld [vmem:[#allocation21_spill] sm:$0xff] }
 0xa4a   :  { %2717 = vmatpush1.msra.mxu0 %v10628_v18  ;;  %2788 = vmatpush1.msra.mxu1 %v10629_v57  ;;  %v10639_v57 = vld [vmem:[#allocation4_spill] sm:$0xff] }
 0xa4b   :  { %2718 = vmatprep.subr.mxu0 %v10630_v12  ;;  %2789 = vmatprep.subr.mxu1 %v10631_v10  ;;  %v10640_v12 = vld [vmem:[#allocation10_spill] sm:$0xff] }
 0xa4c   :  { %2719 = vmatpush1.msra.mxu0 %v10632_v33  ;;  %2790 = vmatpush1.msra.mxu1 %v10633_v24  ;;  %v10641_v33 = vld [vmem:[#allocation59_spill] sm:$0xff] }
 0xa4d   :  { %2720 = vmatprep.subr.mxu0 %v10634_v8  ;;  %2791 = vmatprep.subr.mxu1 %v10635_v29  ;;  %v10642_v8 = vld [vmem:[#allocation61_spill] sm:$0xff] }
 0xa4e   :  { %2721 = vmatpush1.msra.mxu0 %v10636_v26  ;;  %2754 = vmatprep.mubr.f32.mxu0 %v10637_v41 }
 0xa4f   :  { %2792 = vmatpush1.msra.mxu1 %v10638_v63  ;;  %2825 = vmatprep.mubr.f32.mxu1 %v10637_v41 }
 0xa50   :  { %2867 = vmatprep.subr.mxu0 %v10639_v57  ;;  %2938 = vmatprep.subr.mxu1 %v10640_v12 }
 0xaef   :  { %v2579_v10 = vpop.f32.mrf.mxu0  ;;  %v2650_v29 = vpop.f32.mrf.mxu1 }
 0xaf0   :  { %v2655_v18 = vadd.f32 %v2579_v10, %v10641_v33  ;;  %v2657_v41 = vadd.f32 %v2650_v29, %v10644_v38 }
 0xaf1   :  { %v2581_v24 = vpop.f32.mrf.mxu0  ;;  %v2652_v25 = vpop.f32.mrf.mxu1 }
 0xaf2   :  { %v5214_v31 = vmul.f32 -1.442695, %v2655_v18  ;;  %v2656_v0 = vadd.f32 %v2581_v24, %v10642_v8  ;;  %v2658_v63 = vadd.f32 %v2652_v25, %v10643_v11 }
 0xaf4   :  { %5754 = vpow2.f32 %v5214_v31  ;;  %v5215_v26 = vmul.f32 -1.442695, %v2656_v0  ;;  %v5216_v58 = vmul.f32 -1.442695, %v2658_v63 }
 0xaf6   :  { %5756 = vpow2.f32 %v5215_v26 }
 0xaf7   :  { %5758 = vtanh.f32 %v2657_v41 }
 0xaf8   :  { %5760 = vpow2.f32 %v5216_v58 }
 0xb01   :  { %v5755_v57 = vpop.eup %5754 }
 0xb02   :  { %v2662_v39 = vadd.f32 1.0, %v5755_v57  ;;  %v10666_v57 = vld [vmem:[#allocation65_spill] sm:$0xff] }
 0xb03   :  { %v5757_v12 = vpop.eup %5756 }
 0xb04   :  { %5762 = vrcp.f32 %v2662_v39  ;;  %v2668_v10 = vadd.f32 1.0, %v5757_v12  ;;  %v5759_v18 = vpop.eup %5758 }
 0xb05   :  { %v5761_v33 = vpop.eup %5760 }
 0xb06   :  { %5764 = vrcp.f32 %v2668_v10  ;;  %v2675_v8 = vadd.f32 1.0, %v5761_v33 }
 0xb08   :  { %5766 = vrcp.f32 %v2675_v8 }
 0xb11   :  { %v5763_v31 = vpop.eup %5762 }
 0xb12   :  { %v2679_v24 = vmul.f32 %v5763_v31, %v5759_v18  ;;  %v10667_v31 = vld [vmem:[#allocation66_spill] sm:$0xff] }
 0xb13   :  { %v5765_v0 = vpop.eup %5764 }
 0xb14   :  { %v2678_v26 = vmul.f32 %v5765_v0, %v8587_v30  ;;  %v10668_v0 = vld [vmem:[#allocation64_spill] sm:$0xff] }
 0xb15   :  { %v5767_v38 = vpop.eup %5766 }
 0xb16   :  { %v8665_v11 = vadd.f32 %v2679_v24, %v2678_v26 }
 0xb18   :  { %5768 = vtanh.f32 %v8665_v11 }
 0xb25   :  { %v5769_v25 = vpop.eup %5768 }
 0xb26   :  { %v2682_v41 = vmul.f32 %v5769_v25, %v5767_v38 }
 0xb28   :  { %2755 = vmatmul.mubr.f32.vlgmr.msra.gmra.mxu0 %v2682_v41  ;;  %2826 = vmatmul.mubr.f32.vlgmr.msra.gmra.mxu1 %v2682_v41  ;;  %v2683_v39 = vmul.f32 %v2682_v41, %v8510_v51 }
 0xb29   :  { %2868 = vmatpush1.msra.mxu0 %v8029_v55  ;;  %2939 = vmatpush1.msra.mxu1 %v8035_v62  ;;  %v10645_v55 = vld [vmem:[#allocation35_spill] sm:$0xff]  ;;  %v10646_v62 = vld [vmem:[#allocation37_spill] sm:$0xff] }
 0xb2a   :  { %2869 = vmatprep.subr.mxu0 %v8041_v9  ;;  %2940 = vmatprep.subr.mxu1 %v8047_v19  ;;  %v8674_v30 = vadd.f32 %v2683_v39, %v8596_v5  ;;  %v10647_v9 = vld [vmem:[#allocation38_spill] sm:$0xff]  ;;  %v10648_v19 = vld [vmem:[#allocation36_spill] sm:$0xff]  ;;  %v10665_v5 = vld [vmem:[#allocation63_spill] sm:$0xff] }
 0xb2b   :  { %2870 = vmatpush1.msra.mxu0 %v8056_v15  ;;  %2941 = vmatpush1.msra.mxu1 %v8062_v60  ;;  %v10649_v15 = vld [vmem:[#allocation3_spill] sm:$0xff]  ;;  %v10650_v60 = vld [vmem:[#allocation8_spill] sm:$0xff] }
 0xb2c   :  { %2871 = vmatprep.subr.mxu0 %v8068_v54  ;;  %2942 = vmatprep.subr.mxu1 %v8074_v3  ;;  %v10651_v54 = vld [vmem:[#allocation39_spill] sm:$0xff]  ;;  %v10652_v3 = vld [vmem:[#allocation41_spill] sm:$0xff] }
 0xb2d   :  { %2872 = vmatpush1.msra.mxu0 %v8080_v20  ;;  %2943 = vmatpush1.msra.mxu1 %v8086_v23  ;;  %v10653_v20 = vld [vmem:[#allocation42_spill] sm:$0xff]  ;;  %v10654_v23 = vld [vmem:[#allocation40_spill] sm:$0xff] }
 0xb2e   :  { %2873 = vmatprep.subr.mxu0 %v8092_v59  ;;  %2944 = vmatprep.subr.mxu1 %v8098_v16  ;;  %v10655_v59 = vld [vmem:[#allocation15_spill] sm:$0xff]  ;;  %v10656_v16 = vld [vmem:[#allocation9_spill] sm:$0xff] }
 0xb2f   :  { %2874 = vmatpush1.msra.mxu0 %v8104_v56  ;;  %2945 = vmatpush1.msra.mxu1 %v8110_v4  ;;  %v10657_v56 = vld [vmem:[#allocation16_spill] sm:$0xff]  ;;  %v10658_v4 = vld [vmem:[#allocation11_spill] sm:$0xff] }
 0xb30   :  { %2875 = vmatprep.subr.mxu0 %v8116_v14  ;;  %2946 = vmatprep.subr.mxu1 %v8122_v2  ;;  %v10659_v14 = vld [vmem:[#allocation18_spill] sm:$0xff]  ;;  %v10660_v2 = vld [vmem:[#allocation13_spill] sm:$0xff] }
 0xb31   :  { %2876 = vmatpush1.msra.mxu0 %v10565_v1  ;;  %2947 = vmatpush1.msra.mxu1 %v10566_v42  ;;  %v8745_v1 = vld [vmem:[%s10141_s3 + $0x1f8] sm:$0xff] }
 0xb32   :  { %2877 = vmatprep.subr.mxu0 %v8140_v61  ;;  %2948 = vmatprep.subr.mxu1 %v8257_v17  ;;  %v10663_v61 = vmov 0.0  }
 0xb33   :  { %2878 = vmatpush1.msra.mxu0 %v8147_v7  ;;  %2949 = vmatpush1.msra.mxu1 %v8264_v27  ;;  %v10661_v7 = vld [vmem:[#allocation20_spill] sm:$0xff] }
 0xb34   :  { %2879 = vmatprep.subr.mxu0 %v8154_v13  ;;  %2950 = vmatprep.subr.mxu1 %v8271_v28  ;;  %v10662_v13 = vld [vmem:[#allocation17_spill] sm:$0xff] }
 0xb35   :  { %2880 = vmatpush1.msra.mxu0 %v8161_v21  ;;  %2951 = vmatpush1.msra.mxu1 %v8278_v32  ;;  %v10664_v21 = vld [vmem:[#allocation21_spill] sm:$0xff] }
 0xb36   :  { %2881 = vmatprep.subr.mxu0 %v8168_v22  ;;  %2952 = vmatprep.subr.mxu1 %v8285_v35  ;;  %v8739_v22 = vld [vmem:[%s10141_s3 + $0x1e8] sm:$0xff] }
 0xb37   :  { %2882 = vmatpush1.msra.mxu0 %v8291_v46  ;;  %2953 = vmatpush1.msra.mxu1 %v8297_v52 }
 0xb38   :  { %2883 = vmatprep.subr.mxu0 %v8303_v36  ;;  %2954 = vmatprep.subr.mxu1 %v8309_v37 }
 0xb39   :  { %2884 = vmatpush1.msra.mxu0 %v8315_v40  ;;  %2955 = vmatpush1.msra.mxu1 %v8321_v43 }
 0xb3a   :  { %2885 = vmatprep.subr.mxu0 %v8327_v44  ;;  %2956 = vmatprep.subr.mxu1 %v8333_v47 }
 0xb3b   :  { %2886 = vmatpush1.msra.mxu0 %v8339_v48  ;;  %2957 = vmatpush1.msra.mxu1 %v8345_v49 }
 0xb3c   :  { %2887 = vmatprep.subr.mxu0 %v8351_v50  ;;  %2958 = vmatprep.subr.mxu1 %v8357_v53 }
 0xb3d   :  { %2888 = vmatpush1.msra.mxu0 %v8363_v45  ;;  %2959 = vmatpush1.msra.mxu1 %v8369_v34 }
 0xb3e   :  { %2889 = vmatprep.subr.mxu0 %v8375_v6  ;;  %2960 = vmatprep.subr.mxu1 %v10645_v55 }
 0xb3f   :  { %2890 = vmatpush1.msra.mxu0 %v10646_v62  ;;  %2961 = vmatpush1.msra.mxu1 %v10647_v9 }
 0xb40   :  { %2891 = vmatprep.subr.mxu0 %v10648_v19  ;;  %2962 = vmatprep.subr.mxu1 %v10649_v15 }
 0xb41   :  { %2892 = vmatpush1.msra.mxu0 %v10650_v60  ;;  %2963 = vmatpush1.msra.mxu1 %v10651_v54 }
 0xb42   :  { %2893 = vmatprep.subr.mxu0 %v10652_v3  ;;  %2964 = vmatprep.subr.mxu1 %v10653_v20 }
 0xb43   :  { %2894 = vmatpush1.msra.mxu0 %v10654_v23  ;;  %2965 = vmatpush1.msra.mxu1 %v10655_v59 }
 0xb44   :  { %2895 = vmatprep.subr.mxu0 %v10656_v16  ;;  %2966 = vmatprep.subr.mxu1 %v10657_v56 }
 0xb45   :  { %2896 = vmatpush1.msra.mxu0 %v10658_v4  ;;  %2967 = vmatpush1.msra.mxu1 %v10659_v14 }
 0xb46   :  { %2897 = vmatprep.subr.mxu0 %v10660_v2  ;;  %2968 = vmatprep.subr.mxu1 %v10661_v7 }
 0xb47   :  { %2898 = vmatpush1.msra.mxu0 %v10662_v13  ;;  %2931 = vmatprep.mubr.f32.mxu0 %v10663_v61 }
 0xb48   :  { %2969 = vmatpush1.msra.mxu1 %v10664_v21  ;;  %3002 = vmatprep.mubr.f32.mxu1 %v10663_v61 }
 0xb49   :  { %3044 = vmatprep.subr.mxu0 %v8739_v22  ;;  %3115 = vmatprep.subr.mxu1 %v8745_v1 }
 0xbe8   :  { %v2756_v42 = vpop.f32.mrf.mxu0  ;;  %v2827_v10 = vpop.f32.mrf.mxu1 }
 0xbe9   :  { %v2832_v58 = vadd.f32 %v2756_v42, %v10665_v5  ;;  %v2834_v8 = vadd.f32 %v2827_v10, %v10668_v0  ;;  %v8760_v0 = vld [vmem:[%s10141_s3 + $0x1e0] sm:$0xff] }
 0xbea   :  { %v2758_v63 = vpop.f32.mrf.mxu0  ;;  %v2829_v33 = vpop.f32.mrf.mxu1 }
 0xbeb   :  { %v5217_v29 = vmul.f32 -1.442695, %v2832_v58  ;;  %v2833_v12 = vadd.f32 %v2758_v63, %v10666_v57  ;;  %v2835_v24 = vadd.f32 %v2829_v33, %v10667_v31 }
 0xbed   :  { %5770 = vpow2.f32 %v5217_v29  ;;  %v5218_v18 = vmul.f32 -1.442695, %v2833_v12  ;;  %v5219_v26 = vmul.f32 -1.442695, %v2835_v24 }
 0xbef   :  { %5772 = vpow2.f32 %v5218_v18 }
 0xbf0   :  { %5774 = vtanh.f32 %v2834_v8  ;;  %v8772_v8 = vld [vmem:[%s10141_s3 + $0x1c8] sm:$0xff] }
 0xbf1   :  { %5776 = vpow2.f32 %v5219_v26  ;;  %v8778_v26 = vld [vmem:[%s10141_s3 + $0x1d8] sm:$0xff] }
 0xbfa   :  { %v5771_v38 = vpop.eup %5770 }
 0xbfb   :  { %v2839_v25 = vadd.f32 1.0, %v5771_v38 }
 0xbfc   :  { %v5773_v41 = vpop.eup %5772 }
 0xbfd   :  { %5778 = vrcp.f32 %v2839_v25  ;;  %v2845_v39 = vadd.f32 1.0, %v5773_v41  ;;  %v5775_v42 = vpop.eup %5774  ;;  %v8787_v25 = vld [vmem:[%s10141_s3 + $0x1c0] sm:$0xff]  ;;  %v8793_v41 = vld [vmem:[%s10141_s3 + $0x1d0] sm:$0xff] }
 0xbfe   :  { %v5777_v5 = vpop.eup %5776 }
 0xbff   :  { %5780 = vrcp.f32 %v2845_v39  ;;  %v2852_v57 = vadd.f32 1.0, %v5777_v5  ;;  %v8799_v39 = vld [vmem:[%s10141_s3 + $0x1a8] sm:$0xff]  ;;  %v8817_v5 = vld [vmem:[%s10141_s3 + $0x1b0] sm:$0xff] }
 0xc01   :  { %5782 = vrcp.f32 %v2852_v57  ;;  %v8841_v57 = vld [vmem:[%s10141_s3 + $0x190] sm:$0xff] }
 0xc0a   :  { %v5779_v58 = vpop.eup %5778 }
 0xc0b   :  { %v2856_v63 = vmul.f32 %v5779_v58, %v5775_v42  ;;  %v8811_v42 = vld [vmem:[%s10141_s3 + $0x1a0] sm:$0xff]  ;;  %v8823_v58 = vld [vmem:[%s10141_s3 + $0x188] sm:$0xff] }
 0xc0c   :  { %v5781_v29 = vpop.eup %5780 }
 0xc0d   :  { %v2855_v12 = vmul.f32 %v5781_v29, %v8665_v11  ;;  %v8766_v11 = vld [vmem:[%s10141_s3 + $0x1f0] sm:$0xff]  ;;  %v8835_v29 = vld [vmem:[%s10141_s3 + $0x180] sm:$0xff] }
 0xc0e   :  { %v5783_v10 = vpop.eup %5782 }
 0xc0f   :  { %v8753_v18 = vadd.f32 %v2856_v63, %v2855_v12  ;;  %v8829_v63 = vld [vmem:[%s10141_s3 + $0x198] sm:$0xff]  ;;  %v8847_v12 = vld [vmem:[%s10141_s3 + $0x168] sm:$0xff] }
 0xc11   :  { %5784 = vtanh.f32 %v8753_v18 }
 0xc1e   :  { %v5785_v33 = vpop.eup %5784 }
 0xc1f   :  { %v2859_v31 = vmul.f32 %v5785_v33, %v5783_v10  ;;  %v8853_v10 = vld [vmem:[%s10141_s3 + $0x178] sm:$0xff]  ;;  %v8859_v33 = vld [vmem:[%s10141_s3 + $0x160] sm:$0xff] }
 0xc20   :  { %10669 = vst [vmem:[#allocation22_spill] sm:$0xff] %v8859_v33 }
 0xc21   :  { %2932 = vmatmul.mubr.f32.vlgmr.msra.gmra.mxu0 %v2859_v31  ;;  %3003 = vmatmul.mubr.f32.vlgmr.msra.gmra.mxu1 %v2859_v31  ;;  %v2860_v24 = vmul.f32 %v2859_v31, %v8510_v51  ;;  %v8865_v31 = vld [vmem:[%s10141_s3 + $0x170] sm:$0xff] }
 0xc22   :  { %3045 = vmatpush1.msra.mxu0 %v8760_v0  ;;  %3116 = vmatpush1.msra.mxu1 %v8766_v11  ;;  %10670 = vst [vmem:[#allocation23_spill] sm:$0xff] %v8865_v31 }
 0xc23   :  { %3046 = vmatprep.subr.mxu0 %v8772_v8  ;;  %3117 = vmatprep.subr.mxu1 %v8778_v26  ;;  %v8782_v38 = vadd.f32 %v2860_v24, %v8674_v30  ;;  %v8805_v30 = vld [vmem:[%s10141_s3 + $0x1b8] sm:$0xff]  ;;  %v8871_v24 = vld [vmem:[%s10141_s3 + $0x148] sm:$0xff] }
 0xc24   :  { %3047 = vmatpush1.msra.mxu0 %v8787_v25  ;;  %3118 = vmatpush1.msra.mxu1 %v8793_v41 }
 0xc25   :  { %3048 = vmatprep.subr.mxu0 %v8799_v39  ;;  %3119 = vmatprep.subr.mxu1 %v8805_v30 }
 0xc26   :  { %3049 = vmatpush1.msra.mxu0 %v8811_v42  ;;  %3120 = vmatpush1.msra.mxu1 %v8817_v5 }
 0xc27   :  { %3050 = vmatprep.subr.mxu0 %v8823_v58  ;;  %3121 = vmatprep.subr.mxu1 %v8829_v63 }
 0xc28   :  { %3051 = vmatpush1.msra.mxu0 %v8835_v29  ;;  %3122 = vmatpush1.msra.mxu1 %v8841_v57 }
 0xc29   :  { %3052 = vmatprep.subr.mxu0 %v8847_v12  ;;  %3123 = vmatprep.subr.mxu1 %v8853_v10 }
 0xc2a   :  { %3053 = vmatpush1.msra.mxu0 %v8859_v33  ;;  %3124 = vmatpush1.msra.mxu1 %v8865_v31  ;;  %v8878_v33 = vld [vmem:[%s10141_s3 + $0x140] sm:$0xff]  ;;  %v8885_v31 = vld [vmem:[%s10141_s3 + $0x128] sm:$0xff] }
 0xc2b   :  { %3054 = vmatprep.subr.mxu0 %v8871_v24  ;;  %3125 = vmatprep.subr.mxu1 %v8257_v17  ;;  %v8892_v17 = vld [vmem:[%s10141_s3 + $0x120] sm:$0xff] }
 0xc2c   :  { %3055 = vmatpush1.msra.mxu0 %v8878_v33  ;;  %3126 = vmatpush1.msra.mxu1 %v8264_v27  ;;  %v8899_v27 = vld [vmem:[%s10141_s3 + $0x108] sm:$0xff] }
 0xc2d   :  { %3056 = vmatprep.subr.mxu0 %v8885_v31  ;;  %3127 = vmatprep.subr.mxu1 %v8271_v28 }
 0xc2e   :  { %3057 = vmatpush1.msra.mxu0 %v8892_v17  ;;  %3128 = vmatpush1.msra.mxu1 %v8278_v32  ;;  %v10671_v32 = vld [vmem:[#allocation67_spill] sm:$0xff] }
 0xc2f   :  { %3058 = vmatprep.subr.mxu0 %v8899_v27  ;;  %3129 = vmatprep.subr.mxu1 %v8285_v35 }
 0xc30   :  { %3059 = vmatpush1.msra.mxu0 %v8291_v46  ;;  %3130 = vmatpush1.msra.mxu1 %v8297_v52 }
 0xc31   :  { %3060 = vmatprep.subr.mxu0 %v8303_v36  ;;  %3131 = vmatprep.subr.mxu1 %v8309_v37  ;;  %v10672_v36 = vld [vmem:[#allocation69_spill] sm:$0xff] }
 0xc32   :  { %3061 = vmatpush1.msra.mxu0 %v8315_v40  ;;  %3132 = vmatpush1.msra.mxu1 %v8321_v43 }
 0xc33   :  { %3062 = vmatprep.subr.mxu0 %v8327_v44  ;;  %3133 = vmatprep.subr.mxu1 %v8333_v47  ;;  %v10673_v47 = vld [vmem:[#allocation70_spill] sm:$0xff] }
 0xc34   :  { %3063 = vmatpush1.msra.mxu0 %v8339_v48  ;;  %3134 = vmatpush1.msra.mxu1 %v8345_v49  ;;  %v10674_v49 = vld [vmem:[#allocation68_spill] sm:$0xff] }
 0xc35   :  { %3064 = vmatprep.subr.mxu0 %v8351_v50  ;;  %3135 = vmatprep.subr.mxu1 %v8357_v53 }
 0xc36   :  { %3065 = vmatpush1.msra.mxu0 %v8363_v45  ;;  %3136 = vmatpush1.msra.mxu1 %v8369_v34 }
 0xc37   :  { %3066 = vmatprep.subr.mxu0 %v8375_v6  ;;  %3137 = vmatprep.subr.mxu1 %v10645_v55 }
 0xc38   :  { %3067 = vmatpush1.msra.mxu0 %v10646_v62  ;;  %3138 = vmatpush1.msra.mxu1 %v10647_v9 }
 0xc39   :  { %3068 = vmatprep.subr.mxu0 %v10648_v19  ;;  %3139 = vmatprep.subr.mxu1 %v10649_v15 }
 0xc3a   :  { %3069 = vmatpush1.msra.mxu0 %v10650_v60  ;;  %3140 = vmatpush1.msra.mxu1 %v10651_v54 }
 0xc3b   :  { %3070 = vmatprep.subr.mxu0 %v10652_v3  ;;  %3141 = vmatprep.subr.mxu1 %v10653_v20 }
 0xc3c   :  { %3071 = vmatpush1.msra.mxu0 %v10654_v23  ;;  %3142 = vmatpush1.msra.mxu1 %v10655_v59 }
 0xc3d   :  { %3072 = vmatprep.subr.mxu0 %v10656_v16  ;;  %3143 = vmatprep.subr.mxu1 %v10657_v56 }
 0xc3e   :  { %3073 = vmatpush1.msra.mxu0 %v10658_v4  ;;  %3144 = vmatpush1.msra.mxu1 %v10659_v14  ;;  %v10675_v14 = vld [vmem:[#allocation22_spill] sm:$0xff] }
 0xc3f   :  { %3074 = vmatprep.subr.mxu0 %v10660_v2  ;;  %3145 = vmatprep.subr.mxu1 %v10661_v7  ;;  %v10676_v2 = vld [vmem:[#allocation23_spill] sm:$0xff]  ;;  %v8975_v7 = vld [vmem:[%s10141_s3 + $0x158] sm:$0xff] }
 0xc40   :  { %3075 = vmatpush1.msra.mxu0 %v10662_v13  ;;  %3108 = vmatprep.mubr.f32.mxu0 %v10663_v61  ;;  %v8982_v13 = vld [vmem:[%s10141_s3 + $0x150] sm:$0xff] }
 0xc41   :  { %3146 = vmatpush1.msra.mxu1 %v10664_v21  ;;  %3179 = vmatprep.mubr.f32.mxu1 %v10663_v61  ;;  %v8989_v21 = vld [vmem:[%s10141_s3 + $0x138] sm:$0xff] }
 0xc42   :  { %3221 = vmatprep.subr.mxu0 %v8739_v22  ;;  %3292 = vmatprep.subr.mxu1 %v8745_v1 }
 0xce1   :  { %v2933_v28 = vpop.f32.mrf.mxu0  ;;  %v3004_v40 = vpop.f32.mrf.mxu1 }
 0xce2   :  { %v3009_v35 = vadd.f32 %v2933_v28, %v10671_v32  ;;  %v3011_v50 = vadd.f32 %v3004_v40, %v10674_v49  ;;  %v9009_v28 = vld [vmem:[%s10141_s3 + $0x100] sm:$0xff]  ;;  %v9015_v32 = vld [vmem:[%s10141_s3 + $0x110] sm:$0xff]  ;;  %v9051_v40 = vld [vmem:[%s10141_s3 + $0xd8] sm:$0xff] }
 0xce3   :  { %v2935_v46 = vpop.f32.mrf.mxu0  ;;  %v3006_v44 = vpop.f32.mrf.mxu1  ;;  %v9081_v49 = vld [vmem:[%s10141_s3 + $0xa0] sm:$0xff] }
 0xce4   :  { %v5220_v52 = vmul.f32 -1.442695, %v3009_v35  ;;  %v3010_v37 = vadd.f32 %v2935_v46, %v10672_v36  ;;  %v3012_v48 = vadd.f32 %v3006_v44, %v10673_v47  ;;  %v9021_v35 = vld [vmem:[%s10141_s3 + $0xe8] sm:$0xff]  ;;  %v9027_v46 = vld [vmem:[%s10141_s3 + $0xf8] sm:$0xff]  ;;  %v9039_v36 = vld [vmem:[%s10141_s3 + $0xf0] sm:$0xff] }
 0xce5   :  { %v9063_v44 = vld [vmem:[%s10141_s3 + $0xd0] sm:$0xff]  ;;  %v9069_v47 = vld [vmem:[%s10141_s3 + $0xa8] sm:$0xff] }
 0xce6   :  { %5786 = vpow2.f32 %v5220_v52  ;;  %v5221_v43 = vmul.f32 -1.442695, %v3010_v37  ;;  %v5222_v53 = vmul.f32 -1.442695, %v3012_v48  ;;  %v9033_v52 = vld [vmem:[%s10141_s3 + $0xe0] sm:$0xff]  ;;  %v9045_v37 = vld [vmem:[%s10141_s3 + $0xc8] sm:$0xff] }
 0xce7   :  { %v9075_v48 = vld [vmem:[%s10141_s3 + $0xb8] sm:$0xff] }
 0xce8   :  { %5788 = vpow2.f32 %v5221_v43  ;;  %v9057_v43 = vld [vmem:[%s10141_s3 + $0xc0] sm:$0xff] }
 0xce9   :  { %5790 = vtanh.f32 %v3011_v50  ;;  %v9087_v50 = vld [vmem:[%s10141_s3 + $0xb0] sm:$0xff] }
 0xcea   :  { %5792 = vpow2.f32 %v5222_v53  ;;  %v9093_v53 = vld [vmem:[%s10141_s3 + $0x88] sm:$0xff] }
 0xcf3   :  { %v5787_v45 = vpop.eup %5786 }
 0xcf4   :  { %v3016_v34 = vadd.f32 1.0, %v5787_v45  ;;  %v9099_v45 = vld [vmem:[%s10141_s3 + $0x98] sm:$0xff] }
 0xcf5   :  { %v5789_v6 = vpop.eup %5788  ;;  %10677 = vst [vmem:[#allocation25_spill] sm:$0xff] %v9099_v45 }
 0xcf6   :  { %5794 = vrcp.f32 %v3016_v34  ;;  %v3022_v55 = vadd.f32 1.0, %v5789_v6  ;;  %v5791_v62 = vpop.eup %5790  ;;  %v9105_v34 = vld [vmem:[%s10141_s3 + $0x80] sm:$0xff]  ;;  %v9111_v6 = vld [vmem:[%s10141_s3 + $0x90] sm:$0xff] }
 0xcf7   :  { %v5793_v9 = vpop.eup %5792  ;;  %10678 = vst [vmem:[#allocation26_spill] sm:$0xff] %v9105_v34  ;;  %10679 = vst [vmem:[#allocation24_spill] sm:$0xff] %v9111_v6 }
 0xcf8   :  { %5796 = vrcp.f32 %v3022_v55  ;;  %v3029_v54 = vadd.f32 1.0, %v5793_v9  ;;  %v9117_v55 = vld [vmem:[%s10141_s3 + $0x68] sm:$0xff]  ;;  %v9129_v9 = vld [vmem:[%s10141_s3 + $0x60] sm:$0xff] }
 0xcf9   :  { %10680 = vst [vmem:[#allocation27_spill] sm:$0xff] %v9117_v55  ;;  %10682 = vst [vmem:[#allocation30_spill] sm:$0xff] %v9129_v9 }
 0xcfa   :  { %5798 = vrcp.f32 %v3029_v54  ;;  %v9153_v54 = vld [vmem:[%s10141_s3 + $0x40] sm:$0xff] }
 0xcfb   :  { %10686 = vst [vmem:[#allocation46_spill] sm:$0xff] %v9153_v54 }
 0xd03   :  { %v5795_v19 = vpop.eup %5794 }
 0xd04   :  { %v3033_v15 = vmul.f32 %v5795_v19, %v5791_v62  ;;  %v9123_v62 = vld [vmem:[%s10141_s3 + $0x78] sm:$0xff]  ;;  %v9135_v19 = vld [vmem:[%s10141_s3 + $0x70] sm:$0xff] }
 0xd05   :  { %v5797_v60 = vpop.eup %5796  ;;  %10681 = vst [vmem:[#allocation29_spill] sm:$0xff] %v9123_v62  ;;  %10683 = vst [vmem:[#allocation28_spill] sm:$0xff] %v9135_v19 }
 0xd06   :  { %v3032_v3 = vmul.f32 %v5797_v60, %v8753_v18  ;;  %v8996_v18 = vld [vmem:[%s10141_s3 + $0x130] sm:$0xff]  ;;  %v9147_v60 = vld [vmem:[%s10141_s3 + $0x58] sm:$0xff] }
 0xd07   :  { %v5799_v23 = vpop.eup %5798  ;;  %10685 = vst [vmem:[#allocation45_spill] sm:$0xff] %v9147_v60 }
 0xd08   :  { %v8946_v20 = vadd.f32 %v3033_v15, %v3032_v3  ;;  %v9141_v15 = vld [vmem:[%s10141_s3 + $0x48] sm:$0xff]  ;;  %v9159_v3 = vld [vmem:[%s10141_s3 + $0x50] sm:$0xff] }
 0xd09   :  { %10684 = vst [vmem:[#allocation43_spill] sm:$0xff] %v9141_v15  ;;  %10687 = vst [vmem:[#allocation44_spill] sm:$0xff] %v9159_v3 }
 0xd0a   :  { %5800 = vtanh.f32 %v8946_v20 }
 0xd17   :  { %v5801_v59 = vpop.eup %5800 }
 0xd18   :  { %v3036_v16 = vmul.f32 %v5801_v59, %v5799_v23  ;;  %v9165_v23 = vld [vmem:[%s10141_s3 + $0x28] sm:$0xff]  ;;  %v9171_v59 = vld [vmem:[%s10141_s3 + $0x38] sm:$0xff] }
 0xd19   :  { %10688 = vst [vmem:[#allocation47_spill] sm:$0xff] %v9165_v23  ;;  %10689 = vst [vmem:[#allocation49_spill] sm:$0xff] %v9171_v59 }
 0xd1a   :  { %3109 = vmatmul.mubr.f32.vlgmr.msra.gmra.mxu0 %v3036_v16  ;;  %3180 = vmatmul.mubr.f32.vlgmr.msra.gmra.mxu1 %v3036_v16  ;;  %v3037_v56 = vmul.f32 %v3036_v16, %v8510_v51  ;;  %v9177_v16 = vld [vmem:[%s10141_s3 + $0x20] sm:$0xff] }
 0xd1b   :  { %3222 = vmatpush1.msra.mxu0 %v8760_v0  ;;  %3293 = vmatpush1.msra.mxu1 %v8766_v11  ;;  %10690 = vst [vmem:[#allocation50_spill] sm:$0xff] %v9177_v16 }
 0xd1c   :  { %3223 = vmatprep.subr.mxu0 %v8772_v8  ;;  %3294 = vmatprep.subr.mxu1 %v8778_v26  ;;  %v8955_v4 = vadd.f32 %v3037_v56, %v8782_v38  ;;  %v9003_v38 = vld [vmem:[%s10141_s3 + $0x118] sm:$0xff]  ;;  %v9183_v56 = vld [vmem:[%s10141_s3 + $0x30] sm:$0xff] }
 0xd1d   :  { %3224 = vmatpush1.msra.mxu0 %v8787_v25  ;;  %3295 = vmatpush1.msra.mxu1 %v8793_v41  ;;  %10691 = vst [vmem:[#allocation48_spill] sm:$0xff] %v9183_v56 }
 0xd1e   :  { %3225 = vmatprep.subr.mxu0 %v8799_v39  ;;  %3296 = vmatprep.subr.mxu1 %v8805_v30 }
 0xd1f   :  { %3226 = vmatpush1.msra.mxu0 %v8811_v42  ;;  %3297 = vmatpush1.msra.mxu1 %v8817_v5 }
 0xd20   :  { %3227 = vmatprep.subr.mxu0 %v8823_v58  ;;  %3298 = vmatprep.subr.mxu1 %v8829_v63 }
 0xd21   :  { %3228 = vmatpush1.msra.mxu0 %v8835_v29  ;;  %3299 = vmatpush1.msra.mxu1 %v8841_v57 }
 0xd22   :  { %3229 = vmatprep.subr.mxu0 %v8847_v12  ;;  %3300 = vmatprep.subr.mxu1 %v8853_v10 }
 0xd23   :  { %3230 = vmatpush1.msra.mxu0 %v10675_v14  ;;  %3301 = vmatpush1.msra.mxu1 %v10676_v2 }
 0xd24   :  { %3231 = vmatprep.subr.mxu0 %v8871_v24  ;;  %3302 = vmatprep.subr.mxu1 %v8975_v7 }
 0xd25   :  { %3232 = vmatpush1.msra.mxu0 %v8878_v33  ;;  %3303 = vmatpush1.msra.mxu1 %v8982_v13 }
 0xd26   :  { %3233 = vmatprep.subr.mxu0 %v8885_v31  ;;  %3304 = vmatprep.subr.mxu1 %v8989_v21 }
 0xd27   :  { %3234 = vmatpush1.msra.mxu0 %v8892_v17  ;;  %3305 = vmatpush1.msra.mxu1 %v8996_v18 }
 0xd28   :  { %3235 = vmatprep.subr.mxu0 %v8899_v27  ;;  %3306 = vmatprep.subr.mxu1 %v9003_v38 }
 0xd29   :  { %3236 = vmatpush1.msra.mxu0 %v9009_v28  ;;  %3307 = vmatpush1.msra.mxu1 %v9015_v32 }
 0xd2a   :  { %3237 = vmatprep.subr.mxu0 %v9021_v35  ;;  %3308 = vmatprep.subr.mxu1 %v9027_v46 }
 0xd2b   :  { %3238 = vmatpush1.msra.mxu0 %v9033_v52  ;;  %3309 = vmatpush1.msra.mxu1 %v9039_v36 }
 0xd2c   :  { %3239 = vmatprep.subr.mxu0 %v9045_v37  ;;  %3310 = vmatprep.subr.mxu1 %v9051_v40 }
 0xd2d   :  { %3240 = vmatpush1.msra.mxu0 %v9057_v43  ;;  %3311 = vmatpush1.msra.mxu1 %v9063_v44 }
 0xd2e   :  { %3241 = vmatprep.subr.mxu0 %v9069_v47  ;;  %3312 = vmatprep.subr.mxu1 %v9075_v48 }
 0xd2f   :  { %3242 = vmatpush1.msra.mxu0 %v9081_v49  ;;  %3313 = vmatpush1.msra.mxu1 %v9087_v50 }
 0xd30   :  { %3243 = vmatprep.subr.mxu0 %v9093_v53  ;;  %3314 = vmatprep.subr.mxu1 %v9099_v45 }
 0xd31   :  { %3244 = vmatpush1.msra.mxu0 %v9105_v34  ;;  %3315 = vmatpush1.msra.mxu1 %v9111_v6  ;;  %v10699_v6 = vld [vmem:[#allocation72_spill] sm:$0xff] }
 0xd32   :  { %3245 = vmatprep.subr.mxu0 %v9117_v55  ;;  %3316 = vmatprep.subr.mxu1 %v9123_v62  ;;  %v10698_v55 = vld [vmem:[#allocation74_spill] sm:$0xff] }
 0xd33   :  { %3246 = vmatpush1.msra.mxu0 %v9129_v9  ;;  %3317 = vmatpush1.msra.mxu1 %v9135_v19 }
 0xd34   :  { %3247 = vmatprep.subr.mxu0 %v9141_v15  ;;  %3318 = vmatprep.subr.mxu1 %v9147_v60  ;;  %v10697_v60 = vld [vmem:[#allocation73_spill] sm:$0xff] }
 0xd35   :  { %3248 = vmatpush1.msra.mxu0 %v9153_v54  ;;  %3319 = vmatpush1.msra.mxu1 %v9159_v3 }
 0xd36   :  { %3249 = vmatprep.subr.mxu0 %v9165_v23  ;;  %3320 = vmatprep.subr.mxu1 %v9171_v59  ;;  %v9189_v23 = vld [vmem:[%s10141_s3 + $0x8] sm:$0xff]  ;;  %v9195_v59 = vld [vmem:[%s10141_s3 + $0x18] sm:$0xff] }
 0xd37   :  { %3250 = vmatpush1.msra.mxu0 %v9177_v16  ;;  %3321 = vmatpush1.msra.mxu1 %v9183_v56  ;;  %10692 = vst [vmem:[#allocation5_spill] sm:$0xff] %v9189_v23  ;;  %10693 = vst [vmem:[#allocation31_spill] sm:$0xff] %v9195_v59  ;;  %v9201_v16 = vld [vmem:[%s10141_s3] sm:$0xff] }
 0xd38   :  { %3251 = vmatprep.subr.mxu0 %v9189_v23  ;;  %3322 = vmatprep.subr.mxu1 %v9195_v59  ;;  %10694 = vst [vmem:[#allocation33_spill] sm:$0xff] %v9201_v16  ;;  %v9208_v23 = vld [vmem:[%s10141_s3 + $0x10] sm:$0xff]  ;;  %v10696_v56 = vld [vmem:[#allocation71_spill] sm:$0xff] }
 0xd39   :  { %3252 = vmatpush1.msra.mxu0 %v9201_v16  ;;  %3285 = vmatprep.mubr.f32.mxu0 %v10663_v61  ;;  %10695 = vst [vmem:[#allocation51_spill] sm:$0xff] %v9208_v23 }
 0xd3a   :  { %3323 = vmatpush1.msra.mxu1 %v9208_v23  ;;  %3356 = vmatprep.mubr.f32.mxu1 %v10663_v61 }
 0xd3b   :  { %3398 = vmatprep.subr.mxu0 %v8739_v22  ;;  %3469 = vmatprep.subr.mxu1 %v8745_v1 }
 0xdda   :  { %v3110_v59 = vpop.f32.mrf.mxu0  ;;  %v3181_v19 = vpop.f32.mrf.mxu1 }
 0xddb   :  { %v3186_v3 = vadd.f32 %v3110_v59, %v10696_v56  ;;  %v3188_v61 = vadd.f32 %v3181_v19, %v10699_v6 }
 0xddc   :  { %v3112_v54 = vpop.f32.mrf.mxu0  ;;  %v3183_v62 = vpop.f32.mrf.mxu1 }
 0xddd   :  { %v5223_v16 = vmul.f32 -1.442695, %v3186_v3  ;;  %v3187_v15 = vadd.f32 %v3112_v54, %v10697_v60  ;;  %v3189_v23 = vadd.f32 %v3183_v62, %v10698_v55 }
 0xddf   :  { %5802 = vpow2.f32 %v5223_v16  ;;  %v5224_v9 = vmul.f32 -1.442695, %v3187_v15  ;;  %v5225_v34 = vmul.f32 -1.442695, %v3189_v23 }
 0xde1   :  { %5804 = vpow2.f32 %v5224_v9 }
 0xde2   :  { %5806 = vtanh.f32 %v3188_v61 }
 0xde3   :  { %5808 = vpow2.f32 %v5225_v34 }
 0xdec   :  { %v5803_v22 = vpop.eup %5802 }
 0xded   :  { %v3193_v45 = vadd.f32 1.0, %v5803_v22 }
 0xdee   :  { %v5805_v1 = vpop.eup %5804 }
 0xdef   :  { %5810 = vrcp.f32 %v3193_v45  ;;  %v3199_v59 = vadd.f32 1.0, %v5805_v1  ;;  %v5807_v3 = vpop.eup %5806 }
 0xdf0   :  { %v5809_v60 = vpop.eup %5808 }
 0xdf1   :  { %5812 = vrcp.f32 %v3199_v59  ;;  %v3206_v9 = vadd.f32 1.0, %v5809_v60  ;;  %v3574_v60 = vld [vmem:[%s10144_s4] sm:$0xff] }
 0xdf3   :  { %5814 = vrcp.f32 %v3206_v9 }
 0xdfc   :  { %v5811_v54 = vpop.eup %5810 }
 0xdfd   :  { %v3210_v16 = vmul.f32 %v5811_v54, %v5807_v3  ;;  %v3594_v54 = vld [vmem:[%s10143_s5 + $0x10] sm:$0xff] }
 0xdfe   :  { %v5813_v15 = vpop.eup %5812 }
 0xdff   :  { %v3209_v56 = vmul.f32 %v5813_v15, %v8946_v20  ;;  %v3593_v15 = vld [vmem:[%s10143_s5 + $0x8] sm:$0xff] }
 0xe00   :  { %v5815_v6 = vpop.eup %5814 }
 0xe01   :  { %v9219_v55 = vadd.f32 %v3210_v16, %v3209_v56  ;;  %v3592_v56 = vld [vmem:[%s10143_s5] sm:$0xff] }
 0xe03   :  { %5816 = vtanh.f32 %v9219_v55 }
 0xe10   :  { %v5817_v61 = vpop.eup %5816 }
 0xe11   :  { %v3213_v62 = vmul.f32 %v5817_v61, %v5815_v6  ;;  %v3816_v6 = vld [vmem:[%s10145_s7 + $0x18] sm:$0xff]  ;;  %v3815_v61 = vld [vmem:[%s10145_s7 + $0x10] sm:$0xff] }
 0xe13   :  { %3286 = vmatmul.mubr.f32.vlgmr.msra.gmra.mxu0 %v3213_v62  ;;  %3357 = vmatmul.mubr.f32.vlgmr.msra.gmra.mxu1 %v3213_v62  ;;  %v3214_v45 = vmul.f32 %v3213_v62, %v8510_v51  ;;  %v3814_v62 = vld [vmem:[%s10145_s7 + $0x8] sm:$0xff] }
 0xe14   :  { %3399 = vmatpush1.msra.mxu0 %v8760_v0  ;;  %3470 = vmatpush1.msra.mxu1 %v8766_v11  ;;  %v10700_v0 = vld [vmem:[#allocation25_spill] sm:$0xff]  ;;  %v10701_v11 = vld [vmem:[#allocation26_spill] sm:$0xff] }
 0xe15   :  { %3400 = vmatprep.subr.mxu0 %v8772_v8  ;;  %3471 = vmatprep.subr.mxu1 %v8778_v26  ;;  %v9228_v20 = vadd.f32 %v3214_v45, %v8955_v4  ;;  %v10702_v8 = vld [vmem:[#allocation24_spill] sm:$0xff]  ;;  %v10703_v26 = vld [vmem:[#allocation27_spill] sm:$0xff] }
 0xe16   :  { %3401 = vmatpush1.msra.mxu0 %v8787_v25  ;;  %3472 = vmatpush1.msra.mxu1 %v8793_v41  ;;  %v10704_v25 = vld [vmem:[#allocation29_spill] sm:$0xff]  ;;  %v10705_v41 = vld [vmem:[#allocation30_spill] sm:$0xff]  ;;  %v3813_v45 = vld [vmem:[%s10145_s7] sm:$0xff] }
 0xe17   :  { %3402 = vmatprep.subr.mxu0 %v8799_v39  ;;  %3473 = vmatprep.subr.mxu1 %v8805_v30  ;;  %v10706_v39 = vld [vmem:[#allocation28_spill] sm:$0xff]  ;;  %v10707_v30 = vld [vmem:[#allocation43_spill] sm:$0xff] }
 0xe18   :  { %3403 = vmatpush1.msra.mxu0 %v8811_v42  ;;  %3474 = vmatpush1.msra.mxu1 %v8817_v5  ;;  %v10708_v42 = vld [vmem:[#allocation45_spill] sm:$0xff]  ;;  %v10709_v5 = vld [vmem:[#allocation46_spill] sm:$0xff] }
 0xe19   :  { %3404 = vmatprep.subr.mxu0 %v8823_v58  ;;  %3475 = vmatprep.subr.mxu1 %v8829_v63  ;;  %v10710_v58 = vld [vmem:[#allocation44_spill] sm:$0xff]  ;;  %v10711_v63 = vld [vmem:[#allocation47_spill] sm:$0xff] }
 0xe1a   :  { %3405 = vmatpush1.msra.mxu0 %v8835_v29  ;;  %3476 = vmatpush1.msra.mxu1 %v8841_v57  ;;  %v10712_v29 = vld [vmem:[#allocation49_spill] sm:$0xff]  ;;  %v10713_v57 = vld [vmem:[#allocation50_spill] sm:$0xff] }
 0xe1b   :  { %3406 = vmatprep.subr.mxu0 %v8847_v12  ;;  %3477 = vmatprep.subr.mxu1 %v8853_v10  ;;  %v10714_v12 = vld [vmem:[#allocation48_spill] sm:$0xff]  ;;  %v10715_v10 = vld [vmem:[#allocation5_spill] sm:$0xff] }
 0xe1c   :  { %3407 = vmatpush1.msra.mxu0 %v10675_v14  ;;  %3478 = vmatpush1.msra.mxu1 %v10676_v2  ;;  %v10720_v14 = vld [vmem:[#allocation75_spill] sm:$0xff] }
 0xe1d   :  { %3408 = vmatprep.subr.mxu0 %v8871_v24  ;;  %3479 = vmatprep.subr.mxu1 %v8975_v7  ;;  %v10718_v24 = vmov 0.0  }
 0xe1e   :  { %3409 = vmatpush1.msra.mxu0 %v8878_v33  ;;  %3480 = vmatpush1.msra.mxu1 %v8982_v13  ;;  %v10716_v33 = vld [vmem:[#allocation31_spill] sm:$0xff] }
 0xe1f   :  { %3410 = vmatprep.subr.mxu0 %v8885_v31  ;;  %3481 = vmatprep.subr.mxu1 %v8989_v21  ;;  %v10717_v31 = vld [vmem:[#allocation33_spill] sm:$0xff] }
 0xe20   :  { %3411 = vmatpush1.msra.mxu0 %v8892_v17  ;;  %3482 = vmatpush1.msra.mxu1 %v8996_v18  ;;  %v10719_v17 = vld [vmem:[#allocation51_spill] sm:$0xff]  ;;  %v10721_v21 = vld [vmem:[#allocation77_spill] sm:$0xff] }
 0xe21   :  { %3412 = vmatprep.subr.mxu0 %v8899_v27  ;;  %3483 = vmatprep.subr.mxu1 %v9003_v38  ;;  %v3595_v27 = vld [vmem:[%s10143_s5 + $0x18] sm:$0xff] }
 0xe22   :  { %3413 = vmatpush1.msra.mxu0 %v9009_v28  ;;  %3484 = vmatpush1.msra.mxu1 %v9015_v32 }
 0xe23   :  { %3414 = vmatprep.subr.mxu0 %v9021_v35  ;;  %3485 = vmatprep.subr.mxu1 %v9027_v46  ;;  %v10722_v35 = vld [vmem:[#allocation78_spill] sm:$0xff] }
 0xe24   :  { %3415 = vmatpush1.msra.mxu0 %v9033_v52  ;;  %3486 = vmatpush1.msra.mxu1 %v9039_v36  ;;  %v10723_v52 = vld [vmem:[#allocation76_spill] sm:$0xff] }
 0xe25   :  { %3416 = vmatprep.subr.mxu0 %v9045_v37  ;;  %3487 = vmatprep.subr.mxu1 %v9051_v40 }
 0xe26   :  { %3417 = vmatpush1.msra.mxu0 %v9057_v43  ;;  %3488 = vmatpush1.msra.mxu1 %v9063_v44 }
 0xe27   :  { %3418 = vmatprep.subr.mxu0 %v9069_v47  ;;  %3489 = vmatprep.subr.mxu1 %v9075_v48 }
 0xe28   :  { %3419 = vmatpush1.msra.mxu0 %v9081_v49  ;;  %3490 = vmatpush1.msra.mxu1 %v9087_v50 }
 0xe29   :  { %3420 = vmatprep.subr.mxu0 %v9093_v53  ;;  %3491 = vmatprep.subr.mxu1 %v10700_v0  ;;  %v10724_v0 = vld [vmem:[#allocation79_spill] sm:$0xff] }
 0xe2a   :  { %3421 = vmatpush1.msra.mxu0 %v10701_v11  ;;  %3492 = vmatpush1.msra.mxu1 %v10702_v8 }
 0xe2b   :  { %3422 = vmatprep.subr.mxu0 %v10703_v26  ;;  %3493 = vmatprep.subr.mxu1 %v10704_v25  ;;  %v10725_v25 = vld [vmem:[#allocation81_spill] sm:$0xff] }
 0xe2c   :  { %3423 = vmatpush1.msra.mxu0 %v10705_v41  ;;  %3494 = vmatpush1.msra.mxu1 %v10706_v39 }
 0xe2d   :  { %3424 = vmatprep.subr.mxu0 %v10707_v30  ;;  %3495 = vmatprep.subr.mxu1 %v10708_v42 }
 0xe2e   :  { %3425 = vmatpush1.msra.mxu0 %v10709_v5  ;;  %3496 = vmatpush1.msra.mxu1 %v10710_v58  ;;  %v9348_v58 = vld [vmem:[%s10146_s6] ss:$0 sm:$0xff]  ;;  %s6044_s6 = smov 32  }
 0xe2f   :  { %3426 = vmatprep.subr.mxu0 %v10711_v63  ;;  %3497 = vmatprep.subr.mxu1 %v10712_v29 }
 0xe30   :  { %3427 = vmatpush1.msra.mxu0 %v10713_v57  ;;  %3498 = vmatpush1.msra.mxu1 %v10714_v12  ;;  %v10726_v57 = vld [vmem:[#allocation82_spill] sm:$0xff] }
 0xe31   :  { %3428 = vmatprep.subr.mxu0 %v10715_v10  ;;  %3499 = vmatprep.subr.mxu1 %v10716_v33  ;;  %v10727_v10 = vld [vmem:[#allocation80_spill] sm:$0xff] }
 0xe32   :  { %3429 = vmatpush1.msra.mxu0 %v10717_v31  ;;  %3462 = vmatprep.mubr.f32.mxu0 %v10718_v24 }
 0xe33   :  { %3500 = vmatpush1.msra.mxu1 %v10719_v17  ;;  %3533 = vmatprep.mubr.f32.mxu1 %v10718_v24 }
 0xe34   :  { %5476 = vmatprep.subr.mxu1 %v10718_v24  ;;  %5441 = vmatprep.subr.mxu0 %v3595_v27 }
 0xed3   :  { %v3287_v4 = vpop.f32.mrf.mxu0  ;;  %v3358_v38 = vpop.f32.mrf.mxu1 }
 0xed4   :  { %v3363_v2 = vadd.f32 %v3287_v4, %v10720_v14  ;;  %v3365_v36 = vadd.f32 %v3358_v38, %v10723_v52 }
 0xed5   :  { %v3289_v7 = vpop.f32.mrf.mxu0  ;;  %v3360_v32 = vpop.f32.mrf.mxu1 }
 0xed6   :  { %v5226_v13 = vmul.f32 -1.442695, %v3363_v2  ;;  %v3364_v18 = vadd.f32 %v3289_v7, %v10721_v21  ;;  %v3366_v46 = vadd.f32 %v3360_v32, %v10722_v35  ;;  %v10728_v35 = vld [vmem:[#allocation12_spill] sm:$0xff] }
 0xed8   :  { %5818 = vpow2.f32 %v5226_v13  ;;  %v5227_v28 = vmul.f32 -1.442695, %v3364_v18  ;;  %v5228_v37 = vmul.f32 -1.442695, %v3366_v46  ;;  %v10729_v46 = vld [vmem:[#allocation34_spill] sm:$0xff] }
 0xed9   :  { %v661_v52 = vadd.f32 %v10729_v46, %v10728_v35 }
 0xeda   :  { %5820 = vpow2.f32 %v5227_v28 }
 0xedb   :  { %5822 = vtanh.f32 %v3365_v36  ;;  %v10730_v36 = vld [vmem:[#allocation6_spill] sm:$0xff] }
 0xedc   :  { %5824 = vpow2.f32 %v5228_v37  ;;  %v10731_v37 = vld [vmem:[#allocation32_spill] sm:$0xff] }
 0xee5   :  { %v5819_v40 = vpop.eup %5818 }
 0xee6   :  { %v3370_v43 = vadd.f32 1.0, %v5819_v40  ;;  %v665_v40 = vadd.f32 %v10731_v37, %v10730_v36 }
 0xee7   :  { %v5821_v44 = vpop.eup %5820 }
 0xee8   :  { %5826 = vrcp.f32 %v3370_v43  ;;  %v3376_v47 = vadd.f32 1.0, %v5821_v44  ;;  %v5823_v48 = vpop.eup %5822  ;;  %v662_v43 = vmul.f32 0.125, %v661_v52  ;;  %v666_v44 = vmul.f32 0.125, %v665_v40 }
 0xee9   :  { %v5825_v49 = vpop.eup %5824 }
 0xeea   :  { %5828 = vrcp.f32 %v3376_v47  ;;  %v3383_v19 = vadd.f32 1.0, %v5825_v49  ;;  %v10732_v47 = vld [vmem:[#allocation14_spill] sm:$0xff] }
 0xeec   :  { %5830 = vrcp.f32 %v3383_v19 }
 0xef5   :  { %v5827_v50 = vpop.eup %5826 }
 0xef6   :  { %v3387_v53 = vmul.f32 %v5827_v50, %v5823_v48  ;;  %v10733_v48 = vld [vmem:[#allocation7_spill] sm:$0xff] }
 0xef7   :  { %v5829_v34 = vpop.eup %5828  ;;  %v669_v49 = vadd.f32 %v10733_v48, %v10732_v47 }
 0xef8   :  { %v3386_v23 = vmul.f32 %v5829_v34, %v9219_v55  ;;  %v3575_v55 = vld [vmem:[%s10144_s4 + $0x8] sm:$0xff] }
 0xef9   :  { %v5831_v1 = vpop.eup %5830  ;;  %v670_v34 = vmul.f32 0.0625, %v669_v49 }
 0xefa   :  { %v9299_v22 = vadd.f32 %v3387_v53, %v3386_v23  ;;  %v667_v53 = vadd.f32 %v666_v44, %v662_v43  ;;  %v10734_v23 = vld [vmem:[#allocation19_spill] sm:$0xff] }
 0xefb   :  { %vm672_vm4 = vcmp.gt.f32.partialorder %v10734_v23, 0.5 }
 0xefc   :  { %5832 = vtanh.f32 %v9299_v22 }
 0xf09   :  { %v5833_v59 = vpop.eup %5832 }
 0xf0a   :  { %v3390_v3 = vmul.f32 %v5833_v59, %v5831_v1  ;;  %v10735_v1 = vld [vmem:[#allocation83_spill] sm:$0xff] }
 0xf0c   :  { %3463 = vmatmul.mubr.f32.vlgmr.msra.gmra.mxu0 %v3390_v3  ;;  %3534 = vmatmul.mubr.f32.vlgmr.msra.gmra.mxu1 %v3390_v3  ;;  %v3391_v16 = vmul.f32 %v3390_v3, %v8510_v51  ;;  %v671_v3 = vadd.f32 %v670_v34, %v667_v53 }
 0xf0d   :  { %5442 = vmatpush3.msra.mxu0 %v3595_v27  ;;  %5449 = vmatprep.mubr.msk.f32.mxu0 %vm3603_vm2, %v3574_v60 }
 0xf0e   :  { %5443 = vmatprep.subr.mxu0 %v3594_v54  ;;  %v9314_v9 = vadd.f32 %v3391_v16, %v9228_v20  ;;  %5477 = vmatpush3.msra.mxu1 %v3816_v6 }
 0xf0f   :  { %5444 = vmatpush3.msra.mxu0 %v3594_v54  ;;  %5478 = vmatprep.subr.mxu1 %v10718_v24 }
 0xf10   :  { %5445 = vmatprep.subr.mxu0 %v3593_v15  ;;  %5479 = vmatpush3.msra.mxu1 %v3815_v61 }
 0xf11   :  { %5446 = vmatpush3.msra.mxu0 %v3593_v15  ;;  %5480 = vmatprep.subr.mxu1 %v10718_v24  ;;  %v3576_v15 = vld [vmem:[%s10144_s4 + $0x10] sm:$0xff] }
 0xf12   :  { %5447 = vmatprep.subr.mxu0 %v3592_v56  ;;  %5481 = vmatpush3.msra.mxu1 %v3814_v62 }
 0xf13   :  { %5448 = vmatpush3.msra.mxu0 %v3592_v56  ;;  %5482 = vmatprep.subr.mxu1 %v10718_v24  ;;  %v3577_v56 = vld [vmem:[%s10144_s4 + $0x18] sm:$0xff] }
 0xf14   :  { %5450 = vmatmul.mubr.msk.f32.vlgmr.msra.gmra.mxu0 %vm3603_vm2, %v3575_v55  ;;  %5483 = vmatpush3.msra.mxu1 %v3813_v45  ;;  %v3580_v55 = vld [vmem:[%s10144_s4 + $0x30] sm:$0xff] }
 0xf15   :  { %5484 = vmatprep.mubr.msk.f32.mxu1 %vm6043_vm3, %v10718_v24  ;;  %5487 = vmatprep.subr.mxu1 %v10718_v24 }
 0xf16   :  { %5452 = vmatprep.mubr.msk.f32.mxu0 %vm3603_vm2, %v3576_v15 }
 0xf18   :  { %5453 = vmatmul.mubr.msk.f32.gmra.mxu0 %vm3603_vm2, %v3577_v56 }
 0xfcc   :  { %v3464_v20 = vpop.f32.mrf.mxu0  ;;  %v3535_v39 = vpop.f32.mrf.mxu1 }
 0xfcd   :  { %v3540_v11 = vadd.f32 %v3464_v20, %v10724_v0  ;;  %v3542_v33 = vadd.f32 %v3535_v39, %v10727_v10  ;;  %v3585_v20 = vld [vmem:[%s10144_s4 + $0x58] sm:$0xff]  ;;  %v3586_v0 = vld [vmem:[%s10144_s4 + $0x60] sm:$0xff] }
 0xfce   :  { %v3466_v8 = vpop.f32.mrf.mxu0  ;;  %v3537_v5 = vpop.f32.mrf.mxu1  ;;  %v3967_v10 = vld [vmem:[%s10147_s8] sm:$0xff] }
 0xfcf   :  { %v5229_v26 = vmul.f32 -1.442695, %v3540_v11  ;;  %v3541_v41 = vadd.f32 %v3466_v8, %v10725_v25  ;;  %v3543_v12 = vadd.f32 %v3537_v5, %v10726_v57  ;;  %v3587_v11 = vld [vmem:[%s10144_s4 + $0x68] sm:$0xff]  ;;  %v3588_v8 = vld [vmem:[%s10144_s4 + $0x70] sm:$0xff]  ;;  %v3590_v25 = vld [vmem:[%s10144_s4 + $0x80] sm:$0xff] }
 0xfd0   :  { %v3970_v57 = vld [vmem:[%s10147_s8 + $0x18] sm:$0xff] }
 0xfd1   :  { %5834 = vpow2.f32 %v5229_v26  ;;  %v5230_v30 = vmul.f32 -1.442695, %v3541_v41  ;;  %v5231_v31 = vmul.f32 -1.442695, %v3543_v12  ;;  %v3589_v26 = vld [vmem:[%s10144_s4 + $0x78] sm:$0xff]  ;;  %v3591_v41 = vld [vmem:[%s10144_s4 + $0x88] sm:$0xff] }
 0xfd2   :  { %v3969_v12 = vld [vmem:[%s10147_s8 + $0x10] sm:$0xff] }
 0xfd3   :  { %5836 = vpow2.f32 %v5230_v30 }
 0xfd4   :  { %v9343_v42 = vpop.f32.mrf.mxu0  ;;  %5838 = vtanh.f32 %v3542_v33 }
 0xfd5   :  { %5840 = vpow2.f32 %v5231_v31  ;;  %v3730_v33 = vadd.f32 %v9343_v42, %v9348_v58  ;;  %v4124_v42 = vld [vmem:[%s10148_s9 + $0x18] sm:$0xff]  ;;  %v4123_v31 = vld [vmem:[%s10148_s9 + $0x10] sm:$0xff] }
 0xfd6   :  { %v3724_v63 = vpop.f32.mrf.mxu0  ;;  %5552 = vmatprep.subr.mxu0 %v4124_v42 }
 0xfd7   :  { %v9351_v29 = vadd.f32 %v9348_v58, %v3724_v63  ;;  %5553 = vmatpush3.msra.mxu0 %v4124_v42 }
 0xfd8   :  { %5554 = vmatprep.subr.mxu0 %v4123_v31 }
 0xfd9   :  { %5485 = vmatmul.mubr.msk.f32.vlgmr.msra.gmra.mxu1 %vm3603_vm2, %v9351_v29  ;;  %5555 = vmatpush3.msra.mxu0 %v4123_v31 }
 0xfda   :  { %5488 = vmatpush3.msra.mxu1 %v3816_v6  ;;  %5495 = vmatprep.mubr.msk.f32.mxu1 %vm6043_vm3, %v10718_v24  ;;  %v3581_v6 = vld [vmem:[%s10144_s4 + $0x38] sm:$0xff] }
 0xfdb   :  { %5489 = vmatprep.subr.mxu1 %v10718_v24 }
 0xfdc   :  { %5490 = vmatpush3.msra.mxu1 %v3815_v61  ;;  %v3582_v61 = vld [vmem:[%s10144_s4 + $0x40] sm:$0xff] }
 0xfdd   :  { %5491 = vmatprep.subr.mxu1 %v10718_v24 }
 0xfde   :  { %v5835_v17 = vpop.eup %5834  ;;  %5492 = vmatpush3.msra.mxu1 %v3814_v62  ;;  %v3583_v62 = vld [vmem:[%s10144_s4 + $0x48] sm:$0xff] }
 0xfdf   :  { %v3547_v27 = vadd.f32 1.0, %v5835_v17  ;;  %5493 = vmatprep.subr.mxu1 %v10718_v24  ;;  %v4122_v17 = vld [vmem:[%s10148_s9 + $0x8] sm:$0xff] }
 0xfe0   :  { %v5837_v4 = vpop.eup %5836  ;;  %5494 = vmatpush3.msra.mxu1 %v3813_v45  ;;  %v3584_v45 = vld [vmem:[%s10144_s4 + $0x50] sm:$0xff]  ;;  %5556 = vmatprep.subr.mxu0 %v4122_v17 }
 0xfe1   :  { %5842 = vrcp.f32 %v3547_v27  ;;  %v3553_v14 = vadd.f32 1.0, %v5837_v4  ;;  %5498 = vmatprep.subr.mxu1 %v10718_v24  ;;  %v5839_v2 = vpop.eup %5838  ;;  %5557 = vmatpush3.msra.mxu0 %v4122_v17  ;;  %v5454_v27 = vpop.f32.mrf.mxu0 }
 0xfe2   :  { %v5841_v7 = vpop.eup %5840  ;;  %v3740_v44 = vadd.f32 %v5454_v27, %v9348_v58 }
 0xfe3   :  { %5844 = vrcp.f32 %v3553_v14  ;;  %v3560_v38 = vadd.f32 1.0, %v5841_v7  ;;  %v3734_v4 = vpop.f32.mrf.mxu0 }
 0xfe4   :  { %v9485_v52 = vadd.f32 %v9348_v58, %v3734_v4 }
 0xfe5   :  { %5846 = vrcp.f32 %v3560_v38 }
 0xfee   :  { %v5843_v13 = vpop.eup %5842 }
 0xfef   :  { %v3564_v21 = vmul.f32 %v5843_v13, %v5839_v2 }
 0xff0   :  { %v5845_v18 = vpop.eup %5844 }
 0xff1   :  { %v3563_v28 = vmul.f32 %v5845_v18, %v9299_v22 }
 0xff2   :  { %v5847_v50 = vpop.eup %5846 }
 0xff3   :  { %v3565_v32 = vadd.f32 %v3564_v21, %v3563_v28 }
 0xff5   :  { %5848 = vtanh.f32 %v3565_v32 }
0x1002   :  { %v5849_v19 = vpop.eup %5848 }
0x1003   :  { %v3567_v22 = vmul.f32 %v5849_v19, %v5847_v50 }
0x1005   :  { %v9372_v59 = vsel %vm672_vm4, %v3567_v22, %v10735_v1  ;;  %v3568_v60 = vmul.f32 %v3567_v22, %v8510_v51  ;;  %v3578_v51 = vld [vmem:[%s10144_s4 + $0x20] sm:$0xff] }
0x1006   :  { %4691 = vrot.lane.b32.xlu1 %v9372_v59, %s6044_s6  ;;  %5455 = vmatprep.mubr.msk.f32.mxu0 %vm3603_vm2, %v3578_v51 }
0x1007   :  { %v3569_v54 = vadd.f32 %v3568_v60, %v9314_v9  ;;  %v3579_v9 = vld [vmem:[%s10144_s4 + $0x28] sm:$0xff] }
0x1008   :  { %5456 = vmatmul.mubr.msk.f32.gmra.mxu0 %vm3603_vm2, %v3579_v9 }
0x1009   :  { %v3573_v16 = vmul.f32 %v3569_v54, %v671_v3  ;;  %5458 = vmatprep.mubr.msk.f32.mxu0 %vm3603_vm2, %v3580_v55 }
0x100b   :  { %4680 = vrot.lane.b32.xlu0 %v3573_v16, %s6045_s21 }
0x100c   :  { %5459 = vmatmul.mubr.msk.f32.gmra.mxu0 %vm3603_vm2, %v3581_v6 }
0x100d   :  { %5461 = vmatprep.mubr.msk.f32.mxu0 %vm3603_vm2, %v3582_v61 }
0x1010   :  { %5462 = vmatmul.mubr.msk.f32.gmra.mxu0 %vm3603_vm2, %v3583_v62 }
0x1011   :  { %5464 = vmatprep.mubr.msk.f32.mxu0 %vm3603_vm2, %v3584_v45 }
0x1014   :  { %5465 = vmatmul.mubr.msk.f32.gmra.mxu0 %vm3603_vm2, %v3585_v20 }
0x1015   :  { %5467 = vmatprep.mubr.msk.f32.mxu0 %vm3603_vm2, %v3586_v0 }
0x1018   :  { %5468 = vmatmul.mubr.msk.f32.gmra.mxu0 %vm3603_vm2, %v3587_v11 }
0x1019   :  { %5470 = vmatprep.mubr.msk.f32.mxu0 %vm3603_vm2, %v3588_v8 }
0x101c   :  { %5471 = vmatmul.mubr.msk.f32.gmra.mxu0 %vm3603_vm2, %v3589_v26 }
0x101d   :  { %5473 = vmatprep.mubr.msk.f32.mxu0 %vm3603_vm2, %v3590_v25 }
0x1020   :  { %5474 = vmatmul.mubr.msk.f32.gmra.mxu0 %vm3603_vm2, %v3591_v41 }
0x1078   :  { %v4692_v62 = vpop.permute.xlu1 %4691 }
0x1099   :  { %v3886_v39 = vpop.f32.mrf.mxu1 }
0x109a   :  { %v3890_v30 = vmul.f32 %v3886_v39, %v9351_v29  ;;  %v3968_v29 = vld [vmem:[%s10147_s8 + $0x8] sm:$0xff] }
0x109b   :  { %v5486_v5 = vpop.f32.mrf.mxu1 }
0x109c   :  { %v9442_v63 = vadd.f32 %v3890_v30, %v3886_v39 }
0x109e   :  { %5496 = vmatmul.mubr.msk.f32.vlgmr.msra.gmra.mxu1 %vm3603_vm2, %v9442_v63 }
0x109f   :  { %5499 = vmatpush3.msra.mxu1 %v3970_v57  ;;  %5506 = vmatprep.mubr.msk.f32.mxu1 %vm6043_vm3, %v10718_v24 }
0x10a0   :  { %5500 = vmatprep.subr.mxu1 %v10718_v24 }
0x10a1   :  { %5501 = vmatpush3.msra.mxu1 %v3969_v12 }
0x10a2   :  { %5502 = vmatprep.subr.mxu1 %v10718_v24 }
0x10a3   :  { %5503 = vmatpush3.msra.mxu1 %v3968_v29 }
0x10a4   :  { %5504 = vmatprep.subr.mxu1 %v10718_v24 }
0x10a5   :  { %5505 = vmatpush3.msra.mxu1 %v3967_v10 }
0x10a6   :  { %5507 = vmatmul.mubr.msk.f32.vlgmr.msra.gmra.mxu1 %vm3603_vm2, %v3730_v33  ;;  %5509 = vmatprep.subr.mxu1 %v10718_v24 }
0x10a7   :  { %5510 = vmatpush3.msra.mxu1 %v3970_v57  ;;  %5517 = vmatprep.mubr.msk.f32.mxu1 %vm6043_vm3, %v10718_v24 }
0x10a8   :  { %5511 = vmatprep.subr.mxu1 %v10718_v24 }
0x10a9   :  { %5512 = vmatpush3.msra.mxu1 %v3969_v12 }
0x10aa   :  { %5513 = vmatprep.subr.mxu1 %v10718_v24 }
0x10ab   :  { %5514 = vmatpush3.msra.mxu1 %v3968_v29 }
0x10ac   :  { %5515 = vmatprep.subr.mxu1 %v10718_v24  ;;  %v4121_v24 = vld [vmem:[%s10148_s9] sm:$0xff]  ;;  %s6046_s9 = smov 64  }
0x10ad   :  { %5516 = vmatpush3.msra.mxu1 %v3967_v10  ;;  %5558 = vmatprep.subr.mxu0 %v4121_v24 }
0x10ae   :  { %5520 = vmatprep.subr.mxu1 %v4124_v42  ;;  %5559 = vmatpush3.msra.mxu0 %v4121_v24 }
0x10c8   :  { %v5457_v14 = vpop.f32.mrf.mxu0 }
0x10c9   :  { %v3750_v49 = vadd.f32 %v5457_v14, %v9348_v58 }
0x10ca   :  { %v3744_v2 = vpop.f32.mrf.mxu0 }
0x10cb   :  { %v3745_v43 = vadd.f32 %v9348_v58, %v3744_v2 }
0x10cc   :  { %v5460_v7 = vpop.f32.mrf.mxu0 }
0x10cd   :  { %v3760_v34 = vadd.f32 %v5460_v7, %v9348_v58 }
0x10ce   :  { %v3754_v13 = vpop.f32.mrf.mxu0 }
0x10cf   :  { %v3755_v48 = vadd.f32 %v9348_v58, %v3754_v13 }
0x10d0   :  { %v5463_v38 = vpop.f32.mrf.mxu0 }
0x10d1   :  { %v3770_v22 = vadd.f32 %v5463_v38, %v9348_v58 }
0x10d2   :  { %v3764_v28 = vpop.f32.mrf.mxu0 }
0x10d3   :  { %v9499_v53 = vadd.f32 %v9348_v58, %v3764_v28 }
0x10d4   :  { %v5466_v37 = vpop.f32.mrf.mxu0 }
0x10d5   :  { %v3780_v60 = vadd.f32 %v5466_v37, %v9348_v58 }
0x10d6   :  { %v3774_v40 = vpop.f32.mrf.mxu0 }
0x10d7   :  { %v9506_v23 = vadd.f32 %v9348_v58, %v3774_v40 }
0x10d8   :  { %v5469_v47 = vpop.f32.mrf.mxu0 }
0x10d9   :  { %v3790_v15 = vadd.f32 %v5469_v47, %v9348_v58 }
0x10da   :  { %v3784_v50 = vpop.f32.mrf.mxu0 }
0x10db   :  { %v9513_v3 = vadd.f32 %v9348_v58, %v3784_v50 }
0x10dc   :  { %v5472_v19 = vpop.f32.mrf.mxu0 }
0x10dd   :  { %v9531_v55 = vadd.f32 %v5472_v19, %v9348_v58 }
0x10de   :  { %v3794_v1 = vpop.f32.mrf.mxu0 }
0x10df   :  { %v9520_v16 = vadd.f32 %v9348_v58, %v3794_v1 }
0x10e0   :  { %v5475_v54 = vpop.f32.mrf.mxu0 }
0x10e1   :  { %v9538_v61 = vadd.f32 %v5475_v54, %v9348_v58  ;;  %v4760_v54 = vld [vmem:[%s10149_s10 + $0x1e8] sm:$0xff] }
0x10e2   :  { %v3804_v56 = vpop.f32.mrf.mxu0 }
0x10e3   :  { %v9528_v9 = vadd.f32 %v9348_v58, %v3804_v56  ;;  %v4761_v56 = vld [vmem:[%s10149_s10 + $0x1f0] sm:$0xff] }
0x115e   :  { %v3961_v21 = vpop.f32.mrf.mxu1 }
0x115f   :  { %v3965_v51 = vmul.f32 %v3961_v21, %v9442_v63 }
0x1160   :  { %v5497_v18 = vpop.f32.mrf.mxu1 }
0x1161   :  { %v3966_v6 = vadd.f32 %v3965_v51, %v3961_v21  ;;  %v4756_v51 = vld [vmem:[%s10149_s10 + $0x1c8] sm:$0xff] }
0x1163   :  { %v9543_v45 = vsel %vm3603_vm2, %v3966_v6, %v4692_v62  ;;  %v4757_v6 = vld [vmem:[%s10149_s10 + $0x1d0] sm:$0xff]  ;;  %v4754_v62 = vld [vmem:[%s10149_s10 + $0x1b8] sm:$0xff] }
0x1166   :  { %v4040_v32 = vpop.f32.mrf.mxu1 }
0x1167   :  { %v4044_v35 = vmul.f32 %v4040_v32, %v3730_v33 }
0x1168   :  { %v5508_v46 = vpop.f32.mrf.mxu1 }
0x1169   :  { %v4045_v36 = vadd.f32 %v4044_v35, %v4040_v32 }
0x116b   :  { %5518 = vmatmul.mubr.msk.f32.vlgmr.msra.gmra.mxu1 %vm3603_vm2, %v4045_v36 }
0x116c   :  { %5521 = vmatpush3.msra.mxu1 %v4124_v42  ;;  %5528 = vmatprep.mubr.msk.f32.mxu1 %vm3603_vm2, %v9485_v52 }
0x116d   :  { %5522 = vmatprep.subr.mxu1 %v4123_v31 }
0x116e   :  { %5523 = vmatpush3.msra.mxu1 %v4123_v31 }
0x116f   :  { %5524 = vmatprep.subr.mxu1 %v4122_v17 }
0x1170   :  { %5525 = vmatpush3.msra.mxu1 %v4122_v17 }
0x1171   :  { %5526 = vmatprep.subr.mxu1 %v4121_v24 }
0x1172   :  { %5527 = vmatpush3.msra.mxu1 %v4121_v24 }
0x1173   :  { %5529 = vmatmul.mubr.msk.f32.vlgmr.msra.gmra.mxu1 %vm3603_vm2, %v3740_v44  ;;  %4798 = vmatprep.subr.mxu1 %v4760_v54  ;;  %v4712_v54 = vld [vmem:[%s10149_s10 + $0x68] sm:$0xff] }
0x1174   :  { %5531 = vmatprep.mubr.msk.f32.mxu1 %vm3603_vm2, %v3745_v43 }
0x1177   :  { %5532 = vmatmul.mubr.msk.f32.gmra.mxu1 %vm3603_vm2, %v3750_v49 }
0x1178   :  { %5534 = vmatprep.mubr.msk.f32.mxu1 %vm3603_vm2, %v3755_v48 }
0x117b   :  { %5535 = vmatmul.mubr.msk.f32.gmra.mxu1 %vm3603_vm2, %v3760_v34 }
0x117c   :  { %5537 = vmatprep.mubr.msk.f32.mxu1 %vm3603_vm2, %v9499_v53 }
0x117f   :  { %5538 = vmatmul.mubr.msk.f32.gmra.mxu1 %vm3603_vm2, %v3770_v22 }
0x1180   :  { %5540 = vmatprep.mubr.msk.f32.mxu1 %vm3603_vm2, %v9506_v23 }
0x1183   :  { %5541 = vmatmul.mubr.msk.f32.gmra.mxu1 %vm3603_vm2, %v3780_v60 }
0x1184   :  { %5543 = vmatprep.mubr.msk.f32.mxu1 %vm3603_vm2, %v9513_v3 }
0x1187   :  { %5544 = vmatmul.mubr.msk.f32.gmra.mxu1 %vm3603_vm2, %v3790_v15 }
0x1188   :  { %5546 = vmatprep.mubr.msk.f32.mxu1 %vm3603_vm2, %v9520_v16 }
0x118b   :  { %5547 = vmatmul.mubr.msk.f32.gmra.mxu1 %vm3603_vm2, %v9531_v55 }
0x118c   :  { %5549 = vmatprep.mubr.msk.f32.mxu1 %vm3603_vm2, %v9528_v9 }
0x118f   :  { %5550 = vmatmul.mubr.msk.f32.gmra.mxu1 %vm3603_vm2, %v9538_v61 }
0x1190   :  { %5287 = vmatprep.mubr.msk.f32.mxu1 %vm191_vm0, %v9543_v45 }
0x122b   :  { %v4115_v20 = vpop.f32.mrf.mxu1 }
0x122c   :  { %v4119_v0 = vmul.f32 %v4115_v20, %v4045_v36 }
0x122d   :  { %v5519_v11 = vpop.f32.mrf.mxu1 }
0x122e   :  { %v4120_v8 = vadd.f32 %v4119_v0, %v4115_v20  ;;  %v4753_v20 = vld [vmem:[%s10149_s10 + $0x1b0] sm:$0xff]  ;;  %v4748_v0 = vld [vmem:[%s10149_s10 + $0x188] sm:$0xff]  ;;  %v4750_v11 = vld [vmem:[%s10149_s10 + $0x198] sm:$0xff] }
0x1230   :  { %v5589_v26 = vpack.i.bf16 %v9372_v59, %v4120_v8  ;;  %v4747_v8 = vld [vmem:[%s10149_s10 + $0x180] sm:$0xff] }
0x1232   :  { %5590 = vrot.lane.b32.xlu0 %v5589_v26, %s6046_s9  ;;  %v4749_v26 = vld [vmem:[%s10149_s10 + $0x190] sm:$0xff] }
0x1233   :  { %v5530_v58 = vpop.f32.mrf.mxu1 }
0x1234   :  { %v4319_v25 = vmul.f32 %v5530_v58, %v3740_v44 }
0x1235   :  { %v4239_v41 = vpop.f32.mrf.mxu1 }
0x1236   :  { %v4318_v39 = vmul.f32 %v4239_v41, %v9485_v52  ;;  %v9551_v63 = vadd.f32 %v5530_v58, %v4319_v25  ;;  %v4744_v58 = vld [vmem:[%s10149_s10 + $0x168] sm:$0xff]  ;;  %v4746_v25 = vld [vmem:[%s10149_s10 + $0x178] sm:$0xff] }
0x1237   :  { %v5533_v30 = vpop.f32.mrf.mxu1 }
0x1238   :  { %v9549_v5 = vadd.f32 %v4318_v39, %v4239_v41  ;;  %v4321_v57 = vmul.f32 %v5533_v30, %v3750_v49  ;;  %v4743_v41 = vld [vmem:[%s10149_s10 + $0x160] sm:$0xff]  ;;  %v4745_v39 = vld [vmem:[%s10149_s10 + $0x170] sm:$0xff] }
0x1239   :  { %v4249_v12 = vpop.f32.mrf.mxu1 }
0x123a   :  { %v4320_v29 = vmul.f32 %v4249_v12, %v3745_v43  ;;  %5560 = vmatprep.mubr.msk.f32.mxu0 %vm3603_vm2, %v9549_v5  ;;  %v9559_v33 = vadd.f32 %v5533_v30, %v4321_v57  ;;  %v4740_v30 = vld [vmem:[%s10149_s10 + $0x148] sm:$0xff]  ;;  %v4742_v57 = vld [vmem:[%s10149_s10 + $0x158] sm:$0xff] }
0x123b   :  { %v5536_v10 = vpop.f32.mrf.mxu1  ;;  %5561 = vmatmul.mubr.msk.f32.vlgmr.msra.gmra.mxu0 %vm3603_vm2, %v9551_v63 }
0x123c   :  { %v9557_v59 = vadd.f32 %v4320_v29, %v4249_v12  ;;  %v4323_v42 = vmul.f32 %v5536_v10, %v3760_v34  ;;  %v4739_v12 = vld [vmem:[%s10149_s10 + $0x140] sm:$0xff]  ;;  %v4741_v29 = vld [vmem:[%s10149_s10 + $0x150] sm:$0xff] }
0x123d   :  { %v4259_v31 = vpop.f32.mrf.mxu1 }
0x123e   :  { %v4322_v17 = vmul.f32 %v4259_v31, %v3755_v48  ;;  %5563 = vmatprep.mubr.msk.f32.mxu0 %vm3603_vm2, %v9557_v59  ;;  %v9567_v4 = vadd.f32 %v5536_v10, %v4323_v42  ;;  %v4736_v10 = vld [vmem:[%s10149_s10 + $0x128] sm:$0xff]  ;;  %v4738_v42 = vld [vmem:[%s10149_s10 + $0x138] sm:$0xff] }
0x123f   :  { %v5539_v24 = vpop.f32.mrf.mxu1  ;;  %5564 = vmatmul.mubr.msk.f32.gmra.mxu0 %vm3603_vm2, %v9559_v33 }
0x1240   :  { %v9565_v27 = vadd.f32 %v4322_v17, %v4259_v31  ;;  %v4325_v14 = vmul.f32 %v5539_v24, %v3770_v22  ;;  %v4735_v31 = vld [vmem:[%s10149_s10 + $0x120] sm:$0xff]  ;;  %v4737_v17 = vld [vmem:[%s10149_s10 + $0x130] sm:$0xff] }
0x1241   :  { %v4269_v2 = vpop.f32.mrf.mxu1 }
0x1242   :  { %v4324_v7 = vmul.f32 %v4269_v2, %v9499_v53  ;;  %5566 = vmatprep.mubr.msk.f32.mxu0 %vm3603_vm2, %v9565_v27  ;;  %v9576_v18 = vadd.f32 %v5539_v24, %v4325_v14  ;;  %v4732_v24 = vld [vmem:[%s10149_s10 + $0x108] sm:$0xff]  ;;  %v4734_v14 = vld [vmem:[%s10149_s10 + $0x118] sm:$0xff] }
0x1243   :  { %v5542_v13 = vpop.f32.mrf.mxu1  ;;  %5567 = vmatmul.mubr.msk.f32.gmra.mxu0 %vm3603_vm2, %v9567_v4 }
0x1244   :  { %v9574_v21 = vadd.f32 %v4324_v7, %v4269_v2  ;;  %v4327_v38 = vmul.f32 %v5542_v13, %v3780_v60  ;;  %v4731_v2 = vld [vmem:[%s10149_s10 + $0x100] sm:$0xff]  ;;  %v4733_v7 = vld [vmem:[%s10149_s10 + $0x110] sm:$0xff] }
0x1245   :  { %v4279_v28 = vpop.f32.mrf.mxu1 }
0x1246   :  { %v4326_v32 = vmul.f32 %v4279_v28, %v9506_v23  ;;  %5569 = vmatprep.mubr.msk.f32.mxu0 %vm3603_vm2, %v9574_v21  ;;  %v9585_v52 = vadd.f32 %v5542_v13, %v4327_v38  ;;  %v4728_v13 = vld [vmem:[%s10149_s10 + $0xe8] sm:$0xff]  ;;  %v4730_v38 = vld [vmem:[%s10149_s10 + $0xf8] sm:$0xff] }
0x1247   :  { %v5545_v35 = vpop.f32.mrf.mxu1  ;;  %5570 = vmatmul.mubr.msk.f32.gmra.mxu0 %vm3603_vm2, %v9576_v18 }
0x1248   :  { %v9583_v46 = vadd.f32 %v4326_v32, %v4279_v28  ;;  %v4329_v36 = vmul.f32 %v5545_v35, %v3790_v15  ;;  %v4759_v15 = vld [vmem:[%s10149_s10 + $0x1e0] sm:$0xff]  ;;  %v4729_v32 = vld [vmem:[%s10149_s10 + $0xf0] sm:$0xff] }
0x1249   :  { %v4289_v37 = vpop.f32.mrf.mxu1  ;;  %4799 = vmatpush1.msra.mxu1 %v4759_v15  ;;  %v4727_v28 = vld [vmem:[%s10149_s10 + $0xe0] sm:$0xff] }
0x124a   :  { %v4328_v40 = vmul.f32 %v4289_v37, %v9513_v3  ;;  %5572 = vmatprep.mubr.msk.f32.mxu0 %vm3603_vm2, %v9583_v46  ;;  %v9594_v47 = vadd.f32 %v5545_v35, %v4329_v36  ;;  %4800 = vmatprep.subr.mxu1 %v4756_v51  ;;  %v4724_v35 = vld [vmem:[%s10149_s10 + $0xc8] sm:$0xff]  ;;  %v4726_v36 = vld [vmem:[%s10149_s10 + $0xd8] sm:$0xff]  ;;  %v4711_v15 = vld [vmem:[%s10149_s10 + $0x60] sm:$0xff] }
0x124b   :  { %v5548_v43 = vpop.f32.mrf.mxu1  ;;  %5573 = vmatmul.mubr.msk.f32.gmra.mxu0 %vm3603_vm2, %v9585_v52  ;;  %v4708_v51 = vld [vmem:[%s10149_s10 + $0x48] sm:$0xff] }
0x124c   :  { %v9592_v44 = vadd.f32 %v4328_v40, %v4289_v37  ;;  %v4331_v48 = vmul.f32 %v5548_v43, %v9531_v55  ;;  %v4755_v55 = vld [vmem:[%s10149_s10 + $0x1c0] sm:$0xff]  ;;  %v4725_v40 = vld [vmem:[%s10149_s10 + $0xd0] sm:$0xff] }
0x124d   :  { %v4299_v49 = vpop.f32.mrf.mxu1  ;;  %4801 = vmatpush1.msra.mxu1 %v4755_v55  ;;  %v4723_v37 = vld [vmem:[%s10149_s10 + $0xc0] sm:$0xff] }
0x124e   :  { %v4330_v50 = vmul.f32 %v4299_v49, %v9520_v16  ;;  %5575 = vmatprep.mubr.msk.f32.mxu0 %vm3603_vm2, %v9592_v44  ;;  %v9604_v19 = vadd.f32 %v5548_v43, %v4331_v48  ;;  %v4762_v16 = vld [vmem:[%s10149_s10 + $0x1f8] sm:$0xff]  ;;  %v4720_v43 = vld [vmem:[%s10149_s10 + $0xa8] sm:$0xff]  ;;  %v4707_v55 = vld [vmem:[%s10149_s10 + $0x40] sm:$0xff] }
0x124f   :  { %v5551_v53 = vpop.f32.mrf.mxu1  ;;  %5576 = vmatmul.mubr.msk.f32.gmra.mxu0 %vm3603_vm2, %v9594_v47  ;;  %4869 = vmatprep.subr.mxu0 %v4762_v16  ;;  %v4722_v48 = vld [vmem:[%s10149_s10 + $0xb8] sm:$0xff] }
0x1250   :  { %v9602_v34 = vadd.f32 %v4330_v50, %v4299_v49  ;;  %v4333_v23 = vmul.f32 %v5551_v53, %v9538_v61  ;;  %4870 = vmatpush1.msra.mxu0 %v4761_v56  ;;  %v4752_v61 = vld [vmem:[%s10149_s10 + $0x1a8] sm:$0xff]  ;;  %v4719_v49 = vld [vmem:[%s10149_s10 + $0xa0] sm:$0xff]  ;;  %v4721_v50 = vld [vmem:[%s10149_s10 + $0xb0] sm:$0xff] }
0x1251   :  { %v4309_v22 = vpop.f32.mrf.mxu1  ;;  %4802 = vmatprep.subr.mxu1 %v4752_v61  ;;  %v4714_v16 = vld [vmem:[%s10149_s10 + $0x78] sm:$0xff]  ;;  %v4713_v56 = vld [vmem:[%s10149_s10 + $0x70] sm:$0xff]  ;;  %v4704_v61 = vld [vmem:[%s10149_s10 + $0x28] sm:$0xff] }
0x1252   :  { %v4332_v1 = vmul.f32 %v4309_v22, %v9528_v9  ;;  %5578 = vmatprep.mubr.msk.f32.mxu0 %vm3603_vm2, %v9602_v34  ;;  %v9614_v60 = vadd.f32 %v5551_v53, %v4333_v23  ;;  %v4758_v9 = vld [vmem:[%s10149_s10 + $0x1d8] sm:$0xff]  ;;  %v4716_v53 = vld [vmem:[%s10149_s10 + $0x88] sm:$0xff] }
0x1253   :  { %5579 = vmatmul.mubr.msk.f32.gmra.mxu0 %vm3603_vm2, %v9604_v19  ;;  %4871 = vmatprep.subr.mxu0 %v4758_v9  ;;  %v4718_v23 = vld [vmem:[%s10149_s10 + $0x98] sm:$0xff] }
0x1254   :  { %v9612_v3 = vadd.f32 %v4332_v1, %v4309_v22  ;;  %4872 = vmatpush1.msra.mxu0 %v4757_v6  ;;  %v4715_v22 = vld [vmem:[%s10149_s10 + $0x80] sm:$0xff]  ;;  %v4717_v1 = vld [vmem:[%s10149_s10 + $0x90] sm:$0xff]  ;;  %v4710_v9 = vld [vmem:[%s10149_s10 + $0x58] sm:$0xff] }
0x1255   :  { %4873 = vmatprep.subr.mxu0 %v4754_v62  ;;  %v4709_v6 = vld [vmem:[%s10149_s10 + $0x50] sm:$0xff]  ;;  %v4706_v62 = vld [vmem:[%s10149_s10 + $0x38] sm:$0xff] }
0x1256   :  { %5581 = vmatprep.mubr.msk.f32.mxu0 %vm3603_vm2, %v9612_v3  ;;  %4874 = vmatpush1.msra.mxu0 %v4753_v20  ;;  %v4705_v20 = vld [vmem:[%s10149_s10 + $0x30] sm:$0xff] }
0x1257   :  { %5582 = vmatmul.mubr.msk.f32.gmra.mxu0 %vm3603_vm2, %v9614_v60  ;;  %4875 = vmatprep.subr.mxu0 %v4750_v11  ;;  %v4702_v11 = vld [vmem:[%s10149_s10 + $0x18] sm:$0xff] }
0x1258   :  { %5288 = vmatprep.mubr.msk.f32.mxu0 %vm191_vm0, %v9543_v45  ;;  %v4751_v45 = vld [vmem:[%s10149_s10 + $0x1a0] sm:$0xff]  ;;  %4876 = vmatpush1.msra.mxu0 %v4749_v26  ;;  %v4701_v26 = vld [vmem:[%s10149_s10 + $0x10] sm:$0xff] }
0x1259   :  { %4803 = vmatpush1.msra.mxu1 %v4751_v45  ;;  %4877 = vmatprep.subr.mxu0 %v4746_v25  ;;  %v4703_v45 = vld [vmem:[%s10149_s10 + $0x20] sm:$0xff]  ;;  %v4794_v25 = vld [vmem:[%s10149_s10 + $0x2f8] sm:$0xff] }
0x125a   :  { %4804 = vmatprep.subr.mxu1 %v4748_v0  ;;  %4878 = vmatpush1.msra.mxu0 %v4745_v39  ;;  %v4700_v0 = vld [vmem:[%s10149_s10 + $0x8] sm:$0xff]  ;;  %v4793_v39 = vld [vmem:[%s10149_s10 + $0x2f0] sm:$0xff] }
0x125b   :  { %4805 = vmatpush1.msra.mxu1 %v4747_v8  ;;  %4879 = vmatprep.subr.mxu0 %v4742_v57  ;;  %v4699_v8 = vld [vmem:[%s10149_s10] sm:$0xff]  ;;  %v4790_v57 = vld [vmem:[%s10149_s10 + $0x2d8] sm:$0xff] }
0x125c   :  { %4806 = vmatprep.subr.mxu1 %v4744_v58  ;;  %4880 = vmatpush1.msra.mxu0 %v4741_v29  ;;  %v4792_v58 = vld [vmem:[%s10149_s10 + $0x2e8] sm:$0xff]  ;;  %v4789_v29 = vld [vmem:[%s10149_s10 + $0x2d0] sm:$0xff] }
0x125d   :  { %4807 = vmatpush1.msra.mxu1 %v4743_v41  ;;  %4881 = vmatprep.subr.mxu0 %v4738_v42  ;;  %v4791_v41 = vld [vmem:[%s10149_s10 + $0x2e0] sm:$0xff]  ;;  %v4786_v42 = vld [vmem:[%s10149_s10 + $0x2b8] sm:$0xff] }
0x125e   :  { %4808 = vmatprep.subr.mxu1 %v4740_v30  ;;  %4882 = vmatpush1.msra.mxu0 %v4737_v17  ;;  %v4788_v30 = vld [vmem:[%s10149_s10 + $0x2c8] sm:$0xff]  ;;  %v4785_v17 = vld [vmem:[%s10149_s10 + $0x2b0] sm:$0xff] }
0x125f   :  { %4809 = vmatpush1.msra.mxu1 %v4739_v12  ;;  %4883 = vmatprep.subr.mxu0 %v4734_v14  ;;  %v4787_v12 = vld [vmem:[%s10149_s10 + $0x2c0] sm:$0xff]  ;;  %v4782_v14 = vld [vmem:[%s10149_s10 + $0x298] sm:$0xff] }
0x1260   :  { %4810 = vmatprep.subr.mxu1 %v4736_v10  ;;  %4884 = vmatpush1.msra.mxu0 %v4733_v7  ;;  %v4784_v10 = vld [vmem:[%s10149_s10 + $0x2a8] sm:$0xff]  ;;  %v4781_v7 = vld [vmem:[%s10149_s10 + $0x290] sm:$0xff] }
0x1261   :  { %4811 = vmatpush1.msra.mxu1 %v4735_v31  ;;  %4885 = vmatprep.subr.mxu0 %v4730_v38  ;;  %v4783_v31 = vld [vmem:[%s10149_s10 + $0x2a0] sm:$0xff]  ;;  %v4778_v38 = vld [vmem:[%s10149_s10 + $0x278] sm:$0xff] }
0x1262   :  { %4812 = vmatprep.subr.mxu1 %v4732_v24  ;;  %4886 = vmatpush1.msra.mxu0 %v4729_v32  ;;  %v4780_v24 = vld [vmem:[%s10149_s10 + $0x288] sm:$0xff]  ;;  %v4777_v32 = vld [vmem:[%s10149_s10 + $0x270] sm:$0xff] }
0x1263   :  { %4813 = vmatpush1.msra.mxu1 %v4731_v2  ;;  %4887 = vmatprep.subr.mxu0 %v4726_v36  ;;  %v4779_v2 = vld [vmem:[%s10149_s10 + $0x280] sm:$0xff]  ;;  %v4774_v36 = vld [vmem:[%s10149_s10 + $0x258] sm:$0xff] }
0x1264   :  { %4814 = vmatprep.subr.mxu1 %v4728_v13  ;;  %4888 = vmatpush1.msra.mxu0 %v4725_v40  ;;  %v4776_v13 = vld [vmem:[%s10149_s10 + $0x268] sm:$0xff]  ;;  %v4773_v40 = vld [vmem:[%s10149_s10 + $0x250] sm:$0xff] }
0x1265   :  { %4815 = vmatpush1.msra.mxu1 %v4727_v28  ;;  %4889 = vmatprep.subr.mxu0 %v4722_v48  ;;  %v4775_v28 = vld [vmem:[%s10149_s10 + $0x260] sm:$0xff]  ;;  %v4770_v48 = vld [vmem:[%s10149_s10 + $0x238] sm:$0xff] }
0x1266   :  { %4816 = vmatprep.subr.mxu1 %v4724_v35  ;;  %4890 = vmatpush1.msra.mxu0 %v4721_v50  ;;  %v4772_v35 = vld [vmem:[%s10149_s10 + $0x248] sm:$0xff]  ;;  %v4769_v50 = vld [vmem:[%s10149_s10 + $0x230] sm:$0xff] }
0x1267   :  { %4817 = vmatpush1.msra.mxu1 %v4723_v37  ;;  %4891 = vmatprep.subr.mxu0 %v4718_v23  ;;  %v4771_v37 = vld [vmem:[%s10149_s10 + $0x240] sm:$0xff]  ;;  %v4766_v23 = vld [vmem:[%s10149_s10 + $0x218] sm:$0xff] }
0x1268   :  { %4818 = vmatprep.subr.mxu1 %v4720_v43  ;;  %4892 = vmatpush1.msra.mxu0 %v4717_v1  ;;  %v4768_v43 = vld [vmem:[%s10149_s10 + $0x228] sm:$0xff]  ;;  %v4765_v1 = vld [vmem:[%s10149_s10 + $0x210] sm:$0xff] }
0x1269   :  { %4819 = vmatpush1.msra.mxu1 %v4719_v49  ;;  %4893 = vmatprep.subr.mxu0 %v4714_v16  ;;  %v4767_v49 = vld [vmem:[%s10149_s10 + $0x220] sm:$0xff]  ;;  %v5003_v16 = vld [vmem:[%s10150_s11 + $0x1f8] sm:$0xff] }
0x126a   :  { %4820 = vmatprep.subr.mxu1 %v4716_v53  ;;  %4894 = vmatpush1.msra.mxu0 %v4713_v56  ;;  %v4764_v53 = vld [vmem:[%s10149_s10 + $0x208] sm:$0xff] }
0x126b   :  { %4821 = vmatpush1.msra.mxu1 %v4715_v22  ;;  %4895 = vmatprep.subr.mxu0 %v4710_v9  ;;  %v4763_v22 = vld [vmem:[%s10149_s10 + $0x200] sm:$0xff] }
0x126c   :  { %4822 = vmatprep.subr.mxu1 %v4712_v54  ;;  %4896 = vmatpush1.msra.mxu0 %v4709_v6  ;;  %v4971_v54 = vld [vmem:[%s10150_s11 + $0xf8] sm:$0xff] }
0x126d   :  { %4823 = vmatpush1.msra.mxu1 %v4711_v15  ;;  %4897 = vmatprep.subr.mxu0 %v4706_v62 }
0x126e   :  { %4824 = vmatprep.subr.mxu1 %v4708_v51  ;;  %4898 = vmatpush1.msra.mxu0 %v4705_v20 }
0x126f   :  { %4825 = vmatpush1.msra.mxu1 %v4707_v55  ;;  %4899 = vmatprep.subr.mxu0 %v4702_v11 }
0x1270   :  { %4826 = vmatprep.subr.mxu1 %v4704_v61  ;;  %4900 = vmatpush1.msra.mxu0 %v4701_v26 }
0x1271   :  { %4827 = vmatpush1.msra.mxu1 %v4703_v45  ;;  %4917 = vmatprep.subr.mxu0 %v4794_v25 }
0x1272   :  { %4828 = vmatprep.subr.mxu1 %v4700_v0  ;;  %4918 = vmatpush2.msra.mxu0 %v4793_v39 }
0x1273   :  { %4829 = vmatpush1.msra.mxu1 %v4699_v8  ;;  %4919 = vmatprep.subr.mxu0 %v4790_v57 }
0x1274   :  { %4846 = vmatprep.subr.mxu1 %v4792_v58  ;;  %4920 = vmatpush2.msra.mxu0 %v4789_v29 }
0x1275   :  { %4847 = vmatpush2.msra.mxu1 %v4791_v41  ;;  %4921 = vmatprep.subr.mxu0 %v4786_v42 }
0x1276   :  { %4848 = vmatprep.subr.mxu1 %v4788_v30  ;;  %4922 = vmatpush2.msra.mxu0 %v4785_v17 }
0x1277   :  { %4849 = vmatpush2.msra.mxu1 %v4787_v12  ;;  %4923 = vmatprep.subr.mxu0 %v4782_v14 }
0x1278   :  { %4850 = vmatprep.subr.mxu1 %v4784_v10  ;;  %4924 = vmatpush2.msra.mxu0 %v4781_v7 }
0x1279   :  { %4851 = vmatpush2.msra.mxu1 %v4783_v31  ;;  %4925 = vmatprep.subr.mxu0 %v4778_v38 }
0x127a   :  { %4852 = vmatprep.subr.mxu1 %v4780_v24  ;;  %4926 = vmatpush2.msra.mxu0 %v4777_v32 }
0x127b   :  { %4853 = vmatpush2.msra.mxu1 %v4779_v2  ;;  %4927 = vmatprep.subr.mxu0 %v4774_v36 }
0x127c   :  { %4854 = vmatprep.subr.mxu1 %v4776_v13  ;;  %4928 = vmatpush2.msra.mxu0 %v4773_v40 }
0x127d   :  { %4855 = vmatpush2.msra.mxu1 %v4775_v28  ;;  %4929 = vmatprep.subr.mxu0 %v4770_v48 }
0x127e   :  { %4856 = vmatprep.subr.mxu1 %v4772_v35  ;;  %4930 = vmatpush2.msra.mxu0 %v4769_v50 }
0x127f   :  { %4857 = vmatpush2.msra.mxu1 %v4771_v37  ;;  %4931 = vmatprep.subr.mxu0 %v4766_v23 }
0x1280   :  { %4858 = vmatprep.subr.mxu1 %v4768_v43  ;;  %4932 = vmatpush2.msra.mxu0 %v4765_v1 }
0x1281   :  { %4859 = vmatpush2.msra.mxu1 %v4767_v49  ;;  %5406 = vmatprep.subr.mxu0 %v5003_v16 }
0x1282   :  { %4860 = vmatprep.subr.mxu1 %v4764_v53 }
0x1283   :  { %4861 = vmatpush2.msra.mxu1 %v4763_v22 }
0x1284   :  { %5371 = vmatprep.subr.mxu1 %v4971_v54 }
0x12fb   :  { %v5562_v15 = vpop.f32.mrf.mxu0 }
0x12fc   :  { %v4544_v6 = vmul.f32 %v5562_v15, %v9551_v63 }
0x12fd   :  { %v4464_v56 = vpop.f32.mrf.mxu0 }
0x12fe   :  { %v4543_v9 = vmul.f32 %v4464_v56, %v9549_v5  ;;  %v4560_v26 = vadd.f32 %v5562_v15, %v4544_v6 }
0x12ff   :  { %v5565_v51 = vpop.f32.mrf.mxu0 }
0x1300   :  { %v4546_v55 = vmul.f32 %v5565_v51, %v9559_v33  ;;  %v4559_v20 = vadd.f32 %v4543_v9, %v4464_v56  ;;  %v4576_v57 = vsel %vm3603_vm2, %v4560_v26, 0.0 }
0x1301   :  { %v4474_v61 = vpop.f32.mrf.mxu0 }
0x1302   :  { %v4545_v62 = vmul.f32 %v4474_v61, %v9557_v59  ;;  %v4562_v0 = vadd.f32 %v5565_v51, %v4546_v55  ;;  %v4575_v33 = vsel %vm3603_vm2, %v4559_v20, 0.0 }
0x1303   :  { %v5568_v45 = vpop.f32.mrf.mxu0 }
0x1304   :  { %v4561_v11 = vadd.f32 %v4545_v62, %v4474_v61  ;;  %v4548_v8 = vmul.f32 %v5568_v45, %v9567_v4  ;;  %v4585_v63 = vsel %vm3603_vm2, %v4562_v0, 0.0 }
0x1305   :  { %v4484_v58 = vpop.f32.mrf.mxu0 }
0x1306   :  { %v4584_v25 = vsel %vm3603_vm2, %v4561_v11, 0.0  ;;  %v4564_v41 = vadd.f32 %v5568_v45, %v4548_v8  ;;  %v4547_v5 = vmul.f32 %v4484_v58, %v9565_v27  ;;  %v4577_v27 = vadd.f32 %v4576_v57, %v4575_v33 }
0x1307   :  { %v5571_v39 = vpop.f32.mrf.mxu0  ;;  %v4586_v12 = vadd.f32 %v4585_v63, %v4584_v25 }
0x1308   :  { %v4563_v30 = vadd.f32 %v4547_v5, %v4484_v58  ;;  %v4550_v59 = vmul.f32 %v5571_v39, %v9576_v18  ;;  %v4594_v4 = vsel %vm3603_vm2, %v4564_v41, 0.0  ;;  %v4578_v36 = vrot.slane %v4577_v27, 4 }
0x1309   :  { %v4494_v29 = vpop.f32.mrf.mxu0  ;;  %v4587_v7 = vrot.slane %v4586_v12, 4 }
0x130a   :  { %v4593_v10 = vsel %vm3603_vm2, %v4563_v30, 0.0  ;;  %v4566_v42 = vadd.f32 %v5571_v39, %v4550_v59  ;;  %v4549_v31 = vmul.f32 %v4494_v29, %v9574_v21  ;;  %v4579_v1 = vadd.f32 %v4578_v36, %v4577_v27 }
0x130b   :  { %v4595_v17 = vadd.f32 %v4594_v4, %v4593_v10  ;;  %v5574_v24 = vpop.f32.mrf.mxu0  ;;  %v4588_v48 = vadd.f32 %v4587_v7, %v4586_v12 }
0x130c   :  { %v4565_v14 = vadd.f32 %v4549_v31, %v4494_v29  ;;  %v4552_v2 = vmul.f32 %v5574_v24, %v9585_v52  ;;  %v4603_v38 = vsel %vm3603_vm2, %v4566_v42, 0.0  ;;  %v4580_v20 = vrot.slane %v4579_v1, 2 }
0x130d   :  { %v4596_v13 = vrot.slane %v4595_v17, 4  ;;  %v4504_v18 = vpop.f32.mrf.mxu0  ;;  %v4589_v9 = vrot.slane %v4588_v48, 2 }
0x130e   :  { %v4602_v28 = vsel %vm3603_vm2, %v4565_v14, 0.0  ;;  %v4568_v32 = vadd.f32 %v5574_v24, %v4552_v2  ;;  %v4551_v35 = vmul.f32 %v4504_v18, %v9583_v46  ;;  %v4581_v57 = vadd.f32 %v4580_v20, %v4579_v1 }
0x130f   :  { %v4604_v37 = vadd.f32 %v4603_v38, %v4602_v28  ;;  %v5577_v40 = vpop.f32.mrf.mxu0  ;;  %v4597_v49 = vadd.f32 %v4596_v13, %v4595_v17 }
0x1310   :  { %v4567_v21 = vadd.f32 %v4551_v35, %v4504_v18  ;;  %v4554_v43 = vmul.f32 %v5577_v40, %v9594_v47  ;;  %v4612_v53 = vsel %vm3603_vm2, %v4568_v32, 0.0  ;;  %v4582_v2 = vrot.slane %v4581_v57, 1 }
0x1311   :  { %v4605_v50 = vrot.slane %v4604_v37, 4  ;;  %v4514_v52 = vpop.f32.mrf.mxu0  ;;  %v4598_v47 = vrot.slane %v4597_v49, 2 }
0x1312   :  { %v4611_v23 = vsel %vm3603_vm2, %v4567_v21, 0.0  ;;  %v4553_v22 = vmul.f32 %v4514_v52, %v9592_v44  ;;  %v4570_v46 = vadd.f32 %v5577_v40, %v4554_v43  ;;  %v4583_v40 = vadd.f32 %v4582_v2, %v4581_v57  ;;  %v5001_v57 = vld [vmem:[%s10150_s11 + $0x1e8] sm:$0xff]  ;;  %v4998_v2 = vld [vmem:[%s10150_s11 + $0x1d0] sm:$0xff] }
0x1313   :  { %v4606_v54 = vadd.f32 %v4605_v50, %v4604_v37  ;;  %v4613_v16 = vadd.f32 %v4612_v53, %v4611_v23  ;;  %v5580_v15 = vpop.f32.mrf.mxu0  ;;  %v4599_v41 = vadd.f32 %v4598_v47, %v4597_v49 }
0x1314   :  { %v4569_v56 = vadd.f32 %v4553_v22, %v4514_v52  ;;  %v4556_v51 = vmul.f32 %v5580_v15, %v9604_v19  ;;  %v4621_v11 = vsel %vm3603_vm2, %v4570_v46, 0.0  ;;  %v4590_v19 = vadd.f32 %v4589_v9, %v4588_v48 }
0x1315   :  { %v4614_v55 = vrot.slane %v4613_v16, 4  ;;  %v4524_v6 = vpop.f32.mrf.mxu0  ;;  %v4607_v0 = vrot.slane %v4606_v54, 2  ;;  %v4600_v27 = vrot.slane %v4599_v41, 1  ;;  %v4648_v1 = vmul.f32 0.0625, %v4583_v40  ;;  %v4963_v40 = vld [vmem:[%s10150_s11 + $0xb8] sm:$0xff] }
0x1316   :  { %v4620_v61 = vsel %vm3603_vm2, %v4569_v56, 0.0  ;;  %v4572_v62 = vadd.f32 %v5580_v15, %v4556_v51  ;;  %v4555_v45 = vmul.f32 %v4524_v6, %v9602_v34  ;;  %v4591_v31 = vrot.slane %v4590_v19, 1  ;;  %v4681_v15 = vpop.permute.xlu0 %4680 }
0x1317   :  { %v4615_v44 = vadd.f32 %v4614_v55, %v4613_v16  ;;  %v5583_v8 = vpop.f32.mrf.mxu0  ;;  %v4622_v26 = vadd.f32 %v4621_v11, %v4620_v61  ;;  %v4608_v12 = vadd.f32 %v4607_v0, %v4606_v54  ;;  %v4601_v36 = vadd.f32 %v4600_v27, %v4599_v41  ;;  %v4955_v41 = vld [vmem:[%s10150_s11 + $0x78] sm:$0xff] }
0x1318   :  { %v4571_v58 = vadd.f32 %v4555_v45, %v4524_v6  ;;  %v4558_v25 = vmul.f32 %v5583_v8, %v9614_v60  ;;  %v4630_v39 = vsel %vm3603_vm2, %v4572_v62, 0.0  ;;  %v4592_v28 = vadd.f32 %v4591_v31, %v4590_v19  ;;  %v4984_v31 = vld [vmem:[%s10150_s11 + $0x160] sm:$0xff]  ;;  %v4999_v27 = vld [vmem:[%s10150_s11 + $0x1d8] sm:$0xff] }
0x1319   :  { %v4616_v5 = vrot.slane %v4615_v44, 2  ;;  %v4534_v33 = vpop.f32.mrf.mxu0  ;;  %v4623_v63 = vrot.slane %v4622_v26, 4  ;;  %v4609_v7 = vrot.slane %v4608_v12, 1  ;;  %v4650_v22 = vmul.f32 0.0625, %v4601_v36  ;;  %v4948_v36 = vld [vmem:[%s10150_s11 + $0x40] sm:$0xff] }
0x131a   :  { %v4629_v30 = vsel %vm3603_vm2, %v4571_v58, 0.0  ;;  %v4574_v34 = vadd.f32 %v5583_v8, %v4558_v25  ;;  %v4557_v59 = vmul.f32 %v4534_v33, %v9612_v3  ;;  %v4649_v50 = vmul.f32 0.0625, %v4592_v28  ;;  %v5591_v45 = vpop.permute.xlu0 %5590  ;;  %v4981_v28 = vld [vmem:[%s10150_s11 + $0x148] sm:$0xff] }
0x131b   :  { %v4631_v29 = vadd.f32 %v4630_v39, %v4629_v30  ;;  %v4617_v4 = vadd.f32 %v4616_v5, %v4615_v44  ;;  %v4624_v10 = vadd.f32 %v4623_v63, %v4622_v26  ;;  %v4610_v21 = vadd.f32 %v4609_v7, %v4608_v12  ;;  %v4987_v5 = vld [vmem:[%s10150_s11 + $0x178] sm:$0xff]  ;;  %v5002_v63 = vld [vmem:[%s10150_s11 + $0x1f0] sm:$0xff]  ;;  %v4953_v12 = vld [vmem:[%s10150_s11 + $0x68] sm:$0xff] }
0x131c   :  { %v4573_v42 = vadd.f32 %v4557_v59, %v4534_v33  ;;  %v4639_v24 = vsel %vm3603_vm2, %v4574_v34, 0.0  ;;  %v4665_v51 = vsel %vm4664_vm5, %v4649_v50, %v4648_v1  ;;  %v5592_v8 = vunpack.i.l.bf16 %v5591_v45  ;;  %v4970_v33 = vld [vmem:[%s10150_s11 + $0xf0] sm:$0xff]  ;;  %v4969_v59 = vld [vmem:[%s10150_s11 + $0xe8] sm:$0xff] }
0x131d   :  { %v4632_v60 = vrot.slane %v4631_v29, 4  ;;  %v4625_v17 = vrot.slane %v4624_v10, 2  ;;  %v4618_v38 = vrot.slane %v4617_v4, 1  ;;  %v4651_v54 = vmul.f32 0.0625, %v4610_v21  ;;  %v4954_v30 = vld [vmem:[%s10150_s11 + $0x70] sm:$0xff]  ;;  %v4995_v21 = vld [vmem:[%s10150_s11 + $0x1b8] sm:$0xff] }
0x131e   :  { %v4638_v14 = vsel %vm3603_vm2, %v4573_v42, 0.0  ;;  %v4667_v55 = vsel %vm4666_vm6, %v4650_v22, %v4665_v51  ;;  %v5593_v58 = vunpack.i.h.bf16 %v5591_v45  ;;  %v4986_v34 = vld [vmem:[%s10150_s11 + $0x170] sm:$0xff]  ;;  %v4952_v42 = vld [vmem:[%s10150_s11 + $0x60] sm:$0xff]  ;;  %v4993_v22 = vld [vmem:[%s10150_s11 + $0x1a8] sm:$0xff] }
0x131f   :  { %v4633_v13 = vadd.f32 %v4632_v60, %v4631_v29  ;;  %v4640_v18 = vadd.f32 %v4639_v24, %v4638_v14  ;;  %v4626_v3 = vadd.f32 %v4625_v17, %v4624_v10  ;;  %v4619_v49 = vadd.f32 %v4618_v38, %v4617_v4  ;;  %v4985_v29 = vld [vmem:[%s10150_s11 + $0x168] sm:$0xff]  ;;  %v4968_v4 = vld [vmem:[%s10150_s11 + $0xe0] sm:$0xff]  ;;  %v4967_v60 = vld [vmem:[%s10150_s11 + $0xd8] sm:$0xff] }
0x1320   :  { %v4669_v61 = vsel %vm4668_vm7, %v4651_v54, %v4667_v55  ;;  %v5000_v10 = vld [vmem:[%s10150_s11 + $0x1e0] sm:$0xff]  ;;  %v4951_v17 = vld [vmem:[%s10150_s11 + $0x58] sm:$0xff]  ;;  %v4966_v14 = vld [vmem:[%s10150_s11 + $0xd0] sm:$0xff] }
0x1321   :  { %v4634_v32 = vrot.slane %v4633_v13, 2  ;;  %v4641_v35 = vrot.slane %v4640_v18, 4  ;;  %v4627_v37 = vrot.slane %v4626_v3, 1  ;;  %v4652_v56 = vmul.f32 0.0625, %v4619_v49  ;;  %v4983_v24 = vld [vmem:[%s10150_s11 + $0x158] sm:$0xff]  ;;  %v4950_v7 = vld [vmem:[%s10150_s11 + $0x50] sm:$0xff] }
0x1322   :  { %v4997_v38 = vld [vmem:[%s10150_s11 + $0x1c8] sm:$0xff]  ;;  %v4962_v49 = vld [vmem:[%s10150_s11 + $0xb0] sm:$0xff]  ;;  %v4959_v51 = vld [vmem:[%s10150_s11 + $0x98] sm:$0xff] }
0x1323   :  { %v4635_v43 = vadd.f32 %v4634_v32, %v4633_v13  ;;  %v4642_v48 = vadd.f32 %v4641_v35, %v4640_v18  ;;  %v4628_v52 = vadd.f32 %v4627_v37, %v4626_v3  ;;  %v4671_v20 = vsel %vm4670_vm8, %v4652_v56, %v4669_v61  ;;  %v4982_v13 = vld [vmem:[%s10150_s11 + $0x150] sm:$0xff]  ;;  %v4965_v18 = vld [vmem:[%s10150_s11 + $0xc8] sm:$0xff]  ;;  %v4964_v32 = vld [vmem:[%s10150_s11 + $0xc0] sm:$0xff] }
0x1324   :  { %v4949_v3 = vld [vmem:[%s10150_s11 + $0x48] sm:$0xff]  ;;  %v4996_v35 = vld [vmem:[%s10150_s11 + $0x1c0] sm:$0xff]  ;;  %v4994_v50 = vld [vmem:[%s10150_s11 + $0x1b0] sm:$0xff] }
0x1325   :  { %v4636_v53 = vrot.slane %v4635_v43, 1  ;;  %v4643_v23 = vrot.slane %v4642_v48, 2  ;;  %v4653_v9 = vmul.f32 0.0625, %v4628_v52  ;;  %v4980_v37 = vld [vmem:[%s10150_s11 + $0x140] sm:$0xff]  ;;  %v4946_v52 = vld [vmem:[%s10150_s11 + $0x30] sm:$0xff]  ;;  %v4945_v1 = vld [vmem:[%s10150_s11 + $0x28] sm:$0xff] }
0x1326   :  { %v4977_v54 = vld [vmem:[%s10150_s11 + $0x128] sm:$0xff]  ;;  %v4976_v56 = vld [vmem:[%s10150_s11 + $0x120] sm:$0xff]  ;;  %v4975_v55 = vld [vmem:[%s10150_s11 + $0x118] sm:$0xff] }
0x1327   :  { %v4637_v16 = vadd.f32 %v4636_v53, %v4635_v43  ;;  %v4644_v46 = vadd.f32 %v4643_v23, %v4642_v48  ;;  %v4673_v0 = vsel %vm4672_vm9, %v4653_v9, %v4671_v20  ;;  %v4947_v43 = vld [vmem:[%s10150_s11 + $0x38] sm:$0xff]  ;;  %v4978_v53 = vld [vmem:[%s10150_s11 + $0x130] sm:$0xff]  ;;  %v4961_v23 = vld [vmem:[%s10150_s11 + $0xa8] sm:$0xff] }
0x1328   :  { %v4979_v48 = vld [vmem:[%s10150_s11 + $0x138] sm:$0xff]  ;;  %v4990_v61 = vld [vmem:[%s10150_s11 + $0x190] sm:$0xff]  ;;  %v4957_v20 = vld [vmem:[%s10150_s11 + $0x88] sm:$0xff] }
0x1329   :  { %v4645_v47 = vrot.slane %v4644_v46, 1  ;;  %v4654_v6 = vmul.f32 0.0625, %v4637_v16  ;;  %v4960_v16 = vld [vmem:[%s10150_s11 + $0xa0] sm:$0xff]  ;;  %v4991_v9 = vld [vmem:[%s10150_s11 + $0x198] sm:$0xff]  ;;  %v4974_v45 = vld [vmem:[%s10150_s11 + $0x110] sm:$0xff] }
0x132b   :  { %v4646_v62 = vadd.f32 %v4645_v47, %v4644_v46  ;;  %v4675_v11 = vsel %vm4674_vm10, %v4654_v6, %v4673_v0  ;;  %v4992_v46 = vld [vmem:[%s10150_s11 + $0x1a0] sm:$0xff]  ;;  %v4943_v47 = vld [vmem:[%s10150_s11 + $0x18] sm:$0xff]  ;;  %v4958_v6 = vld [vmem:[%s10150_s11 + $0x90] sm:$0xff] }
0x132c   :  { %v4989_v0 = vld [vmem:[%s10150_s11 + $0x188] sm:$0xff] }
0x132d   :  { %v4655_v44 = vmul.f32 0.0625, %v4646_v62  ;;  %v4942_v62 = vld [vmem:[%s10150_s11 + $0x10] sm:$0xff] }
0x132f   :  { %v4677_v26 = vsel %vm4676_vm11, %v4655_v44, %v4675_v11  ;;  %v4941_v44 = vld [vmem:[%s10150_s11 + $0x8] sm:$0xff] }
0x1330   :  { %v4694_v25 = vsel %vm3603_vm2, %v4677_v26, %v4681_v15  ;;  %v4944_v15 = vld [vmem:[%s10150_s11 + $0x20] sm:$0xff]  ;;  %v4973_v11 = vld [vmem:[%s10150_s11 + $0x108] sm:$0xff] }
0x1331   :  { %v4695_v19 = vsel %vm191_vm0, %v4694_v25, %v5592_v8  ;;  %v4956_v8 = vld [vmem:[%s10150_s11 + $0x80] sm:$0xff] }
0x1332   :  { %v4697_v39 = vsel %vm4696_vm12, %v4695_v19, %v5593_v58  ;;  %v4988_v26 = vld [vmem:[%s10150_s11 + $0x180] sm:$0xff] }
0x1333   :  { %4863 = vmatmul.mubr.f32.vlgmr.msra.gmra.mxu1 %v4697_v39  ;;  %4934 = vmatmul.mubr.f32.vlgmr.msra.gmra.mxu0 %v4697_v39  ;;  %v4940_v58 = vld [vmem:[%s10150_s11] sm:$0xff] }
0x1334   :  { %5372 = vmatpush3.msra.mxu1 %v4955_v41  ;;  %5407 = vmatpush3.msra.mxu0 %v4987_v5  ;;  %v4972_v25 = vld [vmem:[%s10150_s11 + $0x100] sm:$0xff] }
0x1335   :  { %5373 = vmatprep.subr.mxu1 %v4970_v33  ;;  %5408 = vmatprep.subr.mxu0 %v5002_v63 }
0x1336   :  { %5374 = vmatpush3.msra.mxu1 %v4954_v30  ;;  %5409 = vmatpush3.msra.mxu0 %v4986_v34 }
0x1337   :  { %5375 = vmatprep.subr.mxu1 %v4969_v59  ;;  %5410 = vmatprep.subr.mxu0 %v5001_v57 }
0x1338   :  { %5376 = vmatpush3.msra.mxu1 %v4953_v12  ;;  %5411 = vmatpush3.msra.mxu0 %v4985_v29 }
0x1339   :  { %5377 = vmatprep.subr.mxu1 %v4968_v4  ;;  %5412 = vmatprep.subr.mxu0 %v5000_v10 }
0x133a   :  { %5378 = vmatpush3.msra.mxu1 %v4952_v42  ;;  %5413 = vmatpush3.msra.mxu0 %v4984_v31 }
0x133b   :  { %5379 = vmatprep.subr.mxu1 %v4967_v60  ;;  %5414 = vmatprep.subr.mxu0 %v4999_v27 }
0x133c   :  { %5380 = vmatpush3.msra.mxu1 %v4951_v17  ;;  %5415 = vmatpush3.msra.mxu0 %v4983_v24 }
0x133d   :  { %5381 = vmatprep.subr.mxu1 %v4966_v14  ;;  %5416 = vmatprep.subr.mxu0 %v4998_v2 }
0x133e   :  { %5382 = vmatpush3.msra.mxu1 %v4950_v7  ;;  %5417 = vmatpush3.msra.mxu0 %v4982_v13 }
0x133f   :  { %5383 = vmatprep.subr.mxu1 %v4965_v18  ;;  %5418 = vmatprep.subr.mxu0 %v4997_v38 }
0x1340   :  { %5384 = vmatpush3.msra.mxu1 %v4949_v3  ;;  %5419 = vmatpush3.msra.mxu0 %v4981_v28 }
0x1341   :  { %5385 = vmatprep.subr.mxu1 %v4964_v32  ;;  %5420 = vmatprep.subr.mxu0 %v4996_v35 }
0x1342   :  { %5386 = vmatpush3.msra.mxu1 %v4948_v36  ;;  %5421 = vmatpush3.msra.mxu0 %v4980_v37 }
0x1343   :  { %5387 = vmatprep.subr.mxu1 %v4963_v40  ;;  %5422 = vmatprep.subr.mxu0 %v4995_v21 }
0x1344   :  { %5388 = vmatpush3.msra.mxu1 %v4947_v43  ;;  %5423 = vmatpush3.msra.mxu0 %v4979_v48 }
0x1345   :  { %5389 = vmatprep.subr.mxu1 %v4962_v49  ;;  %5424 = vmatprep.subr.mxu0 %v4994_v50 }
0x1346   :  { %5390 = vmatpush3.msra.mxu1 %v4946_v52  ;;  %5425 = vmatpush3.msra.mxu0 %v4978_v53 }
0x1347   :  { %5391 = vmatprep.subr.mxu1 %v4961_v23  ;;  %5426 = vmatprep.subr.mxu0 %v4993_v22 }
0x1348   :  { %5392 = vmatpush3.msra.mxu1 %v4945_v1  ;;  %5427 = vmatpush3.msra.mxu0 %v4977_v54 }
0x1349   :  { %5393 = vmatprep.subr.mxu1 %v4960_v16  ;;  %5428 = vmatprep.subr.mxu0 %v4992_v46 }
0x134a   :  { %5394 = vmatpush3.msra.mxu1 %v4944_v15  ;;  %5429 = vmatpush3.msra.mxu0 %v4976_v56 }
0x134b   :  { %5395 = vmatprep.subr.mxu1 %v4959_v51  ;;  %5430 = vmatprep.subr.mxu0 %v4991_v9 }
0x134c   :  { %5396 = vmatpush3.msra.mxu1 %v4943_v47  ;;  %5431 = vmatpush3.msra.mxu0 %v4975_v55 }
0x134d   :  { %5397 = vmatprep.subr.mxu1 %v4958_v6  ;;  %5432 = vmatprep.subr.mxu0 %v4990_v61 }
0x134e   :  { %5398 = vmatpush3.msra.mxu1 %v4942_v62  ;;  %5433 = vmatpush3.msra.mxu0 %v4974_v45 }
0x134f   :  { %5399 = vmatprep.subr.mxu1 %v4957_v20  ;;  %5434 = vmatprep.subr.mxu0 %v4989_v0 }
0x1350   :  { %5400 = vmatpush3.msra.mxu1 %v4941_v44  ;;  %5435 = vmatpush3.msra.mxu0 %v4973_v11 }
0x1351   :  { %5401 = vmatprep.subr.mxu1 %v4956_v8  ;;  %5436 = vmatprep.subr.mxu0 %v4988_v26 }
0x1352   :  { %5402 = vmatpush3.msra.mxu1 %v4940_v58  ;;  %5437 = vmatpush3.msra.mxu0 %v4972_v25 }
0x13f3   :  { %v4864_v19 = vpop.f32.mrf.mxu1  ;;  %v4935_v41 = vpop.f32.mrf.mxu0 }
0x13f5   :  { %v4866_v5 = vpop.f32.mrf.mxu1  ;;  %v4937_v39 = vpop.f32.mrf.mxu0 }
0x13f6   :  { %5068 = vmatprep.mubr.f32.mxu1 %v4866_v5  ;;  %5138 = vmatprep.mubr.f32.mxu0 %v4937_v39 }
0x13f7   :  { %5069 = vmatmul.mubr.f32.vlgmr.msra.gmra.mxu1 %v4864_v19  ;;  %5139 = vmatmul.mubr.f32.vlgmr.msra.gmra.mxu0 %v4935_v41 }
0x14b7   :  { %v5403_v33 = vpop.f32.mrf.mxu1  ;;  %v5438_v63 = vpop.f32.mrf.mxu0 }
0x14b9   :  { %v5404_v30 = vpop.f32.mrf.mxu1  ;;  %v5439_v34 = vpop.f32.mrf.mxu0 }
0x14ba   :  { %v5405_v59 = vadd.f32 %v5404_v30, %v5403_v33  ;;  %v5440_v57 = vadd.f32 %v5439_v34, %v5438_v63 }
0x14bc   :  { %v5141_v12 = vadd.f32 %v5440_v57, %v5405_v59 }
0x14be   :  { %vm5144_vm0 = vcmp.ge.f32.partialorder %v5141_v12, 0.0  ;;  %v5145_v29 = vmul.f32 0.01, %v5141_v12 }
0x14c0   :  { %v5146_v4 = vsel %vm5144_vm0, %v5141_v12, %v5145_v29 }
0x14c1   :  { %5147 = vst [vmem:[%s10151_s12] sm:$0xff] %v5146_v4 }

</bundles_post_ra>
